<compile_context>
chip_gen: v7x
topology: tpu7x:2x2x1
jax: 0.10.0
libtpu: 0.0.40
codegen_flags: <defaults>
</compile_context>

<pallas_src>
import math

import jax
import jax.numpy as jnp
from jax import lax
from jax.experimental import pallas as pl
from jax.experimental.pallas import tpu as pltpu

EPS = 1e-5  # PyTorch nn.LayerNorm default


# ----------------------------- in-kernel helpers -----------------------------

def _mm(a, b):
    return jnp.dot(a, b, preferred_element_type=jnp.float32)


def _layernorm(x, g, b):
    mu = jnp.mean(x, axis=-1, keepdims=True)
    var = jnp.mean((x - mu) ** 2, axis=-1, keepdims=True)
    return (x - mu) * lax.rsqrt(var + EPS) * g + b


# --------------------------------- kernel ------------------------------------

def build_kernel(*, depth, heads, dim_head, Bt, S, emb_scale, mxu_dtype=jnp.bfloat16):
    D = heads * dim_head
    N = Bt * S                      # packed tokens per grid step
    cdt = mxu_dtype                 # MXU operand dtype (accumulation stays f32)

    def kernel(x_ref, pe_ref, w_emb_ref, b_emb_ref, w_qkv_ref, b_qkv_ref,
               w_out_ref, b_out_ref, ln_ref, ffw1_ref, ffb1_ref, ffw2_ref, ffb2_ref,
               w_sum_ref, b_sum_ref, *fc_and_out):
        # TODO(synk): the optional src attention mask of forward(x, mask) is not implemented;
        #             the model is exercised with mask=None (the default).
        out_ref = fc_and_out[-1]
        fc_refs = fc_and_out[:-1]
        n_fc = len(fc_refs) // 2

        # ---- embedding * sqrt(d_model) + positional encoding (per-sample row, broadcast) ----
        In = x_ref.shape[2]
        x = x_ref[...].reshape(N, In)                                     # (Bt*S, In)
        h = (_mm(x.astype(cdt), w_emb_ref[...]) + b_emb_ref[...]) * emb_scale     # (N, D) f32
        h = (h.reshape(Bt, S, D) + pe_ref[0][:, None, :]).reshape(N, D)

        for l in range(depth):
            # -------- multi-head self-attention (post-LN encoder layer) --------
            # One fused (N, D) @ (D, 3*heads*dh) projection; q-scale folded into W host-side.
            qkv = _mm(h.astype(cdt), w_qkv_ref[l]) + b_qkv_ref[l]         # (N, 3D) f32

            o_heads = []
            for hh in range(heads):                                       # static lane slices
                q = qkv[:, (0 * heads + hh) * dim_head:(0 * heads + hh + 1) * dim_head]
                k = qkv[:, (1 * heads + hh) * dim_head:(1 * heads + hh + 1) * dim_head]
                v = qkv[:, (2 * heads + hh) * dim_head:(2 * heads + hh + 1) * dim_head]
                q = q.reshape(Bt, S, dim_head).astype(cdt)
                k = k.reshape(Bt, S, dim_head).astype(cdt)
                v = v.reshape(Bt, S, dim_head).astype(cdt)

                s = jnp.einsum("bqd,bkd->bqk", q, k,
                               preferred_element_type=jnp.float32)        # (Bt, S, S) f32
                s = s - jnp.max(s, axis=-1, keepdims=True)
                e = jnp.exp(s)
                p = e * pl.reciprocal(jnp.sum(e, axis=-1, keepdims=True), approx=True)
                o = jnp.einsum("bqk,bkd->bqd", p.astype(cdt), v,
                               preferred_element_type=jnp.float32)        # (Bt, S, dh) f32
                o_heads.append(o.reshape(N, dim_head))

            # fused out-projection: concat heads back to (N, D), one (N,D)@(D,D) matmul
            o_cat = jnp.concatenate(o_heads, axis=-1)                     # (N, D) f32
            attn = _mm(o_cat.astype(cdt), w_out_ref[l]) + b_out_ref[l]

            h = _layernorm(h + attn, ln_ref[l, 0], ln_ref[l, 1])

            # -------- feed-forward (ReLU) --------
            f = jnp.maximum(_mm(h.astype(cdt), ffw1_ref[l]) + ffb1_ref[l], 0.0)
            f = _mm(f.astype(cdt), ffw2_ref[l]) + ffb2_ref[l]
            h = _layernorm(h + f, ln_ref[l, 2], ln_ref[l, 3])

        # ---- fully_connected head (token-wise); every layer lane-padded to 128, kept f32 ----
        z = h
        for i in range(n_fc):
            z = _mm(z, fc_refs[2 * i][...]) + fc_refs[2 * i + 1][...]
            if i < n_fc - 1:
                z = jnp.maximum(z, 0.0)                                   # ReLU (Dropout = id)
        # z: (Bt*S, Lpad)

        # ---- permute + fc_sum(Linear(S,1)) + permute + [:, -1, :] as a VPU weighted sum ----
        z3 = z.reshape(Bt, S, z.shape[1])                                 # tile-aligned split
        w = w_sum_ref[...][None, :, :]                                    # (1, S, 1)
        out = jnp.sum(z3 * w, axis=1) + b_sum_ref[...]                    # (Bt, Lpad)
        out_ref[0] = out.astype(out_ref.dtype)

    return kernel


# --------------------------------- wrapper -----------------------------------

def transformer_model_forward(x, params, pe_rows, *, heads, dim_head, num_labels,
                              num_chunks=1, mxu_dtype=jnp.bfloat16):
    """num_chunks=1 for single-TC v5e/v6e; num_chunks=2 shards the batch over v7x's 2 TCs."""
    B, S, In = x.shape
    D = heads * dim_head
    depth = params["w_qkv"].shape[0]
    assert B % num_chunks == 0
    Bt = B // num_chunks
    Lpad = ((num_labels + 127) // 128) * 128                              # lane-dense output
    scale = 1.0 / math.sqrt(dim_head)

    # ---- host-side weight repacking ----
    # fused qkv: fold 1/sqrt(dh) into the q columns, pack (depth, 3, heads, D, dh) ->
    # (depth, D, 3*heads*dh); bias -> (depth, 1, 3*heads*dh). MXU operands cast to bf16.
    w_qkv = params["w_qkv"].at[:, 0].multiply(scale)
    b_qkv = params["b_qkv"].at[:, 0].multiply(scale)
    w_qkv_k = jnp.transpose(w_qkv, (0, 3, 1, 2, 4)).reshape(depth, D, 3 * D).astype(mxu_dtype)
    b_qkv_k = b_qkv.reshape(depth, 1, 3 * D).astype(jnp.float32)
    # fused out-projection: (depth, heads, dh, D) -> (depth, D, D), rows ordered (head, dh)
    w_out_k = params["w_out"].reshape(depth, D, D).astype(mxu_dtype)

    w_emb_k = params["w_emb"].astype(mxu_dtype)
    ffw1_k = params["ffw1"].astype(mxu_dtype)
    ffw2_k = params["ffw2"].astype(mxu_dtype)

    # pad EVERY FC layer to 128 output lanes with zeros (zero rows/cols + zero bias keep the
    # math exact; ReLU keeps pads at 0); sliced back to num_labels below.
    fc = list(params["fc"])
    fc_pad, prev = [], D
    for i in range(len(fc) // 2):
        w_i, b_i = fc[2 * i], fc[2 * i + 1]
        fin, fout = w_i.shape
        out_p = ((fout + 127) // 128) * 128
        fc_pad.append(jnp.zeros((prev, out_p), jnp.float32).at[:fin, :fout].set(w_i))
        fc_pad.append(jnp.zeros((1, out_p), jnp.float32).at[:, :fout].set(b_i))
        prev = out_p
    assert prev == Lpad

    # fc_sum weight as a (S, 1) column for the in-kernel VPU weighted sum
    w_sum_k = params["w_sum"].reshape(S, 1).astype(jnp.float32)

    # positional-encoding rows (pe[:B, 0, :]) reshaped so each grid step gets its Bt rows;
    # the kernel broadcasts them over the sequence axis (module quirk reproduced).
    pe_k = pe_rows.reshape(num_chunks, Bt, D).astype(jnp.float32)

    weights = [w_emb_k, params["b_emb"], w_qkv_k, b_qkv_k, w_out_k, params["b_out"],
               params["ln"], ffw1_k, params["ffb1"], ffw2_k, params["ffb2"],
               w_sum_k, params["b_sum"]] + fc_pad

    # all weights resident as full blocks (tiny here); at production sizes tile the layer axis
    # (grid dim / pltpu.emit_pipeline), single-buffer invariant weights, and set
    # vmem_limit_bytes — v7x has only 64 MiB physical VMEM.
    def full_spec(a):
        nd = a.ndim
        return pl.BlockSpec(a.shape, lambda c, _nd=nd: (0,) * _nd)

    in_specs = [pl.BlockSpec((Bt, S, In), lambda c: (c, 0, 0)),
                pl.BlockSpec((1, Bt, D), lambda c: (c, 0, 0))] + [full_spec(w) for w in weights]
    out_spec = pl.BlockSpec((1, Bt, Lpad), lambda c: (c, 0, 0))

    kernel = build_kernel(depth=depth, heads=heads, dim_head=dim_head,
                          Bt=Bt, S=S, emb_scale=math.sqrt(D), mxu_dtype=mxu_dtype)
    fn = pl.pallas_call(
        kernel,
        out_shape=jax.ShapeDtypeStruct((num_chunks, Bt, Lpad), jnp.float32),
        grid_spec=pltpu.PrefetchScalarGridSpec(
            num_scalar_prefetch=0,
            grid=(num_chunks,),
            in_specs=in_specs,
            out_specs=out_spec,
        ),
        compiler_params=pltpu.CompilerParams(dimension_semantics=("parallel",)),
    )
    out = fn(x, pe_k, *weights)
    return out.reshape(B, Lpad)[:, :num_labels]


# ------------------------- params (synthetic, deterministic) -----------------

def fc_plan(input_size, output_size):
    plan = []
    cur = input_size
    while cur // 3 > output_size * 2:
        nxt = cur // 3
        plan.append((cur, nxt))
        cur = nxt
    plan.append((cur, output_size))
    return plan


def positional_rows(batch, d_model):
    # rows pe[0..batch-1, 0, :] of the PositionalEncoding buffer
    position = jnp.arange(batch, dtype=jnp.float32)[:, None]
    div_term = jnp.exp(jnp.arange(0, d_model, 2, dtype=jnp.float32)
                       * (-math.log(10000.0) / d_model))
    pe = jnp.zeros((batch, d_model), jnp.float32)
    pe = pe.at[:, 0::2].set(jnp.sin(position * div_term))
    pe = pe.at[:, 1::2].set(jnp.cos(position * div_term))
    return pe


def init_params(key, *, In, S, D, depth, heads, dim_head, ff, num_labels):
    keys = iter(jax.random.split(key, 64))

    def w(shape, scale=0.05):
        return jax.random.normal(next(keys), shape, jnp.float32) * scale

    params = dict(
        w_emb=w((In, D)), b_emb=w((1, D), 0.01),
        # per-head layout (natural form; the wrapper fuses/repacks for the kernel):
        w_qkv=w((depth, 3, heads, D, dim_head)),
        b_qkv=w((depth, 3, heads, dim_head), 0.01),
        w_out=w((depth, heads, dim_head, D)), b_out=w((depth, D), 0.01),
        # packed LayerNorm slab: [ln1_g, ln1_b, ln2_g, ln2_b]
        ln=jnp.stack([1.0 + w((depth, D), 0.02), w((depth, D), 0.02),
                      1.0 + w((depth, D), 0.02), w((depth, D), 0.02)], axis=1),
        ffw1=w((depth, D, ff)), ffb1=w((depth, ff), 0.01),
        ffw2=w((depth, ff, D)), ffb2=w((depth, D), 0.01),
        w_sum=w((1, S), 0.3), b_sum=w((1, 1), 0.01),
    )
    fc = []
    for fin, fout in fc_plan(D, num_labels):
        fc.append(w((fin, fout), 0.2))
        fc.append(w((1, fout), 0.02))
    params["fc"] = fc
    return params


# ---------------------------- pure-JAX reference ------------------------------

def reference_forward(x, p, pe_rows, *, heads, dim_head):
    B, S, In = x.shape
    D = heads * dim_head
    depth = p["w_qkv"].shape[0]
    scale = 1.0 / math.sqrt(dim_head)

    def ln(t, g, b):
        mu = t.mean(-1, keepdims=True)
        var = ((t - mu) ** 2).mean(-1, keepdims=True)
        return (t - mu) / jnp.sqrt(var + EPS) * g + b

    h = (jnp.einsum("bsi,id->bsd", x, p["w_emb"]) + p["b_emb"][0]) * math.sqrt(D)
    h = h + pe_rows[:, None, :]        # pe[:batch] broadcast over the sequence axis (module quirk)

    for l in range(depth):
        q = jnp.einsum("bsd,hde->bhse", h, p["w_qkv"][l, 0]) + p["b_qkv"][l, 0][None, :, None, :]
        k = jnp.einsum("bsd,hde->bhse", h, p["w_qkv"][l, 1]) + p["b_qkv"][l, 1][None, :, None, :]
        v = jnp.einsum("bsd,hde->bhse", h, p["w_qkv"][l, 2]) + p["b_qkv"][l, 2][None, :, None, :]
        s = jnp.einsum("bhqe,bhke->bhqk", q, k) * scale
        a = jax.nn.softmax(s, axis=-1)
        o = jnp.einsum("bhqk,bhke->bhqe", a, v)                          # (B, H, S, dh)
        o = jnp.einsum("bhse,hed->bsd", o, p["w_out"][l]) + p["b_out"][l]
        h = ln(h + o, p["ln"][l, 0], p["ln"][l, 1])

        f = jax.nn.relu(jnp.einsum("bsd,df->bsf", h, p["ffw1"][l]) + p["ffb1"][l])
        f = jnp.einsum("bsf,fd->bsd", f, p["ffw2"][l]) + p["ffb2"][l]
        h = ln(h + f, p["ln"][l, 2], p["ln"][l, 3])

    z = h
    fc = p["fc"]
    n_fc = len(fc) // 2
    for i in range(n_fc):
        z = jnp.einsum("bsf,fo->bso", z, fc[2 * i]) + fc[2 * i + 1][0]
        if i < n_fc - 1:
            z = jax.nn.relu(z)
    # permute(0,2,1) ; fc_sum ; permute ; [:, -1, :]
    out = jnp.einsum("bsc,s->bc", z, p["w_sum"][0]) + p["b_sum"][0, 0]
    return out


# ----------------------------------- main -------------------------------------

if __name__ == "__main__":
    # small config consistent with the module
    B = 4            # batch
    S = 32           # config.sequence_length
    In = 16          # config.input_size
    n_head = 4       # config.transformer_n_head
    D = 64           # config.d_model_transformer (divisible by n_head -> unchanged by the floor)
    dim_head = D // n_head
    d_ff = 128       # config.d_ff_transformer
    depth = 2        # config.num_layers_transformer
    num_labels = 3   # config.num_labels

    key = jax.random.PRNGKey(0)
    kx, kp = jax.random.split(key)
    x = jax.random.normal(kx, (B, S, In), dtype=jnp.float32)
    params = init_params(kp, In=In, S=S, D=D, depth=depth, heads=n_head,
                         dim_head=dim_head, ff=d_ff, num_labels=num_labels)
    pe_rows = positional_rows(B, D)

    # num_chunks=1: single grid step — right choice on single-TC v5e/v6e; on v7x benchmark
    # num_chunks=2 (parallel grid) against 1 at this tiny problem size.
    out = transformer_model_forward(x, params, pe_rows, heads=n_head, dim_head=dim_head,
                                    num_labels=num_labels, num_chunks=1)
    out = jax.block_until_ready(out)
    assert out.shape == (B, num_labels)

    ref = reference_forward(x, params, pe_rows, heads=n_head, dim_head=dim_head)
    # tolerance reflects bf16 MXU operands in the transformer body vs. the pure-f32 reference
    # (f32 accumulation; LayerNorm/softmax/residuals and the FC head stay f32).
    err = float(jnp.max(jnp.abs(out - ref)))
    assert jnp.allclose(out, ref, atol=5e-2, rtol=5e-2), err

    print("KERNEL_OK")
</pallas_src>

<mosaic_0001>
module attributes {stable_mosaic.version = 11 : i64} {
  func.func @kernel(%arg0: i32, %arg1: memref<4x32x16xf32, #tpu.memory_space<vmem>>, %arg2: memref<1x4x64xf32, #tpu.memory_space<vmem>>, %arg3: memref<16x64xbf16, #tpu.memory_space<vmem>>, %arg4: memref<1x64xf32, #tpu.memory_space<vmem>>, %arg5: memref<2x64x192xbf16, #tpu.memory_space<vmem>>, %arg6: memref<2x1x192xf32, #tpu.memory_space<vmem>>, %arg7: memref<2x64x64xbf16, #tpu.memory_space<vmem>>, %arg8: memref<2x64xf32, #tpu.memory_space<vmem>>, %arg9: memref<2x4x64xf32, #tpu.memory_space<vmem>>, %arg10: memref<2x64x128xbf16, #tpu.memory_space<vmem>>, %arg11: memref<2x128xf32, #tpu.memory_space<vmem>>, %arg12: memref<2x128x64xbf16, #tpu.memory_space<vmem>>, %arg13: memref<2x64xf32, #tpu.memory_space<vmem>>, %arg14: memref<32x1xf32, #tpu.memory_space<vmem>>, %arg15: memref<1x1xf32, #tpu.memory_space<vmem>>, %arg16: memref<64x128xf32, #tpu.memory_space<vmem>>, %arg17: memref<1x128xf32, #tpu.memory_space<vmem>>, %arg18: memref<128x128xf32, #tpu.memory_space<vmem>>, %arg19: memref<1x128xf32, #tpu.memory_space<vmem>>, %arg20: memref<128x128xf32, #tpu.memory_space<vmem>>, %arg21: memref<1x128xf32, #tpu.memory_space<vmem>>, %arg22: memref<1x4x128xf32, #tpu.memory_space<vmem>>) attributes {dimension_semantics = [#tpu.dimension_semantics<parallel>], iteration_bounds = array<i64: 1>, scalar_prefetch = 0 : i64, scratch_operands = 0 : i64, tpu.core_type = #tpu.core_type<tc>, window_params = [{transform_indices = @transform_0, window_bounds = array<i64: 4, 32, 16>}, {transform_indices = @transform_1, window_bounds = array<i64: 1, 4, 64>}, {pipeline_mode = #tpu.pipeline_mode<synchronous>, transform_indices = @transform_2, window_bounds = array<i64: 16, 64>}, {pipeline_mode = #tpu.pipeline_mode<synchronous>, transform_indices = @transform_3, window_bounds = array<i64: 1, 64>}, {pipeline_mode = #tpu.pipeline_mode<synchronous>, transform_indices = @transform_4, window_bounds = array<i64: 2, 64, 192>}, {pipeline_mode = #tpu.pipeline_mode<synchronous>, transform_indices = @transform_5, window_bounds = array<i64: 2, 1, 192>}, {pipeline_mode = #tpu.pipeline_mode<synchronous>, transform_indices = @transform_6, window_bounds = array<i64: 2, 64, 64>}, {pipeline_mode = #tpu.pipeline_mode<synchronous>, transform_indices = @transform_7, window_bounds = array<i64: 2, 64>}, {pipeline_mode = #tpu.pipeline_mode<synchronous>, transform_indices = @transform_8, window_bounds = array<i64: 2, 4, 64>}, {pipeline_mode = #tpu.pipeline_mode<synchronous>, transform_indices = @transform_9, window_bounds = array<i64: 2, 64, 128>}, {pipeline_mode = #tpu.pipeline_mode<synchronous>, transform_indices = @transform_10, window_bounds = array<i64: 2, 128>}, {pipeline_mode = #tpu.pipeline_mode<synchronous>, transform_indices = @transform_11, window_bounds = array<i64: 2, 128, 64>}, {pipeline_mode = #tpu.pipeline_mode<synchronous>, transform_indices = @transform_12, window_bounds = array<i64: 2, 64>}, {pipeline_mode = #tpu.pipeline_mode<synchronous>, transform_indices = @transform_13, window_bounds = array<i64: 32, 1>}, {pipeline_mode = #tpu.pipeline_mode<synchronous>, transform_indices = @transform_14, window_bounds = array<i64: 1, 1>}, {pipeline_mode = #tpu.pipeline_mode<synchronous>, transform_indices = @transform_15, window_bounds = array<i64: 64, 128>}, {pipeline_mode = #tpu.pipeline_mode<synchronous>, transform_indices = @transform_16, window_bounds = array<i64: 1, 128>}, {pipeline_mode = #tpu.pipeline_mode<synchronous>, transform_indices = @transform_17, window_bounds = array<i64: 128, 128>}, {pipeline_mode = #tpu.pipeline_mode<synchronous>, transform_indices = @transform_18, window_bounds = array<i64: 1, 128>}, {pipeline_mode = #tpu.pipeline_mode<synchronous>, transform_indices = @transform_19, window_bounds = array<i64: 128, 128>}, {pipeline_mode = #tpu.pipeline_mode<synchronous>, transform_indices = @transform_20, window_bounds = array<i64: 1, 128>}, {transform_indices = @transform_21, window_bounds = array<i64: 1, 4, 128>}]} {
    %c0 = arith.constant 0 : index
    %c0_0 = arith.constant 0 : index
    %c0_1 = arith.constant 0 : index
    %0 = vector.load %arg1[%c0, %c0_0, %c0_1] : memref<4x32x16xf32, #tpu.memory_space<vmem>>, vector<4x32x16xf32>
    %1 = vector.shape_cast %0 : vector<4x32x16xf32> to vector<128x16xf32>
    %2 = arith.truncf %1 : vector<128x16xf32> to vector<128x16xbf16>
    %c0_2 = arith.constant 0 : index
    %c0_3 = arith.constant 0 : index
    %3 = vector.load %arg3[%c0_2, %c0_3] : memref<16x64xbf16, #tpu.memory_space<vmem>>, vector<16x64xbf16>
    %cst = arith.constant dense<0.000000e+00> : vector<128x64xf32>
    %4 = tpu.matmul %2, %3, %cst {dimension_numbers = #tpu.dot_dimension_numbers<[1], [0], [0], [1], [0, 0, 1, 1], [], []>} : vector<128x16xbf16>, vector<16x64xbf16>, vector<128x64xf32> -> vector<128x64xf32>
    %c0_4 = arith.constant 0 : index
    %c0_5 = arith.constant 0 : index
    %5 = vector.load %arg4[%c0_4, %c0_5] : memref<1x64xf32, #tpu.memory_space<vmem>>, vector<1x64xf32>
    %6 = vector.broadcast %5 : vector<1x64xf32> to vector<128x64xf32>
    %7 = arith.addf %4, %6 : vector<128x64xf32>
    %cst_6 = arith.constant 8.000000e+00 : f32
    %8 = vector.broadcast %cst_6 : f32 to vector<128x64xf32>
    %9 = arith.mulf %7, %8 : vector<128x64xf32>
    %10 = vector.shape_cast %9 : vector<128x64xf32> to vector<4x32x64xf32>
    %c0_7 = arith.constant 0 : index
    %c0_8 = arith.constant 0 : index
    %c0_9 = arith.constant 0 : index
    %11 = vector.load %arg2[%c0_7, %c0_8, %c0_9] : memref<1x4x64xf32, #tpu.memory_space<vmem>>, vector<1x4x64xf32>
    %12 = vector.shape_cast %11 : vector<1x4x64xf32> to vector<4x64xf32>
    %13 = vector.shape_cast %12 : vector<4x64xf32> to vector<4x1x64xf32>
    %14 = vector.broadcast %13 : vector<4x1x64xf32> to vector<4x32x64xf32>
    %15 = arith.addf %10, %14 : vector<4x32x64xf32>
    %16 = vector.shape_cast %15 : vector<4x32x64xf32> to vector<128x64xf32>
    %17 = arith.truncf %16 : vector<128x64xf32> to vector<128x64xbf16>
    %c0_10 = arith.constant 0 : index
    %c0_11 = arith.constant 0 : index
    %c0_12 = arith.constant 0 : index
    %18 = vector.load %arg5[%c0_10, %c0_11, %c0_12] : memref<2x64x192xbf16, #tpu.memory_space<vmem>>, vector<1x64x192xbf16>
    %19 = vector.shape_cast %18 : vector<1x64x192xbf16> to vector<64x192xbf16>
    %cst_13 = arith.constant dense<0.000000e+00> : vector<128x192xf32>
    %20 = tpu.matmul %17, %19, %cst_13 {dimension_numbers = #tpu.dot_dimension_numbers<[1], [0], [0], [1], [0, 0, 1, 1], [], []>} : vector<128x64xbf16>, vector<64x192xbf16>, vector<128x192xf32> -> vector<128x192xf32>
    %c0_14 = arith.constant 0 : index
    %c0_15 = arith.constant 0 : index
    %c0_16 = arith.constant 0 : index
    %21 = vector.load %arg6[%c0_14, %c0_15, %c0_16] : memref<2x1x192xf32, #tpu.memory_space<vmem>>, vector<1x1x192xf32>
    %22 = vector.shape_cast %21 : vector<1x1x192xf32> to vector<1x192xf32>
    %23 = vector.broadcast %22 : vector<1x192xf32> to vector<128x192xf32>
    %24 = arith.addf %20, %23 : vector<128x192xf32>
    %25 = vector.extract_strided_slice %24 {offsets = [0, 0], sizes = [128, 16], strides = [1, 1]} : vector<128x192xf32> to vector<128x16xf32>
    %26 = vector.extract_strided_slice %24 {offsets = [0, 64], sizes = [128, 16], strides = [1, 1]} : vector<128x192xf32> to vector<128x16xf32>
    %27 = vector.extract_strided_slice %24 {offsets = [0, 128], sizes = [128, 16], strides = [1, 1]} : vector<128x192xf32> to vector<128x16xf32>
    %28 = vector.shape_cast %25 : vector<128x16xf32> to vector<4x32x16xf32>
    %29 = arith.truncf %28 : vector<4x32x16xf32> to vector<4x32x16xbf16>
    %30 = vector.shape_cast %26 : vector<128x16xf32> to vector<4x32x16xf32>
    %31 = arith.truncf %30 : vector<4x32x16xf32> to vector<4x32x16xbf16>
    %32 = vector.shape_cast %27 : vector<128x16xf32> to vector<4x32x16xf32>
    %33 = arith.truncf %32 : vector<4x32x16xf32> to vector<4x32x16xbf16>
    "tpu.trace_start"() <{level = 10 : i32, message = "bqd,bkd->bqk"}> : () -> ()
    %cst_17 = arith.constant dense<0.000000e+00> : vector<4x32x32xf32>
    %34 = tpu.matmul %29, %31, %cst_17 {dimension_numbers = #tpu.dot_dimension_numbers<[2], [2], [1], [1], [0, 0, 0, 1, 1, 1], [0], [0]>} : vector<4x32x16xbf16>, vector<4x32x16xbf16>, vector<4x32x32xf32> -> vector<4x32x32xf32>
    "tpu.trace_stop"() : () -> ()
    %cst_18 = arith.constant dense<0xFF800000> : vector<4x32xf32>
    %35 = vector.multi_reduction <maximumf>, %34, %cst_18 [2] : vector<4x32x32xf32> to vector<4x32xf32>
    %36 = vector.shape_cast %35 : vector<4x32xf32> to vector<4x32x1xf32>
    %37 = vector.broadcast %36 : vector<4x32x1xf32> to vector<4x32x32xf32>
    %38 = arith.subf %34, %37 : vector<4x32x32xf32>
    %39 = math.exp %38 : vector<4x32x32xf32>
    %cst_19 = arith.constant dense<0.000000e+00> : vector<4x32xf32>
    %40 = vector.multi_reduction <add>, %39, %cst_19 [2] : vector<4x32x32xf32> to vector<4x32xf32>
    %41 = vector.shape_cast %40 : vector<4x32xf32> to vector<4x32x1xf32>
    %42 = tpu.reciprocal %41 {approx = true} : vector<4x32x1xf32> -> vector<4x32x1xf32>
    %43 = vector.broadcast %42 : vector<4x32x1xf32> to vector<4x32x32xf32>
    %44 = arith.mulf %39, %43 : vector<4x32x32xf32>
    %45 = arith.truncf %44 : vector<4x32x32xf32> to vector<4x32x32xbf16>
    "tpu.trace_start"() <{level = 10 : i32, message = "bqk,bkd->bqd"}> : () -> ()
    %cst_20 = arith.constant dense<0.000000e+00> : vector<4x32x16xf32>
    %46 = tpu.matmul %45, %33, %cst_20 {dimension_numbers = #tpu.dot_dimension_numbers<[2], [1], [1], [2], [0, 0, 0, 1, 1, 2], [0], [0]>} : vector<4x32x32xbf16>, vector<4x32x16xbf16>, vector<4x32x16xf32> -> vector<4x32x16xf32>
    "tpu.trace_stop"() : () -> ()
    %47 = vector.shape_cast %46 : vector<4x32x16xf32> to vector<128x16xf32>
    %48 = vector.extract_strided_slice %24 {offsets = [0, 16], sizes = [128, 16], strides = [1, 1]} : vector<128x192xf32> to vector<128x16xf32>
    %49 = vector.extract_strided_slice %24 {offsets = [0, 80], sizes = [128, 16], strides = [1, 1]} : vector<128x192xf32> to vector<128x16xf32>
    %50 = vector.extract_strided_slice %24 {offsets = [0, 144], sizes = [128, 16], strides = [1, 1]} : vector<128x192xf32> to vector<128x16xf32>
    %51 = vector.shape_cast %48 : vector<128x16xf32> to vector<4x32x16xf32>
    %52 = arith.truncf %51 : vector<4x32x16xf32> to vector<4x32x16xbf16>
    %53 = vector.shape_cast %49 : vector<128x16xf32> to vector<4x32x16xf32>
    %54 = arith.truncf %53 : vector<4x32x16xf32> to vector<4x32x16xbf16>
    %55 = vector.shape_cast %50 : vector<128x16xf32> to vector<4x32x16xf32>
    %56 = arith.truncf %55 : vector<4x32x16xf32> to vector<4x32x16xbf16>
    "tpu.trace_start"() <{level = 10 : i32, message = "bqd,bkd->bqk"}> : () -> ()
    %cst_21 = arith.constant dense<0.000000e+00> : vector<4x32x32xf32>
    %57 = tpu.matmul %52, %54, %cst_21 {dimension_numbers = #tpu.dot_dimension_numbers<[2], [2], [1], [1], [0, 0, 0, 1, 1, 1], [0], [0]>} : vector<4x32x16xbf16>, vector<4x32x16xbf16>, vector<4x32x32xf32> -> vector<4x32x32xf32>
    "tpu.trace_stop"() : () -> ()
    %cst_22 = arith.constant dense<0xFF800000> : vector<4x32xf32>
    %58 = vector.multi_reduction <maximumf>, %57, %cst_22 [2] : vector<4x32x32xf32> to vector<4x32xf32>
    %59 = vector.shape_cast %58 : vector<4x32xf32> to vector<4x32x1xf32>
    %60 = vector.broadcast %59 : vector<4x32x1xf32> to vector<4x32x32xf32>
    %61 = arith.subf %57, %60 : vector<4x32x32xf32>
    %62 = math.exp %61 : vector<4x32x32xf32>
    %cst_23 = arith.constant dense<0.000000e+00> : vector<4x32xf32>
    %63 = vector.multi_reduction <add>, %62, %cst_23 [2] : vector<4x32x32xf32> to vector<4x32xf32>
    %64 = vector.shape_cast %63 : vector<4x32xf32> to vector<4x32x1xf32>
    %65 = tpu.reciprocal %64 {approx = true} : vector<4x32x1xf32> -> vector<4x32x1xf32>
    %66 = vector.broadcast %65 : vector<4x32x1xf32> to vector<4x32x32xf32>
    %67 = arith.mulf %62, %66 : vector<4x32x32xf32>
    %68 = arith.truncf %67 : vector<4x32x32xf32> to vector<4x32x32xbf16>
    "tpu.trace_start"() <{level = 10 : i32, message = "bqk,bkd->bqd"}> : () -> ()
    %cst_24 = arith.constant dense<0.000000e+00> : vector<4x32x16xf32>
    %69 = tpu.matmul %68, %56, %cst_24 {dimension_numbers = #tpu.dot_dimension_numbers<[2], [1], [1], [2], [0, 0, 0, 1, 1, 2], [0], [0]>} : vector<4x32x32xbf16>, vector<4x32x16xbf16>, vector<4x32x16xf32> -> vector<4x32x16xf32>
    "tpu.trace_stop"() : () -> ()
    %70 = vector.shape_cast %69 : vector<4x32x16xf32> to vector<128x16xf32>
    %71 = vector.extract_strided_slice %24 {offsets = [0, 32], sizes = [128, 16], strides = [1, 1]} : vector<128x192xf32> to vector<128x16xf32>
    %72 = vector.extract_strided_slice %24 {offsets = [0, 96], sizes = [128, 16], strides = [1, 1]} : vector<128x192xf32> to vector<128x16xf32>
    %73 = vector.extract_strided_slice %24 {offsets = [0, 160], sizes = [128, 16], strides = [1, 1]} : vector<128x192xf32> to vector<128x16xf32>
    %74 = vector.shape_cast %71 : vector<128x16xf32> to vector<4x32x16xf32>
    %75 = arith.truncf %74 : vector<4x32x16xf32> to vector<4x32x16xbf16>
    %76 = vector.shape_cast %72 : vector<128x16xf32> to vector<4x32x16xf32>
    %77 = arith.truncf %76 : vector<4x32x16xf32> to vector<4x32x16xbf16>
    %78 = vector.shape_cast %73 : vector<128x16xf32> to vector<4x32x16xf32>
    %79 = arith.truncf %78 : vector<4x32x16xf32> to vector<4x32x16xbf16>
    "tpu.trace_start"() <{level = 10 : i32, message = "bqd,bkd->bqk"}> : () -> ()
    %cst_25 = arith.constant dense<0.000000e+00> : vector<4x32x32xf32>
    %80 = tpu.matmul %75, %77, %cst_25 {dimension_numbers = #tpu.dot_dimension_numbers<[2], [2], [1], [1], [0, 0, 0, 1, 1, 1], [0], [0]>} : vector<4x32x16xbf16>, vector<4x32x16xbf16>, vector<4x32x32xf32> -> vector<4x32x32xf32>
    "tpu.trace_stop"() : () -> ()
    %cst_26 = arith.constant dense<0xFF800000> : vector<4x32xf32>
    %81 = vector.multi_reduction <maximumf>, %80, %cst_26 [2] : vector<4x32x32xf32> to vector<4x32xf32>
    %82 = vector.shape_cast %81 : vector<4x32xf32> to vector<4x32x1xf32>
    %83 = vector.broadcast %82 : vector<4x32x1xf32> to vector<4x32x32xf32>
    %84 = arith.subf %80, %83 : vector<4x32x32xf32>
    %85 = math.exp %84 : vector<4x32x32xf32>
    %cst_27 = arith.constant dense<0.000000e+00> : vector<4x32xf32>
    %86 = vector.multi_reduction <add>, %85, %cst_27 [2] : vector<4x32x32xf32> to vector<4x32xf32>
    %87 = vector.shape_cast %86 : vector<4x32xf32> to vector<4x32x1xf32>
    %88 = tpu.reciprocal %87 {approx = true} : vector<4x32x1xf32> -> vector<4x32x1xf32>
    %89 = vector.broadcast %88 : vector<4x32x1xf32> to vector<4x32x32xf32>
    %90 = arith.mulf %85, %89 : vector<4x32x32xf32>
    %91 = arith.truncf %90 : vector<4x32x32xf32> to vector<4x32x32xbf16>
    "tpu.trace_start"() <{level = 10 : i32, message = "bqk,bkd->bqd"}> : () -> ()
    %cst_28 = arith.constant dense<0.000000e+00> : vector<4x32x16xf32>
    %92 = tpu.matmul %91, %79, %cst_28 {dimension_numbers = #tpu.dot_dimension_numbers<[2], [1], [1], [2], [0, 0, 0, 1, 1, 2], [0], [0]>} : vector<4x32x32xbf16>, vector<4x32x16xbf16>, vector<4x32x16xf32> -> vector<4x32x16xf32>
    "tpu.trace_stop"() : () -> ()
    %93 = vector.shape_cast %92 : vector<4x32x16xf32> to vector<128x16xf32>
    %94 = vector.extract_strided_slice %24 {offsets = [0, 48], sizes = [128, 16], strides = [1, 1]} : vector<128x192xf32> to vector<128x16xf32>
    %95 = vector.extract_strided_slice %24 {offsets = [0, 112], sizes = [128, 16], strides = [1, 1]} : vector<128x192xf32> to vector<128x16xf32>
    %96 = vector.extract_strided_slice %24 {offsets = [0, 176], sizes = [128, 16], strides = [1, 1]} : vector<128x192xf32> to vector<128x16xf32>
    %97 = vector.shape_cast %94 : vector<128x16xf32> to vector<4x32x16xf32>
    %98 = arith.truncf %97 : vector<4x32x16xf32> to vector<4x32x16xbf16>
    %99 = vector.shape_cast %95 : vector<128x16xf32> to vector<4x32x16xf32>
    %100 = arith.truncf %99 : vector<4x32x16xf32> to vector<4x32x16xbf16>
    %101 = vector.shape_cast %96 : vector<128x16xf32> to vector<4x32x16xf32>
    %102 = arith.truncf %101 : vector<4x32x16xf32> to vector<4x32x16xbf16>
    "tpu.trace_start"() <{level = 10 : i32, message = "bqd,bkd->bqk"}> : () -> ()
    %cst_29 = arith.constant dense<0.000000e+00> : vector<4x32x32xf32>
    %103 = tpu.matmul %98, %100, %cst_29 {dimension_numbers = #tpu.dot_dimension_numbers<[2], [2], [1], [1], [0, 0, 0, 1, 1, 1], [0], [0]>} : vector<4x32x16xbf16>, vector<4x32x16xbf16>, vector<4x32x32xf32> -> vector<4x32x32xf32>
    "tpu.trace_stop"() : () -> ()
    %cst_30 = arith.constant dense<0xFF800000> : vector<4x32xf32>
    %104 = vector.multi_reduction <maximumf>, %103, %cst_30 [2] : vector<4x32x32xf32> to vector<4x32xf32>
    %105 = vector.shape_cast %104 : vector<4x32xf32> to vector<4x32x1xf32>
    %106 = vector.broadcast %105 : vector<4x32x1xf32> to vector<4x32x32xf32>
    %107 = arith.subf %103, %106 : vector<4x32x32xf32>
    %108 = math.exp %107 : vector<4x32x32xf32>
    %cst_31 = arith.constant dense<0.000000e+00> : vector<4x32xf32>
    %109 = vector.multi_reduction <add>, %108, %cst_31 [2] : vector<4x32x32xf32> to vector<4x32xf32>
    %110 = vector.shape_cast %109 : vector<4x32xf32> to vector<4x32x1xf32>
    %111 = tpu.reciprocal %110 {approx = true} : vector<4x32x1xf32> -> vector<4x32x1xf32>
    %112 = vector.broadcast %111 : vector<4x32x1xf32> to vector<4x32x32xf32>
    %113 = arith.mulf %108, %112 : vector<4x32x32xf32>
    %114 = arith.truncf %113 : vector<4x32x32xf32> to vector<4x32x32xbf16>
    "tpu.trace_start"() <{level = 10 : i32, message = "bqk,bkd->bqd"}> : () -> ()
    %cst_32 = arith.constant dense<0.000000e+00> : vector<4x32x16xf32>
    %115 = tpu.matmul %114, %102, %cst_32 {dimension_numbers = #tpu.dot_dimension_numbers<[2], [1], [1], [2], [0, 0, 0, 1, 1, 2], [0], [0]>} : vector<4x32x32xbf16>, vector<4x32x16xbf16>, vector<4x32x16xf32> -> vector<4x32x16xf32>
    "tpu.trace_stop"() : () -> ()
    %116 = vector.shape_cast %115 : vector<4x32x16xf32> to vector<128x16xf32>
    %117 = tpu.concatenate %47, %70, %93, %116 in 1 : vector<128x16xf32>, vector<128x16xf32>, vector<128x16xf32>, vector<128x16xf32> -> vector<128x64xf32>
    %118 = arith.truncf %117 : vector<128x64xf32> to vector<128x64xbf16>
    %c0_33 = arith.constant 0 : index
    %c0_34 = arith.constant 0 : index
    %c0_35 = arith.constant 0 : index
    %119 = vector.load %arg7[%c0_33, %c0_34, %c0_35] : memref<2x64x64xbf16, #tpu.memory_space<vmem>>, vector<1x64x64xbf16>
    %120 = vector.shape_cast %119 : vector<1x64x64xbf16> to vector<64x64xbf16>
    %cst_36 = arith.constant dense<0.000000e+00> : vector<128x64xf32>
    %121 = tpu.matmul %118, %120, %cst_36 {dimension_numbers = #tpu.dot_dimension_numbers<[1], [0], [0], [1], [0, 0, 1, 1], [], []>} : vector<128x64xbf16>, vector<64x64xbf16>, vector<128x64xf32> -> vector<128x64xf32>
    %c0_37 = arith.constant 0 : index
    %c0_38 = arith.constant 0 : index
    %122 = vector.load %arg8[%c0_37, %c0_38] : memref<2x64xf32, #tpu.memory_space<vmem>>, vector<1x64xf32>
    %123 = vector.shape_cast %122 : vector<1x64xf32> to vector<64xf32>
    %124 = vector.shape_cast %123 : vector<64xf32> to vector<1x64xf32>
    %125 = vector.broadcast %124 : vector<1x64xf32> to vector<128x64xf32>
    %126 = arith.addf %121, %125 : vector<128x64xf32>
    %127 = arith.addf %16, %126 : vector<128x64xf32>
    %c0_39 = arith.constant 0 : index
    %c0_40 = arith.constant 0 : index
    %c0_41 = arith.constant 0 : index
    %128 = vector.load %arg9[%c0_39, %c0_40, %c0_41] : memref<2x4x64xf32, #tpu.memory_space<vmem>>, vector<1x1x64xf32>
    %129 = vector.shape_cast %128 : vector<1x1x64xf32> to vector<64xf32>
    %c0_42 = arith.constant 0 : index
    %c1 = arith.constant 1 : index
    %c0_43 = arith.constant 0 : index
    %130 = vector.load %arg9[%c0_42, %c1, %c0_43] : memref<2x4x64xf32, #tpu.memory_space<vmem>>, vector<1x1x64xf32>
    %131 = vector.shape_cast %130 : vector<1x1x64xf32> to vector<64xf32>
    %cst_44 = arith.constant dense<0.000000e+00> : vector<128xf32>
    %132 = vector.multi_reduction <add>, %127, %cst_44 [1] : vector<128x64xf32> to vector<128xf32>
    %133 = vector.shape_cast %132 : vector<128xf32> to vector<128x1xf32>
    %cst_45 = arith.constant 6.400000e+01 : f32
    %134 = vector.broadcast %cst_45 : f32 to vector<128x1xf32>
    %135 = arith.divf %133, %134 : vector<128x1xf32>
    %136 = vector.broadcast %135 : vector<128x1xf32> to vector<128x64xf32>
    %137 = arith.subf %127, %136 : vector<128x64xf32>
    %138 = arith.mulf %137, %137 : vector<128x64xf32>
    %cst_46 = arith.constant dense<0.000000e+00> : vector<128xf32>
    %139 = vector.multi_reduction <add>, %138, %cst_46 [1] : vector<128x64xf32> to vector<128xf32>
    %140 = vector.shape_cast %139 : vector<128xf32> to vector<128x1xf32>
    %cst_47 = arith.constant 6.400000e+01 : f32
    %141 = vector.broadcast %cst_47 : f32 to vector<128x1xf32>
    %142 = arith.divf %140, %141 : vector<128x1xf32>
    %143 = vector.broadcast %135 : vector<128x1xf32> to vector<128x64xf32>
    %144 = arith.subf %127, %143 : vector<128x64xf32>
    %cst_48 = arith.constant 9.99999974E-6 : f32
    %145 = vector.broadcast %cst_48 : f32 to vector<128x1xf32>
    %146 = arith.addf %142, %145 : vector<128x1xf32>
    %147 = math.rsqrt %146 : vector<128x1xf32>
    %148 = vector.broadcast %147 : vector<128x1xf32> to vector<128x64xf32>
    %149 = arith.mulf %144, %148 : vector<128x64xf32>
    %150 = vector.shape_cast %129 : vector<64xf32> to vector<1x64xf32>
    %151 = vector.broadcast %150 : vector<1x64xf32> to vector<128x64xf32>
    %152 = arith.mulf %149, %151 : vector<128x64xf32>
    %153 = vector.shape_cast %131 : vector<64xf32> to vector<1x64xf32>
    %154 = vector.broadcast %153 : vector<1x64xf32> to vector<128x64xf32>
    %155 = arith.addf %152, %154 : vector<128x64xf32>
    %156 = arith.truncf %155 : vector<128x64xf32> to vector<128x64xbf16>
    %c0_49 = arith.constant 0 : index
    %c0_50 = arith.constant 0 : index
    %c0_51 = arith.constant 0 : index
    %157 = vector.load %arg10[%c0_49, %c0_50, %c0_51] : memref<2x64x128xbf16, #tpu.memory_space<vmem>>, vector<1x64x128xbf16>
    %158 = vector.shape_cast %157 : vector<1x64x128xbf16> to vector<64x128xbf16>
    %cst_52 = arith.constant dense<0.000000e+00> : vector<128x128xf32>
    %159 = tpu.matmul %156, %158, %cst_52 {dimension_numbers = #tpu.dot_dimension_numbers<[1], [0], [0], [1], [0, 0, 1, 1], [], []>} : vector<128x64xbf16>, vector<64x128xbf16>, vector<128x128xf32> -> vector<128x128xf32>
    %c0_53 = arith.constant 0 : index
    %c0_54 = arith.constant 0 : index
    %160 = vector.load %arg11[%c0_53, %c0_54] : memref<2x128xf32, #tpu.memory_space<vmem>>, vector<1x128xf32>
    %161 = vector.shape_cast %160 : vector<1x128xf32> to vector<128xf32>
    %162 = vector.shape_cast %161 : vector<128xf32> to vector<1x128xf32>
    %163 = vector.broadcast %162 : vector<1x128xf32> to vector<128x128xf32>
    %164 = arith.addf %159, %163 : vector<128x128xf32>
    %cst_55 = arith.constant 0.000000e+00 : f32
    %165 = vector.broadcast %cst_55 : f32 to vector<128x128xf32>
    %166 = arith.maximumf %164, %165 : vector<128x128xf32>
    %167 = arith.truncf %166 : vector<128x128xf32> to vector<128x128xbf16>
    %c0_56 = arith.constant 0 : index
    %c0_57 = arith.constant 0 : index
    %c0_58 = arith.constant 0 : index
    %168 = vector.load %arg12[%c0_56, %c0_57, %c0_58] : memref<2x128x64xbf16, #tpu.memory_space<vmem>>, vector<1x128x64xbf16>
    %169 = vector.shape_cast %168 : vector<1x128x64xbf16> to vector<128x64xbf16>
    %cst_59 = arith.constant dense<0.000000e+00> : vector<128x64xf32>
    %170 = tpu.matmul %167, %169, %cst_59 {dimension_numbers = #tpu.dot_dimension_numbers<[1], [0], [0], [1], [0, 0, 1, 1], [], []>} : vector<128x128xbf16>, vector<128x64xbf16>, vector<128x64xf32> -> vector<128x64xf32>
    %c0_60 = arith.constant 0 : index
    %c0_61 = arith.constant 0 : index
    %171 = vector.load %arg13[%c0_60, %c0_61] : memref<2x64xf32, #tpu.memory_space<vmem>>, vector<1x64xf32>
    %172 = vector.shape_cast %171 : vector<1x64xf32> to vector<64xf32>
    %173 = vector.shape_cast %172 : vector<64xf32> to vector<1x64xf32>
    %174 = vector.broadcast %173 : vector<1x64xf32> to vector<128x64xf32>
    %175 = arith.addf %170, %174 : vector<128x64xf32>
    %176 = arith.addf %155, %175 : vector<128x64xf32>
    %c0_62 = arith.constant 0 : index
    %c2 = arith.constant 2 : index
    %c0_63 = arith.constant 0 : index
    %177 = vector.load %arg9[%c0_62, %c2, %c0_63] : memref<2x4x64xf32, #tpu.memory_space<vmem>>, vector<1x1x64xf32>
    %178 = vector.shape_cast %177 : vector<1x1x64xf32> to vector<64xf32>
    %c0_64 = arith.constant 0 : index
    %c3 = arith.constant 3 : index
    %c0_65 = arith.constant 0 : index
    %179 = vector.load %arg9[%c0_64, %c3, %c0_65] : memref<2x4x64xf32, #tpu.memory_space<vmem>>, vector<1x1x64xf32>
    %180 = vector.shape_cast %179 : vector<1x1x64xf32> to vector<64xf32>
    %cst_66 = arith.constant dense<0.000000e+00> : vector<128xf32>
    %181 = vector.multi_reduction <add>, %176, %cst_66 [1] : vector<128x64xf32> to vector<128xf32>
    %182 = vector.shape_cast %181 : vector<128xf32> to vector<128x1xf32>
    %cst_67 = arith.constant 6.400000e+01 : f32
    %183 = vector.broadcast %cst_67 : f32 to vector<128x1xf32>
    %184 = arith.divf %182, %183 : vector<128x1xf32>
    %185 = vector.broadcast %184 : vector<128x1xf32> to vector<128x64xf32>
    %186 = arith.subf %176, %185 : vector<128x64xf32>
    %187 = arith.mulf %186, %186 : vector<128x64xf32>
    %cst_68 = arith.constant dense<0.000000e+00> : vector<128xf32>
    %188 = vector.multi_reduction <add>, %187, %cst_68 [1] : vector<128x64xf32> to vector<128xf32>
    %189 = vector.shape_cast %188 : vector<128xf32> to vector<128x1xf32>
    %cst_69 = arith.constant 6.400000e+01 : f32
    %190 = vector.broadcast %cst_69 : f32 to vector<128x1xf32>
    %191 = arith.divf %189, %190 : vector<128x1xf32>
    %192 = vector.broadcast %184 : vector<128x1xf32> to vector<128x64xf32>
    %193 = arith.subf %176, %192 : vector<128x64xf32>
    %cst_70 = arith.constant 9.99999974E-6 : f32
    %194 = vector.broadcast %cst_70 : f32 to vector<128x1xf32>
    %195 = arith.addf %191, %194 : vector<128x1xf32>
    %196 = math.rsqrt %195 : vector<128x1xf32>
    %197 = vector.broadcast %196 : vector<128x1xf32> to vector<128x64xf32>
    %198 = arith.mulf %193, %197 : vector<128x64xf32>
    %199 = vector.shape_cast %178 : vector<64xf32> to vector<1x64xf32>
    %200 = vector.broadcast %199 : vector<1x64xf32> to vector<128x64xf32>
    %201 = arith.mulf %198, %200 : vector<128x64xf32>
    %202 = vector.shape_cast %180 : vector<64xf32> to vector<1x64xf32>
    %203 = vector.broadcast %202 : vector<1x64xf32> to vector<128x64xf32>
    %204 = arith.addf %201, %203 : vector<128x64xf32>
    %205 = arith.truncf %204 : vector<128x64xf32> to vector<128x64xbf16>
    %c1_71 = arith.constant 1 : index
    %c0_72 = arith.constant 0 : index
    %c0_73 = arith.constant 0 : index
    %206 = vector.load %arg5[%c1_71, %c0_72, %c0_73] : memref<2x64x192xbf16, #tpu.memory_space<vmem>>, vector<1x64x192xbf16>
    %207 = vector.shape_cast %206 : vector<1x64x192xbf16> to vector<64x192xbf16>
    %cst_74 = arith.constant dense<0.000000e+00> : vector<128x192xf32>
    %208 = tpu.matmul %205, %207, %cst_74 {dimension_numbers = #tpu.dot_dimension_numbers<[1], [0], [0], [1], [0, 0, 1, 1], [], []>} : vector<128x64xbf16>, vector<64x192xbf16>, vector<128x192xf32> -> vector<128x192xf32>
    %c1_75 = arith.constant 1 : index
    %c0_76 = arith.constant 0 : index
    %c0_77 = arith.constant 0 : index
    %209 = vector.load %arg6[%c1_75, %c0_76, %c0_77] : memref<2x1x192xf32, #tpu.memory_space<vmem>>, vector<1x1x192xf32>
    %210 = vector.shape_cast %209 : vector<1x1x192xf32> to vector<1x192xf32>
    %211 = vector.broadcast %210 : vector<1x192xf32> to vector<128x192xf32>
    %212 = arith.addf %208, %211 : vector<128x192xf32>
    %213 = vector.extract_strided_slice %212 {offsets = [0, 0], sizes = [128, 16], strides = [1, 1]} : vector<128x192xf32> to vector<128x16xf32>
    %214 = vector.extract_strided_slice %212 {offsets = [0, 64], sizes = [128, 16], strides = [1, 1]} : vector<128x192xf32> to vector<128x16xf32>
    %215 = vector.extract_strided_slice %212 {offsets = [0, 128], sizes = [128, 16], strides = [1, 1]} : vector<128x192xf32> to vector<128x16xf32>
    %216 = vector.shape_cast %213 : vector<128x16xf32> to vector<4x32x16xf32>
    %217 = arith.truncf %216 : vector<4x32x16xf32> to vector<4x32x16xbf16>
    %218 = vector.shape_cast %214 : vector<128x16xf32> to vector<4x32x16xf32>
    %219 = arith.truncf %218 : vector<4x32x16xf32> to vector<4x32x16xbf16>
    %220 = vector.shape_cast %215 : vector<128x16xf32> to vector<4x32x16xf32>
    %221 = arith.truncf %220 : vector<4x32x16xf32> to vector<4x32x16xbf16>
    "tpu.trace_start"() <{level = 10 : i32, message = "bqd,bkd->bqk"}> : () -> ()
    %cst_78 = arith.constant dense<0.000000e+00> : vector<4x32x32xf32>
    %222 = tpu.matmul %217, %219, %cst_78 {dimension_numbers = #tpu.dot_dimension_numbers<[2], [2], [1], [1], [0, 0, 0, 1, 1, 1], [0], [0]>} : vector<4x32x16xbf16>, vector<4x32x16xbf16>, vector<4x32x32xf32> -> vector<4x32x32xf32>
    "tpu.trace_stop"() : () -> ()
    %cst_79 = arith.constant dense<0xFF800000> : vector<4x32xf32>
    %223 = vector.multi_reduction <maximumf>, %222, %cst_79 [2] : vector<4x32x32xf32> to vector<4x32xf32>
    %224 = vector.shape_cast %223 : vector<4x32xf32> to vector<4x32x1xf32>
    %225 = vector.broadcast %224 : vector<4x32x1xf32> to vector<4x32x32xf32>
    %226 = arith.subf %222, %225 : vector<4x32x32xf32>
    %227 = math.exp %226 : vector<4x32x32xf32>
    %cst_80 = arith.constant dense<0.000000e+00> : vector<4x32xf32>
    %228 = vector.multi_reduction <add>, %227, %cst_80 [2] : vector<4x32x32xf32> to vector<4x32xf32>
    %229 = vector.shape_cast %228 : vector<4x32xf32> to vector<4x32x1xf32>
    %230 = tpu.reciprocal %229 {approx = true} : vector<4x32x1xf32> -> vector<4x32x1xf32>
    %231 = vector.broadcast %230 : vector<4x32x1xf32> to vector<4x32x32xf32>
    %232 = arith.mulf %227, %231 : vector<4x32x32xf32>
    %233 = arith.truncf %232 : vector<4x32x32xf32> to vector<4x32x32xbf16>
    "tpu.trace_start"() <{level = 10 : i32, message = "bqk,bkd->bqd"}> : () -> ()
    %cst_81 = arith.constant dense<0.000000e+00> : vector<4x32x16xf32>
    %234 = tpu.matmul %233, %221, %cst_81 {dimension_numbers = #tpu.dot_dimension_numbers<[2], [1], [1], [2], [0, 0, 0, 1, 1, 2], [0], [0]>} : vector<4x32x32xbf16>, vector<4x32x16xbf16>, vector<4x32x16xf32> -> vector<4x32x16xf32>
    "tpu.trace_stop"() : () -> ()
    %235 = vector.shape_cast %234 : vector<4x32x16xf32> to vector<128x16xf32>
    %236 = vector.extract_strided_slice %212 {offsets = [0, 16], sizes = [128, 16], strides = [1, 1]} : vector<128x192xf32> to vector<128x16xf32>
    %237 = vector.extract_strided_slice %212 {offsets = [0, 80], sizes = [128, 16], strides = [1, 1]} : vector<128x192xf32> to vector<128x16xf32>
    %238 = vector.extract_strided_slice %212 {offsets = [0, 144], sizes = [128, 16], strides = [1, 1]} : vector<128x192xf32> to vector<128x16xf32>
    %239 = vector.shape_cast %236 : vector<128x16xf32> to vector<4x32x16xf32>
    %240 = arith.truncf %239 : vector<4x32x16xf32> to vector<4x32x16xbf16>
    %241 = vector.shape_cast %237 : vector<128x16xf32> to vector<4x32x16xf32>
    %242 = arith.truncf %241 : vector<4x32x16xf32> to vector<4x32x16xbf16>
    %243 = vector.shape_cast %238 : vector<128x16xf32> to vector<4x32x16xf32>
    %244 = arith.truncf %243 : vector<4x32x16xf32> to vector<4x32x16xbf16>
    "tpu.trace_start"() <{level = 10 : i32, message = "bqd,bkd->bqk"}> : () -> ()
    %cst_82 = arith.constant dense<0.000000e+00> : vector<4x32x32xf32>
    %245 = tpu.matmul %240, %242, %cst_82 {dimension_numbers = #tpu.dot_dimension_numbers<[2], [2], [1], [1], [0, 0, 0, 1, 1, 1], [0], [0]>} : vector<4x32x16xbf16>, vector<4x32x16xbf16>, vector<4x32x32xf32> -> vector<4x32x32xf32>
    "tpu.trace_stop"() : () -> ()
    %cst_83 = arith.constant dense<0xFF800000> : vector<4x32xf32>
    %246 = vector.multi_reduction <maximumf>, %245, %cst_83 [2] : vector<4x32x32xf32> to vector<4x32xf32>
    %247 = vector.shape_cast %246 : vector<4x32xf32> to vector<4x32x1xf32>
    %248 = vector.broadcast %247 : vector<4x32x1xf32> to vector<4x32x32xf32>
    %249 = arith.subf %245, %248 : vector<4x32x32xf32>
    %250 = math.exp %249 : vector<4x32x32xf32>
    %cst_84 = arith.constant dense<0.000000e+00> : vector<4x32xf32>
    %251 = vector.multi_reduction <add>, %250, %cst_84 [2] : vector<4x32x32xf32> to vector<4x32xf32>
    %252 = vector.shape_cast %251 : vector<4x32xf32> to vector<4x32x1xf32>
    %253 = tpu.reciprocal %252 {approx = true} : vector<4x32x1xf32> -> vector<4x32x1xf32>
    %254 = vector.broadcast %253 : vector<4x32x1xf32> to vector<4x32x32xf32>
    %255 = arith.mulf %250, %254 : vector<4x32x32xf32>
    %256 = arith.truncf %255 : vector<4x32x32xf32> to vector<4x32x32xbf16>
    "tpu.trace_start"() <{level = 10 : i32, message = "bqk,bkd->bqd"}> : () -> ()
    %cst_85 = arith.constant dense<0.000000e+00> : vector<4x32x16xf32>
    %257 = tpu.matmul %256, %244, %cst_85 {dimension_numbers = #tpu.dot_dimension_numbers<[2], [1], [1], [2], [0, 0, 0, 1, 1, 2], [0], [0]>} : vector<4x32x32xbf16>, vector<4x32x16xbf16>, vector<4x32x16xf32> -> vector<4x32x16xf32>
    "tpu.trace_stop"() : () -> ()
    %258 = vector.shape_cast %257 : vector<4x32x16xf32> to vector<128x16xf32>
    %259 = vector.extract_strided_slice %212 {offsets = [0, 32], sizes = [128, 16], strides = [1, 1]} : vector<128x192xf32> to vector<128x16xf32>
    %260 = vector.extract_strided_slice %212 {offsets = [0, 96], sizes = [128, 16], strides = [1, 1]} : vector<128x192xf32> to vector<128x16xf32>
    %261 = vector.extract_strided_slice %212 {offsets = [0, 160], sizes = [128, 16], strides = [1, 1]} : vector<128x192xf32> to vector<128x16xf32>
    %262 = vector.shape_cast %259 : vector<128x16xf32> to vector<4x32x16xf32>
    %263 = arith.truncf %262 : vector<4x32x16xf32> to vector<4x32x16xbf16>
    %264 = vector.shape_cast %260 : vector<128x16xf32> to vector<4x32x16xf32>
    %265 = arith.truncf %264 : vector<4x32x16xf32> to vector<4x32x16xbf16>
    %266 = vector.shape_cast %261 : vector<128x16xf32> to vector<4x32x16xf32>
    %267 = arith.truncf %266 : vector<4x32x16xf32> to vector<4x32x16xbf16>
    "tpu.trace_start"() <{level = 10 : i32, message = "bqd,bkd->bqk"}> : () -> ()
    %cst_86 = arith.constant dense<0.000000e+00> : vector<4x32x32xf32>
    %268 = tpu.matmul %263, %265, %cst_86 {dimension_numbers = #tpu.dot_dimension_numbers<[2], [2], [1], [1], [0, 0, 0, 1, 1, 1], [0], [0]>} : vector<4x32x16xbf16>, vector<4x32x16xbf16>, vector<4x32x32xf32> -> vector<4x32x32xf32>
    "tpu.trace_stop"() : () -> ()
    %cst_87 = arith.constant dense<0xFF800000> : vector<4x32xf32>
    %269 = vector.multi_reduction <maximumf>, %268, %cst_87 [2] : vector<4x32x32xf32> to vector<4x32xf32>
    %270 = vector.shape_cast %269 : vector<4x32xf32> to vector<4x32x1xf32>
    %271 = vector.broadcast %270 : vector<4x32x1xf32> to vector<4x32x32xf32>
    %272 = arith.subf %268, %271 : vector<4x32x32xf32>
    %273 = math.exp %272 : vector<4x32x32xf32>
    %cst_88 = arith.constant dense<0.000000e+00> : vector<4x32xf32>
    %274 = vector.multi_reduction <add>, %273, %cst_88 [2] : vector<4x32x32xf32> to vector<4x32xf32>
    %275 = vector.shape_cast %274 : vector<4x32xf32> to vector<4x32x1xf32>
    %276 = tpu.reciprocal %275 {approx = true} : vector<4x32x1xf32> -> vector<4x32x1xf32>
    %277 = vector.broadcast %276 : vector<4x32x1xf32> to vector<4x32x32xf32>
    %278 = arith.mulf %273, %277 : vector<4x32x32xf32>
    %279 = arith.truncf %278 : vector<4x32x32xf32> to vector<4x32x32xbf16>
    "tpu.trace_start"() <{level = 10 : i32, message = "bqk,bkd->bqd"}> : () -> ()
    %cst_89 = arith.constant dense<0.000000e+00> : vector<4x32x16xf32>
    %280 = tpu.matmul %279, %267, %cst_89 {dimension_numbers = #tpu.dot_dimension_numbers<[2], [1], [1], [2], [0, 0, 0, 1, 1, 2], [0], [0]>} : vector<4x32x32xbf16>, vector<4x32x16xbf16>, vector<4x32x16xf32> -> vector<4x32x16xf32>
    "tpu.trace_stop"() : () -> ()
    %281 = vector.shape_cast %280 : vector<4x32x16xf32> to vector<128x16xf32>
    %282 = vector.extract_strided_slice %212 {offsets = [0, 48], sizes = [128, 16], strides = [1, 1]} : vector<128x192xf32> to vector<128x16xf32>
    %283 = vector.extract_strided_slice %212 {offsets = [0, 112], sizes = [128, 16], strides = [1, 1]} : vector<128x192xf32> to vector<128x16xf32>
    %284 = vector.extract_strided_slice %212 {offsets = [0, 176], sizes = [128, 16], strides = [1, 1]} : vector<128x192xf32> to vector<128x16xf32>
    %285 = vector.shape_cast %282 : vector<128x16xf32> to vector<4x32x16xf32>
    %286 = arith.truncf %285 : vector<4x32x16xf32> to vector<4x32x16xbf16>
    %287 = vector.shape_cast %283 : vector<128x16xf32> to vector<4x32x16xf32>
    %288 = arith.truncf %287 : vector<4x32x16xf32> to vector<4x32x16xbf16>
    %289 = vector.shape_cast %284 : vector<128x16xf32> to vector<4x32x16xf32>
    %290 = arith.truncf %289 : vector<4x32x16xf32> to vector<4x32x16xbf16>
    "tpu.trace_start"() <{level = 10 : i32, message = "bqd,bkd->bqk"}> : () -> ()
    %cst_90 = arith.constant dense<0.000000e+00> : vector<4x32x32xf32>
    %291 = tpu.matmul %286, %288, %cst_90 {dimension_numbers = #tpu.dot_dimension_numbers<[2], [2], [1], [1], [0, 0, 0, 1, 1, 1], [0], [0]>} : vector<4x32x16xbf16>, vector<4x32x16xbf16>, vector<4x32x32xf32> -> vector<4x32x32xf32>
    "tpu.trace_stop"() : () -> ()
    %cst_91 = arith.constant dense<0xFF800000> : vector<4x32xf32>
    %292 = vector.multi_reduction <maximumf>, %291, %cst_91 [2] : vector<4x32x32xf32> to vector<4x32xf32>
    %293 = vector.shape_cast %292 : vector<4x32xf32> to vector<4x32x1xf32>
    %294 = vector.broadcast %293 : vector<4x32x1xf32> to vector<4x32x32xf32>
    %295 = arith.subf %291, %294 : vector<4x32x32xf32>
    %296 = math.exp %295 : vector<4x32x32xf32>
    %cst_92 = arith.constant dense<0.000000e+00> : vector<4x32xf32>
    %297 = vector.multi_reduction <add>, %296, %cst_92 [2] : vector<4x32x32xf32> to vector<4x32xf32>
    %298 = vector.shape_cast %297 : vector<4x32xf32> to vector<4x32x1xf32>
    %299 = tpu.reciprocal %298 {approx = true} : vector<4x32x1xf32> -> vector<4x32x1xf32>
    %300 = vector.broadcast %299 : vector<4x32x1xf32> to vector<4x32x32xf32>
    %301 = arith.mulf %296, %300 : vector<4x32x32xf32>
    %302 = arith.truncf %301 : vector<4x32x32xf32> to vector<4x32x32xbf16>
    "tpu.trace_start"() <{level = 10 : i32, message = "bqk,bkd->bqd"}> : () -> ()
    %cst_93 = arith.constant dense<0.000000e+00> : vector<4x32x16xf32>
    %303 = tpu.matmul %302, %290, %cst_93 {dimension_numbers = #tpu.dot_dimension_numbers<[2], [1], [1], [2], [0, 0, 0, 1, 1, 2], [0], [0]>} : vector<4x32x32xbf16>, vector<4x32x16xbf16>, vector<4x32x16xf32> -> vector<4x32x16xf32>
    "tpu.trace_stop"() : () -> ()
    %304 = vector.shape_cast %303 : vector<4x32x16xf32> to vector<128x16xf32>
    %305 = tpu.concatenate %235, %258, %281, %304 in 1 : vector<128x16xf32>, vector<128x16xf32>, vector<128x16xf32>, vector<128x16xf32> -> vector<128x64xf32>
    %306 = arith.truncf %305 : vector<128x64xf32> to vector<128x64xbf16>
    %c1_94 = arith.constant 1 : index
    %c0_95 = arith.constant 0 : index
    %c0_96 = arith.constant 0 : index
    %307 = vector.load %arg7[%c1_94, %c0_95, %c0_96] : memref<2x64x64xbf16, #tpu.memory_space<vmem>>, vector<1x64x64xbf16>
    %308 = vector.shape_cast %307 : vector<1x64x64xbf16> to vector<64x64xbf16>
    %cst_97 = arith.constant dense<0.000000e+00> : vector<128x64xf32>
    %309 = tpu.matmul %306, %308, %cst_97 {dimension_numbers = #tpu.dot_dimension_numbers<[1], [0], [0], [1], [0, 0, 1, 1], [], []>} : vector<128x64xbf16>, vector<64x64xbf16>, vector<128x64xf32> -> vector<128x64xf32>
    %c1_98 = arith.constant 1 : index
    %c0_99 = arith.constant 0 : index
    %310 = vector.load %arg8[%c1_98, %c0_99] : memref<2x64xf32, #tpu.memory_space<vmem>>, vector<1x64xf32>
    %311 = vector.shape_cast %310 : vector<1x64xf32> to vector<64xf32>
    %312 = vector.shape_cast %311 : vector<64xf32> to vector<1x64xf32>
    %313 = vector.broadcast %312 : vector<1x64xf32> to vector<128x64xf32>
    %314 = arith.addf %309, %313 : vector<128x64xf32>
    %315 = arith.addf %204, %314 : vector<128x64xf32>
    %c1_100 = arith.constant 1 : index
    %c0_101 = arith.constant 0 : index
    %c0_102 = arith.constant 0 : index
    %316 = vector.load %arg9[%c1_100, %c0_101, %c0_102] : memref<2x4x64xf32, #tpu.memory_space<vmem>>, vector<1x1x64xf32>
    %317 = vector.shape_cast %316 : vector<1x1x64xf32> to vector<64xf32>
    %c1_103 = arith.constant 1 : index
    %c1_104 = arith.constant 1 : index
    %c0_105 = arith.constant 0 : index
    %318 = vector.load %arg9[%c1_103, %c1_104, %c0_105] : memref<2x4x64xf32, #tpu.memory_space<vmem>>, vector<1x1x64xf32>
    %319 = vector.shape_cast %318 : vector<1x1x64xf32> to vector<64xf32>
    %cst_106 = arith.constant dense<0.000000e+00> : vector<128xf32>
    %320 = vector.multi_reduction <add>, %315, %cst_106 [1] : vector<128x64xf32> to vector<128xf32>
    %321 = vector.shape_cast %320 : vector<128xf32> to vector<128x1xf32>
    %cst_107 = arith.constant 6.400000e+01 : f32
    %322 = vector.broadcast %cst_107 : f32 to vector<128x1xf32>
    %323 = arith.divf %321, %322 : vector<128x1xf32>
    %324 = vector.broadcast %323 : vector<128x1xf32> to vector<128x64xf32>
    %325 = arith.subf %315, %324 : vector<128x64xf32>
    %326 = arith.mulf %325, %325 : vector<128x64xf32>
    %cst_108 = arith.constant dense<0.000000e+00> : vector<128xf32>
    %327 = vector.multi_reduction <add>, %326, %cst_108 [1] : vector<128x64xf32> to vector<128xf32>
    %328 = vector.shape_cast %327 : vector<128xf32> to vector<128x1xf32>
    %cst_109 = arith.constant 6.400000e+01 : f32
    %329 = vector.broadcast %cst_109 : f32 to vector<128x1xf32>
    %330 = arith.divf %328, %329 : vector<128x1xf32>
    %331 = vector.broadcast %323 : vector<128x1xf32> to vector<128x64xf32>
    %332 = arith.subf %315, %331 : vector<128x64xf32>
    %cst_110 = arith.constant 9.99999974E-6 : f32
    %333 = vector.broadcast %cst_110 : f32 to vector<128x1xf32>
    %334 = arith.addf %330, %333 : vector<128x1xf32>
    %335 = math.rsqrt %334 : vector<128x1xf32>
    %336 = vector.broadcast %335 : vector<128x1xf32> to vector<128x64xf32>
    %337 = arith.mulf %332, %336 : vector<128x64xf32>
    %338 = vector.shape_cast %317 : vector<64xf32> to vector<1x64xf32>
    %339 = vector.broadcast %338 : vector<1x64xf32> to vector<128x64xf32>
    %340 = arith.mulf %337, %339 : vector<128x64xf32>
    %341 = vector.shape_cast %319 : vector<64xf32> to vector<1x64xf32>
    %342 = vector.broadcast %341 : vector<1x64xf32> to vector<128x64xf32>
    %343 = arith.addf %340, %342 : vector<128x64xf32>
    %344 = arith.truncf %343 : vector<128x64xf32> to vector<128x64xbf16>
    %c1_111 = arith.constant 1 : index
    %c0_112 = arith.constant 0 : index
    %c0_113 = arith.constant 0 : index
    %345 = vector.load %arg10[%c1_111, %c0_112, %c0_113] : memref<2x64x128xbf16, #tpu.memory_space<vmem>>, vector<1x64x128xbf16>
    %346 = vector.shape_cast %345 : vector<1x64x128xbf16> to vector<64x128xbf16>
    %cst_114 = arith.constant dense<0.000000e+00> : vector<128x128xf32>
    %347 = tpu.matmul %344, %346, %cst_114 {dimension_numbers = #tpu.dot_dimension_numbers<[1], [0], [0], [1], [0, 0, 1, 1], [], []>} : vector<128x64xbf16>, vector<64x128xbf16>, vector<128x128xf32> -> vector<128x128xf32>
    %c1_115 = arith.constant 1 : index
    %c0_116 = arith.constant 0 : index
    %348 = vector.load %arg11[%c1_115, %c0_116] : memref<2x128xf32, #tpu.memory_space<vmem>>, vector<1x128xf32>
    %349 = vector.shape_cast %348 : vector<1x128xf32> to vector<128xf32>
    %350 = vector.shape_cast %349 : vector<128xf32> to vector<1x128xf32>
    %351 = vector.broadcast %350 : vector<1x128xf32> to vector<128x128xf32>
    %352 = arith.addf %347, %351 : vector<128x128xf32>
    %cst_117 = arith.constant 0.000000e+00 : f32
    %353 = vector.broadcast %cst_117 : f32 to vector<128x128xf32>
    %354 = arith.maximumf %352, %353 : vector<128x128xf32>
    %355 = arith.truncf %354 : vector<128x128xf32> to vector<128x128xbf16>
    %c1_118 = arith.constant 1 : index
    %c0_119 = arith.constant 0 : index
    %c0_120 = arith.constant 0 : index
    %356 = vector.load %arg12[%c1_118, %c0_119, %c0_120] : memref<2x128x64xbf16, #tpu.memory_space<vmem>>, vector<1x128x64xbf16>
    %357 = vector.shape_cast %356 : vector<1x128x64xbf16> to vector<128x64xbf16>
    %cst_121 = arith.constant dense<0.000000e+00> : vector<128x64xf32>
    %358 = tpu.matmul %355, %357, %cst_121 {dimension_numbers = #tpu.dot_dimension_numbers<[1], [0], [0], [1], [0, 0, 1, 1], [], []>} : vector<128x128xbf16>, vector<128x64xbf16>, vector<128x64xf32> -> vector<128x64xf32>
    %c1_122 = arith.constant 1 : index
    %c0_123 = arith.constant 0 : index
    %359 = vector.load %arg13[%c1_122, %c0_123] : memref<2x64xf32, #tpu.memory_space<vmem>>, vector<1x64xf32>
    %360 = vector.shape_cast %359 : vector<1x64xf32> to vector<64xf32>
    %361 = vector.shape_cast %360 : vector<64xf32> to vector<1x64xf32>
    %362 = vector.broadcast %361 : vector<1x64xf32> to vector<128x64xf32>
    %363 = arith.addf %358, %362 : vector<128x64xf32>
    %364 = arith.addf %343, %363 : vector<128x64xf32>
    %c1_124 = arith.constant 1 : index
    %c2_125 = arith.constant 2 : index
    %c0_126 = arith.constant 0 : index
    %365 = vector.load %arg9[%c1_124, %c2_125, %c0_126] : memref<2x4x64xf32, #tpu.memory_space<vmem>>, vector<1x1x64xf32>
    %366 = vector.shape_cast %365 : vector<1x1x64xf32> to vector<64xf32>
    %c1_127 = arith.constant 1 : index
    %c3_128 = arith.constant 3 : index
    %c0_129 = arith.constant 0 : index
    %367 = vector.load %arg9[%c1_127, %c3_128, %c0_129] : memref<2x4x64xf32, #tpu.memory_space<vmem>>, vector<1x1x64xf32>
    %368 = vector.shape_cast %367 : vector<1x1x64xf32> to vector<64xf32>
    %cst_130 = arith.constant dense<0.000000e+00> : vector<128xf32>
    %369 = vector.multi_reduction <add>, %364, %cst_130 [1] : vector<128x64xf32> to vector<128xf32>
    %370 = vector.shape_cast %369 : vector<128xf32> to vector<128x1xf32>
    %cst_131 = arith.constant 6.400000e+01 : f32
    %371 = vector.broadcast %cst_131 : f32 to vector<128x1xf32>
    %372 = arith.divf %370, %371 : vector<128x1xf32>
    %373 = vector.broadcast %372 : vector<128x1xf32> to vector<128x64xf32>
    %374 = arith.subf %364, %373 : vector<128x64xf32>
    %375 = arith.mulf %374, %374 : vector<128x64xf32>
    %cst_132 = arith.constant dense<0.000000e+00> : vector<128xf32>
    %376 = vector.multi_reduction <add>, %375, %cst_132 [1] : vector<128x64xf32> to vector<128xf32>
    %377 = vector.shape_cast %376 : vector<128xf32> to vector<128x1xf32>
    %cst_133 = arith.constant 6.400000e+01 : f32
    %378 = vector.broadcast %cst_133 : f32 to vector<128x1xf32>
    %379 = arith.divf %377, %378 : vector<128x1xf32>
    %380 = vector.broadcast %372 : vector<128x1xf32> to vector<128x64xf32>
    %381 = arith.subf %364, %380 : vector<128x64xf32>
    %cst_134 = arith.constant 9.99999974E-6 : f32
    %382 = vector.broadcast %cst_134 : f32 to vector<128x1xf32>
    %383 = arith.addf %379, %382 : vector<128x1xf32>
    %384 = math.rsqrt %383 : vector<128x1xf32>
    %385 = vector.broadcast %384 : vector<128x1xf32> to vector<128x64xf32>
    %386 = arith.mulf %381, %385 : vector<128x64xf32>
    %387 = vector.shape_cast %366 : vector<64xf32> to vector<1x64xf32>
    %388 = vector.broadcast %387 : vector<1x64xf32> to vector<128x64xf32>
    %389 = arith.mulf %386, %388 : vector<128x64xf32>
    %390 = vector.shape_cast %368 : vector<64xf32> to vector<1x64xf32>
    %391 = vector.broadcast %390 : vector<1x64xf32> to vector<128x64xf32>
    %392 = arith.addf %389, %391 : vector<128x64xf32>
    %c0_135 = arith.constant 0 : index
    %c0_136 = arith.constant 0 : index
    %393 = vector.load %arg16[%c0_135, %c0_136] : memref<64x128xf32, #tpu.memory_space<vmem>>, vector<64x128xf32>
    %cst_137 = arith.constant dense<0.000000e+00> : vector<128x128xf32>
    %394 = tpu.matmul %392, %393, %cst_137 {dimension_numbers = #tpu.dot_dimension_numbers<[1], [0], [0], [1], [0, 0, 1, 1], [], []>} : vector<128x64xf32>, vector<64x128xf32>, vector<128x128xf32> -> vector<128x128xf32>
    %c0_138 = arith.constant 0 : index
    %c0_139 = arith.constant 0 : index
    %395 = vector.load %arg17[%c0_138, %c0_139] : memref<1x128xf32, #tpu.memory_space<vmem>>, vector<1x128xf32>
    %396 = vector.broadcast %395 : vector<1x128xf32> to vector<128x128xf32>
    %397 = arith.addf %394, %396 : vector<128x128xf32>
    %cst_140 = arith.constant 0.000000e+00 : f32
    %398 = vector.broadcast %cst_140 : f32 to vector<128x128xf32>
    %399 = arith.maximumf %397, %398 : vector<128x128xf32>
    %c0_141 = arith.constant 0 : index
    %c0_142 = arith.constant 0 : index
    %400 = vector.load %arg18[%c0_141, %c0_142] : memref<128x128xf32, #tpu.memory_space<vmem>>, vector<128x128xf32>
    %cst_143 = arith.constant dense<0.000000e+00> : vector<128x128xf32>
    %401 = tpu.matmul %399, %400, %cst_143 {dimension_numbers = #tpu.dot_dimension_numbers<[1], [0], [0], [1], [0, 0, 1, 1], [], []>} : vector<128x128xf32>, vector<128x128xf32>, vector<128x128xf32> -> vector<128x128xf32>
    %c0_144 = arith.constant 0 : index
    %c0_145 = arith.constant 0 : index
    %402 = vector.load %arg19[%c0_144, %c0_145] : memref<1x128xf32, #tpu.memory_space<vmem>>, vector<1x128xf32>
    %403 = vector.broadcast %402 : vector<1x128xf32> to vector<128x128xf32>
    %404 = arith.addf %401, %403 : vector<128x128xf32>
    %cst_146 = arith.constant 0.000000e+00 : f32
    %405 = vector.broadcast %cst_146 : f32 to vector<128x128xf32>
    %406 = arith.maximumf %404, %405 : vector<128x128xf32>
    %c0_147 = arith.constant 0 : index
    %c0_148 = arith.constant 0 : index
    %407 = vector.load %arg20[%c0_147, %c0_148] : memref<128x128xf32, #tpu.memory_space<vmem>>, vector<128x128xf32>
    %cst_149 = arith.constant dense<0.000000e+00> : vector<128x128xf32>
    %408 = tpu.matmul %406, %407, %cst_149 {dimension_numbers = #tpu.dot_dimension_numbers<[1], [0], [0], [1], [0, 0, 1, 1], [], []>} : vector<128x128xf32>, vector<128x128xf32>, vector<128x128xf32> -> vector<128x128xf32>
    %c0_150 = arith.constant 0 : index
    %c0_151 = arith.constant 0 : index
    %409 = vector.load %arg21[%c0_150, %c0_151] : memref<1x128xf32, #tpu.memory_space<vmem>>, vector<1x128xf32>
    %410 = vector.broadcast %409 : vector<1x128xf32> to vector<128x128xf32>
    %411 = arith.addf %408, %410 : vector<128x128xf32>
    %412 = vector.shape_cast %411 : vector<128x128xf32> to vector<4x32x128xf32>
    %c0_152 = arith.constant 0 : index
    %c0_153 = arith.constant 0 : index
    %413 = vector.load %arg14[%c0_152, %c0_153] : memref<32x1xf32, #tpu.memory_space<vmem>>, vector<32x1xf32>
    %414 = vector.shape_cast %413 : vector<32x1xf32> to vector<1x32x1xf32>
    %415 = vector.broadcast %414 : vector<1x32x1xf32> to vector<4x32x128xf32>
    %416 = arith.mulf %412, %415 : vector<4x32x128xf32>
    %cst_154 = arith.constant dense<0.000000e+00> : vector<4x128xf32>
    %417 = vector.multi_reduction <add>, %416, %cst_154 [1] : vector<4x32x128xf32> to vector<4x128xf32>
    %c0_155 = arith.constant 0 : index
    %c0_156 = arith.constant 0 : index
    %418 = vector.load %arg15[%c0_155, %c0_156] : memref<1x1xf32, #tpu.memory_space<vmem>>, vector<1x1xf32>
    %419 = vector.broadcast %418 : vector<1x1xf32> to vector<4x128xf32>
    %420 = arith.addf %417, %419 : vector<4x128xf32>
    %c0_157 = arith.constant 0 : index
    %c0_158 = arith.constant 0 : index
    %c0_159 = arith.constant 0 : index
    %421 = vector.load %arg22[%c0_157, %c0_158, %c0_159] : memref<1x4x128xf32, #tpu.memory_space<vmem>>, vector<1x4x128xf32>
    %422 = vector.shape_cast %421 : vector<1x4x128xf32> to vector<4x128xf32>
    %423 = vector.shape_cast %420 : vector<4x128xf32> to vector<1x4x128xf32>
    tpu.vector_store %arg22[%c0_157, %c0_158, %c0_159], %423 {strides = array<i32>} : memref<1x4x128xf32, #tpu.memory_space<vmem>>, vector<1x4x128xf32>,
    return
  }
  func.func @transform_0(%arg0: i32) -> (i32, i32, i32) {
    %c0_i32 = arith.constant 0 : i32
    %c0_i32_0 = arith.constant 0 : i32
    %c0_i32_1 = arith.constant 0 : i32
    return %arg0, %c0_i32, %c0_i32_0 : i32, i32, i32
  }
  func.func @transform_1(%arg0: i32) -> (i32, i32, i32) {
    %c0_i32 = arith.constant 0 : i32
    %c0_i32_0 = arith.constant 0 : i32
    %c0_i32_1 = arith.constant 0 : i32
    return %arg0, %c0_i32, %c0_i32_0 : i32, i32, i32
  }
  func.func @transform_2(%arg0: i32) -> (i32, i32) {
    %c0_i32 = arith.constant 0 : i32
    %c0_i32_0 = arith.constant 0 : i32
    %c0_i32_1 = arith.constant 0 : i32
    return %c0_i32, %c0_i32_0 : i32, i32
  }
  func.func @transform_3(%arg0: i32) -> (i32, i32) {
    %c0_i32 = arith.constant 0 : i32
    %c0_i32_0 = arith.constant 0 : i32
    %c0_i32_1 = arith.constant 0 : i32
    return %c0_i32, %c0_i32_0 : i32, i32
  }
  func.func @transform_4(%arg0: i32) -> (i32, i32, i32) {
    %c0_i32 = arith.constant 0 : i32
    %c0_i32_0 = arith.constant 0 : i32
    %c0_i32_1 = arith.constant 0 : i32
    %c0_i32_2 = arith.constant 0 : i32
    return %c0_i32, %c0_i32_0, %c0_i32_1 : i32, i32, i32
  }
  func.func @transform_5(%arg0: i32) -> (i32, i32, i32) {
    %c0_i32 = arith.constant 0 : i32
    %c0_i32_0 = arith.constant 0 : i32
    %c0_i32_1 = arith.constant 0 : i32
    %c0_i32_2 = arith.constant 0 : i32
    return %c0_i32, %c0_i32_0, %c0_i32_1 : i32, i32, i32
  }
  func.func @transform_6(%arg0: i32) -> (i32, i32, i32) {
    %c0_i32 = arith.constant 0 : i32
    %c0_i32_0 = arith.constant 0 : i32
    %c0_i32_1 = arith.constant 0 : i32
    %c0_i32_2 = arith.constant 0 : i32
    return %c0_i32, %c0_i32_0, %c0_i32_1 : i32, i32, i32
  }
  func.func @transform_7(%arg0: i32) -> (i32, i32) {
    %c0_i32 = arith.constant 0 : i32
    %c0_i32_0 = arith.constant 0 : i32
    %c0_i32_1 = arith.constant 0 : i32
    return %c0_i32, %c0_i32_0 : i32, i32
  }
  func.func @transform_8(%arg0: i32) -> (i32, i32, i32) {
    %c0_i32 = arith.constant 0 : i32
    %c0_i32_0 = arith.constant 0 : i32
    %c0_i32_1 = arith.constant 0 : i32
    %c0_i32_2 = arith.constant 0 : i32
    return %c0_i32, %c0_i32_0, %c0_i32_1 : i32, i32, i32
  }
  func.func @transform_9(%arg0: i32) -> (i32, i32, i32) {
    %c0_i32 = arith.constant 0 : i32
    %c0_i32_0 = arith.constant 0 : i32
    %c0_i32_1 = arith.constant 0 : i32
    %c0_i32_2 = arith.constant 0 : i32
    return %c0_i32, %c0_i32_0, %c0_i32_1 : i32, i32, i32
  }
  func.func @transform_10(%arg0: i32) -> (i32, i32) {
    %c0_i32 = arith.constant 0 : i32
    %c0_i32_0 = arith.constant 0 : i32
    %c0_i32_1 = arith.constant 0 : i32
    return %c0_i32, %c0_i32_0 : i32, i32
  }
  func.func @transform_11(%arg0: i32) -> (i32, i32, i32) {
    %c0_i32 = arith.constant 0 : i32
    %c0_i32_0 = arith.constant 0 : i32
    %c0_i32_1 = arith.constant 0 : i32
    %c0_i32_2 = arith.constant 0 : i32
    return %c0_i32, %c0_i32_0, %c0_i32_1 : i32, i32, i32
  }
  func.func @transform_12(%arg0: i32) -> (i32, i32) {
    %c0_i32 = arith.constant 0 : i32
    %c0_i32_0 = arith.constant 0 : i32
    %c0_i32_1 = arith.constant 0 : i32
    return %c0_i32, %c0_i32_0 : i32, i32
  }
  func.func @transform_13(%arg0: i32) -> (i32, i32) {
    %c0_i32 = arith.constant 0 : i32
    %c0_i32_0 = arith.constant 0 : i32
    %c0_i32_1 = arith.constant 0 : i32
    return %c0_i32, %c0_i32_0 : i32, i32
  }
  func.func @transform_14(%arg0: i32) -> (i32, i32) {
    %c0_i32 = arith.constant 0 : i32
    %c0_i32_0 = arith.constant 0 : i32
    %c0_i32_1 = arith.constant 0 : i32
    return %c0_i32, %c0_i32_0 : i32, i32
  }
  func.func @transform_15(%arg0: i32) -> (i32, i32) {
    %c0_i32 = arith.constant 0 : i32
    %c0_i32_0 = arith.constant 0 : i32
    %c0_i32_1 = arith.constant 0 : i32
    return %c0_i32, %c0_i32_0 : i32, i32
  }
  func.func @transform_16(%arg0: i32) -> (i32, i32) {
    %c0_i32 = arith.constant 0 : i32
    %c0_i32_0 = arith.constant 0 : i32
    %c0_i32_1 = arith.constant 0 : i32
    return %c0_i32, %c0_i32_0 : i32, i32
  }
  func.func @transform_17(%arg0: i32) -> (i32, i32) {
    %c0_i32 = arith.constant 0 : i32
    %c0_i32_0 = arith.constant 0 : i32
    %c0_i32_1 = arith.constant 0 : i32
    return %c0_i32, %c0_i32_0 : i32, i32
  }
  func.func @transform_18(%arg0: i32) -> (i32, i32) {
    %c0_i32 = arith.constant 0 : i32
    %c0_i32_0 = arith.constant 0 : i32
    %c0_i32_1 = arith.constant 0 : i32
    return %c0_i32, %c0_i32_0 : i32, i32
  }
  func.func @transform_19(%arg0: i32) -> (i32, i32) {
    %c0_i32 = arith.constant 0 : i32
    %c0_i32_0 = arith.constant 0 : i32
    %c0_i32_1 = arith.constant 0 : i32
    return %c0_i32, %c0_i32_0 : i32, i32
  }
  func.func @transform_20(%arg0: i32) -> (i32, i32) {
    %c0_i32 = arith.constant 0 : i32
    %c0_i32_0 = arith.constant 0 : i32
    %c0_i32_1 = arith.constant 0 : i32
    return %c0_i32, %c0_i32_0 : i32, i32
  }
  func.func @transform_21(%arg0: i32) -> (i32, i32, i32) {
    %c0_i32 = arith.constant 0 : i32
    %c0_i32_0 = arith.constant 0 : i32
    %c0_i32_1 = arith.constant 0 : i32
    return %arg0, %c0_i32, %c0_i32_0 : i32, i32, i32
  }
}

</mosaic_0001>

<bundles_post_ra>
// kernel: tpu_custom_call.1
= control target key start
LH: loop header
LB: loop body
LE: loop exit
PB: predicated region body
PF: predicated region fallthrough
CT: control target
= control target key end

     0   :  { %s17106_s0 = inlined_call_operand.vmem [shape: f32[4,32,16], index: 0, kind: input, shape index: {}]   ;;  %s17107_s1 = inlined_call_operand.hbm [shape: f32[1,4,64], index: 1, kind: input, shape index: {}]   ;;  %s17108_s2 = inlined_call_operand.hbm [shape: bf16[16,64], index: 2, kind: input, shape index: {}]   ;;  %s17109_s3 = inlined_call_operand.hbm [shape: f32[1,64], index: 3, kind: input, shape index: {}]   ;;  %s17110_s4 = inlined_call_operand.vmem [shape: bf16[2,64,192], index: 4, kind: input, shape index: {}]   ;;  %s17111_s5 = inlined_call_operand.hbm [shape: f32[2,1,192], index: 5, kind: input, shape index: {}]   ;;  %s17112_s6 = inlined_call_operand.hbm [shape: bf16[2,64,64], index: 6, kind: input, shape index: {}]   ;;  %s17113_s7 = inlined_call_operand.vmem [shape: f32[2,64], index: 7, kind: input, shape index: {}]   ;;  %s17114_s8 = inlined_call_operand.hbm [shape: f32[2,4,64], index: 8, kind: input, shape index: {}]   ;;  %s17115_s9 = inlined_call_operand.hbm [shape: bf16[2,64,128], index: 9, kind: input, shape index: {}]   ;;  %s17116_s10 = inlined_call_operand.vmem [shape: f32[2,128], index: 10, kind: input, shape index: {}]   ;;  %s17117_s11 = inlined_call_operand.vmem [shape: bf16[2,128,64], index: 11, kind: input, shape index: {}]   ;;  %s17118_s12 = inlined_call_operand.vmem [shape: f32[2,64], index: 12, kind: input, shape index: {}]   ;;  %s17119_s13 = inlined_call_operand.vmem [shape: f32[32,1], index: 13, kind: input, shape index: {}]   ;;  %s17120_s14 = inlined_call_operand.<no memory space> [shape: f32[1,1], index: 14, kind: input, shape index: {}]   ;;  %s17121_s15 = inlined_call_operand.hbm [shape: f32[64,128], index: 15, kind: input, shape index: {}]   ;;  %s17122_s16 = inlined_call_operand.vmem [shape: f32[1,128], index: 16, kind: input, shape index: {}]   ;;  %s17123_s17 = inlined_call_operand.vmem [shape: f32[128,128], index: 17, kind: input, shape index: {}]   ;;  %s17124_s18 = inlined_call_operand.vmem [shape: f32[1,128], index: 18, kind: input, shape index: {}]   ;;  %s17125_s19 = inlined_call_operand.vmem [shape: f32[128,128], index: 19, kind: input, shape index: {}]   ;;  %s17126_s20 = inlined_call_operand.vmem [shape: f32[1,128], index: 20, kind: input, shape index: {}]   ;;  %s17127_s21 = inlined_call_operand.hbm [shape: f32[1,4,128], index: 21, kind: output, shape index: {}]  }
   0x1   :  { %17186 = sst [smem:[#allocation61_spill]] %s17106_s0  ;;  %v26_v0 = vstv %s17120_s14 }
   0x2   :  { %17187 = sst [smem:[#allocation62_spill]] %s17107_s1  ;;  %27 = vst [vmem:[#allocation2] sm:$0x1] %v26_v0 }
   0x3   :  { %17188 = sst [smem:[#allocation63_spill]] %s17108_s2 }
   0x4   :  { %17189 = sst [smem:[#allocation64_spill]] %s17109_s3 }
   0x5   :  { %17190 = sst [smem:[#allocation65_spill]] %s17110_s4 }
   0x6   :  { %17191 = sst [smem:[#allocation66_spill]] %s17111_s5 }
   0x7   :  { %17192 = sst [smem:[#allocation67_spill]] %s17127_s21 }
   0x8   :  { %28 = vsyncpa [#allocation4], 0 }
   0x9   :  { %29 = vsyncpa [#allocation7], 0 }
   0xa   :  { %30 = vsyncpa [#allocation10], 0 }
   0xb   :  { %31 = vsyncpa [#allocation13], 0 }
   0xc   :  { %32 = vsyncpa [#allocation16], 0 }
   0xd   :  { %33 = vsyncpa [#allocation5], 0  ;;  %s12620_s26 = smov [#allocation6]   ;;  %s17193_s29 = sld [smem:[#allocation63_spill]] }
   0xe   :  { %s51_s27 = sshll.u32 %s12620_s26, 4  ;;  %s52_s27 = int_to_ptr.vmem [resolvable:$true] %s51_s27 }
  0x13   :  { %s12410_s0 = scalar_lea.hbm %s17193_s29, 128 }
  0x14   :  { %p12411_p0 = scmp.ne.s32.totalorder %s17193_s29, %s12410_s0  ;;  %p12414_p1 = scmp.lt.u32.totalorder %s12410_s0, %s17193_s29 }
  0x16   :  { %p12416_p2 = pnand %p12414_p1, %p12411_p0 }
  0x18   :  { %12419 = shalt.err (!%p12416_p2)
}
  0x19   :  { %s12420_s22 = scalar_lea.vmem %s52_s27, 128  ;;  %p12425_p4 = scmp.lt.s32.totalorder %s52_s27, %s52_s27 }
  0x1a   :  { %p12421_p3 = scmp.ne.s32.totalorder %s52_s27, %s12420_s22  ;;  %p12426_p5 = scmp.lt.s32.totalorder %s12420_s22, %s12420_s22 }
  0x1c   :  { %p12427_p6 = por %p12426_p5, %p12425_p4 }
  0x1e   :  { %p12428_p7 = pnand %p12427_p6, %p12421_p3 }
  0x20   :  { %12431 = shalt.err (!%p12428_p7)
}
  0x21   :  { %s17135_s23 = smov 64   ;;  %s17137_s1 = smov 4  }
  0x22   :  { %57 = dma.hbm_to_vmem [thread:$0]  %s17193_s29, 128, %s52_s27, [#allocation7], %s17135_s23, %s17135_s23, %s17137_s1  }
  0x23   :  { %s12623_s25 = smov [#allocation9]   ;;  %s17194_s0 = sld [smem:[#allocation66_spill]] }
  0x24   :  { %s75_s26 = sshll.u32 %s12623_s25, 4  ;;  %s76_s26 = int_to_ptr.vmem [resolvable:$true] %s75_s26 }
  0x29   :  { %s12432_s4 = scalar_lea.hbm %s17194_s0, 64 }
  0x2a   :  { %p12433_p8 = scmp.ne.s32.totalorder %s17194_s0, %s12432_s4  ;;  %p12436_p9 = scmp.lt.u32.totalorder %s12432_s4, %s17194_s0 }
  0x2c   :  { %p12438_p10 = pnand %p12436_p9, %p12433_p8 }
  0x2e   :  { %12441 = shalt.err (!%p12438_p10)
}
  0x2f   :  { %s12442_s21 = scalar_lea.vmem %s76_s26, 64  ;;  %p12447_p12 = scmp.lt.s32.totalorder %s76_s26, %s76_s26 }
  0x30   :  { %p12443_p11 = scmp.ne.s32.totalorder %s76_s26, %s12442_s21  ;;  %p12448_p13 = scmp.lt.s32.totalorder %s12442_s21, %s12442_s21 }
  0x32   :  { %p12449_p0 = por %p12448_p13, %p12447_p12 }
  0x34   :  { %p12450_p1 = pnand %p12449_p0, %p12443_p11 }
  0x36   :  { %12453 = shalt.err (!%p12450_p1)
}
  0x37   :  { %s17139_s27 = smov 32   ;;  %s12625_s29 = smov 2  }
  0x38   :  { %81 = dma.hbm_to_vmem [thread:$0]  %s17194_s0, 64, %s76_s26, [#allocation10], %s17139_s27, %s17139_s27, %s12625_s29  }
  0x39   :  { %s12626_s25 = smov [#allocation12]   ;;  %s12627_s28 = smov [#allocation3]  }
  0x3a   :  { %s101_s3 = sshll.u32 %s12626_s25, 4  ;;  %s42_s4 = sshll.u32 %s12627_s28, 4  ;;  %s102_s3 = int_to_ptr.vmem [resolvable:$true] %s101_s3  ;;  %s43_s4 = int_to_ptr.vmem [resolvable:$true] %s42_s4 }
  0x3b   :  { %s12454_s21 = scalar_lea.hbm %s17114_s8, 128 }
  0x3c   :  { %p12455_p2 = scmp.ne.s32.totalorder %s17114_s8, %s12454_s21  ;;  %p12458_p3 = scmp.lt.u32.totalorder %s12454_s21, %s17114_s8 }
  0x3e   :  { %p12460_p4 = pnand %p12458_p3, %p12455_p2 }
  0x40   :  { %12463 = shalt.err (!%p12460_p4)
}
  0x41   :  { %s12464_s26 = scalar_lea.vmem %s102_s3, 128  ;;  %p12469_p6 = scmp.lt.s32.totalorder %s102_s3, %s102_s3 }
  0x42   :  { %p12465_p5 = scmp.ne.s32.totalorder %s102_s3, %s12464_s26  ;;  %p12470_p7 = scmp.lt.s32.totalorder %s12464_s26, %s12464_s26 }
  0x44   :  { %p12471_p8 = por %p12470_p7, %p12469_p6 }
  0x46   :  { %p12472_p9 = pnand %p12471_p8, %p12465_p5 }
  0x48   :  { %12475 = shalt.err (!%p12472_p9)
}
  0x49   :  { %s17195_s0 = smov 4   ;;  %s17196_s29 = smov 64  }
  0x4a   :  { %107 = dma.hbm_to_vmem [thread:$0]  %s17114_s8, 128, %s102_s3, [#allocation13], %s17196_s29, %s17196_s29, %s17195_s0  }
  0x4b   :  { %s17197_s23 = sld [smem:[#allocation62_spill]] }
  0x51   :  { %s12476_s1 = scalar_lea.hbm %s17197_s23, 64 }
  0x52   :  { %p12477_p10 = scmp.ne.s32.totalorder %s17197_s23, %s12476_s1  ;;  %p12480_p11 = scmp.lt.u32.totalorder %s12476_s1, %s17197_s23 }
  0x54   :  { %p12482_p12 = pnand %p12480_p11, %p12477_p10 }
  0x56   :  { %12485 = shalt.err (!%p12482_p12)
}
  0x57   :  { %s12486_s22 = scalar_lea.vmem %s43_s4, 64  ;;  %p12491_p0 = scmp.lt.s32.totalorder %s43_s4, %s43_s4 }
  0x58   :  { %p12487_p13 = scmp.ne.s32.totalorder %s43_s4, %s12486_s22  ;;  %p12492_p1 = scmp.lt.s32.totalorder %s12486_s22, %s12486_s22 }
  0x5a   :  { %p12493_p2 = por %p12492_p1, %p12491_p0 }
  0x5c   :  { %p12494_p3 = pnand %p12493_p2, %p12487_p13 }
  0x5e   :  { %12497 = shalt.err (!%p12494_p3)
}
  0x5f   :  { %45 = dma.hbm_to_vmem [thread:$0]  %s17197_s23, 64, %s43_s4, [#allocation4]  }
  0x60   :  { %s12628_s26 = smov [#allocation8]   ;;  %s12629_s2 = smov [#allocation11]  }
  0x61   :  { %s64_s24 = sshll.u32 %s12628_s26, 4  ;;  %s87_s25 = sshll.u32 %s12629_s2, 4  ;;  %s65_s24 = int_to_ptr.vmem [resolvable:$true] %s64_s24  ;;  %s12811_s25 = int_to_ptr.vmem [resolvable:$true] %s87_s25 }
  0x62   :  { %s17198_s30 = sld [smem:[#allocation64_spill]] }
  0x68   :  { %s12498_s5 = scalar_lea.hbm %s17198_s30, 16 }
  0x69   :  { %p12499_p4 = scmp.ne.s32.totalorder %s17198_s30, %s12498_s5  ;;  %p12502_p5 = scmp.lt.u32.totalorder %s12498_s5, %s17198_s30 }
  0x6b   :  { %p12504_p6 = pnand %p12502_p5, %p12499_p4 }
  0x6d   :  { %12507 = shalt.err (!%p12504_p6)
}
  0x6e   :  { %s12508_s4 = scalar_lea.vmem %s65_s24, 16  ;;  %s12512_s23 = scalar_lea.vmem %s65_s24, 32 }
  0x6f   :  { %p12509_p7 = scmp.ne.s32.totalorder %s65_s24, %s12508_s4  ;;  %p12513_p8 = scmp.lt.s32.totalorder %s65_s24, %s65_s24 }
  0x70   :  { %p12514_p9 = scmp.lt.s32.totalorder %s12512_s23, %s12508_s4 }
  0x72   :  { %p12515_p10 = por %p12514_p9, %p12513_p8 }
  0x74   :  { %p12516_p11 = pnand %p12515_p10, %p12509_p7 }
  0x76   :  { %12519 = shalt.err (!%p12516_p11)
}
  0x77   :  { %67 = dma.hbm_to_vmem [thread:$0]  %s17198_s30, 16, %s65_s24, [#allocation7]  }
  0x78   :  { %s12520_s28 = scalar_lea.hbm %s17112_s6, 1024 }
  0x79   :  { %p12521_p12 = scmp.ne.s32.totalorder %s17112_s6, %s12520_s28  ;;  %p12524_p13 = scmp.lt.u32.totalorder %s12520_s28, %s17112_s6 }
  0x7b   :  { %p12526_p0 = pnand %p12524_p13, %p12521_p12 }
  0x7d   :  { %12529 = shalt.err (!%p12526_p0)
}
  0x7e   :  { %s12530_s14 = scalar_lea.vmem %s12811_s25, 1024  ;;  %p12535_p2 = scmp.lt.s32.totalorder %s12811_s25, %s12811_s25 }
  0x7f   :  { %p12531_p1 = scmp.ne.s32.totalorder %s12811_s25, %s12530_s14  ;;  %p12536_p3 = scmp.lt.s32.totalorder %s12530_s14, %s12530_s14 }
  0x81   :  { %p12537_p4 = por %p12536_p3, %p12535_p2 }
  0x83   :  { %p12538_p5 = pnand %p12537_p4, %p12531_p1 }
  0x85   :  { %12541 = shalt.err (!%p12538_p5)
}
  0x86   :  { %93 = dma.hbm_to_vmem [thread:$0]  %s17112_s6, 1024, %s12811_s25, [#allocation10], %s17196_s29, %s17196_s29, %s17195_s0  }
  0x87   :  { %s12630_s22 = smov [#allocation14]   ;;  %s12631_s23 = smov [#allocation15]  }
  0x88   :  { %s113_s4 = sshll.u32 %s12630_s22, 4  ;;  %s135_s8 = sshll.u32 %s12631_s23, 4  ;;  %s114_s4 = int_to_ptr.vmem [resolvable:$true] %s113_s4  ;;  %s12845_s8 = int_to_ptr.vmem [resolvable:$true] %s135_s8 }
  0x89   :  { %s12542_s2 = scalar_lea.hbm %s17115_s9, 1024 }
  0x8a   :  { %p12543_p6 = scmp.ne.s32.totalorder %s17115_s9, %s12542_s2  ;;  %p12546_p7 = scmp.lt.u32.totalorder %s12542_s2, %s17115_s9 }
  0x8c   :  { %p12548_p8 = pnand %p12546_p7, %p12543_p6 }
  0x8e   :  { %12551 = shalt.err (!%p12548_p8)
}
  0x8f   :  { %s12552_s6 = scalar_lea.vmem %s114_s4, 1024  ;;  %p12557_p10 = scmp.lt.s32.totalorder %s114_s4, %s114_s4 }
  0x90   :  { %p12553_p9 = scmp.ne.s32.totalorder %s114_s4, %s12552_s6  ;;  %p12558_p11 = scmp.lt.s32.totalorder %s12552_s6, %s12552_s6 }
  0x92   :  { %p12559_p12 = por %p12558_p11, %p12557_p10 }
  0x94   :  { %p12560_p13 = pnand %p12559_p12, %p12553_p9 }
  0x96   :  { %12563 = shalt.err (!%p12560_p13)
}
  0x97   :  { %119 = dma.hbm_to_vmem [thread:$0]  %s17115_s9, 1024, %s114_s4, [#allocation13], %s17196_s29, %s17196_s29, %s17195_s0  }
  0x98   :  { %s12564_s30 = scalar_lea.hbm %s17121_s15, 1024 }
  0x99   :  { %p12565_p0 = scmp.ne.s32.totalorder %s17121_s15, %s12564_s30  ;;  %p12568_p1 = scmp.lt.u32.totalorder %s12564_s30, %s17121_s15 }
  0x9b   :  { %p12570_p2 = pnand %p12568_p1, %p12565_p0 }
  0x9d   :  { %12573 = shalt.err (!%p12570_p2)
}
  0x9e   :  { %s12574_s2 = scalar_lea.vmem %s12845_s8, 1024  ;;  %p12579_p4 = scmp.lt.s32.totalorder %s12845_s8, %s12845_s8 }
  0x9f   :  { %p12575_p3 = scmp.ne.s32.totalorder %s12845_s8, %s12574_s2  ;;  %p12580_p5 = scmp.lt.s32.totalorder %s12574_s2, %s12574_s2 }
  0xa1   :  { %p12581_p6 = por %p12580_p5, %p12579_p4 }
  0xa3   :  { %p12582_p7 = pnand %p12581_p6, %p12575_p3 }
  0xa5   :  { %12585 = shalt.err (!%p12582_p7)
}
  0xa6   :  { %s12632_s9 = smov 128   ;;  %s12633_s0 = smov 8  }
  0xa7   :  { %141 = dma.hbm_to_vmem [thread:$0]  %s17121_s15, 1024, %s12845_s8, [#allocation16], %s12632_s9, %s12632_s9, %s12633_s0  }
  0xa8   :  { %12608 = dma.done.wait [#allocation4], 64  }
  0xa9   :  { %12609 = vsyncadd [#allocation4], 4294967232 }
  0xaa   :  { %12610 = dma.done.wait [#allocation7], 144  }
  0xab   :  { %12611 = vsyncadd [#allocation7], 4294967152 }
  0xac   :  { %12612 = dma.done.wait [#allocation10], 1088  }
  0xad   :  { %12613 = vsyncadd [#allocation10], 4294966208 }
  0xae   :  { %12614 = dma.done.wait [#allocation13], 1152  }
  0xaf   :  { %12615 = vsyncadd [#allocation13], 4294966144 }
  0xb0   :  { %12616 = dma.done.wait [#allocation16], 1024  }
  0xb1   :  { %12617 = vsyncadd [#allocation16], 4294966272  ;;  %v11713_v1 = vld [vmem:[#allocation6] sm:$0xff]   ;;  %s17199_s5 = sld [smem:[#allocation61_spill]]  ;;  %vm216_vm0 = vcmask 130048   ;;  %s17200_s25 = sld [smem:[#allocation65_spill]]  ;;  %v367_v37 = vlaneseq }
  0xb2   :  { %10463 = vmatprep.subr.bf16.mxu0 %v11713_v1  ;;  %v17142_v34 = vmov 0   ;;  %v12635_v35 = vmov 1966171168   ;;  %v12965_v42 = vld [vmem:[#allocation8] ss:$0 sm:$0xff]  ;;  %vm484_vm1 = vcmask 523264  }
  0xb3   :  { %10464 = vmatpush3.bf16.msra.mxu0 %v11713_v1  ;;  %541 = vmatprep.mubr.bf16.mxu1 %v17142_v34  ;;  %v365_v36 = vunpack.c.l.s4 %v12635_v35  ;;  %v12962_v39 = vshrl.u32 %v367_v37, 7  ;;  %v9747_v41 = vld.sshfl [vmem:[#allocation3] sm:$0x33 pattern:$0x75316420]  ;;  %vm906_vm2 = vcmask 261120  }
  0xb4   :  { %11711 = vset.pattern.permute.xlu1 %v17142_v34  ;;  %11712 = vset.pattern.permute.xlu0 %v17142_v34  ;;  %v363_v62 = vcombine.high %v9747_v41, %v9747_v41  ;;  %s12636_s23 = smov 48   ;;  %s12637_s3 = smov 112   ;;  %vm3655_vm3 = vcmask 392192   ;;  %vm9710_vm4 = vcmask 1041409   ;;  %vm9712_vm5 = vcmask 1042434  }
  0xb5   :  { %v366_v38 = vunpack.c.0.s8 %v365_v36  ;;  %17201 = vst [vmem:[#allocation24_spill] sm:$0xff] %v12962_v39  ;;  %v12968_v45 = vsub.s32 0, %v12962_v39  ;;  %s17235_s26 = smov 32   ;;  %s12638_s2 = smov 96   ;;  %vm9714_vm6 = vcmask 1043459  }
  0xb6   :  { %s12639_s9 = smov 16   ;;  %s12640_s0 = smov 80  }
  0xb7   :  { %v177_v2 = vld [vmem:[%s17199_s5] sm:$0xff]  ;;  %v178_v3 = vld [vmem:[%s17199_s5 + $0x8] sm:$0xff]  ;;  %v179_v4 = vld [vmem:[%s17199_s5 + $0x10] sm:$0xff]  ;;  %v369_v40 = vsub.s32 %v366_v38, %v12962_v39  ;;  %17202 = vst [vmem:[#allocation25_spill] sm:$0xff] %v12968_v45 }
  0xb8   :  { %v193_v5 = vpack.c.bf16 %v178_v3, %v177_v2  ;;  %v180_v6 = vld [vmem:[%s17199_s5 + $0x18] sm:$0xff]  ;;  %v181_v7 = vld [vmem:[%s17199_s5 + $0x20] sm:$0xff]  ;;  %v182_v8 = vld [vmem:[%s17199_s5 + $0x28] sm:$0xff] }
  0xb9   :  { %v194_v9 = vpack.c.bf16 %v180_v6, %v179_v4  ;;  %v195_v10 = vpack.c.bf16 %v182_v8, %v181_v7  ;;  %v183_v11 = vld [vmem:[%s17199_s5 + $0x30] sm:$0xff]  ;;  %v184_v12 = vld [vmem:[%s17199_s5 + $0x38] sm:$0xff]  ;;  %v185_v13 = vld [vmem:[%s17199_s5 + $0x40] sm:$0xff]  ;;  %v370_v44 = vrot.slane %v9747_v41, %v369_v40  ;;  %v377_v3 = vrot.slane %v363_v62, %v369_v40 }
  0xba   :  { %10465 = vmatprep.mubr.msk.bf16.mxu0 %vm216_vm0, %v193_v5  ;;  %v186_v14 = vld [vmem:[%s17199_s5 + $0x48] sm:$0xff]  ;;  %v196_v17 = vpack.c.bf16 %v184_v12, %v183_v11  ;;  %v187_v19 = vld [vmem:[%s17199_s5 + $0x50] sm:$0xff]  ;;  %v188_v20 = vld [vmem:[%s17199_s5 + $0x58] sm:$0xff] }
  0xbb   :  { %10466 = vmatmul.mubr.msk.bf16.vlgmr.msra.gmra.mrb[0].mxu0 %vm216_vm0, %v194_v9  ;;  %v11714_v15 = vld [vmem:[%s17200_s25 + $0x4] ss:$8 sps:$4 sm:$0xff]   ;;  %v11716_v16 = vld [vmem:[%s17200_s25] ss:$8 sps:$4 sm:$0xff]   ;;  %v197_v18 = vpack.c.bf16 %v186_v14, %v185_v13  ;;  %v198_v23 = vpack.c.bf16 %v188_v20, %v187_v19  ;;  %v191_v25 = vld [vmem:[%s17199_s5 + $0x70] sm:$0xff]  ;;  %v383_v50 = vrot.slane %v370_v44, %v12968_v45 }
  0xbc   :  { %10469 = vmatprep.mubr.msk.bf16.mxu0 %vm216_vm0, %v195_v10  ;;  %509 = vmatprep.subr.bf16.mxu1 %v11714_v15  ;;  %v189_v21 = vld [vmem:[%s17199_s5 + $0x60] sm:$0xff]  ;;  %v190_v22 = vld [vmem:[%s17199_s5 + $0x68] sm:$0xff]  ;;  %v192_v26 = vld [vmem:[%s17199_s5 + $0x78] sm:$0xff]  ;;  %v387_v10 = vrot.slane %v377_v3, %v12968_v45 }
  0xbd   :  { %510 = vmatpush1.bf16.msra.mxu1 %v11716_v16  ;;  %v199_v24 = vpack.c.bf16 %v190_v22, %v189_v21  ;;  %v200_v27 = vpack.c.bf16 %v192_v26, %v191_v25  ;;  %v11717_v28 = vld [vmem:[%s17200_s25 + $0x14] ss:$8 sps:$4 sm:$0xff]   ;;  %v11719_v29 = vld [vmem:[%s17200_s25 + $0x10] ss:$8 sps:$4 sm:$0xff]   ;;  %v11720_v30 = vld [vmem:[%s17200_s25 + $0x24] ss:$8 sps:$4 sm:$0xff]   ;;  %v378_v26 = vcombine.high %v370_v44, %v370_v44 }
  0xbe   :  { %511 = vmatprep.subr.bf16.mxu1 %v11717_v28  ;;  %v11722_v31 = vld [vmem:[%s17200_s25 + $0x20] ss:$8 sps:$4 sm:$0xff]   ;;  %v11723_v32 = vld [vmem:[%s17200_s25 + $0x34] ss:$8 sps:$4 sm:$0xff]   ;;  %v11725_v33 = vld [vmem:[%s17200_s25 + $0x30] ss:$8 sps:$4 sm:$0xff]  }
  0xc1   :  { %512 = vmatpush1.bf16.msra.mxu1 %v11719_v29 }
  0xc2   :  { %513 = vmatprep.subr.bf16.mxu1 %v11720_v30 }
  0xc3   :  { %10470 = vmatmul.mubr.msk.bf16.gmra.mrb[4].mxu0 %vm216_vm0, %v196_v17 }
  0xc4   :  { %10473 = vmatprep.mubr.msk.bf16.mxu0 %vm216_vm0, %v197_v18 }
  0xc5   :  { %514 = vmatpush1.bf16.msra.mxu1 %v11722_v31 }
  0xc6   :  { %515 = vmatprep.subr.bf16.mxu1 %v11723_v32  ;;  %v391_v32 = vrot.slane %v378_v26, %v12968_v45 }
  0xc9   :  { %516 = vmatpush1.bf16.msra.mxu1 %v11725_v33 }
  0xcb   :  { %10474 = vmatmul.mubr.msk.bf16.gmra.mrb[8].mxu0 %vm216_vm0, %v198_v23 }
  0xcc   :  { %10477 = vmatprep.mubr.msk.bf16.mxu0 %vm216_vm0, %v199_v24 }
  0xd3   :  { %10478 = vmatmul.mubr.msk.bf16.gmra.mrb[12].mxu0 %vm216_vm0, %v200_v27 }
 0x18e   :  { %v10467_v43 = vpop.f32.mrb[0].mxu0 }
 0x18f   :  { %v275_v46 = vpop.f32.mrb[1].mxu0  ;;  %v284_v55 = vadd.f32 %v10467_v43, %v12965_v42 }
 0x190   :  { %v276_v47 = vadd.f32 %v12965_v42, %v275_v46  ;;  %v10468_v48 = vpop.f32.mrb[2].mxu0  ;;  %v379_v46 = vcombine.high %v377_v3, %v377_v3  ;;  %v432_v3 = vld [vmem:[#allocation9] sm:$0x3] }
 0x191   :  { %v278_v49 = vpop.f32.mrb[3].mxu0  ;;  %v287_v53 = vadd.f32 %v10468_v48, %v12965_v42  ;;  %v340_v1 = vmul.f32 8.0, %v284_v55 }
 0x192   :  { %v338_v51 = vmul.f32 8.0, %v276_v47  ;;  %v279_v52 = vadd.f32 %v12965_v42, %v278_v49 }
 0x193   :  { %v341_v60 = vmul.f32 8.0, %v287_v53  ;;  %v12987_v6 = vadd.f32 %v383_v50, %v340_v1 }
 0x194   :  { %v339_v54 = vmul.f32 8.0, %v279_v52  ;;  %v12975_v56 = vadd.f32 %v383_v50, %v338_v51  ;;  %v395_v51 = vrot.slane %v379_v46, %v12968_v45 }
 0x195   :  { %v12983_v2 = vadd.f32 %v383_v50, %v341_v60  ;;  %17206 = vst [vmem:[#allocation29_spill] sm:$0xff] %v12987_v6 }
 0x196   :  { %17203 = vst [vmem:[#allocation26_spill] sm:$0xff] %v12975_v56  ;;  %v12977_v57 = vadd.f32 %v383_v50, %v339_v54  ;;  %v10471_v58 = vpop.f32.mrb[4].mxu0 }
 0x197   :  { %v291_v59 = vpop.f32.mrb[5].mxu0  ;;  %17205 = vst [vmem:[#allocation28_spill] sm:$0xff] %v12983_v2  ;;  %v417_v9 = vpack.c.bf16 %v12983_v2, %v12987_v6  ;;  %v300_v15 = vadd.f32 %v10471_v58, %v12965_v42 }
 0x198   :  { %17204 = vst [vmem:[#allocation27_spill] sm:$0xff] %v12977_v57  ;;  %v416_v61 = vpack.c.bf16 %v12977_v57, %v12975_v56  ;;  %v10472_v63 = vpop.f32.mrb[6].mxu0  ;;  %v292_v4 = vadd.f32 %v12965_v42, %v291_v59 }
 0x199   :  { %v294_v0 = vpop.f32.mrb[7].mxu0  ;;  %v303_v17 = vadd.f32 %v10472_v63, %v12965_v42  ;;  %v344_v21 = vmul.f32 8.0, %v300_v15 }
 0x19a   :  { %9756 = vmatmul.mubr.msk.bf16.vlgmr.msra.gmra.mrb[0].mxu1 %vm484_vm1, %v416_v61  ;;  %v295_v5 = vadd.f32 %v12965_v42, %v294_v0  ;;  %v342_v11 = vmul.f32 8.0, %v292_v4  ;;  %v17141_v4 = vsub.s32 1, %v12962_v39 }
 0x19b   :  { %551 = vmatprep.mubr.bf16.mxu1 %v17142_v34  ;;  %v345_v22 = vmul.f32 8.0, %v303_v17  ;;  %v13004_v27 = vadd.f32 %v387_v10, %v344_v21 }
 0x19c   :  { %v343_v12 = vmul.f32 8.0, %v295_v5  ;;  %v12995_v16 = vadd.f32 %v387_v10, %v342_v11  ;;  %v13055_v5 = vrot.slane %v432_v3, %v12968_v45 }
 0x19d   :  { %17209 = vst [vmem:[#allocation32_spill] sm:$0xff] %v13004_v27  ;;  %v13006_v28 = vadd.f32 %v387_v10, %v345_v22 }
 0x19e   :  { %v10475_v7 = vpop.f32.mrb[8].mxu0  ;;  %17207 = vst [vmem:[#allocation30_spill] sm:$0xff] %v12995_v16  ;;  %v12998_v18 = vadd.f32 %v387_v10, %v343_v12 }
 0x19f   :  { %v307_v8 = vpop.f32.mrb[9].mxu0  ;;  %17210 = vst [vmem:[#allocation33_spill] sm:$0xff] %v13006_v28  ;;  %v419_v31 = vpack.c.bf16 %v13006_v28, %v13004_v27  ;;  %v316_v36 = vadd.f32 %v10475_v7, %v12965_v42 }
 0x1a0   :  { %v10476_v13 = vpop.f32.mrb[10].mxu0  ;;  %17208 = vst [vmem:[#allocation31_spill] sm:$0xff] %v12998_v18  ;;  %v418_v23 = vpack.c.bf16 %v12998_v18, %v12995_v16  ;;  %v308_v29 = vadd.f32 %v12965_v42, %v307_v8  ;;  %v13059_v8 = vrot.slane %v432_v3, %v17141_v4 }
 0x1a1   :  { %v310_v14 = vpop.f32.mrb[11].mxu0  ;;  %v319_v38 = vadd.f32 %v10476_v13, %v12965_v42  ;;  %v348_v41 = vmul.f32 8.0, %v316_v36 }
 0x1a2   :  { %9757 = vmatmul.mubr.msk.bf16.gmra.mrb[4].mxu1 %vm484_vm1, %v417_v9  ;;  %v311_v30 = vadd.f32 %v12965_v42, %v310_v14  ;;  %v346_v33 = vmul.f32 8.0, %v308_v29 }
 0x1a3   :  { %561 = vmatprep.mubr.bf16.mxu1 %v17142_v34  ;;  %v349_v43 = vmul.f32 8.0, %v319_v38  ;;  %v13027_v49 = vadd.f32 %v391_v32, %v348_v41 }
 0x1a4   :  { %v347_v35 = vmul.f32 8.0, %v311_v30  ;;  %v13016_v37 = vadd.f32 %v391_v32, %v346_v33 }
 0x1a5   :  { %17213 = vst [vmem:[#allocation36_spill] sm:$0xff] %v13027_v49  ;;  %v13029_v50 = vadd.f32 %v391_v32, %v349_v43 }
 0x1a6   :  { %v10479_v19 = vpop.f32.mrb[12].mxu0  ;;  %17211 = vst [vmem:[#allocation34_spill] sm:$0xff] %v13016_v37  ;;  %v13019_v40 = vadd.f32 %v391_v32, %v347_v35 }
 0x1a7   :  { %v323_v20 = vpop.f32.mrb[13].mxu0  ;;  %17214 = vst [vmem:[#allocation37_spill] sm:$0xff] %v13029_v50  ;;  %v421_v54 = vpack.c.bf16 %v13029_v50, %v13027_v49  ;;  %v332_v55 = vadd.f32 %v10479_v19, %v12965_v42 }
 0x1a8   :  { %v10480_v24 = vpop.f32.mrb[14].mxu0  ;;  %17212 = vst [vmem:[#allocation35_spill] sm:$0xff] %v13019_v40  ;;  %v420_v44 = vpack.c.bf16 %v13019_v40, %v13016_v37  ;;  %v324_v47 = vadd.f32 %v12965_v42, %v323_v20 }
 0x1a9   :  { %v326_v25 = vpop.f32.mrb[15].mxu0  ;;  %v335_v59 = vadd.f32 %v10480_v24, %v12965_v42  ;;  %v352_v61 = vmul.f32 8.0, %v332_v55 }
 0x1aa   :  { %9758 = vmatmul.mubr.msk.bf16.gmra.mrb[8].mxu1 %vm484_vm1, %v418_v23  ;;  %v327_v48 = vadd.f32 %v12965_v42, %v326_v25  ;;  %v350_v52 = vmul.f32 8.0, %v324_v47 }
 0x1ab   :  { %571 = vmatprep.mubr.bf16.mxu1 %v17142_v34  ;;  %v353_v62 = vmul.f32 8.0, %v335_v59  ;;  %v13044_v0 = vadd.f32 %v395_v51, %v352_v61 }
 0x1ac   :  { %v351_v53 = vmul.f32 8.0, %v327_v48  ;;  %v13035_v58 = vadd.f32 %v395_v51, %v350_v52 }
 0x1ad   :  { %17217 = vst [vmem:[#allocation40_spill] sm:$0xff] %v13044_v0  ;;  %v13046_v1 = vadd.f32 %v395_v51, %v353_v62 }
 0x1ae   :  { %17215 = vst [vmem:[#allocation38_spill] sm:$0xff] %v13035_v58  ;;  %v13038_v60 = vadd.f32 %v395_v51, %v351_v53 }
 0x1af   :  { %17218 = vst [vmem:[#allocation41_spill] sm:$0xff] %v13046_v1  ;;  %v423_v42 = vpack.c.bf16 %v13046_v1, %v13044_v0 }
 0x1b0   :  { %17216 = vst [vmem:[#allocation39_spill] sm:$0xff] %v13038_v60  ;;  %v422_v63 = vpack.c.bf16 %v13038_v60, %v13035_v58 }
 0x1b2   :  { %9759 = vmatmul.mubr.msk.bf16.gmra.mrb[12].mxu1 %vm484_vm1, %v419_v31 }
 0x1b3   :  { %581 = vmatprep.mubr.bf16.mxu1 %v17142_v34 }
 0x1ba   :  { %9760 = vmatmul.mubr.msk.bf16.gmra.mrb[16].mxu1 %vm484_vm1, %v420_v44 }
 0x1bb   :  { %591 = vmatprep.mubr.bf16.mxu1 %v17142_v34 }
 0x1c2   :  { %9761 = vmatmul.mubr.msk.bf16.gmra.mrb[20].mxu1 %vm484_vm1, %v421_v54 }
 0x1c3   :  { %601 = vmatprep.mubr.bf16.mxu1 %v17142_v34 }
 0x1ca   :  { %9762 = vmatmul.mubr.msk.bf16.gmra.mrb[24].mxu1 %vm484_vm1, %v422_v63 }
 0x1cb   :  { %611 = vmatprep.mubr.bf16.mxu1 %v17142_v34 }
 0x1d2   :  { %9763 = vmatmul.mubr.msk.bf16.gmra.mrb[28].mxu1 %vm484_vm1, %v423_v42 }
 0x26d   :  { %v543_v7 = vpop.f32.mrb[0].mxu1 }
 0x26e   :  { %v544_v9 = vadd.f32 %v543_v7, %v13055_v5  ;;  %v545_v10 = vpop.f32.mrb[1].mxu1 }
 0x26f   :  { %v547_v11 = vpop.f32.mrb[2].mxu1  ;;  %v546_v14 = vadd.f32 %v545_v10, %v13059_v8 }
 0x270   :  { %v548_v12 = vadd.f32 %v547_v11, %v13055_v5  ;;  %v549_v13 = vpop.f32.mrb[3].mxu1 }
 0x271   :  { %v550_v15 = vadd.f32 %v549_v13, %v13059_v8 }
 0x272   :  { %v13065_v17 = vpack.c.bf16 %v548_v12, %v544_v9 }
 0x273   :  { %v13067_v19 = vpack.c.bf16 %v550_v15, %v546_v14 }
 0x274   :  { %640 = vrot.lane.b32.xlu0 %v13065_v17, %s17196_s29  ;;  %10485 = vmatprep.mubr.msk.bf16.mxu0 %vm216_vm0, %v13065_v17 }
 0x275   :  { %v553_v20 = vpop.f32.mrb[4].mxu1 }
 0x276   :  { %v554_v21 = vadd.f32 %v553_v20, %v13055_v5  ;;  %v555_v22 = vpop.f32.mrb[5].mxu1 }
 0x277   :  { %v557_v23 = vpop.f32.mrb[6].mxu1  ;;  %v556_v26 = vadd.f32 %v555_v22, %v13059_v8 }
 0x278   :  { %v558_v24 = vadd.f32 %v557_v23, %v13055_v5  ;;  %v559_v25 = vpop.f32.mrb[7].mxu1 }
 0x279   :  { %v560_v29 = vadd.f32 %v559_v25, %v13059_v8 }
 0x27a   :  { %v13077_v30 = vpack.c.bf16 %v558_v24, %v554_v21 }
 0x27b   :  { %v13079_v31 = vpack.c.bf16 %v560_v29, %v556_v26 }
 0x27c   :  { %642 = vrot.lane.b32.xlu0 %v13077_v30, %s17196_s29 }
 0x27d   :  { %v563_v32 = vpop.f32.mrb[8].mxu1 }
 0x27e   :  { %v564_v33 = vadd.f32 %v563_v32, %v13055_v5  ;;  %v565_v35 = vpop.f32.mrb[9].mxu1 }
 0x27f   :  { %v567_v36 = vpop.f32.mrb[10].mxu1  ;;  %v566_v43 = vadd.f32 %v565_v35, %v13059_v8 }
 0x280   :  { %v568_v38 = vadd.f32 %v567_v36, %v13055_v5  ;;  %v569_v41 = vpop.f32.mrb[11].mxu1 }
 0x281   :  { %v570_v44 = vadd.f32 %v569_v41, %v13059_v8 }
 0x282   :  { %v13087_v46 = vpack.c.bf16 %v568_v38, %v564_v33 }
 0x283   :  { %v13089_v47 = vpack.c.bf16 %v570_v44, %v566_v43 }
 0x284   :  { %707 = vrot.lane.b32.xlu1 %v13087_v46, %s17196_s29 }
 0x285   :  { %v573_v48 = vpop.f32.mrb[12].mxu1 }
 0x286   :  { %v574_v51 = vadd.f32 %v573_v48, %v13055_v5  ;;  %v575_v52 = vpop.f32.mrb[13].mxu1 }
 0x287   :  { %v576_v53 = vadd.f32 %v575_v52, %v13059_v8  ;;  %v577_v54 = vpop.f32.mrb[14].mxu1 }
 0x288   :  { %v578_v55 = vadd.f32 %v577_v54, %v13055_v5  ;;  %v579_v59 = vpop.f32.mrb[15].mxu1 }
 0x289   :  { %v580_v61 = vadd.f32 %v579_v59, %v13059_v8 }
 0x28a   :  { %v13097_v62 = vpack.c.bf16 %v578_v55, %v574_v51 }
 0x28b   :  { %v13099_v63 = vpack.c.bf16 %v580_v61, %v576_v53 }
 0x28c   :  { %709 = vrot.lane.b32.xlu1 %v13097_v62, %s17196_s29 }
 0x28d   :  { %v583_v42 = vpop.f32.mrb[16].mxu1 }
 0x28e   :  { %v584_v3 = vadd.f32 %v583_v42, %v13055_v5  ;;  %v585_v7 = vpop.f32.mrb[17].mxu1 }
 0x28f   :  { %v587_v9 = vpop.f32.mrb[18].mxu1  ;;  %v586_v12 = vadd.f32 %v585_v7, %v13059_v8 }
 0x290   :  { %v588_v10 = vadd.f32 %v587_v9, %v13055_v5  ;;  %v589_v11 = vpop.f32.mrb[19].mxu1 }
 0x291   :  { %v590_v13 = vadd.f32 %v589_v11, %v13059_v8 }
 0x292   :  { %v13107_v14 = vpack.c.bf16 %v588_v10, %v584_v3 }
 0x293   :  { %v13109_v15 = vpack.c.bf16 %v590_v13, %v586_v12 }
 0x294   :  { %774 = vrot.lane.b32.xlu0 %v13107_v14, %s17196_s29 }
 0x295   :  { %v593_v20 = vpop.f32.mrb[20].mxu1 }
 0x296   :  { %v594_v21 = vadd.f32 %v593_v20, %v13055_v5  ;;  %v595_v22 = vpop.f32.mrb[21].mxu1 }
 0x297   :  { %v597_v23 = vpop.f32.mrb[22].mxu1  ;;  %v596_v26 = vadd.f32 %v595_v22, %v13059_v8 }
 0x298   :  { %v598_v24 = vadd.f32 %v597_v23, %v13055_v5  ;;  %v599_v25 = vpop.f32.mrb[23].mxu1 }
 0x299   :  { %v600_v29 = vadd.f32 %v599_v25, %v13059_v8 }
 0x29a   :  { %v13117_v32 = vpack.c.bf16 %v598_v24, %v594_v21 }
 0x29b   :  { %v13119_v33 = vpack.c.bf16 %v600_v29, %v596_v26 }
 0x29c   :  { %776 = vrot.lane.b32.xlu1 %v13117_v32, %s17196_s29 }
 0x29d   :  { %v603_v35 = vpop.f32.mrb[24].mxu1 }
 0x29e   :  { %v604_v36 = vadd.f32 %v603_v35, %v13055_v5  ;;  %v605_v38 = vpop.f32.mrb[25].mxu1 }
 0x29f   :  { %v606_v41 = vadd.f32 %v605_v38, %v13059_v8  ;;  %v607_v43 = vpop.f32.mrb[26].mxu1 }
 0x2a0   :  { %v608_v44 = vadd.f32 %v607_v43, %v13055_v5  ;;  %v609_v48 = vpop.f32.mrb[27].mxu1 }
 0x2a1   :  { %v610_v51 = vadd.f32 %v609_v48, %v13059_v8 }
 0x2a2   :  { %v13127_v52 = vpack.c.bf16 %v608_v44, %v604_v36 }
 0x2a3   :  { %v13129_v53 = vpack.c.bf16 %v610_v51, %v606_v41 }
 0x2a4   :  { %841 = vrot.lane.b32.xlu0 %v13127_v52, %s17196_s29  ;;  %10509 = vmatprep.mubr.msk.bf16.mxu1 %vm216_vm0, %v13127_v52 }
 0x2a5   :  { %v613_v54 = vpop.f32.mrb[28].mxu1 }
 0x2a6   :  { %v614_v55 = vadd.f32 %v613_v54, %v13055_v5  ;;  %v615_v59 = vpop.f32.mrb[29].mxu1 }
 0x2a7   :  { %v616_v61 = vadd.f32 %v615_v59, %v13059_v8  ;;  %v617_v42 = vpop.f32.mrb[30].mxu1 }
 0x2a8   :  { %v618_v3 = vadd.f32 %v617_v42, %v13055_v5  ;;  %v619_v7 = vpop.f32.mrb[31].mxu1 }
 0x2a9   :  { %v620_v9 = vadd.f32 %v619_v7, %v13059_v8 }
 0x2aa   :  { %v13139_v10 = vpack.c.bf16 %v618_v3, %v614_v55 }
 0x2ab   :  { %v13141_v11 = vpack.c.bf16 %v620_v9, %v616_v61 }
 0x2ac   :  { %843 = vrot.lane.b32.xlu1 %v13139_v10, %s17196_s29 }
 0x2e6   :  { %v641_v12 = vpop.permute.xlu0 %640 }
 0x2e7   :  { %11385 = vmatprep.subr.msk.bf16.mxu0 %vm216_vm0, %v641_v12  ;;  %v651_v13 = vsel %vm216_vm0, %v641_v12, 0 }
 0x2e8   :  { %10482 = vmatpush3.bf16.xpose.msra.mxu0 %v651_v13 }
 0x2ee   :  { %v643_v20 = vpop.permute.xlu0 %642 }
 0x2ef   :  { %11386 = vmatprep.subr.msk.bf16.mxu0 %vm216_vm0, %v643_v20  ;;  %v654_v5 = vsel %vm216_vm0, %v643_v20, 0 }
 0x2f0   :  { %10484 = vmatpush3.bf16.xpose.msra.mxu0 %v654_v5 }
 0x2f6   :  { %v708_v8 = vpop.permute.xlu1 %707 }
 0x2f7   :  { %10486 = vmatmul.mubr.msk.bf16.vlgmr.msra.gmra.mrb[16].mxu0 %vm216_vm0, %v13077_v30  ;;  %11387 = vmatprep.subr.msk.bf16.mxu0 %vm216_vm0, %v708_v8  ;;  %v718_v21 = vsel %vm216_vm0, %v708_v8, 0 }
 0x2f8   :  { %10490 = vmatpush3.bf16.xpose.msra.mxu0 %v718_v21  ;;  %10493 = vmatprep.mubr.msk.bf16.mxu0 %vm216_vm0, %v13087_v46 }
 0x2fe   :  { %v710_v22 = vpop.permute.xlu1 %709 }
 0x2ff   :  { %11388 = vmatprep.subr.msk.bf16.mxu0 %vm216_vm0, %v710_v22  ;;  %v721_v23 = vsel %vm216_vm0, %v710_v22, 0 }
 0x300   :  { %10492 = vmatpush3.bf16.xpose.msra.mxu0 %v721_v23 }
 0x306   :  { %v775_v24 = vpop.permute.xlu0 %774 }
 0x307   :  { %10494 = vmatmul.mubr.msk.bf16.vlgmr.msra.gmra.mrb[20].mxu0 %vm216_vm0, %v13097_v62  ;;  %11389 = vmatprep.subr.msk.bf16.mxu0 %vm216_vm0, %v775_v24  ;;  %v785_v25 = vsel %vm216_vm0, %v775_v24, 0 }
 0x308   :  { %10498 = vmatpush3.bf16.xpose.msra.mxu0 %v785_v25  ;;  %10501 = vmatprep.mubr.msk.bf16.mxu0 %vm216_vm0, %v13107_v14 }
 0x30e   :  { %v777_v26 = vpop.permute.xlu1 %776 }
 0x30f   :  { %11390 = vmatprep.subr.msk.bf16.mxu0 %vm216_vm0, %v777_v26  ;;  %v788_v29 = vsel %vm216_vm0, %v777_v26, 0 }
 0x310   :  { %10500 = vmatpush3.bf16.xpose.msra.mxu0 %v788_v29 }
 0x311   :  { %10513 = vmatprep.subr.bf16.mxu0 %v13067_v19 }
 0x316   :  { %v842_v35 = vpop.permute.xlu0 %841 }
 0x317   :  { %10502 = vmatmul.mubr.msk.bf16.vlgmr.msra.gmra.mrb[24].mxu0 %vm216_vm0, %v13117_v32  ;;  %11391 = vmatprep.subr.msk.bf16.mxu1 %vm216_vm0, %v842_v35  ;;  %v852_v36 = vsel %vm216_vm0, %v842_v35, 0 }
 0x318   :  { %10506 = vmatpush3.bf16.xpose.msra.mxu1 %v852_v36  ;;  %10514 = vmatpush3.bf16.msra.mxu0 %v13067_v19 }
 0x319   :  { %10515 = vmatprep.subr.bf16.mxu0 %v13079_v31 }
 0x31c   :  { %10516 = vmatpush3.bf16.msra.mxu0 %v13079_v31 }
 0x31d   :  { %10521 = vmatprep.subr.bf16.mxu0 %v13089_v47 }
 0x31e   :  { %v844_v38 = vpop.permute.xlu1 %843 }
 0x31f   :  { %11392 = vmatprep.subr.msk.bf16.mxu1 %vm216_vm0, %v844_v38  ;;  %v855_v41 = vsel %vm216_vm0, %v844_v38, 0 }
 0x320   :  { %10508 = vmatpush3.bf16.xpose.msra.mxu1 %v855_v41 }
 0x321   :  { %10529 = vmatprep.subr.bf16.mxu1 %v13109_v15 }
 0x327   :  { %10510 = vmatmul.mubr.msk.bf16.vlgmr.msra.gmra.mrb[32].mxu1 %vm216_vm0, %v13139_v10 }
 0x328   :  { %10530 = vmatpush3.bf16.msra.mxu1 %v13109_v15 }
 0x329   :  { %10531 = vmatprep.subr.bf16.mxu1 %v13119_v33 }
 0x32c   :  { %10532 = vmatpush3.bf16.msra.mxu1 %v13119_v33 }
 0x3ca   :  { %v10487_v43 = vpop.f32.mrb[16].mxu0 }
 0x3cb   :  { %v690_v44 = vpop.f32.mrb[17].mxu0  ;;  %v913_v48 = vsel %vm906_vm2, %v10487_v43, -inf }
 0x3cc   :  { %914 = vmax.xlane.f32.xlu0 %v913_v48  ;;  %v10488_v51 = vpop.f32.mrb[18].mxu0  ;;  %v907_v59 = vsel %vm906_vm2, %v690_v44, -inf }
 0x3cd   :  { %v693_v54 = vpop.f32.mrb[19].mxu0  ;;  %v916_v61 = vsel %vm906_vm2, %v10488_v51, -inf }
 0x3ce   :  { %v910_v55 = vsel %vm906_vm2, %v693_v54, -inf }
 0x3cf   :  { %911 = vmax.xlane.f32.xlu1 %v910_v55 }
 0x3d0   :  { %908 = vmax.xlane.f32.xlu0 %v907_v59 }
 0x3d4   :  { %917 = vmax.xlane.f32.xlu0 %v916_v61 }
 0x3da   :  { %v10495_v42 = vpop.f32.mrb[20].mxu0 }
 0x3db   :  { %v13186_v3 = vpop.f32.mrb[21].mxu0  ;;  %v925_v7 = vsel %vm906_vm2, %v10495_v42, -inf }
 0x3dc   :  { %926 = vmax.xlane.f32.xlu1 %v925_v7  ;;  %v13189_v9 = vpop.f32.mrb[22].mxu0  ;;  %v919_v20 = vsel %vm906_vm2, %v13186_v3, -inf }
 0x3dd   :  { %v13191_v12 = vpop.f32.mrb[23].mxu0  ;;  %v928_v29 = vsel %vm906_vm2, %v13189_v9, -inf }
 0x3de   :  { %v922_v13 = vsel %vm906_vm2, %v13191_v12, -inf }
 0x3df   :  { %923 = vmax.xlane.f32.xlu0 %v922_v13 }
 0x3e0   :  { %920 = vmax.xlane.f32.xlu1 %v919_v20 }
 0x3ea   :  { %v13197_v5 = vpop.f32.mrb[24].mxu0 }
 0x3eb   :  { %v13199_v8 = vpop.f32.mrb[25].mxu0  ;;  %v937_v21 = vsel %vm906_vm2, %v13197_v5, -inf }
 0x3ec   :  { %938 = vmax.xlane.f32.xlu1 %v937_v21  ;;  %v13203_v22 = vpop.f32.mrb[26].mxu0  ;;  %v931_v25 = vsel %vm906_vm2, %v13199_v8, -inf }
 0x3ed   :  { %v13205_v23 = vpop.f32.mrb[27].mxu0  ;;  %v940_v24 = vsel %vm906_vm2, %v13203_v22, -inf }
 0x3ee   :  { %941 = vmax.xlane.f32.xlu0 %v940_v24  ;;  %v934_v26 = vsel %vm906_vm2, %v13205_v23, -inf }
 0x3f0   :  { %932 = vmax.xlane.f32.xlu1 %v931_v25 }
 0x3f2   :  { %935 = vmax.xlane.f32.xlu0 %v934_v26 }
 0x3f6   :  { %929 = vmax.xlane.f32.xlu0 %v928_v29 }
 0x3fa   :  { %v13215_v35 = vpop.f32.mrb[32].mxu1 }
 0x3fb   :  { %v13217_v36 = vpop.f32.mrb[33].mxu1  ;;  %v949_v38 = vsel %vm906_vm2, %v13215_v35, -inf }
 0x3fc   :  { %v13221_v41 = vpop.f32.mrb[34].mxu1  ;;  %950 = vmax.xlane.f32.xlu1 %v949_v38  ;;  %v943_v59 = vsel %vm906_vm2, %v13217_v36, -inf }
 0x3fd   :  { %v13223_v48 = vpop.f32.mrb[35].mxu1  ;;  %v952_v61 = vsel %vm906_vm2, %v13221_v41, -inf }
 0x3fe   :  { %v946_v55 = vsel %vm906_vm2, %v13223_v48, -inf }
 0x3ff   :  { %947 = vmax.xlane.f32.xlu0 %v946_v55 }
 0x400   :  { %944 = vmax.xlane.f32.xlu1 %v943_v59 }
 0x403   :  { %953 = vmax.xlane.f32.xlu0 %v952_v61 }
 0x411   :  { %1315 = vrot.lane.b32.xlu1 %v13065_v17, %s12636_s23 }
 0x459   :  { %v915_v7 = vpop.xlane.xlu0 %914 }
 0x45a   :  { %v957_v13 = vsub.f32 %v10487_v43, %v915_v7 }
 0x45c   :  { %v975_v20 = vmul.f32 1.442695, %v957_v13  ;;  %v912_v21 = vpop.xlane.xlu1 %911 }
 0x45d   :  { %v909_v24 = vpop.xlane.xlu0 %908  ;;  %v956_v26 = vsub.f32 %v693_v54, %v912_v21 }
 0x45e   :  { %11770 = vpow2.f32 %v975_v20  ;;  %v955_v25 = vsub.f32 %v690_v44, %v909_v24 }
 0x45f   :  { %v973_v59 = vmul.f32 1.442695, %v956_v26 }
 0x460   :  { %v971_v29 = vmul.f32 1.442695, %v955_v25 }
 0x461   :  { %v918_v38 = vpop.xlane.xlu0 %917 }
 0x462   :  { %11772 = vpow2.f32 %v971_v29  ;;  %v958_v55 = vsub.f32 %v10488_v51, %v918_v38 }
 0x464   :  { %v977_v4 = vmul.f32 1.442695, %v958_v55 }
 0x466   :  { %11774 = vpow2.f32 %v977_v4 }
 0x467   :  { %11776 = vpow2.f32 %v973_v59 }
 0x468   :  { %v13233_v61 = vpop.eup %11770 }
 0x469   :  { %v927_v34 = vpop.xlane.xlu1 %926  ;;  %v1009_v43 = vsel %vm906_vm2, %v13233_v61, 0.0 }
 0x46a   :  { %v961_v7 = vsub.f32 %v10495_v42, %v927_v34  ;;  %1010 = vadd.xlane.f32.xlu1 %v1009_v43 }
 0x46c   :  { %v13237_v13 = vpop.eup %11772  ;;  %v983_v44 = vmul.f32 1.442695, %v961_v7  ;;  %v924_v42 = vpop.xlane.xlu0 %923 }
 0x46d   :  { %v921_v54 = vpop.xlane.xlu1 %920  ;;  %v1003_v20 = vsel %vm906_vm2, %v13237_v13, 0.0 }
 0x46e   :  { %11778 = vpow2.f32 %v983_v44  ;;  %v959_v51 = vsub.f32 %v13186_v3, %v921_v54  ;;  %1004 = vadd.xlane.f32.xlu1 %v1003_v20 }
 0x470   :  { %v13242_v4 = vpop.eup %11774  ;;  %v979_v21 = vmul.f32 1.442695, %v959_v51 }
 0x471   :  { %v1012_v24 = vsel %vm906_vm2, %v13242_v4, 0.0  ;;  %v13246_v25 = vpop.eup %11776 }
 0x472   :  { %11780 = vpow2.f32 %v979_v21  ;;  %1013 = vadd.xlane.f32.xlu0 %v1012_v24  ;;  %v1006_v34 = vsel %vm906_vm2, %v13246_v25, 0.0  ;;  %v960_v21 = vsub.f32 %v13191_v12, %v924_v42 }
 0x476   :  { %1007 = vadd.xlane.f32.xlu0 %v1006_v34  ;;  %v981_v34 = vmul.f32 1.442695, %v960_v21 }
 0x478   :  { %v13250_v26 = vpop.eup %11778 }
 0x479   :  { %v939_v29 = vpop.xlane.xlu1 %938  ;;  %v1021_v3 = vsel %vm906_vm2, %v13250_v26, 0.0 }
 0x47a   :  { %v965_v38 = vsub.f32 %v13197_v5, %v939_v29  ;;  %1022 = vadd.xlane.f32.xlu1 %v1021_v3 }
 0x47b   :  { %v942_v55 = vpop.xlane.xlu0 %941 }
 0x47c   :  { %v13255_v59 = vpop.eup %11780  ;;  %v991_v43 = vmul.f32 1.442695, %v965_v38  ;;  %v966_v29 = vsub.f32 %v13203_v22, %v942_v55 }
 0x47d   :  { %v933_v7 = vpop.xlane.xlu1 %932  ;;  %v1015_v44 = vsel %vm906_vm2, %v13255_v59, 0.0 }
 0x47e   :  { %11782 = vpow2.f32 %v991_v43  ;;  %v963_v54 = vsub.f32 %v13199_v8, %v933_v7  ;;  %1016 = vadd.xlane.f32.xlu1 %v1015_v44  ;;  %v993_v43 = vmul.f32 1.442695, %v966_v29 }
 0x47f   :  { %v936_v20 = vpop.xlane.xlu0 %935 }
 0x480   :  { %v987_v51 = vmul.f32 1.442695, %v963_v54  ;;  %v964_v7 = vsub.f32 %v13205_v23, %v936_v20 }
 0x482   :  { %11784 = vpow2.f32 %v987_v51  ;;  %v989_v22 = vmul.f32 1.442695, %v964_v7 }
 0x483   :  { %v930_v24 = vpop.xlane.xlu0 %929 }
 0x484   :  { %v962_v5 = vsub.f32 %v13189_v9, %v930_v24 }
 0x486   :  { %v985_v3 = vmul.f32 1.442695, %v962_v5 }
 0x488   :  { %v13263_v38 = vpop.eup %11782  ;;  %11786 = vpow2.f32 %v985_v3 }
 0x489   :  { %v951_v39 = vpop.xlane.xlu1 %950  ;;  %v1033_v8 = vsel %vm906_vm2, %v13263_v38, 0.0  ;;  %11788 = vpow2.f32 %v981_v34 }
 0x48a   :  { %1034 = vadd.xlane.f32.xlu1 %v1033_v8  ;;  %11790 = vpow2.f32 %v993_v43  ;;  %v969_v34 = vsub.f32 %v13215_v35, %v951_v39 }
 0x48b   :  { %11792 = vpow2.f32 %v989_v22 }
 0x48c   :  { %v13268_v12 = vpop.eup %11784  ;;  %v999_v29 = vmul.f32 1.442695, %v969_v34  ;;  %v948_v8 = vpop.xlane.xlu0 %947 }
 0x48d   :  { %v945_v42 = vpop.xlane.xlu1 %944  ;;  %v1027_v9 = vsel %vm906_vm2, %v13268_v12, 0.0 }
 0x48e   :  { %1028 = vadd.xlane.f32.xlu1 %v1027_v9  ;;  %v967_v3 = vsub.f32 %v13217_v36, %v945_v42  ;;  %11794 = vpow2.f32 %v999_v29 }
 0x490   :  { %v995_v43 = vmul.f32 1.442695, %v967_v3  ;;  %v954_v7 = vpop.xlane.xlu0 %953 }
 0x491   :  { %v13272_v55 = vpop.permute.xlu1 %1315  ;;  %v970_v9 = vsub.f32 %v13221_v41, %v954_v7 }
 0x492   :  { %v13274_v44 = vpop.eup %11786  ;;  %11393 = vmatprep.subr.msk.bf16.mxu1 %vm216_vm0, %v13272_v55  ;;  %11796 = vpow2.f32 %v995_v43 }
 0x493   :  { %v1024_v23 = vsel %vm906_vm2, %v13274_v44, 0.0  ;;  %v13280_v54 = vpop.eup %11788 }
 0x494   :  { %1025 = vadd.xlane.f32.xlu0 %v1024_v23  ;;  %v1018_v20 = vsel %vm906_vm2, %v13280_v54, 0.0  ;;  %v13284_v51 = vpop.eup %11790  ;;  %v968_v23 = vsub.f32 %v13223_v48, %v948_v8 }
 0x495   :  { %v1036_v21 = vsel %vm906_vm2, %v13284_v51, 0.0  ;;  %v13288_v24 = vpop.eup %11792 }
 0x496   :  { %v1030_v5 = vsel %vm906_vm2, %v13288_v24, 0.0  ;;  %v997_v36 = vmul.f32 1.442695, %v968_v23 }
 0x498   :  { %1019 = vadd.xlane.f32.xlu0 %v1018_v20  ;;  %v13301_v22 = vpop.eup %11794  ;;  %v1001_v20 = vmul.f32 1.442695, %v970_v9 }
 0x499   :  { %v1045_v39 = vsel %vm906_vm2, %v13301_v22, 0.0 }
 0x49a   :  { %11798 = vpow2.f32 %v1001_v20 }
 0x49b   :  { %11800 = vpow2.f32 %v997_v36 }
 0x49c   :  { %1037 = vadd.xlane.f32.xlu0 %v1036_v21  ;;  %v13306_v35 = vpop.eup %11796 }
 0x49d   :  { %v1039_v42 = vsel %vm906_vm2, %v13306_v35, 0.0 }
 0x49f   :  { %1311 = vrot.lane.b32.xlu1 %v13065_v17, %s12637_s3 }
 0x4a0   :  { %1031 = vadd.xlane.f32.xlu0 %v1030_v5 }
 0x4a3   :  { %1384 = vrot.lane.b32.xlu1 %v13087_v46, %s12636_s23 }
 0x4a4   :  { %v13310_v21 = vpop.eup %11798 }
 0x4a5   :  { %v1048_v41 = vsel %vm906_vm2, %v13310_v21, 0.0  ;;  %v13314_v48 = vpop.eup %11800 }
 0x4a6   :  { %v1042_v5 = vsel %vm906_vm2, %v13314_v48, 0.0 }
 0x4b6   :  { %1317 = vrot.lane.b32.xlu0 %v13077_v30, %s12636_s23 }
 0x4c7   :  { %1046 = vadd.xlane.f32.xlu1 %v1045_v39 }
 0x4cb   :  { %1040 = vadd.xlane.f32.xlu1 %v1039_v42 }
 0x4d5   :  { %1049 = vadd.xlane.f32.xlu0 %v1048_v41 }
 0x4d9   :  { %1043 = vadd.xlane.f32.xlu0 %v1042_v5 }
 0x4dc   :  { %1313 = vrot.lane.b32.xlu1 %v13077_v30, %s12637_s3 }
 0x4e0   :  { %1455 = vrot.lane.b32.xlu1 %v13117_v32, %s12636_s23 }
 0x4e4   :  { %1380 = vrot.lane.b32.xlu1 %v13087_v46, %s12637_s3 }
 0x4e8   :  { %1522 = vrot.lane.b32.xlu1 %v13127_v52, %s12636_s23 }
 0x4ec   :  { %1524 = vrot.lane.b32.xlu1 %v13139_v10, %s12636_s23 }
 0x4ef   :  { %1453 = vrot.lane.b32.xlu0 %v13107_v14, %s12636_s23 }
 0x4f0   :  { %1520 = vrot.lane.b32.xlu1 %v13139_v10, %s12637_s3 }
 0x4f3   :  { %1386 = vrot.lane.b32.xlu0 %v13097_v62, %s12636_s23 }
 0x4f4   :  { %1773 = vrot.lane.b32.xlu1 %v13067_v19, %s12637_s3 }
 0x4f7   :  { %1449 = vrot.lane.b32.xlu0 %v13107_v14, %s12637_s3  ;;  %v1011_v34 = vpop.xlane.xlu1 %1010 }
 0x4f8   :  { %1899 = vrot.lane.b32.xlu1 %v13109_v15, %s12637_s3 }
 0x4fb   :  { %1451 = vrot.lane.b32.xlu0 %v13117_v32, %s12637_s3  ;;  %v1005_v29 = vpop.xlane.xlu1 %1004 }
 0x4ff   :  { %1382 = vrot.lane.b32.xlu0 %v13097_v62, %s12637_s3  ;;  %v1014_v3 = vpop.xlane.xlu0 %1013 }
 0x500   :  { %11802 = vrcp.f32 %v1014_v3 }
 0x501   :  { %11804 = vrcp.f32 %v1005_v29 }
 0x502   :  { %11806 = vrcp.f32 %v1011_v34 }
 0x503   :  { %1518 = vrot.lane.b32.xlu0 %v13127_v52, %s12637_s3  ;;  %v1008_v8 = vpop.xlane.xlu0 %1007 }
 0x504   :  { %11808 = vrcp.f32 %v1008_v8 }
 0x507   :  { %1775 = vrot.lane.b32.xlu0 %v13079_v31, %s12637_s3  ;;  %v1023_v34 = vpop.xlane.xlu1 %1022 }
 0x50a   :  { %v11803_v43 = vpop.eup %11802 }
 0x50b   :  { %v11805_v7 = vpop.eup %11804  ;;  %v1070_v20 = vmul.f32 %v11803_v43, %v13242_v4 }
 0x50c   :  { %v11807_v9 = vpop.eup %11806  ;;  %v1067_v39 = vmul.f32 %v11805_v7, %v13237_v13  ;;  %v1017_v13 = vpop.xlane.xlu1 %1016 }
 0x50d   :  { %v1069_v42 = vmul.f32 %v11807_v9, %v13233_v61 }
 0x50e   :  { %v11809_v23 = vpop.eup %11808 }
 0x50f   :  { %v1068_v36 = vmul.f32 %v11809_v23, %v13246_v25  ;;  %v1084_v5 = vpack.c.bf16 %v1070_v20, %v1069_v42 }
 0x511   :  { %v1083_v41 = vpack.c.bf16 %v1068_v36, %v1067_v39 }
 0x513   :  { %10517 = vmatprep.mubr.msk.bf16.mxu0 %vm906_vm2, %v1083_v41 }
 0x514   :  { %10518 = vmatmul.mubr.msk.bf16.vlgmr.msra.gmra.mrb[28].mxu0 %vm906_vm2, %v1084_v5 }
 0x515   :  { %10522 = vmatpush3.bf16.msra.mxu0 %v13089_v47 }
 0x516   :  { %10523 = vmatprep.subr.bf16.mxu0 %v13099_v63 }
 0x517   :  { %v1035_v25 = vpop.xlane.xlu1 %1034 }
 0x519   :  { %10524 = vmatpush3.bf16.msra.mxu0 %v13099_v63 }
 0x51a   :  { %10537 = vmatprep.subr.bf16.mxu0 %v13129_v53 }
 0x51b   :  { %v1029_v29 = vpop.xlane.xlu1 %1028 }
 0x521   :  { %v1026_v4 = vpop.xlane.xlu0 %1025 }
 0x522   :  { %11810 = vrcp.f32 %v1026_v4 }
 0x523   :  { %11812 = vrcp.f32 %v1017_v13  ;;  %v1312_v13 = vpop.permute.xlu1 %1311 }
 0x524   :  { %11814 = vrcp.f32 %v1023_v34 }
 0x525   :  { %v1020_v61 = vpop.xlane.xlu0 %1019 }
 0x526   :  { %11816 = vrcp.f32 %v1020_v61 }
 0x529   :  { %v1038_v3 = vpop.xlane.xlu0 %1037 }
 0x52a   :  { %11818 = vrcp.f32 %v1038_v3 }
 0x52b   :  { %11820 = vrcp.f32 %v1029_v29  ;;  %v1385_v29 = vpop.permute.xlu1 %1384 }
 0x52c   :  { %v11811_v8 = vpop.eup %11810  ;;  %11822 = vrcp.f32 %v1035_v25 }
 0x52d   :  { %v1032_v43 = vpop.xlane.xlu0 %1031  ;;  %v11813_v7 = vpop.eup %11812  ;;  %v1074_v20 = vmul.f32 %v11811_v8, %v13274_v44 }
 0x52e   :  { %11824 = vrcp.f32 %v1032_v43  ;;  %v11815_v9 = vpop.eup %11814  ;;  %v1071_v39 = vmul.f32 %v11813_v7, %v13255_v59 }
 0x52f   :  { %v1073_v42 = vmul.f32 %v11815_v9, %v13250_v26 }
 0x530   :  { %v11817_v23 = vpop.eup %11816 }
 0x531   :  { %v1072_v36 = vmul.f32 %v11817_v23, %v13280_v54  ;;  %v1086_v5 = vpack.c.bf16 %v1074_v20, %v1073_v42  ;;  %v1318_v43 = vpop.permute.xlu0 %1317 }
 0x533   :  { %v1085_v41 = vpack.c.bf16 %v1072_v36, %v1071_v39 }
 0x534   :  { %v11819_v34 = vpop.eup %11818 }
 0x535   :  { %10525 = vmatprep.mubr.msk.bf16.mxu0 %vm906_vm2, %v1085_v41  ;;  %v11821_v4 = vpop.eup %11820  ;;  %v1078_v44 = vmul.f32 %v11819_v34, %v13284_v51  ;;  %v1326_v51 = vsel %vm216_vm0, %v13272_v55, 0 }
 0x536   :  { %10526 = vmatmul.mubr.msk.bf16.vlgmr.msra.gmra.mrb[32].mxu0 %vm906_vm2, %v1086_v5  ;;  %v11823_v25 = vpop.eup %11822  ;;  %v1075_v59 = vmul.f32 %v11821_v4, %v13268_v12 }
 0x537   :  { %10538 = vmatpush3.bf16.msra.mxu0 %v13129_v53  ;;  %v1077_v54 = vmul.f32 %v11823_v25, %v13263_v38  ;;  %v1329_v38 = vsel %vm216_vm0, %v1318_v43, 0 }
 0x538   :  { %v11825_v61 = vpop.eup %11824  ;;  %10539 = vmatprep.subr.bf16.mxu0 %v13141_v11 }
 0x539   :  { %v1076_v26 = vmul.f32 %v11825_v61, %v13288_v24  ;;  %v1088_v8 = vpack.c.bf16 %v1078_v44, %v1077_v54 }
 0x53b   :  { %10540 = vmatpush3.bf16.msra.mxu0 %v13141_v11  ;;  %v1087_v3 = vpack.c.bf16 %v1076_v26, %v1075_v59 }
 0x53c   :  { %11395 = vmatprep.subr.msk.bf16.mxu0 %vm216_vm0, %v1385_v29 }
 0x53d   :  { %10533 = vmatprep.mubr.msk.bf16.mxu1 %vm906_vm2, %v1087_v3 }
 0x53e   :  { %10534 = vmatmul.mubr.msk.bf16.vlgmr.msra.gmra.mrb[36].mxu1 %vm906_vm2, %v1088_v8 }
 0x53f   :  { %10546 = vmatpush3.bf16.xpose.msra.mxu1 %v1326_v51  ;;  %10549 = vmatprep.mubr.msk.bf16.mxu1 %vm216_vm0, %v1312_v13 }
 0x540   :  { %11394 = vmatprep.subr.msk.bf16.mxu1 %vm216_vm0, %v1318_v43 }
 0x547   :  { %10548 = vmatpush3.bf16.xpose.msra.mxu1 %v1329_v38 }
 0x554   :  { %v1047_v12 = vpop.xlane.xlu1 %1046 }
 0x558   :  { %v1041_v24 = vpop.xlane.xlu1 %1040 }
 0x55c   :  { %v1314_v7 = vpop.permute.xlu1 %1313 }
 0x55d   :  { %10550 = vmatmul.mubr.msk.bf16.vlgmr.msra.gmra.mrb[40].mxu1 %vm216_vm0, %v1314_v7 }
 0x560   :  { %v1456_v9 = vpop.permute.xlu1 %1455 }
 0x561   :  { %v1467_v8 = vsel %vm216_vm0, %v1456_v9, 0 }
 0x562   :  { %v1050_v23 = vpop.xlane.xlu0 %1049 }
 0x563   :  { %11826 = vrcp.f32 %v1050_v23 }
 0x564   :  { %v1381_v20 = vpop.permute.xlu1 %1380  ;;  %11828 = vrcp.f32 %v1041_v24 }
 0x565   :  { %11830 = vrcp.f32 %v1047_v12 }
 0x566   :  { %v1044_v55 = vpop.xlane.xlu0 %1043 }
 0x567   :  { %11832 = vrcp.f32 %v1044_v55 }
 0x568   :  { %v1523_v39 = vpop.permute.xlu1 %1522 }
 0x56a   :  { %v1454_v36 = vpop.permute.xlu0 %1453 }
 0x56b   :  { %11397 = vmatprep.subr.msk.bf16.mxu1 %vm216_vm0, %v1454_v36  ;;  %v1464_v42 = vsel %vm216_vm0, %v1454_v36, 0 }
 0x56c   :  { %v1525_v41 = vpop.permute.xlu1 %1524  ;;  %10562 = vmatpush3.bf16.xpose.msra.mxu1 %v1464_v42 }
 0x56d   :  { %11398 = vmatprep.subr.msk.bf16.mxu1 %vm216_vm0, %v1456_v9  ;;  %v11827_v5 = vpop.eup %11826  ;;  %v1536_v9 = vsel %vm216_vm0, %v1525_v41, 0 }
 0x56e   :  { %v1387_v34 = vpop.permute.xlu0 %1386  ;;  %v11829_v13 = vpop.eup %11828  ;;  %v1082_v44 = vmul.f32 %v11827_v5, %v13310_v21 }
 0x56f   :  { %v11831_v4 = vpop.eup %11830  ;;  %v1079_v26 = vmul.f32 %v11829_v13, %v13306_v35  ;;  %v1395_v35 = vsel %vm216_vm0, %v1385_v29, 0  ;;  %v1533_v29 = vsel %vm216_vm0, %v1523_v39, 0 }
 0x570   :  { %v1521_v25 = vpop.permute.xlu1 %1520  ;;  %v1081_v3 = vmul.f32 %v11831_v4, %v13301_v22 }
 0x571   :  { %v11833_v61 = vpop.eup %11832 }
 0x572   :  { %v1450_v59 = vpop.permute.xlu0 %1449  ;;  %v1080_v54 = vmul.f32 %v11833_v61, %v13314_v48  ;;  %v1090_v38 = vpack.c.bf16 %v1082_v44, %v1081_v3  ;;  %v1398_v48 = vsel %vm216_vm0, %v1387_v34, 0 }
 0x573   :  { %10565 = vmatprep.mubr.msk.bf16.mxu1 %vm216_vm0, %v1450_v59 }
 0x574   :  { %v1774_v51 = vpop.permute.xlu1 %1773  ;;  %10564 = vmatpush3.bf16.xpose.msra.mxu1 %v1467_v8  ;;  %v1089_v43 = vpack.c.bf16 %v1080_v54, %v1079_v26 }
 0x575   :  { %10577 = vmatprep.subr.bf16.mxu1 %v1774_v51 }
 0x576   :  { %10541 = vmatprep.mubr.msk.bf16.mxu0 %vm906_vm2, %v1089_v43  ;;  %v1452_v12 = vpop.permute.xlu0 %1451 }
 0x577   :  { %10542 = vmatmul.mubr.msk.bf16.vlgmr.msra.gmra.mrb[36].mxu0 %vm906_vm2, %v1090_v38 }
 0x578   :  { %10554 = vmatpush3.bf16.xpose.msra.mxu0 %v1395_v35  ;;  %10557 = vmatprep.mubr.msk.bf16.mxu0 %vm216_vm0, %v1381_v20  ;;  %v13397_v7 = vpop.permute.xlu1 %1899 }
 0x579   :  { %11396 = vmatprep.subr.msk.bf16.mxu0 %vm216_vm0, %v1387_v34 }
 0x57a   :  { %v1383_v22 = vpop.permute.xlu0 %1382 }
 0x57b   :  { %10566 = vmatmul.mubr.msk.bf16.vlgmr.msra.gmra.mrb[44].mxu1 %vm216_vm0, %v1452_v12 }
 0x57c   :  { %10578 = vmatpush3.bf16.msra.mxu1 %v1774_v51 }
 0x57e   :  { %v1519_v21 = vpop.permute.xlu0 %1518 }
 0x580   :  { %10556 = vmatpush3.bf16.xpose.msra.mxu0 %v1398_v48 }
 0x581   :  { %11399 = vmatprep.subr.msk.bf16.mxu0 %vm216_vm0, %v1523_v39 }
 0x582   :  { %v1776_v24 = vpop.permute.xlu0 %1775 }
 0x583   :  { %10579 = vmatprep.subr.bf16.mxu1 %v1776_v24 }
 0x584   :  { %10580 = vmatpush3.bf16.msra.mxu1 %v1776_v24 }
 0x585   :  { %10593 = vmatprep.subr.bf16.mxu1 %v13397_v7 }
 0x587   :  { %10558 = vmatmul.mubr.msk.bf16.vlgmr.msra.gmra.mrb[40].mxu0 %vm216_vm0, %v1383_v22 }
 0x588   :  { %10570 = vmatpush3.bf16.xpose.msra.mxu0 %v1533_v29  ;;  %10573 = vmatprep.mubr.msk.bf16.mxu0 %vm216_vm0, %v1519_v21 }
 0x589   :  { %11400 = vmatprep.subr.msk.bf16.mxu0 %vm216_vm0, %v1525_v41 }
 0x590   :  { %10572 = vmatpush3.bf16.xpose.msra.mxu0 %v1536_v9 }
 0x597   :  { %10574 = vmatmul.mubr.msk.bf16.vlgmr.msra.gmra.mrb[44].mxu0 %vm216_vm0, %v1521_v25 }
 0x5e7   :  { %v13406_v23 = vpop.f32.mrb[28].mxu0 }
 0x5e8   :  { %17219 = vst [vmem:[#allocation42_spill] sm:$0xff] %v13406_v23  ;;  %v13408_v20 = vpop.f32.mrb[29].mxu0 }
 0x5e9   :  { %17220 = vst [vmem:[#allocation43_spill] sm:$0xff] %v13408_v20  ;;  %v13410_v55 = vpop.f32.mrb[30].mxu0 }
 0x5ea   :  { %17221 = vst [vmem:[#allocation44_spill] sm:$0xff] %v13410_v55  ;;  %v13412_v36 = vpop.f32.mrb[31].mxu0 }
 0x5eb   :  { %17222 = vst [vmem:[#allocation45_spill] sm:$0xff] %v13412_v36 }
 0x609   :  { %v13414_v42 = vpop.f32.mrb[32].mxu0 }
 0x60a   :  { %17223 = vst [vmem:[#allocation46_spill] sm:$0xff] %v13414_v42  ;;  %v13416_v39 = vpop.f32.mrb[33].mxu0 }
 0x60b   :  { %17224 = vst [vmem:[#allocation47_spill] sm:$0xff] %v13416_v39  ;;  %v13418_v5 = vpop.f32.mrb[34].mxu0 }
 0x60c   :  { %17225 = vst [vmem:[#allocation48_spill] sm:$0xff] %v13418_v5  ;;  %v13420_v34 = vpop.f32.mrb[35].mxu0 }
 0x60d   :  { %17226 = vst [vmem:[#allocation49_spill] sm:$0xff] %v13420_v34 }
 0x611   :  { %v13422_v41 = vpop.f32.mrb[36].mxu1 }
 0x612   :  { %17227 = vst [vmem:[#allocation50_spill] sm:$0xff] %v13422_v41  ;;  %v13424_v13 = vpop.f32.mrb[37].mxu1 }
 0x613   :  { %17228 = vst [vmem:[#allocation51_spill] sm:$0xff] %v13424_v13  ;;  %v13426_v4 = vpop.f32.mrb[38].mxu1 }
 0x614   :  { %17229 = vst [vmem:[#allocation52_spill] sm:$0xff] %v13426_v4  ;;  %v13428_v25 = vpop.f32.mrb[39].mxu1 }
 0x615   :  { %17230 = vst [vmem:[#allocation53_spill] sm:$0xff] %v13428_v25 }
 0x630   :  { %v13430_v61 = vpop.f32.mrb[40].mxu1 }
 0x631   :  { %v13432_v44 = vpop.f32.mrb[41].mxu1  ;;  %v1593_v59 = vsel %vm906_vm2, %v13430_v61, -inf }
 0x632   :  { %1594 = vmax.xlane.f32.xlu0 %v1593_v59  ;;  %v13436_v26 = vpop.f32.mrb[42].mxu1  ;;  %v1587_v8 = vsel %vm906_vm2, %v13432_v44, -inf }
 0x633   :  { %v13438_v54 = vpop.f32.mrb[43].mxu1  ;;  %v1596_v51 = vsel %vm906_vm2, %v13436_v26, -inf }
 0x634   :  { %v1590_v3 = vsel %vm906_vm2, %v13438_v54, -inf }
 0x635   :  { %1591 = vmax.xlane.f32.xlu1 %v1590_v3 }
 0x636   :  { %1588 = vmax.xlane.f32.xlu0 %v1587_v8 }
 0x63a   :  { %1597 = vmax.xlane.f32.xlu0 %v1596_v51 }
 0x64a   :  { %v13446_v43 = vpop.f32.mrb[36].mxu0 }
 0x64b   :  { %17231 = vst [vmem:[#allocation54_spill] sm:$0xff] %v13446_v43  ;;  %v13448_v38 = vpop.f32.mrb[37].mxu0 }
 0x64c   :  { %17232 = vst [vmem:[#allocation55_spill] sm:$0xff] %v13448_v38  ;;  %v13450_v12 = vpop.f32.mrb[38].mxu0 }
 0x64d   :  { %17233 = vst [vmem:[#allocation56_spill] sm:$0xff] %v13450_v12  ;;  %v13452_v35 = vpop.f32.mrb[39].mxu0 }
 0x64e   :  { %17234 = vst [vmem:[#allocation57_spill] sm:$0xff] %v13452_v35  ;;  %v13454_v22 = vpop.f32.mrb[44].mxu1 }
 0x64f   :  { %v13456_v21 = vpop.f32.mrb[45].mxu1  ;;  %v1617_v48 = vsel %vm906_vm2, %v13454_v22, -inf }
 0x650   :  { %1618 = vmax.xlane.f32.xlu1 %v1617_v48  ;;  %v13460_v24 = vpop.f32.mrb[46].mxu1  ;;  %v1611_v1 = vsel %vm906_vm2, %v13456_v21, -inf }
 0x651   :  { %v13462_v29 = vpop.f32.mrb[47].mxu1  ;;  %v1620_v9 = vsel %vm906_vm2, %v13460_v24, -inf }
 0x652   :  { %1621 = vmax.xlane.f32.xlu0 %v1620_v9  ;;  %v1614_v9 = vsel %vm906_vm2, %v13462_v29, -inf }
 0x65a   :  { %v13466_v59 = vpop.f32.mrb[40].mxu0 }
 0x65b   :  { %v13468_v3 = vpop.f32.mrb[41].mxu0  ;;  %v1605_v8 = vsel %vm906_vm2, %v13466_v59, -inf }
 0x65c   :  { %1606 = vmax.xlane.f32.xlu1 %v1605_v8  ;;  %v13472_v51 = vpop.f32.mrb[42].mxu0  ;;  %v1599_v60 = vsel %vm906_vm2, %v13468_v3, -inf }
 0x65d   :  { %v13474_v45 = vpop.f32.mrb[43].mxu0  ;;  %v1608_v48 = vsel %vm906_vm2, %v13472_v51, -inf }
 0x65e   :  { %1609 = vmax.xlane.f32.xlu0 %v1608_v48  ;;  %v1602_v8 = vsel %vm906_vm2, %v13474_v45, -inf }
 0x660   :  { %1612 = vmax.xlane.f32.xlu1 %v1611_v1 }
 0x662   :  { %1615 = vmax.xlane.f32.xlu0 %v1614_v9 }
 0x664   :  { %1600 = vmax.xlane.f32.xlu1 %v1599_v60 }
 0x666   :  { %1603 = vmax.xlane.f32.xlu0 %v1602_v8 }
 0x66a   :  { %v13486_v0 = vpop.f32.mrb[44].mxu0 }
 0x66b   :  { %v13488_v58 = vpop.f32.mrb[45].mxu0  ;;  %v1629_v9 = vsel %vm906_vm2, %v13486_v0, -inf }
 0x66c   :  { %v13490_v48 = vpop.f32.mrb[46].mxu0  ;;  %v1623_v8 = vsel %vm906_vm2, %v13488_v58, -inf }
 0x66d   :  { %v13492_v50 = vpop.f32.mrb[47].mxu0  ;;  %v1632_v60 = vsel %vm906_vm2, %v13490_v48, -inf }
 0x66e   :  { %v1626_v1 = vsel %vm906_vm2, %v13492_v50, -inf }
 0x675   :  { %1836 = vrot.lane.b32.xlu1 %v13089_v47, %s12637_s3 }
 0x679   :  { %1838 = vrot.lane.b32.xlu1 %v13099_v63, %s12637_s3 }
 0x67c   :  { %1901 = vrot.lane.b32.xlu0 %v13119_v33, %s12637_s3 }
 0x67d   :  { %2027 = vrot.lane.b32.xlu1 %v13065_v17, %s17235_s26 }
 0x681   :  { %1962 = vrot.lane.b32.xlu1 %v13129_v53, %s12637_s3 }
 0x69b   :  { %1633 = vmax.xlane.f32.xlu0 %v1632_v60 }
 0x69f   :  { %1627 = vmax.xlane.f32.xlu0 %v1626_v1 }
 0x6a5   :  { %1630 = vmax.xlane.f32.xlu1 %v1629_v9 }
 0x6a9   :  { %1624 = vmax.xlane.f32.xlu1 %v1623_v8 }
 0x6b5   :  { %1964 = vrot.lane.b32.xlu0 %v13141_v11, %s12637_s3 }
 0x6b9   :  { %2023 = vrot.lane.b32.xlu0 %v13065_v17, %s12638_s2 }
 0x6ba   :  { %2029 = vrot.lane.b32.xlu1 %v13077_v30, %s17235_s26 }
 0x6bf   :  { %v1595_v60 = vpop.xlane.xlu0 %1594 }
 0x6c0   :  { %v1637_v37 = vsub.f32 %v13430_v61, %v1595_v60 }
 0x6c2   :  { %v1592_v1 = vpop.xlane.xlu1 %1591  ;;  %v1655_v27 = vmul.f32 1.442695, %v1637_v37 }
 0x6c3   :  { %v1589_v40 = vpop.xlane.xlu0 %1588  ;;  %v1636_v49 = vsub.f32 %v13438_v54, %v1592_v1 }
 0x6c4   :  { %v1635_v16 = vsub.f32 %v13432_v44, %v1589_v40 }
 0x6c5   :  { %v1653_v28 = vmul.f32 1.442695, %v1636_v49 }
 0x6c6   :  { %v1651_v2 = vmul.f32 1.442695, %v1635_v16 }
 0x6c7   :  { %v1598_v9 = vpop.xlane.xlu0 %1597 }
 0x6c8   :  { %v1638_v8 = vsub.f32 %v13436_v26, %v1598_v9 }
 0x6ca   :  { %v1657_v18 = vmul.f32 1.442695, %v1638_v8 }
 0x6cc   :  { %11834 = vpow2.f32 %v1657_v18 }
 0x6cd   :  { %11836 = vpow2.f32 %v1653_v28 }
 0x6ce   :  { %11838 = vpow2.f32 %v1655_v27 }
 0x6cf   :  { %11840 = vpow2.f32 %v1651_v2 }
 0x6d6   :  { %v13522_v57 = vpop.eup %11834 }
 0x6d7   :  { %v1692_v54 = vsel %vm906_vm2, %v13522_v57, 0.0  ;;  %v13526_v1 = vpop.eup %11836 }
 0x6d8   :  { %1693 = vadd.xlane.f32.xlu0 %v1692_v54  ;;  %v13528_v61 = vpop.eup %11838  ;;  %v1686_v37 = vsel %vm906_vm2, %v13526_v1, 0.0 }
 0x6d9   :  { %v1689_v18 = vsel %vm906_vm2, %v13528_v61, 0.0  ;;  %v13534_v16 = vpop.eup %11840 }
 0x6da   :  { %v1683_v44 = vsel %vm906_vm2, %v13534_v16, 0.0 }
 0x6dc   :  { %1687 = vadd.xlane.f32.xlu0 %v1686_v37 }
 0x6dd   :  { %v1619_v40 = vpop.xlane.xlu1 %1618 }
 0x6de   :  { %v1645_v2 = vsub.f32 %v13454_v22, %v1619_v40  ;;  %1690 = vadd.xlane.f32.xlu1 %v1689_v18 }
 0x6df   :  { %v1622_v27 = vpop.xlane.xlu0 %1621 }
 0x6e0   :  { %v1671_v28 = vmul.f32 1.442695, %v1645_v2  ;;  %v1646_v49 = vsub.f32 %v13460_v24, %v1622_v27 }
 0x6e2   :  { %11842 = vpow2.f32 %v1671_v28  ;;  %v1673_v26 = vmul.f32 1.442695, %v1646_v49  ;;  %1684 = vadd.xlane.f32.xlu1 %v1683_v44 }
 0x6e4   :  { %11844 = vpow2.f32 %v1673_v26 }
 0x6e9   :  { %v1607_v60 = vpop.xlane.xlu1 %1606 }
 0x6ea   :  { %v1641_v9 = vsub.f32 %v13466_v59, %v1607_v60 }
 0x6eb   :  { %v1610_v8 = vpop.xlane.xlu0 %1609 }
 0x6ec   :  { %v13541_v54 = vpop.eup %11842  ;;  %v1663_v37 = vmul.f32 1.442695, %v1641_v9  ;;  %v1642_v22 = vsub.f32 %v13472_v51, %v1610_v8 }
 0x6ed   :  { %v1613_v40 = vpop.xlane.xlu1 %1612  ;;  %v1713_v24 = vsel %vm906_vm2, %v13541_v54, 0.0 }
 0x6ee   :  { %v13546_v18 = vpop.eup %11844  ;;  %11846 = vpow2.f32 %v1663_v37  ;;  %v1665_v2 = vmul.f32 1.442695, %v1642_v22  ;;  %v1643_v27 = vsub.f32 %v13456_v21, %v1613_v40  ;;  %1714 = vadd.xlane.f32.xlu1 %v1713_v24 }
 0x6ef   :  { %v1616_v28 = vpop.xlane.xlu0 %1615  ;;  %v1716_v59 = vsel %vm906_vm2, %v13546_v18, 0.0 }
 0x6f0   :  { %11848 = vpow2.f32 %v1665_v2  ;;  %v1667_v49 = vmul.f32 1.442695, %v1643_v27  ;;  %v1644_v44 = vsub.f32 %v13462_v29, %v1616_v28  ;;  %1717 = vadd.xlane.f32.xlu0 %v1716_v59 }
 0x6f1   :  { %v1601_v51 = vpop.xlane.xlu1 %1600 }
 0x6f2   :  { %11850 = vpow2.f32 %v1667_v49  ;;  %v1669_v26 = vmul.f32 1.442695, %v1644_v44  ;;  %v1639_v60 = vsub.f32 %v13468_v3, %v1601_v51 }
 0x6f3   :  { %v1604_v9 = vpop.xlane.xlu0 %1603 }
 0x6f4   :  { %11852 = vpow2.f32 %v1669_v26  ;;  %v1659_v8 = vmul.f32 1.442695, %v1639_v60  ;;  %v1640_v21 = vsub.f32 %v13474_v45, %v1604_v9 }
 0x6f5   :  { %v1837_v37 = vpop.permute.xlu1 %1836 }
 0x6f6   :  { %11854 = vpow2.f32 %v1659_v8  ;;  %v1661_v22 = vmul.f32 1.442695, %v1640_v21  ;;  %10585 = vmatprep.subr.bf16.mxu0 %v1837_v37 }
 0x6f7   :  { %10586 = vmatpush3.bf16.msra.mxu0 %v1837_v37  ;;  %v13585_v8 = vpop.permute.xlu0 %1901 }
 0x6f8   :  { %v13554_v40 = vpop.eup %11846  ;;  %11856 = vpow2.f32 %v1661_v22 }
 0x6f9   :  { %v1839_v29 = vpop.permute.xlu1 %1838  ;;  %v1701_v24 = vsel %vm906_vm2, %v13554_v40, 0.0 }
 0x6fa   :  { %v13558_v2 = vpop.eup %11848  ;;  %10587 = vmatprep.subr.bf16.mxu0 %v1839_v29  ;;  %1702 = vadd.xlane.f32.xlu1 %v1701_v24 }
 0x6fb   :  { %10588 = vmatpush3.bf16.msra.mxu0 %v1839_v29  ;;  %v1704_v45 = vsel %vm906_vm2, %v13558_v2, 0.0 }
 0x6fc   :  { %v13562_v3 = vpop.eup %11850  ;;  %1705 = vadd.xlane.f32.xlu0 %v1704_v45 }
 0x6fd   :  { %v13564_v27 = vpop.permute.xlu1 %2027  ;;  %v1707_v28 = vsel %vm906_vm2, %v13562_v3, 0.0 }
 0x6fe   :  { %v13568_v59 = vpop.eup %11852  ;;  %1708 = vadd.xlane.f32.xlu1 %v1707_v28 }
 0x6ff   :  { %v1710_v49 = vsel %vm906_vm2, %v13568_v59, 0.0 }
 0x700   :  { %v13572_v44 = vpop.eup %11854  ;;  %1711 = vadd.xlane.f32.xlu0 %v1710_v49 }
 0x701   :  { %v13574_v51 = vpop.permute.xlu1 %1962  ;;  %v1695_v26 = vsel %vm906_vm2, %v13572_v44, 0.0 }
 0x702   :  { %v13578_v60 = vpop.eup %11856  ;;  %10601 = vmatprep.subr.bf16.mxu0 %v13574_v51  ;;  %1696 = vadd.xlane.f32.xlu1 %v1695_v26 }
 0x703   :  { %v1698_v9 = vsel %vm906_vm2, %v13578_v60, 0.0 }
 0x704   :  { %1699 = vadd.xlane.f32.xlu0 %v1698_v9 }
 0x713   :  { %2096 = vrot.lane.b32.xlu1 %v13087_v46, %s17235_s26 }
 0x728   :  { %v1634_v21 = vpop.xlane.xlu0 %1633 }
 0x729   :  { %v1650_v37 = vsub.f32 %v13490_v48, %v1634_v21 }
 0x72b   :  { %v1681_v45 = vmul.f32 1.442695, %v1650_v37 }
 0x72c   :  { %v1628_v22 = vpop.xlane.xlu0 %1627 }
 0x72d   :  { %v1648_v28 = vsub.f32 %v13492_v50, %v1628_v22 }
 0x72f   :  { %v1677_v6 = vmul.f32 1.442695, %v1648_v28 }
 0x732   :  { %v1631_v29 = vpop.xlane.xlu1 %1630 }
 0x733   :  { %v1649_v24 = vsub.f32 %v13486_v0, %v1631_v29 }
 0x735   :  { %v1679_v49 = vmul.f32 1.442695, %v1649_v24 }
 0x736   :  { %v1625_v26 = vpop.xlane.xlu1 %1624 }
 0x737   :  { %11858 = vpow2.f32 %v1679_v49  ;;  %v1647_v9 = vsub.f32 %v13488_v58, %v1625_v26 }
 0x738   :  { %11860 = vpow2.f32 %v1681_v45 }
 0x739   :  { %v1675_v56 = vmul.f32 1.442695, %v1647_v9 }
 0x73a   :  { %v13623_v24 = vpop.permute.xlu1 %2029 }
 0x73b   :  { %11862 = vpow2.f32 %v1675_v56 }
 0x73c   :  { %11864 = vpow2.f32 %v1677_v6  ;;  %v13609_v6 = vpop.permute.xlu0 %1964 }
 0x740   :  { %v13615_v22 = vpop.permute.xlu0 %2023 }
 0x741   :  { %v13591_v38 = vpop.eup %11858 }
 0x742   :  { %v1725_v48 = vsel %vm906_vm2, %v13591_v38, 0.0  ;;  %v13595_v21 = vpop.eup %11860 }
 0x743   :  { %1726 = vadd.xlane.f32.xlu0 %v1725_v48  ;;  %v1728_v58 = vsel %vm906_vm2, %v13595_v21, 0.0 }
 0x745   :  { %v13597_v0 = vpop.eup %11862 }
 0x746   :  { %v1719_v50 = vsel %vm906_vm2, %v13597_v0, 0.0  ;;  %v13603_v37 = vpop.eup %11864 }
 0x747   :  { %1720 = vadd.xlane.f32.xlu1 %v1719_v50  ;;  %1729 = vadd.xlane.f32.xlu0 %v1728_v58  ;;  %v1722_v56 = vsel %vm906_vm2, %v13603_v37, 0.0 }
 0x74b   :  { %1723 = vadd.xlane.f32.xlu0 %v1722_v56 }
 0x758   :  { %2025 = vrot.lane.b32.xlu1 %v13077_v30, %s12638_s2 }
 0x75c   :  { %2167 = vrot.lane.b32.xlu1 %v13117_v32, %s17235_s26 }
 0x760   :  { %2092 = vrot.lane.b32.xlu1 %v13087_v46, %s12638_s2 }
 0x761   :  { %2165 = vrot.lane.b32.xlu0 %v13107_v14, %s17235_s26 }
 0x764   :  { %2234 = vrot.lane.b32.xlu1 %v13127_v52, %s17235_s26 }
 0x765   :  { %2098 = vrot.lane.b32.xlu0 %v13097_v62, %s17235_s26  ;;  %v1694_v29 = vpop.xlane.xlu0 %1693 }
 0x768   :  { %2236 = vrot.lane.b32.xlu1 %v13139_v10, %s17235_s26 }
 0x769   :  { %2161 = vrot.lane.b32.xlu0 %v13107_v14, %s12638_s2  ;;  %v1688_v45 = vpop.xlane.xlu0 %1687 }
 0x76b   :  { %v1691_v28 = vpop.xlane.xlu1 %1690 }
 0x76c   :  { %2232 = vrot.lane.b32.xlu1 %v13139_v10, %s12638_s2  ;;  %11866 = vrcp.f32 %v1691_v28 }
 0x76d   :  { %2163 = vrot.lane.b32.xlu0 %v13117_v32, %s12638_s2  ;;  %11868 = vrcp.f32 %v1688_v45 }
 0x76e   :  { %11870 = vrcp.f32 %v1694_v29 }
 0x76f   :  { %v1685_v49 = vpop.xlane.xlu1 %1684 }
 0x770   :  { %11872 = vrcp.f32 %v1685_v49  ;;  %2483 = vrot.lane.b32.xlu1 %v13067_v19, %s12638_s2 }
 0x771   :  { %2094 = vrot.lane.b32.xlu0 %v13097_v62, %s12638_s2 }
 0x774   :  { %2605 = vrot.lane.b32.xlu1 %v13109_v15, %s12638_s2 }
 0x775   :  { %2230 = vrot.lane.b32.xlu0 %v13127_v52, %s12638_s2 }
 0x776   :  { %v11867_v26 = vpop.eup %11866 }
 0x777   :  { %v11869_v9 = vpop.eup %11868  ;;  %v1749_v58 = vmul.f32 %v11867_v26, %v13528_v61 }
 0x778   :  { %2544 = vrot.lane.b32.xlu1 %v13089_v47, %s12638_s2  ;;  %v11871_v48 = vpop.eup %11870  ;;  %v1748_v29 = vmul.f32 %v11869_v9, %v13526_v1 }
 0x779   :  { %2485 = vrot.lane.b32.xlu0 %v13079_v31, %s12638_s2  ;;  %v1750_v45 = vmul.f32 %v11871_v48, %v13522_v57 }
 0x77a   :  { %v11873_v50 = vpop.eup %11872 }
 0x77b   :  { %v1747_v56 = vmul.f32 %v11873_v50, %v13534_v16  ;;  %v1764_v49 = vpack.c.bf16 %v1750_v45, %v1749_v58  ;;  %v1715_v57 = vpop.xlane.xlu1 %1714 }
 0x77c   :  { %2546 = vrot.lane.b32.xlu1 %v13099_v63, %s12638_s2 }
 0x77d   :  { %2607 = vrot.lane.b32.xlu0 %v13119_v33, %s12638_s2  ;;  %v1763_v28 = vpack.c.bf16 %v1748_v29, %v1747_v56  ;;  %v1718_v1 = vpop.xlane.xlu0 %1717 }
 0x77e   :  { %11874 = vrcp.f32 %v1718_v1 }
 0x77f   :  { %10581 = vmatprep.mubr.msk.bf16.mxu1 %vm906_vm2, %v1763_v28 }
 0x780   :  { %2731 = vrot.lane.b32.xlu1 %v13065_v17, %s12639_s9  ;;  %10582 = vmatmul.mubr.msk.bf16.vlgmr.msra.gmra.mrb[48].mxu1 %vm906_vm2, %v1764_v49 }
 0x781   :  { %10594 = vmatpush3.bf16.msra.mxu1 %v13397_v7 }
 0x782   :  { %10595 = vmatprep.subr.bf16.mxu1 %v13585_v8 }
 0x785   :  { %10596 = vmatpush3.bf16.msra.mxu1 %v13585_v8 }
 0x786   :  { %11401 = vmatprep.subr.msk.bf16.mxu1 %vm216_vm0, %v13564_v27 }
 0x787   :  { %v1703_v61 = vpop.xlane.xlu1 %1702 }
 0x788   :  { %v11875_v50 = vpop.eup %11874 }
 0x789   :  { %v1706_v16 = vpop.xlane.xlu0 %1705  ;;  %v1758_v29 = vmul.f32 %v11875_v50, %v13546_v18 }
 0x78b   :  { %v1709_v26 = vpop.xlane.xlu1 %1708 }
 0x78c   :  { %11876 = vrcp.f32 %v1709_v26 }
 0x78d   :  { %11878 = vrcp.f32 %v1715_v57  ;;  %v1712_v9 = vpop.xlane.xlu0 %1711 }
 0x78e   :  { %11880 = vrcp.f32 %v1712_v9 }
 0x78f   :  { %11882 = vrcp.f32 %v1706_v16  ;;  %v1697_v48 = vpop.xlane.xlu1 %1696 }
 0x790   :  { %11884 = vrcp.f32 %v1697_v48 }
 0x791   :  { %11886 = vrcp.f32 %v1703_v61  ;;  %v1700_v7 = vpop.xlane.xlu0 %1699 }
 0x792   :  { %11888 = vrcp.f32 %v1700_v7 }
 0x796   :  { %v11877_v58 = vpop.eup %11876 }
 0x797   :  { %v11879_v8 = vpop.eup %11878  ;;  %v1755_v28 = vmul.f32 %v11877_v58, %v13562_v3  ;;  %v2038_v3 = vsel %vm216_vm0, %v13564_v27, 0  ;;  %v2097_v27 = vpop.permute.xlu1 %2096 }
 0x798   :  { %v11881_v56 = vpop.eup %11880  ;;  %v1757_v1 = vmul.f32 %v11879_v8, %v13541_v54 }
 0x799   :  { %v11883_v45 = vpop.eup %11882  ;;  %v1756_v49 = vmul.f32 %v11881_v56, %v13568_v59 }
 0x79a   :  { %v11885_v57 = vpop.eup %11884  ;;  %v1754_v61 = vmul.f32 %v11883_v45, %v13558_v2  ;;  %v1768_v48 = vpack.c.bf16 %v1758_v29, %v1757_v1 }
 0x79b   :  { %v11887_v16 = vpop.eup %11886  ;;  %v1767_v26 = vpack.c.bf16 %v1756_v49, %v1755_v28  ;;  %v1751_v7 = vmul.f32 %v11885_v57, %v13572_v44 }
 0x79c   :  { %v11889_v9 = vpop.eup %11888  ;;  %v1753_v50 = vmul.f32 %v11887_v16, %v13554_v40  ;;  %v2041_v40 = vsel %vm216_vm0, %v13623_v24, 0 }
 0x79d   :  { %10597 = vmatprep.mubr.msk.bf16.mxu1 %vm906_vm2, %v1767_v26  ;;  %v1752_v18 = vmul.f32 %v11889_v9, %v13578_v60 }
 0x79e   :  { %10598 = vmatmul.mubr.msk.bf16.vlgmr.msra.gmra.mrb[52].mxu1 %vm906_vm2, %v1768_v48  ;;  %v1766_v2 = vpack.c.bf16 %v1754_v61, %v1753_v50 }
 0x79f   :  { %10610 = vmatpush3.bf16.xpose.msra.mxu1 %v2038_v3  ;;  %10613 = vmatprep.mubr.msk.bf16.mxu1 %vm216_vm0, %v13615_v22  ;;  %v1765_v54 = vpack.c.bf16 %v1752_v18, %v1751_v7 }
 0x7a0   :  { %11402 = vmatprep.subr.msk.bf16.mxu1 %vm216_vm0, %v13623_v24 }
 0x7a1   :  { %10589 = vmatprep.mubr.msk.bf16.mxu0 %vm906_vm2, %v1765_v54 }
 0x7a2   :  { %10590 = vmatmul.mubr.msk.bf16.vlgmr.msra.gmra.mrb[48].mxu0 %vm906_vm2, %v1766_v2 }
 0x7a3   :  { %10602 = vmatpush3.bf16.msra.mxu0 %v13574_v51 }
 0x7a4   :  { %10603 = vmatprep.subr.bf16.mxu0 %v13609_v6 }
 0x7a7   :  { %10604 = vmatpush3.bf16.msra.mxu0 %v13609_v6  ;;  %10612 = vmatpush3.bf16.xpose.msra.mxu1 %v2041_v40 }
 0x7a8   :  { %11403 = vmatprep.subr.msk.bf16.mxu0 %vm216_vm0, %v2097_v27 }
 0x7d0   :  { %v1727_v59 = vpop.xlane.xlu0 %1726 }
 0x7d4   :  { %v1721_v44 = vpop.xlane.xlu1 %1720  ;;  %v1730_v60 = vpop.xlane.xlu0 %1729 }
 0x7d5   :  { %11890 = vrcp.f32 %v1730_v60 }
 0x7d6   :  { %11892 = vrcp.f32 %v1721_v44 }
 0x7d7   :  { %11894 = vrcp.f32 %v1727_v59 }
 0x7d8   :  { %v2026_v22 = vpop.permute.xlu1 %2025  ;;  %v1724_v58 = vpop.xlane.xlu0 %1723 }
 0x7d9   :  { %11896 = vrcp.f32 %v1724_v58  ;;  %10614 = vmatmul.mubr.msk.bf16.vlgmr.msra.gmra.mrb[56].mxu1 %vm216_vm0, %v2026_v22 }
 0x7dc   :  { %v2168_v51 = vpop.permute.xlu1 %2167  ;;  %v2166_v8 = vpop.permute.xlu0 %2165 }
 0x7dd   :  { %11405 = vmatprep.subr.msk.bf16.mxu1 %vm216_vm0, %v2166_v8  ;;  %v2176_v6 = vsel %vm216_vm0, %v2166_v8, 0  ;;  %v2179_v48 = vsel %vm216_vm0, %v2168_v51, 0 }
 0x7de   :  { %10626 = vmatpush3.bf16.xpose.msra.mxu1 %v2176_v6 }
 0x7df   :  { %11406 = vmatprep.subr.msk.bf16.mxu1 %vm216_vm0, %v2168_v51  ;;  %v11891_v24 = vpop.eup %11890 }
 0x7e0   :  { %v2093_v56 = vpop.permute.xlu1 %2092  ;;  %v2099_v29 = vpop.permute.xlu0 %2098  ;;  %v1762_v57 = vmul.f32 %v11891_v24, %v13595_v21  ;;  %v2107_v21 = vsel %vm216_vm0, %v2097_v27, 0 }
 0x7e1   :  { %v11893_v45 = vpop.eup %11892  ;;  %v2110_v2 = vsel %vm216_vm0, %v2099_v29, 0 }
 0x7e2   :  { %v11895_v28 = vpop.eup %11894  ;;  %v1759_v26 = vmul.f32 %v11893_v45, %v13597_v0 }
 0x7e3   :  { %v11897_v49 = vpop.eup %11896  ;;  %v1761_v61 = vmul.f32 %v11895_v28, %v13591_v38 }
 0x7e4   :  { %v2235_v1 = vpop.permute.xlu1 %2234  ;;  %v2162_v16 = vpop.permute.xlu0 %2161  ;;  %v1760_v9 = vmul.f32 %v11897_v49, %v13603_v37 }
 0x7e5   :  { %10629 = vmatprep.mubr.msk.bf16.mxu1 %vm216_vm0, %v2162_v16  ;;  %v1770_v18 = vpack.c.bf16 %v1762_v57, %v1761_v61  ;;  %v2245_v59 = vsel %vm216_vm0, %v2235_v1, 0 }
 0x7e6   :  { %10628 = vmatpush3.bf16.xpose.msra.mxu1 %v2179_v48  ;;  %v1769_v7 = vpack.c.bf16 %v1760_v9, %v1759_v26 }
 0x7e8   :  { %v2237_v50 = vpop.permute.xlu1 %2236  ;;  %10605 = vmatprep.mubr.msk.bf16.mxu0 %vm906_vm2, %v1769_v7  ;;  %v2164_v3 = vpop.permute.xlu0 %2163 }
 0x7e9   :  { %10606 = vmatmul.mubr.msk.bf16.vlgmr.msra.gmra.mrb[52].mxu0 %vm906_vm2, %v1770_v18  ;;  %v2248_v44 = vsel %vm216_vm0, %v2237_v50, 0 }
 0x7ea   :  { %10618 = vmatpush3.bf16.xpose.msra.mxu0 %v2107_v21  ;;  %10621 = vmatprep.mubr.msk.bf16.mxu0 %vm216_vm0, %v2093_v56 }
 0x7eb   :  { %11404 = vmatprep.subr.msk.bf16.mxu0 %vm216_vm0, %v2099_v29 }
 0x7ec   :  { %v2233_v38 = vpop.permute.xlu1 %2232  ;;  %v2095_v0 = vpop.permute.xlu0 %2094 }
 0x7ed   :  { %10630 = vmatmul.mubr.msk.bf16.vlgmr.msra.gmra.mrb[60].mxu1 %vm216_vm0, %v2164_v3 }
 0x7f0   :  { %v2484_v37 = vpop.permute.xlu1 %2483  ;;  %v2231_v54 = vpop.permute.xlu0 %2230 }
 0x7f1   :  { %10641 = vmatprep.subr.bf16.mxu1 %v2484_v37 }
 0x7f2   :  { %10620 = vmatpush3.bf16.xpose.msra.mxu0 %v2110_v2  ;;  %10642 = vmatpush3.bf16.msra.mxu1 %v2484_v37 }
 0x7f3   :  { %11407 = vmatprep.subr.msk.bf16.mxu0 %vm216_vm0, %v2235_v1 }
 0x7f4   :  { %v2486_v40 = vpop.permute.xlu0 %2485  ;;  %v13704_v27 = vpop.permute.xlu1 %2605 }
 0x7f5   :  { %10643 = vmatprep.subr.bf16.mxu1 %v2486_v40 }
 0x7f6   :  { %10644 = vmatpush3.bf16.msra.mxu1 %v2486_v40 }
 0x7f7   :  { %10657 = vmatprep.subr.bf16.mxu1 %v13704_v27 }
 0x7f8   :  { %v2545_v60 = vpop.permute.xlu1 %2544 }
 0x7f9   :  { %10622 = vmatmul.mubr.msk.bf16.vlgmr.msra.gmra.mrb[56].mxu0 %vm216_vm0, %v2095_v0 }
 0x7fa   :  { %10634 = vmatpush3.bf16.xpose.msra.mxu0 %v2245_v59  ;;  %10637 = vmatprep.mubr.msk.bf16.mxu0 %vm216_vm0, %v2231_v54 }
 0x7fb   :  { %11408 = vmatprep.subr.msk.bf16.mxu0 %vm216_vm0, %v2237_v50 }
 0x7fc   :  { %v2547_v22 = vpop.permute.xlu1 %2546 }
 0x800   :  { %v13828_v25 = vpop.permute.xlu1 %2731 }
 0x802   :  { %10636 = vmatpush3.bf16.xpose.msra.mxu0 %v2248_v44 }
 0x803   :  { %10649 = vmatprep.subr.bf16.mxu0 %v2545_v60 }
 0x809   :  { %10638 = vmatmul.mubr.msk.bf16.vlgmr.msra.gmra.mrb[60].mxu0 %vm216_vm0, %v2233_v38 }
 0x80a   :  { %10650 = vmatpush3.bf16.msra.mxu0 %v2545_v60 }
 0x80b   :  { %10651 = vmatprep.subr.bf16.mxu0 %v2547_v22 }
 0x80e   :  { %10652 = vmatpush3.bf16.msra.mxu0 %v2547_v22 }
 0x853   :  { %v13713_v58 = vpop.f32.mrb[48].mxu1 }
 0x854   :  { %v13715_v51 = vpop.f32.mrb[49].mxu1 }
 0x855   :  { %v13717_v8 = vpop.f32.mrb[50].mxu1 }
 0x856   :  { %v13721_v24 = vpop.f32.mrb[51].mxu1 }
 0x871   :  { %v13725_v29 = vpop.f32.mrb[52].mxu1 }
 0x872   :  { %v13727_v45 = vpop.f32.mrb[53].mxu1 }
 0x873   :  { %v13729_v28 = vpop.f32.mrb[54].mxu1 }
 0x874   :  { %v13733_v57 = vpop.f32.mrb[55].mxu1 }
 0x875   :  { %v13737_v16 = vpop.f32.mrb[48].mxu0 }
 0x876   :  { %v13739_v26 = vpop.f32.mrb[49].mxu0 }
 0x877   :  { %v13741_v9 = vpop.f32.mrb[50].mxu0 }
 0x878   :  { %v13745_v48 = vpop.f32.mrb[51].mxu0 }
 0x8ac   :  { %v10615_v18 = vpop.f32.mrb[56].mxu1 }
 0x8ad   :  { %v13749_v50 = vpop.f32.mrb[57].mxu1  ;;  %v2305_v3 = vsel %vm906_vm2, %v10615_v18, -inf }
 0x8ae   :  { %2306 = vmax.xlane.f32.xlu0 %v2305_v3  ;;  %v13752_v21 = vpop.f32.mrb[58].mxu1  ;;  %v2299_v37 = vsel %vm906_vm2, %v13749_v50, -inf }
 0x8af   :  { %v13754_v38 = vpop.f32.mrb[59].mxu1  ;;  %v2308_v54 = vsel %vm906_vm2, %v13752_v21, -inf }
 0x8b0   :  { %v2302_v0 = vsel %vm906_vm2, %v13754_v38, -inf }
 0x8b1   :  { %2303 = vmax.xlane.f32.xlu1 %v2302_v0 }
 0x8b2   :  { %2300 = vmax.xlane.f32.xlu0 %v2299_v37 }
 0x8b6   :  { %2309 = vmax.xlane.f32.xlu0 %v2308_v54 }
 0x8bc   :  { %v13762_v2 = vpop.f32.mrb[52].mxu0 }
 0x8bd   :  { %v13764_v40 = vpop.f32.mrb[53].mxu0 }
 0x8be   :  { %17236 = vst [vmem:[#allocation58_spill] sm:$0xff] %v13764_v40  ;;  %v13766_v59 = vpop.f32.mrb[54].mxu0 }
 0x8bf   :  { %v13770_v60 = vpop.f32.mrb[55].mxu0 }
 0x8c0   :  { %17237 = vst [vmem:[#allocation59_spill] sm:$0xff] %v13770_v60  ;;  %v13774_v3 = vpop.f32.mrb[60].mxu1 }
 0x8c1   :  { %v13776_v0 = vpop.f32.mrb[61].mxu1  ;;  %v2329_v37 = vsel %vm906_vm2, %v13774_v3, -inf }
 0x8c2   :  { %2330 = vmax.xlane.f32.xlu1 %v2329_v37  ;;  %v13780_v54 = vpop.f32.mrb[62].mxu1  ;;  %v2323_v6 = vsel %vm906_vm2, %v13776_v0, -inf }
 0x8c3   :  { %v13782_v1 = vpop.f32.mrb[63].mxu1  ;;  %v2332_v44 = vsel %vm906_vm2, %v13780_v54, -inf }
 0x8c4   :  { %2333 = vmax.xlane.f32.xlu0 %v2332_v44  ;;  %v2326_v44 = vsel %vm906_vm2, %v13782_v1, -inf }
 0x8cc   :  { %v13786_v49 = vpop.f32.mrb[56].mxu0 }
 0x8cd   :  { %v13788_v7 = vpop.f32.mrb[57].mxu0  ;;  %v2317_v22 = vsel %vm906_vm2, %v13786_v49, -inf }
 0x8ce   :  { %2318 = vmax.xlane.f32.xlu1 %v2317_v22  ;;  %v13792_v61 = vpop.f32.mrb[58].mxu0  ;;  %v2311_v35 = vsel %vm906_vm2, %v13788_v7, -inf }
 0x8cf   :  { %v13794_v56 = vpop.f32.mrb[59].mxu0  ;;  %v2320_v37 = vsel %vm906_vm2, %v13792_v61, -inf }
 0x8d0   :  { %2321 = vmax.xlane.f32.xlu0 %v2320_v37  ;;  %v2314_v22 = vsel %vm906_vm2, %v13794_v56, -inf }
 0x8d2   :  { %2324 = vmax.xlane.f32.xlu1 %v2323_v6 }
 0x8d4   :  { %2327 = vmax.xlane.f32.xlu0 %v2326_v44 }
 0x8d6   :  { %2312 = vmax.xlane.f32.xlu1 %v2311_v35 }
 0x8d8   :  { %2315 = vmax.xlane.f32.xlu0 %v2314_v22 }
 0x8dc   :  { %v13806_v43 = vpop.f32.mrb[60].mxu0 }
 0x8dd   :  { %v13808_v12 = vpop.f32.mrb[61].mxu0  ;;  %v2341_v37 = vsel %vm906_vm2, %v13806_v43, -inf }
 0x8de   :  { %2342 = vmax.xlane.f32.xlu1 %v2341_v37  ;;  %v13812_v6 = vpop.f32.mrb[62].mxu0  ;;  %v2335_v35 = vsel %vm906_vm2, %v13808_v12, -inf  ;;  %v13826_v37 = vpop.permute.xlu0 %2607 }
 0x8df   :  { %v13814_v13 = vpop.f32.mrb[63].mxu0  ;;  %v2344_v44 = vsel %vm906_vm2, %v13812_v6, -inf }
 0x8e0   :  { %2345 = vmax.xlane.f32.xlu0 %v2344_v44  ;;  %v2338_v22 = vsel %vm906_vm2, %v13814_v13, -inf }
 0x8e2   :  { %2336 = vmax.xlane.f32.xlu1 %v2335_v35 }
 0x8e4   :  { %2339 = vmax.xlane.f32.xlu0 %v2338_v22 }
 0x8f3   :  { %2666 = vrot.lane.b32.xlu1 %v13129_v53, %s12638_s2 }
 0x8fa   :  { %2668 = vrot.lane.b32.xlu0 %v13141_v11, %s12638_s2 }
 0x93b   :  { %v2307_v41 = vpop.xlane.xlu0 %2306 }
 0x93c   :  { %v2349_v44 = vsub.f32 %v10615_v18, %v2307_v41 }
 0x93e   :  { %v2367_v4 = vmul.f32 1.442695, %v2349_v44  ;;  %v2304_v39 = vpop.xlane.xlu1 %2303 }
 0x93f   :  { %v2301_v34 = vpop.xlane.xlu0 %2300  ;;  %v2348_v22 = vsub.f32 %v13754_v38, %v2304_v39 }
 0x940   :  { %11898 = vpow2.f32 %v2367_v4  ;;  %v2347_v35 = vsub.f32 %v13749_v50, %v2301_v34 }
 0x941   :  { %v2365_v55 = vmul.f32 1.442695, %v2348_v22 }
 0x942   :  { %v2363_v42 = vmul.f32 1.442695, %v2347_v35 }
 0x943   :  { %v2310_v5 = vpop.xlane.xlu0 %2309 }
 0x944   :  { %11900 = vpow2.f32 %v2363_v42  ;;  %v2350_v23 = vsub.f32 %v13752_v21, %v2310_v5 }
 0x946   :  { %v2369_v20 = vmul.f32 1.442695, %v2350_v23 }
 0x948   :  { %11902 = vpow2.f32 %v2369_v20 }
 0x949   :  { %11904 = vpow2.f32 %v2365_v55 }
 0x94a   :  { %v13833_v36 = vpop.eup %11898 }
 0x94b   :  { %v2401_v41 = vsel %vm906_vm2, %v13833_v36, 0.0 }
 0x94c   :  { %2402 = vadd.xlane.f32.xlu1 %v2401_v41 }
 0x94e   :  { %v13837_v4 = vpop.eup %11900 }
 0x94f   :  { %v2331_v34 = vpop.xlane.xlu1 %2330  ;;  %v2395_v39 = vsel %vm906_vm2, %v13837_v4, 0.0 }
 0x950   :  { %v2357_v42 = vsub.f32 %v13774_v3, %v2331_v34  ;;  %2396 = vadd.xlane.f32.xlu1 %v2395_v39 }
 0x952   :  { %v13842_v5 = vpop.eup %11902  ;;  %v2383_v23 = vmul.f32 1.442695, %v2357_v42 }
 0x953   :  { %v2404_v20 = vsel %vm906_vm2, %v13842_v5, 0.0  ;;  %v13846_v55 = vpop.eup %11904 }
 0x954   :  { %11906 = vpow2.f32 %v2383_v23  ;;  %2405 = vadd.xlane.f32.xlu0 %v2404_v20  ;;  %v2398_v18 = vsel %vm906_vm2, %v13846_v55, 0.0 }
 0x958   :  { %2399 = vadd.xlane.f32.xlu0 %v2398_v18 }
 0x95b   :  { %v2319_v50 = vpop.xlane.xlu1 %2318 }
 0x95c   :  { %v2353_v21 = vsub.f32 %v13786_v49, %v2319_v50 }
 0x95e   :  { %v13851_v38 = vpop.eup %11906  ;;  %v2375_v3 = vmul.f32 1.442695, %v2353_v21 }
 0x95f   :  { %v2325_v44 = vpop.xlane.xlu1 %2324  ;;  %v2425_v35 = vsel %vm906_vm2, %v13851_v38, 0.0 }
 0x960   :  { %11908 = vpow2.f32 %v2375_v3  ;;  %v2355_v22 = vsub.f32 %v13776_v0, %v2325_v44  ;;  %2426 = vadd.xlane.f32.xlu1 %v2425_v35 }
 0x962   :  { %v2379_v41 = vmul.f32 1.442695, %v2355_v22 }
 0x963   :  { %v2313_v34 = vpop.xlane.xlu1 %2312 }
 0x964   :  { %11910 = vpow2.f32 %v2379_v41  ;;  %v2351_v39 = vsub.f32 %v13788_v7, %v2313_v34  ;;  %v2334_v7 = vpop.xlane.xlu0 %2333 }
 0x965   :  { %v2358_v22 = vsub.f32 %v13780_v54, %v2334_v7 }
 0x966   :  { %v2371_v42 = vmul.f32 1.442695, %v2351_v39 }
 0x967   :  { %v2385_v41 = vmul.f32 1.442695, %v2358_v22 }
 0x968   :  { %11912 = vpow2.f32 %v2371_v42  ;;  %v2322_v35 = vpop.xlane.xlu0 %2321 }
 0x969   :  { %v2354_v34 = vsub.f32 %v13792_v61, %v2322_v35  ;;  %11914 = vpow2.f32 %v2385_v41 }
 0x96a   :  { %v13857_v23 = vpop.eup %11908 }
 0x96b   :  { %v2343_v49 = vpop.xlane.xlu1 %2342  ;;  %v2413_v20 = vsel %vm906_vm2, %v13857_v23, 0.0  ;;  %v2377_v39 = vmul.f32 1.442695, %v2354_v34 }
 0x96c   :  { %2414 = vadd.xlane.f32.xlu1 %v2413_v20  ;;  %v2361_v54 = vsub.f32 %v13806_v43, %v2343_v49 }
 0x96d   :  { %11916 = vpow2.f32 %v2377_v39 }
 0x96e   :  { %v13861_v18 = vpop.eup %11910  ;;  %2727 = vrot.lane.b32.xlu0 %v13065_v17, %s12640_s0  ;;  %v2328_v17 = vpop.xlane.xlu0 %2327  ;;  %v2391_v61 = vmul.f32 1.442695, %v2361_v54 }
 0x96f   :  { %v2337_v0 = vpop.xlane.xlu1 %2336  ;;  %v2419_v50 = vsel %vm906_vm2, %v13861_v18, 0.0  ;;  %v2356_v42 = vsub.f32 %v13782_v1, %v2328_v17 }
 0x970   :  { %2420 = vadd.xlane.f32.xlu1 %v2419_v50 }
 0x971   :  { %v2381_v50 = vmul.f32 1.442695, %v2356_v42 }
 0x972   :  { %v13867_v21 = vpop.eup %11912  ;;  %v2316_v20 = vpop.xlane.xlu0 %2315 }
 0x973   :  { %v13869_v3 = vpop.permute.xlu1 %2666  ;;  %v2407_v44 = vsel %vm906_vm2, %v13867_v21, 0.0  ;;  %v2352_v40 = vsub.f32 %v13794_v56, %v2316_v20  ;;  %11918 = vpow2.f32 %v2381_v50  ;;  %v13881_v7 = vpop.eup %11914 }
 0x974   :  { %10665 = vmatprep.subr.bf16.mxu0 %v13869_v3  ;;  %2408 = vadd.xlane.f32.xlu1 %v2407_v44  ;;  %v2428_v22 = vsel %vm906_vm2, %v13881_v7, 0.0 }
 0x975   :  { %v2373_v44 = vmul.f32 1.442695, %v2352_v40 }
 0x976   :  { %v2346_v60 = vpop.xlane.xlu0 %2345 }
 0x977   :  { %11920 = vpow2.f32 %v2373_v44  ;;  %v2362_v35 = vsub.f32 %v13812_v6, %v2346_v60  ;;  %v13886_v17 = vpop.eup %11916  ;;  %v2359_v60 = vsub.f32 %v13808_v12, %v2337_v0 }
 0x978   :  { %11922 = vpow2.f32 %v2391_v61  ;;  %v2416_v43 = vsel %vm906_vm2, %v13886_v17, 0.0 }
 0x979   :  { %v2393_v56 = vmul.f32 1.442695, %v2362_v35  ;;  %v2387_v39 = vmul.f32 1.442695, %v2359_v60 }
 0x97a   :  { %v2340_v1 = vpop.xlane.xlu0 %2339 }
 0x97b   :  { %v2360_v41 = vsub.f32 %v13814_v13, %v2340_v1  ;;  %11924 = vpow2.f32 %v2393_v56 }
 0x97d   :  { %v13891_v40 = vpop.eup %11918  ;;  %v2389_v6 = vmul.f32 1.442695, %v2360_v41 }
 0x97e   :  { %v2422_v49 = vsel %vm906_vm2, %v13891_v40, 0.0 }
 0x97f   :  { %11926 = vpow2.f32 %v2389_v6 }
 0x980   :  { %11928 = vpow2.f32 %v2387_v39 }
 0x981   :  { %v13896_v34 = vpop.eup %11920 }
 0x982   :  { %v2410_v13 = vsel %vm906_vm2, %v13896_v34, 0.0  ;;  %v13900_v42 = vpop.eup %11922 }
 0x983   :  { %v2437_v20 = vsel %vm906_vm2, %v13900_v42, 0.0 }
 0x985   :  { %2733 = vrot.lane.b32.xlu1 %v13077_v30, %s12639_s9  ;;  %v13904_v12 = vpop.eup %11924 }
 0x986   :  { %v2440_v0 = vsel %vm906_vm2, %v13904_v12, 0.0 }
 0x989   :  { %v13908_v50 = vpop.eup %11926 }
 0x98a   :  { %v2434_v44 = vsel %vm906_vm2, %v13908_v50, 0.0  ;;  %v13912_v54 = vpop.eup %11928 }
 0x98b   :  { %v2431_v61 = vsel %vm906_vm2, %v13912_v54, 0.0 }
 0x98d   :  { %2429 = vadd.xlane.f32.xlu0 %v2428_v22 }
 0x991   :  { %2417 = vadd.xlane.f32.xlu0 %v2416_v43 }
 0x995   :  { %2423 = vadd.xlane.f32.xlu0 %v2422_v49 }
 0x999   :  { %2411 = vadd.xlane.f32.xlu0 %v2410_v13 }
 0x99d   :  { %2438 = vadd.xlane.f32.xlu0 %v2437_v20 }
 0x9a1   :  { %2441 = vadd.xlane.f32.xlu0 %v2440_v0 }
 0x9a5   :  { %2435 = vadd.xlane.f32.xlu0 %v2434_v44 }
 0x9a9   :  { %2432 = vadd.xlane.f32.xlu1 %v2431_v61 }
 0x9ba   :  { %2729 = vrot.lane.b32.xlu1 %v13077_v30, %s12640_s0 }
 0x9bb   :  { %2800 = vrot.lane.b32.xlu0 %v13087_v46, %s12639_s9 }
 0x9be   :  { %2802 = vrot.lane.b32.xlu1 %v13097_v62, %s12639_s9 }
 0x9bf   :  { %2796 = vrot.lane.b32.xlu0 %v13087_v46, %s12640_s0  ;;  %v13944_v46 = vpop.permute.xlu0 %2668 }
 0x9c2   :  { %2798 = vrot.lane.b32.xlu1 %v13097_v62, %s12640_s0 }
 0x9c3   :  { %2869 = vrot.lane.b32.xlu0 %v13107_v14, %s12639_s9 }
 0x9c6   :  { %2871 = vrot.lane.b32.xlu1 %v13117_v32, %s12639_s9 }
 0x9c7   :  { %2865 = vrot.lane.b32.xlu0 %v13107_v14, %s12640_s0 }
 0x9ca   :  { %2867 = vrot.lane.b32.xlu1 %v13117_v32, %s12640_s0 }
 0x9cb   :  { %2938 = vrot.lane.b32.xlu0 %v13127_v52, %s12639_s9 }
 0x9ce   :  { %2940 = vrot.lane.b32.xlu1 %v13139_v10, %s12639_s9 }
 0x9cf   :  { %2934 = vrot.lane.b32.xlu0 %v13127_v52, %s12640_s0 }
 0x9d2   :  { %2936 = vrot.lane.b32.xlu1 %v13139_v10, %s12640_s0 }
 0x9d6   :  { %3187 = vrot.lane.b32.xlu1 %v13067_v19, %s12640_s0 }
 0x9d9   :  { %v2403_v30 = vpop.xlane.xlu1 %2402 }
 0x9dd   :  { %v2397_v62 = vpop.xlane.xlu1 %2396 }
 0x9e1   :  { %v2406_v14 = vpop.xlane.xlu0 %2405 }
 0x9e2   :  { %11930 = vrcp.f32 %v2406_v14 }
 0x9e3   :  { %11932 = vrcp.f32 %v2397_v62 }
 0x9e4   :  { %11934 = vrcp.f32 %v2403_v30 }
 0x9e5   :  { %v2400_v32 = vpop.xlane.xlu0 %2399 }
 0x9e6   :  { %11936 = vrcp.f32 %v2400_v32 }
 0x9ec   :  { %v11931_v35 = vpop.eup %11930 }
 0x9ed   :  { %v11933_v1 = vpop.eup %11932  ;;  %v2462_v56 = vmul.f32 %v11931_v35, %v13842_v5  ;;  %v2728_v5 = vpop.permute.xlu0 %2727 }
 0x9ee   :  { %v11935_v22 = vpop.eup %11934  ;;  %v2459_v10 = vmul.f32 %v11933_v1, %v13837_v4  ;;  %v2427_v4 = vpop.xlane.xlu1 %2426 }
 0x9ef   :  { %v2461_v41 = vmul.f32 %v11935_v22, %v13833_v36 }
 0x9f0   :  { %v11937_v52 = vpop.eup %11936 }
 0x9f1   :  { %v2460_v19 = vmul.f32 %v11937_v52, %v13846_v55  ;;  %v2476_v60 = vpack.c.bf16 %v2462_v56, %v2461_v41 }
 0x9f3   :  { %v2475_v43 = vpack.c.bf16 %v2460_v19, %v2459_v10 }
 0x9f5   :  { %10645 = vmatprep.mubr.msk.bf16.mxu1 %vm906_vm2, %v2475_v43 }
 0x9f6   :  { %10646 = vmatmul.mubr.msk.bf16.vlgmr.msra.gmra.mrb[64].mxu1 %vm906_vm2, %v2476_v60 }
 0x9f7   :  { %10658 = vmatpush3.bf16.msra.mxu1 %v13704_v27 }
 0x9f8   :  { %10659 = vmatprep.subr.bf16.mxu1 %v13826_v37 }
 0x9f9   :  { %v2415_v55 = vpop.xlane.xlu1 %2414 }
 0x9fb   :  { %10660 = vmatpush3.bf16.msra.mxu1 %v13826_v37 }
 0x9fc   :  { %11409 = vmatprep.subr.msk.bf16.mxu1 %vm216_vm0, %v13828_v25 }
 0x9fd   :  { %v2421_v36 = vpop.xlane.xlu1 %2420 }
 0xa01   :  { %v2409_v39 = vpop.xlane.xlu1 %2408 }
 0xa05   :  { %v2734_v43 = vpop.permute.xlu1 %2733 }
 0xa1a   :  { %v2430_v6 = vpop.xlane.xlu0 %2429 }
 0xa1b   :  { %11938 = vrcp.f32 %v2430_v6 }
 0xa1c   :  { %11940 = vrcp.f32 %v2421_v36 }
 0xa1d   :  { %11942 = vrcp.f32 %v2427_v4 }
 0xa1e   :  { %v2418_v49 = vpop.xlane.xlu0 %2417 }
 0xa22   :  { %v2424_v13 = vpop.xlane.xlu0 %2423 }
 0xa23   :  { %11944 = vrcp.f32 %v2424_v13 }
 0xa24   :  { %11946 = vrcp.f32 %v2418_v49 }
 0xa25   :  { %11948 = vrcp.f32 %v2409_v39  ;;  %v11939_v37 = vpop.eup %11938 }
 0xa26   :  { %11950 = vrcp.f32 %v2415_v55  ;;  %v2412_v27 = vpop.xlane.xlu0 %2411  ;;  %v11941_v0 = vpop.eup %11940  ;;  %v2470_v30 = vmul.f32 %v11939_v37, %v13881_v7 }
 0xa27   :  { %11952 = vrcp.f32 %v2412_v27  ;;  %v11943_v44 = vpop.eup %11942  ;;  %v2467_v32 = vmul.f32 %v11941_v0, %v13861_v18 }
 0xa28   :  { %v2469_v22 = vmul.f32 %v11943_v44, %v13851_v38  ;;  %v2742_v38 = vsel %vm216_vm0, %v13828_v25, 0 }
 0xa2a   :  { %v2439_v20 = vpop.xlane.xlu0 %2438  ;;  %v2480_v41 = vpack.c.bf16 %v2470_v30, %v2469_v22 }
 0xa2d   :  { %v11945_v61 = vpop.eup %11944 }
 0xa2e   :  { %v11947_v62 = vpop.eup %11946  ;;  %v2442_v14 = vpop.xlane.xlu0 %2441  ;;  %v2468_v35 = vmul.f32 %v11945_v61, %v13891_v40 }
 0xa2f   :  { %v11949_v1 = vpop.eup %11948  ;;  %v2466_v19 = vmul.f32 %v11947_v62, %v13886_v17  ;;  %11954 = vrcp.f32 %v2442_v14 }
 0xa30   :  { %v11951_v52 = vpop.eup %11950  ;;  %v2479_v56 = vpack.c.bf16 %v2468_v35, %v2467_v32  ;;  %v2463_v7 = vmul.f32 %v11949_v1, %v13867_v21 }
 0xa31   :  { %v11953_v10 = vpop.eup %11952  ;;  %v2465_v18 = vmul.f32 %v11951_v52, %v13857_v23 }
 0xa32   :  { %10661 = vmatprep.mubr.msk.bf16.mxu1 %vm906_vm2, %v2479_v56  ;;  %v2436_v60 = vpop.xlane.xlu0 %2435  ;;  %v2464_v4 = vmul.f32 %v11953_v10, %v13896_v34 }
 0xa33   :  { %10662 = vmatmul.mubr.msk.bf16.vlgmr.msra.gmra.mrb[68].mxu1 %vm906_vm2, %v2480_v41  ;;  %11956 = vrcp.f32 %v2436_v60  ;;  %v2478_v40 = vpack.c.bf16 %v2466_v19, %v2465_v18 }
 0xa34   :  { %10674 = vmatpush3.bf16.xpose.msra.mxu1 %v2742_v38  ;;  %10677 = vmatprep.mubr.msk.bf16.mxu1 %vm216_vm0, %v2728_v5  ;;  %v2477_v17 = vpack.c.bf16 %v2464_v4, %v2463_v7  ;;  %11958 = vrcp.f32 %v2439_v20  ;;  %v2745_v5 = vsel %vm216_vm0, %v2734_v43, 0 }
 0xa35   :  { %11410 = vmatprep.subr.msk.bf16.mxu1 %vm216_vm0, %v2734_v43 }
 0xa36   :  { %v2433_v21 = vpop.xlane.xlu1 %2432  ;;  %10653 = vmatprep.mubr.msk.bf16.mxu0 %vm906_vm2, %v2477_v17  ;;  %v2801_v34 = vpop.permute.xlu0 %2800 }
 0xa37   :  { %11960 = vrcp.f32 %v2433_v21  ;;  %10654 = vmatmul.mubr.msk.bf16.vlgmr.msra.gmra.mrb[64].mxu0 %vm906_vm2, %v2478_v40 }
 0xa38   :  { %10666 = vmatpush3.bf16.msra.mxu0 %v13869_v3 }
 0xa39   :  { %10667 = vmatprep.subr.bf16.mxu0 %v13944_v46  ;;  %v11955_v55 = vpop.eup %11954 }
 0xa3a   :  { %v2730_v25 = vpop.permute.xlu1 %2729  ;;  %v2797_v23 = vpop.permute.xlu0 %2796  ;;  %v2474_v3 = vmul.f32 %v11955_v55, %v13904_v12  ;;  %v2811_v12 = vsel %vm216_vm0, %v2801_v34, 0 }
 0xa3c   :  { %10668 = vmatpush3.bf16.msra.mxu0 %v13944_v46  ;;  %10676 = vmatpush3.bf16.xpose.msra.mxu1 %v2745_v5 }
 0xa3d   :  { %11411 = vmatprep.subr.msk.bf16.mxu0 %vm216_vm0, %v2801_v34  ;;  %v11957_v49 = vpop.eup %11956 }
 0xa3e   :  { %v2803_v6 = vpop.permute.xlu1 %2802  ;;  %v2870_v36 = vpop.permute.xlu0 %2869  ;;  %v2472_v0 = vmul.f32 %v11957_v49, %v13908_v50 }
 0xa3f   :  { %11413 = vmatprep.subr.msk.bf16.mxu1 %vm216_vm0, %v2870_v36  ;;  %v11959_v39 = vpop.eup %11958  ;;  %v2880_v44 = vsel %vm216_vm0, %v2870_v36, 0  ;;  %v2814_v14 = vsel %vm216_vm0, %v2803_v6, 0 }
 0xa40   :  { %v2473_v46 = vmul.f32 %v11959_v39, %v13900_v42 }
 0xa41   :  { %v11961_v13 = vpop.eup %11960 }
 0xa42   :  { %v2799_v27 = vpop.permute.xlu1 %2798  ;;  %v2866_v37 = vpop.permute.xlu0 %2865  ;;  %v2471_v20 = vmul.f32 %v11961_v13, %v13912_v54  ;;  %v2482_v30 = vpack.c.bf16 %v2474_v3, %v2473_v46 }
 0xa43   :  { %10678 = vmatmul.mubr.msk.bf16.vlgmr.msra.gmra.mrb[72].mxu1 %vm216_vm0, %v2730_v25 }
 0xa44   :  { %10690 = vmatpush3.bf16.xpose.msra.mxu1 %v2880_v44  ;;  %10693 = vmatprep.mubr.msk.bf16.mxu1 %vm216_vm0, %v2866_v37  ;;  %v2481_v61 = vpack.c.bf16 %v2472_v0, %v2471_v20 }
 0xa46   :  { %v2872_v62 = vpop.permute.xlu1 %2871  ;;  %10669 = vmatprep.mubr.msk.bf16.mxu0 %vm906_vm2, %v2481_v61  ;;  %v2939_v32 = vpop.permute.xlu0 %2938 }
 0xa47   :  { %10670 = vmatmul.mubr.msk.bf16.vlgmr.msra.gmra.mrb[68].mxu0 %vm906_vm2, %v2482_v30  ;;  %11414 = vmatprep.subr.msk.bf16.mxu1 %vm216_vm0, %v2872_v62  ;;  %v2883_v50 = vsel %vm216_vm0, %v2872_v62, 0  ;;  %v2949_v52 = vsel %vm216_vm0, %v2939_v32, 0 }
 0xa48   :  { %10682 = vmatpush3.bf16.xpose.msra.mxu0 %v2811_v12  ;;  %10685 = vmatprep.mubr.msk.bf16.mxu0 %vm216_vm0, %v2797_v23 }
 0xa49   :  { %11412 = vmatprep.subr.msk.bf16.mxu0 %vm216_vm0, %v2803_v6 }
 0xa4a   :  { %v2868_v42 = vpop.permute.xlu1 %2867  ;;  %v2935_v22 = vpop.permute.xlu0 %2934 }
 0xa4c   :  { %10692 = vmatpush3.bf16.xpose.msra.mxu1 %v2883_v50 }
 0xa4e   :  { %v2941_v54 = vpop.permute.xlu1 %2940 }
 0xa4f   :  { %v2952_v56 = vsel %vm216_vm0, %v2941_v54, 0 }
 0xa50   :  { %10684 = vmatpush3.bf16.xpose.msra.mxu0 %v2814_v14 }
 0xa51   :  { %11415 = vmatprep.subr.msk.bf16.mxu0 %vm216_vm0, %v2939_v32 }
 0xa52   :  { %v2937_v35 = vpop.permute.xlu1 %2936 }
 0xa53   :  { %10694 = vmatmul.mubr.msk.bf16.vlgmr.msra.gmra.mrb[76].mxu1 %vm216_vm0, %v2868_v42 }
 0xa56   :  { %v3188_v1 = vpop.permute.xlu1 %3187 }
 0xa57   :  { %10686 = vmatmul.mubr.msk.bf16.vlgmr.msra.gmra.mrb[72].mxu0 %vm216_vm0, %v2799_v27  ;;  %10705 = vmatprep.subr.bf16.mxu1 %v3188_v1 }
 0xa58   :  { %10698 = vmatpush3.bf16.xpose.msra.mxu0 %v2949_v52  ;;  %10701 = vmatprep.mubr.msk.bf16.mxu0 %vm216_vm0, %v2935_v22 }
 0xa59   :  { %11416 = vmatprep.subr.msk.bf16.mxu0 %vm216_vm0, %v2941_v54  ;;  %10706 = vmatpush3.bf16.msra.mxu1 %v3188_v1 }
 0xa60   :  { %10700 = vmatpush3.bf16.xpose.msra.mxu0 %v2952_v56 }
 0xa67   :  { %10702 = vmatmul.mubr.msk.bf16.vlgmr.msra.gmra.mrb[76].mxu0 %vm216_vm0, %v2937_v35 }
 0xac9   :  { %v14002_v10 = vpop.f32.mrb[64].mxu1 }
 0xaca   :  { %v14004_v19 = vpop.f32.mrb[65].mxu1 }
 0xacb   :  { %v14006_v41 = vpop.f32.mrb[66].mxu1 }
 0xacc   :  { %v14010_v60 = vpop.f32.mrb[67].mxu1 }
 0xb06   :  { %v14014_v4 = vpop.f32.mrb[68].mxu1 }
 0xb07   :  { %v14016_v18 = vpop.f32.mrb[69].mxu1 }
 0xb08   :  { %v14018_v38 = vpop.f32.mrb[70].mxu1 }
 0xb09   :  { %v14022_v40 = vpop.f32.mrb[71].mxu1 }
 0xb0a   :  { %v14026_v34 = vpop.f32.mrb[64].mxu0 }
 0xb0b   :  { %v14028_v25 = vpop.f32.mrb[65].mxu0 }
 0xb0c   :  { %v14030_v23 = vpop.f32.mrb[66].mxu0 }
 0xb0d   :  { %v14034_v55 = vpop.f32.mrb[67].mxu0 }
 0xb16   :  { %v10679_v36 = vpop.f32.mrb[72].mxu1 }
 0xb17   :  { %v14038_v49 = vpop.f32.mrb[73].mxu1  ;;  %v3009_v39 = vsel %vm906_vm2, %v10679_v36, -inf }
 0xb18   :  { %3010 = vmax.xlane.f32.xlu0 %v3009_v39  ;;  %v14041_v13 = vpop.f32.mrb[74].mxu1  ;;  %v3003_v0 = vsel %vm906_vm2, %v14038_v49, -inf }
 0xb19   :  { %v14043_v3 = vpop.f32.mrb[75].mxu1  ;;  %v3012_v62 = vsel %vm906_vm2, %v14041_v13, -inf }
 0xb1a   :  { %v14045_v27 = vpop.f32.mrb[68].mxu0  ;;  %v3006_v37 = vsel %vm906_vm2, %v14043_v3, -inf }
 0xb1b   :  { %3007 = vmax.xlane.f32.xlu1 %v3006_v37  ;;  %v14049_v20 = vpop.f32.mrb[69].mxu0 }
 0xb1c   :  { %17238 = vst [vmem:[#allocation60_spill] sm:$0xff] %v14049_v20  ;;  %3004 = vmax.xlane.f32.xlu0 %v3003_v0  ;;  %v14053_v46 = vpop.f32.mrb[70].mxu0 }
 0xb1d   :  { %v14057_v61 = vpop.f32.mrb[71].mxu0 }
 0xb20   :  { %3013 = vmax.xlane.f32.xlu0 %v3012_v62 }
 0xb26   :  { %v14063_v12 = vpop.f32.mrb[76].mxu1 }
 0xb27   :  { %v14065_v42 = vpop.f32.mrb[77].mxu1  ;;  %v3033_v56 = vsel %vm906_vm2, %v14063_v12, -inf }
 0xb28   :  { %v14067_v50 = vpop.f32.mrb[78].mxu1  ;;  %v3027_v62 = vsel %vm906_vm2, %v14065_v42, -inf }
 0xb29   :  { %v14069_v54 = vpop.f32.mrb[79].mxu1  ;;  %v3036_v39 = vsel %vm906_vm2, %v14067_v50, -inf }
 0xb2a   :  { %v10687_v14 = vpop.f32.mrb[72].mxu0 }
 0xb2b   :  { %v14071_v32 = vpop.f32.mrb[73].mxu0  ;;  %v3021_v35 = vsel %vm906_vm2, %v10687_v14, -inf }
 0xb2c   :  { %3022 = vmax.xlane.f32.xlu1 %v3021_v35  ;;  %v14074_v1 = vpop.f32.mrb[74].mxu0  ;;  %v3015_v37 = vsel %vm906_vm2, %v14071_v32, -inf }
 0xb2d   :  { %v14076_v22 = vpop.f32.mrb[75].mxu0  ;;  %v3024_v52 = vsel %vm906_vm2, %v14074_v1, -inf }
 0xb2e   :  { %3025 = vmax.xlane.f32.xlu0 %v3024_v52  ;;  %v3018_v0 = vsel %vm906_vm2, %v14076_v22, -inf }
 0xb30   :  { %3034 = vmax.xlane.f32.xlu1 %v3033_v56 }
 0xb32   :  { %3037 = vmax.xlane.f32.xlu0 %v3036_v39  ;;  %v3030_v39 = vsel %vm906_vm2, %v14069_v54, -inf }
 0xb34   :  { %3016 = vmax.xlane.f32.xlu1 %v3015_v37 }
 0xb36   :  { %3019 = vmax.xlane.f32.xlu0 %v3018_v0 }
 0xb38   :  { %3028 = vmax.xlane.f32.xlu1 %v3027_v62 }
 0xb3a   :  { %v14090_v35 = vpop.f32.mrb[76].mxu0 }
 0xb3b   :  { %v14092_v52 = vpop.f32.mrb[77].mxu0  ;;  %v3045_v37 = vsel %vm906_vm2, %v14090_v35, -inf }
 0xb3c   :  { %v14094_v56 = vpop.f32.mrb[78].mxu0  ;;  %v3039_v62 = vsel %vm906_vm2, %v14092_v52, -inf }
 0xb3d   :  { %v14096_v30 = vpop.f32.mrb[79].mxu0  ;;  %v3048_v0 = vsel %vm906_vm2, %v14094_v56, -inf }
 0xb49   :  { %3248 = vrot.lane.b32.xlu1 %v13089_v47, %s12640_s0  ;;  %v3042_v47 = vsel %vm906_vm2, %v14096_v30, -inf }
 0xb4c   :  { %3189 = vrot.lane.b32.xlu0 %v13079_v31, %s12640_s0 }
 0xb6b   :  { %3031 = vmax.xlane.f32.xlu0 %v3030_v39 }
 0xb6d   :  { %3046 = vmax.xlane.f32.xlu1 %v3045_v37 }
 0xb6f   :  { %3049 = vmax.xlane.f32.xlu0 %v3048_v0 }
 0xb71   :  { %3040 = vmax.xlane.f32.xlu1 %v3039_v62 }
 0xb73   :  { %3043 = vmax.xlane.f32.xlu0 %v3042_v47 }
 0xba5   :  { %v3011_v31 = vpop.xlane.xlu0 %3010 }
 0xba6   :  { %v3053_v44 = vsub.f32 %v10679_v36, %v3011_v31 }
 0xba8   :  { %v3071_v21 = vmul.f32 1.442695, %v3053_v44  ;;  %v3008_v39 = vpop.xlane.xlu1 %3007 }
 0xba9   :  { %v3005_v17 = vpop.xlane.xlu0 %3004  ;;  %v3052_v6 = vsub.f32 %v14043_v3, %v3008_v39 }
 0xbaa   :  { %11962 = vpow2.f32 %v3071_v21  ;;  %v3051_v37 = vsub.f32 %v14038_v49, %v3005_v17 }
 0xbab   :  { %v3069_v62 = vmul.f32 1.442695, %v3052_v6 }
 0xbac   :  { %v3067_v5 = vmul.f32 1.442695, %v3051_v37 }
 0xbad   :  { %v3014_v0 = vpop.xlane.xlu0 %3013 }
 0xbae   :  { %11964 = vpow2.f32 %v3067_v5  ;;  %v3054_v7 = vsub.f32 %v14041_v13, %v3014_v0 }
 0xbb0   :  { %v3073_v43 = vmul.f32 1.442695, %v3054_v7 }
 0xbb2   :  { %11966 = vpow2.f32 %v3073_v43 }
 0xbb3   :  { %11968 = vpow2.f32 %v3069_v62 }
 0xbb4   :  { %v14115_v20 = vpop.eup %11962 }
 0xbb5   :  { %v3105_v36 = vsel %vm906_vm2, %v14115_v20, 0.0 }
 0xbb6   :  { %3106 = vadd.xlane.f32.xlu1 %v3105_v36 }
 0xbb8   :  { %v14119_v21 = vpop.eup %11964 }
 0xbb9   :  { %v3023_v17 = vpop.xlane.xlu1 %3022  ;;  %v3099_v49 = vsel %vm906_vm2, %v14119_v21, 0.0 }
 0xbba   :  { %v3057_v3 = vsub.f32 %v10687_v14, %v3023_v17  ;;  %3100 = vadd.xlane.f32.xlu1 %v3099_v49 }
 0xbbb   :  { %v3026_v5 = vpop.xlane.xlu0 %3025 }
 0xbbc   :  { %v14123_v13 = vpop.eup %11966  ;;  %v3079_v7 = vmul.f32 1.442695, %v3057_v3 }
 0xbbd   :  { %v3035_v43 = vpop.xlane.xlu1 %3034  ;;  %v3108_v6 = vsel %vm906_vm2, %v14123_v13, 0.0  ;;  %v14127_v44 = vpop.eup %11968 }
 0xbbe   :  { %11970 = vpow2.f32 %v3079_v7  ;;  %v3061_v47 = vsub.f32 %v14063_v12, %v3035_v43  ;;  %3109 = vadd.xlane.f32.xlu0 %v3108_v6  ;;  %v3102_v14 = vsel %vm906_vm2, %v14127_v44, 0.0 }
 0xbbf   :  { %v3038_v31 = vpop.xlane.xlu0 %3037 }
 0xbc0   :  { %v3087_v39 = vmul.f32 1.442695, %v3061_v47 }
 0xbc1   :  { %v3017_v37 = vpop.xlane.xlu1 %3016 }
 0xbc2   :  { %11972 = vpow2.f32 %v3087_v39  ;;  %v3055_v0 = vsub.f32 %v14071_v32, %v3017_v37  ;;  %3103 = vadd.xlane.f32.xlu0 %v3102_v14  ;;  %v3058_v39 = vsub.f32 %v14074_v1, %v3026_v5  ;;  %v3062_v14 = vsub.f32 %v14067_v50, %v3038_v31 }
 0xbc3   :  { %v3020_v62 = vpop.xlane.xlu0 %3019 }
 0xbc4   :  { %v3075_v36 = vmul.f32 1.442695, %v3055_v0  ;;  %v3081_v37 = vmul.f32 1.442695, %v3058_v39  ;;  %v3089_v0 = vmul.f32 1.442695, %v3062_v14 }
 0xbc5   :  { %v3029_v17 = vpop.xlane.xlu1 %3028 }
 0xbc6   :  { %11974 = vpow2.f32 %v3075_v36  ;;  %v3056_v36 = vsub.f32 %v14076_v22, %v3020_v62 }
 0xbc7   :  { %v3190_v49 = vpop.permute.xlu0 %3189  ;;  %11976 = vpow2.f32 %v3081_v37 }
 0xbc8   :  { %v14133_v3 = vpop.eup %11970  ;;  %10707 = vmatprep.subr.bf16.mxu1 %v3190_v49  ;;  %11978 = vpow2.f32 %v3089_v0 }
 0xbc9   :  { %v3249_v12 = vpop.permute.xlu1 %3248  ;;  %10708 = vmatpush3.bf16.msra.mxu1 %v3190_v49  ;;  %v3117_v7 = vsel %vm906_vm2, %v14133_v3, 0.0  ;;  %v3077_v49 = vmul.f32 1.442695, %v3056_v36 }
 0xbca   :  { %10713 = vmatprep.subr.bf16.mxu0 %v3249_v12  ;;  %3118 = vadd.xlane.f32.xlu1 %v3117_v7 }
 0xbcb   :  { %10714 = vmatpush3.bf16.msra.mxu0 %v3249_v12  ;;  %11980 = vpow2.f32 %v3077_v49  ;;  %v3059_v12 = vsub.f32 %v14065_v42, %v3029_v17 }
 0xbcc   :  { %v14137_v43 = vpop.eup %11972 }
 0xbcd   :  { %v3129_v32 = vsel %vm906_vm2, %v14137_v43, 0.0 }
 0xbce   :  { %3130 = vadd.xlane.f32.xlu1 %v3129_v32 }
 0xbd0   :  { %v14141_v6 = vpop.eup %11974 }
 0xbd1   :  { %v3111_v47 = vsel %vm906_vm2, %v14141_v6, 0.0  ;;  %v14153_v7 = vpop.eup %11976 }
 0xbd2   :  { %3112 = vadd.xlane.f32.xlu1 %v3111_v47  ;;  %v3120_v1 = vsel %vm906_vm2, %v14153_v7, 0.0  ;;  %v14157_v5 = vpop.eup %11978 }
 0xbd3   :  { %v3132_v22 = vsel %vm906_vm2, %v14157_v5, 0.0 }
 0xbd5   :  { %v14162_v62 = vpop.eup %11980 }
 0xbd6   :  { %v3114_v14 = vsel %vm906_vm2, %v14162_v62, 0.0 }
 0xbd8   :  { %3250 = vrot.lane.b32.xlu0 %v13099_v63, %s12640_s0  ;;  %v3083_v63 = vmul.f32 1.442695, %v3059_v12 }
 0xbda   :  { %11982 = vpow2.f32 %v3083_v63 }
 0xbe3   :  { %3309 = vrot.lane.b32.xlu1 %v13109_v15, %s12640_s0 }
 0xbe4   :  { %v14170_v12 = vpop.eup %11982 }
 0xbf7   :  { %3121 = vadd.xlane.f32.xlu0 %v3120_v1 }
 0xbf8   :  { %v3032_v15 = vpop.xlane.xlu0 %3031 }
 0xbf9   :  { %v3060_v50 = vsub.f32 %v14069_v54, %v3032_v15 }
 0xbfa   :  { %v3047_v31 = vpop.xlane.xlu1 %3046 }
 0xbfb   :  { %v3085_v42 = vmul.f32 1.442695, %v3060_v50  ;;  %v3065_v17 = vsub.f32 %v14090_v35, %v3047_v31  ;;  %3133 = vadd.xlane.f32.xlu0 %v3132_v22 }
 0xbfc   :  { %v3050_v32 = vpop.xlane.xlu0 %3049 }
 0xbfd   :  { %11984 = vpow2.f32 %v3085_v42  ;;  %v3095_v47 = vmul.f32 1.442695, %v3065_v17  ;;  %v3066_v39 = vsub.f32 %v14094_v56, %v3050_v32  ;;  %v3123_v56 = vsel %vm906_vm2, %v14170_v12, 0.0 }
 0xbfe   :  { %v3041_v37 = vpop.xlane.xlu1 %3040 }
 0xbff   :  { %11986 = vpow2.f32 %v3095_v47  ;;  %v3097_v54 = vmul.f32 1.442695, %v3066_v39  ;;  %v3063_v0 = vsub.f32 %v14092_v52, %v3041_v37  ;;  %3115 = vadd.xlane.f32.xlu0 %v3114_v14  ;;  %v17239_v47 = vpack.i.bf16 %v13717_v8, %v13713_v58 }
 0xc00   :  { %v3044_v36 = vpop.xlane.xlu0 %3043  ;;  %v17240_v39 = vpack.i.bf16 %v13721_v24, %v13715_v51 }
 0xc01   :  { %11988 = vpow2.f32 %v3097_v54  ;;  %v3091_v49 = vmul.f32 1.442695, %v3063_v0  ;;  %v3064_v35 = vsub.f32 %v14096_v30, %v3044_v36 }
 0xc03   :  { %11990 = vpow2.f32 %v3091_v49  ;;  %v3093_v63 = vmul.f32 1.442695, %v3064_v35 }
 0xc05   :  { %11992 = vpow2.f32 %v3093_v63 }
 0xc07   :  { %v14174_v1 = vpop.eup %11984  ;;  %3124 = vadd.xlane.f32.xlu1 %v3123_v56 }
 0xc08   :  { %v3126_v52 = vsel %vm906_vm2, %v14174_v1, 0.0 }
 0xc09   :  { %v14178_v15 = vpop.eup %11986  ;;  %3127 = vadd.xlane.f32.xlu0 %v3126_v52 }
 0xc0a   :  { %v3141_v30 = vsel %vm906_vm2, %v14178_v15, 0.0 }
 0xc0b   :  { %v14182_v50 = vpop.eup %11988  ;;  %3142 = vadd.xlane.f32.xlu1 %v3141_v30 }
 0xc0c   :  { %v3144_v31 = vsel %vm906_vm2, %v14182_v50, 0.0 }
 0xc0d   :  { %v14186_v22 = vpop.eup %11990  ;;  %3145 = vadd.xlane.f32.xlu0 %v3144_v31 }
 0xc0e   :  { %v3135_v42 = vsel %vm906_vm2, %v14186_v22, 0.0 }
 0xc0f   :  { %v14190_v17 = vpop.eup %11992  ;;  %3136 = vadd.xlane.f32.xlu1 %v3135_v42 }
 0xc10   :  { %v3138_v32 = vsel %vm906_vm2, %v14190_v17, 0.0 }
 0xc11   :  { %3139 = vadd.xlane.f32.xlu0 %v3138_v32 }
 0xc20   :  { %3370 = vrot.lane.b32.xlu1 %v13129_v53, %s12640_s0  ;;  %v17241_v53 = vpack.i.bf16 %v14006_v41, %v14002_v10 }
 0xc24   :  { %3372 = vrot.lane.b32.xlu1 %v13141_v11, %s12640_s0  ;;  %v17242_v11 = vpack.i.bf16 %v14010_v60, %v14004_v19 }
 0xc27   :  { %3311 = vrot.lane.b32.xlu0 %v13119_v33, %s12640_s0 }
 0xc28   :  { %11477 = vrot.lane.b32.xlu1 %v17239_v47, %s12639_s9 }
 0xc2b   :  { %11472 = vrot.lane.b32.xlu0 %v17240_v39, %s12639_s9 }
 0xc2c   :  { %11487 = vrot.lane.b32.xlu1 %v17241_v53, %s17235_s26 }
 0xc2f   :  { %11482 = vrot.lane.b32.xlu0 %v17242_v11, %s17235_s26 }
 0xc43   :  { %v3107_v33 = vpop.xlane.xlu1 %3106 }
 0xc47   :  { %v3101_v37 = vpop.xlane.xlu1 %3100 }
 0xc4b   :  { %v3110_v14 = vpop.xlane.xlu0 %3109 }
 0xc4c   :  { %11994 = vrcp.f32 %v3110_v14 }
 0xc4d   :  { %11996 = vrcp.f32 %v3101_v37 }
 0xc4e   :  { %11998 = vrcp.f32 %v3107_v33 }
 0xc4f   :  { %v3104_v58 = vpop.xlane.xlu0 %3103 }
 0xc50   :  { %12000 = vrcp.f32 %v3104_v58 }
 0xc53   :  { %v3251_v51 = vpop.permute.xlu0 %3250 }
 0xc54   :  { %10715 = vmatprep.subr.bf16.mxu0 %v3251_v51 }
 0xc55   :  { %10716 = vmatpush3.bf16.msra.mxu0 %v3251_v51 }
 0xc56   :  { %v11995_v8 = vpop.eup %11994 }
 0xc57   :  { %v3119_v24 = vpop.xlane.xlu1 %3118  ;;  %v11997_v10 = vpop.eup %11996  ;;  %v3166_v0 = vmul.f32 %v11995_v8, %v14123_v13 }
 0xc58   :  { %v11999_v41 = vpop.eup %11998  ;;  %v3163_v60 = vmul.f32 %v11997_v10, %v14119_v21 }
 0xc59   :  { %v3165_v49 = vmul.f32 %v11999_v41, %v14115_v20 }
 0xc5a   :  { %v12001_v54 = vpop.eup %12000 }
 0xc5b   :  { %v3131_v19 = vpop.xlane.xlu1 %3130  ;;  %v3164_v36 = vmul.f32 %v12001_v54, %v14127_v44  ;;  %v3180_v63 = vpack.c.bf16 %v3166_v0, %v3165_v49 }
 0xc5d   :  { %v3179_v35 = vpack.c.bf16 %v3164_v36, %v3163_v60 }
 0xc5f   :  { %v3113_v56 = vpop.xlane.xlu1 %3112  ;;  %10709 = vmatprep.mubr.msk.bf16.mxu1 %vm906_vm2, %v3179_v35 }
 0xc60   :  { %10710 = vmatmul.mubr.msk.bf16.vlgmr.msra.gmra.mrb[80].mxu1 %vm906_vm2, %v3180_v63 }
 0xc63   :  { %v3310_v52 = vpop.permute.xlu1 %3309 }
 0xc64   :  { %10721 = vmatprep.subr.bf16.mxu1 %v3310_v52 }
 0xc65   :  { %10722 = vmatpush3.bf16.msra.mxu1 %v3310_v52 }
 0xc84   :  { %v3122_v30 = vpop.xlane.xlu0 %3121 }
 0xc85   :  { %12002 = vrcp.f32 %v3122_v30 }
 0xc86   :  { %12004 = vrcp.f32 %v3113_v56 }
 0xc87   :  { %12006 = vrcp.f32 %v3119_v24 }
 0xc88   :  { %v3134_v31 = vpop.xlane.xlu0 %3133 }
 0xc8c   :  { %v3116_v21 = vpop.xlane.xlu0 %3115 }
 0xc8d   :  { %12008 = vrcp.f32 %v3116_v21 }
 0xc8e   :  { %12010 = vrcp.f32 %v3134_v31 }
 0xc8f   :  { %v12003_v13 = vpop.eup %12002 }
 0xc90   :  { %v12005_v44 = vpop.eup %12004  ;;  %v3170_v39 = vmul.f32 %v12003_v13, %v14153_v7  ;;  %v11726_v13 = vld [vmem:[#allocation11] sm:$0xff]  }
 0xc91   :  { %v12007_v42 = vpop.eup %12006  ;;  %v3167_v11 = vmul.f32 %v12005_v44, %v14141_v6  ;;  %v11728_v44 = vld [vmem:[#allocation11 + $0x10] sm:$0xff]  }
 0xc92   :  { %v3169_v37 = vmul.f32 %v12007_v42, %v14133_v3 }
 0xc94   :  { %v3125_v20 = vpop.xlane.xlu1 %3124  ;;  %v3182_v51 = vpack.c.bf16 %v3170_v39, %v3169_v37  ;;  %v17243_v39 = vpack.i.bf16 %v13741_v9, %v13737_v16 }
 0xc95   :  { %12012 = vrcp.f32 %v3125_v20  ;;  %v11727_v20 = vld [vmem:[#allocation11 + $0x8] sm:$0xff]  }
 0xc96   :  { %12014 = vrcp.f32 %v3131_v19  ;;  %v3128_v32 = vpop.xlane.xlu0 %3127 }
 0xc97   :  { %v12009_v47 = vpop.eup %12008  ;;  %12016 = vrcp.f32 %v3128_v32 }
 0xc98   :  { %v3143_v53 = vpop.xlane.xlu1 %3142  ;;  %v3168_v33 = vmul.f32 %v12009_v47, %v14162_v62  ;;  %v12011_v24 = vpop.eup %12010 }
 0xc99   :  { %v3174_v3 = vmul.f32 %v12011_v24, %v14157_v5  ;;  %v17249_v24 = vpack.i.bf16 %v14018_v38, %v14014_v4  ;;  %v17251_v4 = vpack.i.bf16 %v13766_v59, %v13762_v2 }
 0xc9a   :  { %v3146_v14 = vpop.xlane.xlu0 %3145  ;;  %v3181_v58 = vpack.c.bf16 %v3168_v33, %v3167_v11  ;;  %v17245_v11 = vpack.i.bf16 %v14030_v23, %v14026_v34  ;;  %v17246_v33 = vpack.i.bf16 %v14034_v55, %v14028_v25  ;;  %v17248_v34 = vpack.i.bf16 %v13733_v57, %v13727_v45 }
 0xc9b   :  { %12018 = vrcp.f32 %v3146_v14 }
 0xc9c   :  { %v3137_v8 = vpop.xlane.xlu1 %3136  ;;  %10717 = vmatprep.mubr.msk.bf16.mxu0 %vm906_vm2, %v3181_v58 }
 0xc9d   :  { %12020 = vrcp.f32 %v3137_v8  ;;  %10718 = vmatmul.mubr.msk.bf16.vlgmr.msra.gmra.mrb[80].mxu0 %vm906_vm2, %v3182_v51 }
 0xc9e   :  { %12022 = vrcp.f32 %v3143_v53  ;;  %v3140_v7 = vpop.xlane.xlu0 %3139  ;;  %v17244_v53 = vpack.i.bf16 %v13745_v48, %v13739_v26  ;;  %v17247_v26 = vpack.i.bf16 %v13729_v28, %v13725_v29  ;;  %v17250_v29 = vpack.i.bf16 %v14022_v40, %v14016_v18 }
 0xc9f   :  { %v12013_v10 = vpop.eup %12012  ;;  %12024 = vrcp.f32 %v3140_v7  ;;  %v17255_v40 = vpack.i.bf16 %v14053_v46, %v14045_v27 }
 0xca0   :  { %v12015_v6 = vpop.eup %12014  ;;  %v3371_v41 = vpop.permute.xlu1 %3370  ;;  %v3171_v0 = vmul.f32 %v12013_v10, %v14170_v12 }
 0xca1   :  { %v12017_v62 = vpop.eup %12016  ;;  %10729 = vmatprep.subr.bf16.mxu0 %v3371_v41  ;;  %v3173_v60 = vmul.f32 %v12015_v6, %v14137_v43 }
 0xca2   :  { %10730 = vmatpush3.bf16.msra.mxu0 %v3371_v41  ;;  %v3312_v54 = vpop.permute.xlu0 %3311  ;;  %v3172_v19 = vmul.f32 %v12017_v62, %v14174_v1  ;;  %v17252_v41 = vld [vmem:[#allocation59_spill] sm:$0xff]  ;;  %v17253_v62 = vld [vmem:[#allocation58_spill] sm:$0xff] }
 0xca3   :  { %10723 = vmatprep.subr.bf16.mxu1 %v3312_v54  ;;  %v3184_v35 = vpack.c.bf16 %v3174_v3, %v3173_v60  ;;  %v17254_v18 = vpack.i.bf16 %v17252_v41, %v17253_v62  ;;  %v17256_v3 = vld [vmem:[#allocation60_spill] sm:$0xff] }
 0xca4   :  { %v3373_v36 = vpop.permute.xlu1 %3372  ;;  %10724 = vmatpush3.bf16.msra.mxu1 %v3312_v54  ;;  %v3183_v49 = vpack.c.bf16 %v3172_v19, %v3171_v0  ;;  %v17257_v54 = vpack.i.bf16 %v14057_v61, %v17256_v3 }
 0xca5   :  { %10731 = vmatprep.subr.bf16.mxu0 %v3373_v36  ;;  %v12019_v63 = vpop.eup %12018  ;;  %10737 = vmatprep.subr.bf16.mxu1 %v11726_v13 }
 0xca6   :  { %10725 = vmatprep.mubr.msk.bf16.mxu1 %vm906_vm2, %v3183_v49  ;;  %10732 = vmatpush3.bf16.msra.mxu0 %v3373_v36  ;;  %v3178_v12 = vmul.f32 %v12019_v63, %v14182_v50  ;;  %v11729_v50 = vld [vmem:[#allocation11 + $0x18] sm:$0xff]   ;;  %v11473_v59 = vpop.permute.xlu0 %11472 }
 0xca7   :  { %v12021_v5 = vpop.eup %12020  ;;  %10726 = vmatmul.mubr.msk.bf16.vlgmr.msra.gmra.mrb[84].mxu1 %vm906_vm2, %v3184_v35  ;;  %v11475_v19 = vunpack.i.h.bf16 %v11473_v59  ;;  %v11474_v60 = vunpack.i.l.bf16 %v11473_v59 }
 0xca8   :  { %v12023_v56 = vpop.eup %12022  ;;  %v3175_v1 = vmul.f32 %v12021_v5, %v14186_v22  ;;  %10738 = vmatpush3.bf16.msra.mxu1 %v11726_v13  ;;  %v11478_v2 = vpop.permute.xlu1 %11477 }
 0xca9   :  { %v12025_v52 = vpop.eup %12024  ;;  %v3177_v30 = vmul.f32 %v12023_v56, %v14178_v15  ;;  %10739 = vmatprep.subr.bf16.mxu1 %v11727_v20  ;;  %v11480_v49 = vunpack.i.h.bf16 %v11478_v2  ;;  %v11479_v35 = vunpack.i.l.bf16 %v11478_v2  ;;  %v17258_v56 = vld [vmem:[#allocation45_spill] sm:$0xff] }
 0xcaa   :  { %v3176_v43 = vmul.f32 %v12025_v52, %v14190_v17  ;;  %v11483_v36 = vpop.permute.xlu0 %11482  ;;  %v3624_v61 = vsel %vm216_vm0, %v17258_v56, %v11475_v19  ;;  %v17259_v52 = vld [vmem:[#allocation43_spill] sm:$0xff] }
 0xcab   :  { %v3186_v21 = vpack.c.bf16 %v3178_v12, %v3177_v30  ;;  %v11485_v46 = vunpack.i.h.bf16 %v11483_v36  ;;  %v11484_v5 = vunpack.i.l.bf16 %v11483_v36  ;;  %v3623_v12 = vsel %vm216_vm0, %v17259_v52, %v11474_v60 }
 0xcac   :  { %v3185_v31 = vpack.c.bf16 %v3176_v43, %v3175_v1  ;;  %10740 = vmatpush3.bf16.msra.mxu1 %v11727_v20  ;;  %v11488_v0 = vpop.permute.xlu1 %11487  ;;  %v17260_v43 = vld [vmem:[#allocation44_spill] sm:$0xff] }
 0xcad   :  { %10741 = vmatprep.subr.bf16.mxu1 %v11728_v44  ;;  %v11490_v63 = vunpack.i.h.bf16 %v11488_v0  ;;  %v11489_v27 = vunpack.i.l.bf16 %v11488_v0  ;;  %v3626_v30 = vsel %vm216_vm0, %v17260_v43, %v11480_v49 }
 0xcae   :  { %10733 = vmatprep.mubr.msk.bf16.mxu0 %vm906_vm2, %v3185_v31  ;;  %v17261_v31 = vld [vmem:[#allocation42_spill] sm:$0xff] }
 0xcaf   :  { %10734 = vmatmul.mubr.msk.bf16.vlgmr.msra.gmra.mrb[84].mxu0 %vm906_vm2, %v3186_v21  ;;  %v3625_v21 = vsel %vm216_vm0, %v17261_v31, %v11479_v35 }
 0xcb0   :  { %10742 = vmatpush3.bf16.msra.mxu1 %v11728_v44 }
 0xcb1   :  { %10743 = vmatprep.subr.bf16.mxu1 %v11729_v50 }
 0xcb4   :  { %10744 = vmatpush3.bf16.msra.mxu1 %v11729_v50  ;;  %v3641_v50 = vsel %vm906_vm2, %v3625_v21, %v11489_v27  ;;  %v17266_v21 = vld [vmem:[#allocation52_spill] sm:$0xff] }
 0xd33   :  { %v10711_v22 = vpop.f32.mrb[80].mxu1 }
 0xd34   :  { %v3233_v15 = vpop.f32.mrb[81].mxu1 }
 0xd35   :  { %v10712_v17 = vpop.f32.mrb[82].mxu1 }
 0xd36   :  { %v11496_v42 = vpack.i.bf16 %v10712_v17, %v10711_v22  ;;  %v3236_v32 = vpop.f32.mrb[83].mxu1  ;;  %v3642_v22 = vsel %vm906_vm2, %v3626_v30, %v11490_v63 }
 0xd37   :  { %v11491_v47 = vpack.i.bf16 %v3236_v32, %v3233_v15  ;;  %v3640_v32 = vsel %vm906_vm2, %v3624_v61, %v11485_v46 }
 0xd38   :  { %11497 = vrot.lane.b32.xlu1 %v11496_v42, %s12636_s23  ;;  %v3639_v42 = vsel %vm906_vm2, %v3623_v12, %v11484_v5 }
 0xd39   :  { %11492 = vrot.lane.b32.xlu0 %v11491_v47, %s12636_s23 }
 0xd3c   :  { %11507 = vrot.lane.b32.xlu1 %v17243_v39, %s12639_s9 }
 0xd3d   :  { %11502 = vrot.lane.b32.xlu0 %v17244_v53, %s12639_s9 }
 0xd40   :  { %11517 = vrot.lane.b32.xlu1 %v17245_v11, %s17235_s26 }
 0xd41   :  { %11512 = vrot.lane.b32.xlu0 %v17246_v33, %s17235_s26 }
 0xd70   :  { %v10719_v37 = vpop.f32.mrb[80].mxu0 }
 0xd71   :  { %v3294_v14 = vpop.f32.mrb[81].mxu0 }
 0xd72   :  { %v10720_v58 = vpop.f32.mrb[82].mxu0 }
 0xd73   :  { %v11526_v16 = vpack.i.bf16 %v10720_v58, %v10719_v37  ;;  %v3297_v9 = vpop.f32.mrb[83].mxu0 }
 0xd74   :  { %v11521_v51 = vpack.i.bf16 %v3297_v9, %v3294_v14 }
 0xd75   :  { %11527 = vrot.lane.b32.xlu1 %v11526_v16, %s12636_s23 }
 0xd76   :  { %11522 = vrot.lane.b32.xlu0 %v11521_v51, %s12636_s23 }
 0xd79   :  { %11537 = vrot.lane.b32.xlu1 %v17247_v26, %s12639_s9 }
 0xd7a   :  { %v10727_v48 = vpop.f32.mrb[84].mxu1  ;;  %11532 = vrot.lane.b32.xlu0 %v17248_v34, %s12639_s9 }
 0xd7b   :  { %v3355_v25 = vpop.f32.mrb[85].mxu1 }
 0xd7c   :  { %v10728_v23 = vpop.f32.mrb[86].mxu1 }
 0xd7d   :  { %v11556_v55 = vpack.i.bf16 %v10728_v23, %v10727_v48  ;;  %v3358_v8 = vpop.f32.mrb[87].mxu1  ;;  %11547 = vrot.lane.b32.xlu1 %v17249_v24, %s17235_s26  ;;  %v17262_v24 = vld [vmem:[#allocation48_spill] sm:$0xff] }
 0xd7e   :  { %v11551_v7 = vpack.i.bf16 %v3358_v8, %v3355_v25  ;;  %11542 = vrot.lane.b32.xlu0 %v17250_v29, %s17235_s26  ;;  %v17263_v29 = vld [vmem:[#allocation46_spill] sm:$0xff] }
 0xd81   :  { %11557 = vrot.lane.b32.xlu1 %v11556_v55, %s12636_s23 }
 0xd82   :  { %v10735_v28 = vpop.f32.mrb[84].mxu0  ;;  %11552 = vrot.lane.b32.xlu0 %v11551_v7, %s12636_s23 }
 0xd83   :  { %v3416_v45 = vpop.f32.mrb[85].mxu0 }
 0xd84   :  { %v10736_v57 = vpop.f32.mrb[86].mxu0 }
 0xd85   :  { %v11586_v10 = vpack.i.bf16 %v10736_v57, %v10735_v28  ;;  %v3419_v6 = vpop.f32.mrb[87].mxu0  ;;  %11567 = vrot.lane.b32.xlu1 %v17251_v4, %s12639_s9  ;;  %v17264_v57 = vld [vmem:[#allocation49_spill] sm:$0xff] }
 0xd86   :  { %v11581_v38 = vpack.i.bf16 %v3419_v6, %v3416_v45  ;;  %11562 = vrot.lane.b32.xlu0 %v17254_v18, %s12639_s9  ;;  %v17265_v6 = vld [vmem:[#allocation47_spill] sm:$0xff] }
 0xd89   :  { %11577 = vrot.lane.b32.xlu1 %v17255_v40, %s17235_s26 }
 0xd8a   :  { %11572 = vrot.lane.b32.xlu0 %v17257_v54, %s17235_s26 }
 0xd8d   :  { %11587 = vrot.lane.b32.xlu1 %v11586_v10, %s12636_s23 }
 0xd8e   :  { %11582 = vrot.lane.b32.xlu0 %v11581_v38, %s12636_s23 }
 0xdaa   :  { %v11498_v1 = vpop.permute.xlu1 %11497 }
 0xdab   :  { %v11500_v13 = vunpack.i.h.bf16 %v11498_v1  ;;  %v11499_v20 = vunpack.i.l.bf16 %v11498_v1  ;;  %v11493_v44 = vpop.permute.xlu0 %11492 }
 0xdac   :  { %v11495_v15 = vunpack.i.h.bf16 %v11493_v44  ;;  %v11494_v17 = vunpack.i.l.bf16 %v11493_v44 }
 0xdad   :  { %v3659_v47 = vsel %vm3655_vm3, %v3642_v22, %v11500_v13  ;;  %v3658_v39 = vsel %vm3655_vm3, %v3641_v50, %v11499_v20  ;;  %v17267_v20 = vld [vmem:[#allocation50_spill] sm:$0xff]  ;;  %v17268_v22 = vld [vmem:[#allocation53_spill] sm:$0xff] }
 0xdae   :  { %v3673_v53 = vpack.c.bf16 %v3659_v47, %v3658_v39  ;;  %v3656_v11 = vsel %vm3655_vm3, %v3639_v42, %v11494_v17  ;;  %v3657_v33 = vsel %vm3655_vm3, %v3640_v32, %v11495_v15  ;;  %v11508_v14 = vpop.permute.xlu1 %11507  ;;  %v17269_v17 = vld [vmem:[#allocation51_spill] sm:$0xff] }
 0xdaf   :  { %v3672_v37 = vpack.c.bf16 %v3657_v33, %v3656_v11  ;;  %v11503_v58 = vpop.permute.xlu0 %11502  ;;  %v11510_v9 = vunpack.i.h.bf16 %v11508_v14  ;;  %v11509_v51 = vunpack.i.l.bf16 %v11508_v14 }
 0xdb0   :  { %v11505_v48 = vunpack.i.h.bf16 %v11503_v58  ;;  %v11504_v34 = vunpack.i.l.bf16 %v11503_v58 }
 0xdb1   :  { %10745 = vmatprep.mubr.msk.bf16.mxu1 %vm484_vm1, %v3672_v37  ;;  %v3630_v7 = vsel %vm216_vm0, %v17262_v24, %v11510_v9  ;;  %v3629_v28 = vsel %vm216_vm0, %v17263_v29, %v11509_v51 }
 0xdb2   :  { %10746 = vmatmul.mubr.msk.bf16.vlgmr.msra.gmra.mrb[88].mxu1 %vm484_vm1, %v3673_v53  ;;  %v11518_v16 = vpop.permute.xlu1 %11517  ;;  %v3628_v10 = vsel %vm216_vm0, %v17264_v57, %v11505_v48  ;;  %v3627_v4 = vsel %vm216_vm0, %v17265_v6, %v11504_v34 }
 0xdb3   :  { %v11513_v26 = vpop.permute.xlu0 %11512  ;;  %v11520_v25 = vunpack.i.h.bf16 %v11518_v16  ;;  %v11519_v23 = vunpack.i.l.bf16 %v11518_v16 }
 0xdb4   :  { %v11515_v55 = vunpack.i.h.bf16 %v11513_v26  ;;  %v11514_v8 = vunpack.i.l.bf16 %v11513_v26 }
 0xdb5   :  { %v3645_v18 = vsel %vm906_vm2, %v3629_v28, %v11519_v23  ;;  %v3646_v40 = vsel %vm906_vm2, %v3630_v7, %v11520_v25 }
 0xdb6   :  { %v3643_v2 = vsel %vm906_vm2, %v3627_v4, %v11514_v8  ;;  %v3644_v59 = vsel %vm906_vm2, %v3628_v10, %v11515_v55  ;;  %v17270_v4 = vld [vmem:[#allocation56_spill] sm:$0xff] }
 0xde7   :  { %v11528_v45 = vpop.permute.xlu1 %11527 }
 0xde8   :  { %v11530_v38 = vunpack.i.h.bf16 %v11528_v45  ;;  %v11529_v41 = vunpack.i.l.bf16 %v11528_v45  ;;  %v11523_v62 = vpop.permute.xlu0 %11522 }
 0xde9   :  { %v11525_v3 = vunpack.i.h.bf16 %v11523_v62  ;;  %v11524_v54 = vunpack.i.l.bf16 %v11523_v62 }
 0xdea   :  { %v3663_v0 = vsel %vm3655_vm3, %v3646_v40, %v11530_v38  ;;  %v3662_v19 = vsel %vm3655_vm3, %v3645_v18, %v11529_v41  ;;  %v17271_v41 = vld [vmem:[#allocation54_spill] sm:$0xff]  ;;  %v17272_v40 = vld [vmem:[#allocation57_spill] sm:$0xff] }
 0xdeb   :  { %v3660_v60 = vsel %vm3655_vm3, %v3643_v2, %v11524_v54  ;;  %v3661_v36 = vsel %vm3655_vm3, %v3644_v59, %v11525_v3  ;;  %v11538_v49 = vpop.permute.xlu1 %11537  ;;  %v3675_v35 = vpack.c.bf16 %v3663_v0, %v3662_v19  ;;  %v17273_v54 = vld [vmem:[#allocation55_spill] sm:$0xff] }
 0xdec   :  { %v11533_v63 = vpop.permute.xlu0 %11532  ;;  %v3674_v27 = vpack.c.bf16 %v3661_v36, %v3660_v60  ;;  %v11540_v46 = vunpack.i.h.bf16 %v11538_v49  ;;  %v11539_v5 = vunpack.i.l.bf16 %v11538_v49 }
 0xded   :  { %v11535_v61 = vunpack.i.h.bf16 %v11533_v63  ;;  %v11534_v52 = vunpack.i.l.bf16 %v11533_v63 }
 0xdee   :  { %10749 = vmatprep.mubr.msk.bf16.mxu1 %vm484_vm1, %v3674_v27  ;;  %v3634_v13 = vsel %vm216_vm0, %v17266_v21, %v11540_v46  ;;  %v3633_v44 = vsel %vm216_vm0, %v17267_v20, %v11539_v5 }
 0xdef   :  { %v11548_v56 = vpop.permute.xlu1 %11547  ;;  %10750 = vmatmul.mubr.msk.bf16.gmra.mrb[92].mxu1 %vm484_vm1, %v3675_v35  ;;  %v3632_v15 = vsel %vm216_vm0, %v17268_v22, %v11535_v61  ;;  %v3631_v42 = vsel %vm216_vm0, %v17269_v17, %v11534_v52 }
 0xdf0   :  { %v11543_v12 = vpop.permute.xlu0 %11542  ;;  %v11550_v1 = vunpack.i.h.bf16 %v11548_v56  ;;  %v11549_v43 = vunpack.i.l.bf16 %v11548_v56 }
 0xdf1   :  { %v11545_v30 = vunpack.i.h.bf16 %v11543_v12  ;;  %v11544_v31 = vunpack.i.l.bf16 %v11543_v12 }
 0xdf2   :  { %v3649_v53 = vsel %vm906_vm2, %v3633_v44, %v11549_v43  ;;  %v3650_v11 = vsel %vm906_vm2, %v3634_v13, %v11550_v1  ;;  %v14371_v1 = vld [vmem:[%s17113_s7] ss:$0 sm:$0xff]  ;;  %v17274_v44 = vld [vmem:[#allocation26_spill] sm:$0xff] }
 0xdf3   :  { %v11558_v50 = vpop.permute.xlu1 %11557  ;;  %v3647_v14 = vsel %vm906_vm2, %v3631_v42, %v11544_v31  ;;  %v3648_v58 = vsel %vm906_vm2, %v3632_v15, %v11545_v30  ;;  %v17275_v15 = vld [vmem:[#allocation29_spill] sm:$0xff] }
 0xdf4   :  { %v11560_v32 = vunpack.i.h.bf16 %v11558_v50  ;;  %v11559_v47 = vunpack.i.l.bf16 %v11558_v50  ;;  %v11553_v39 = vpop.permute.xlu0 %11552 }
 0xdf5   :  { %v11555_v33 = vunpack.i.h.bf16 %v11553_v39  ;;  %v11554_v37 = vunpack.i.l.bf16 %v11553_v39 }
 0xdf6   :  { %v3667_v16 = vsel %vm3655_vm3, %v3650_v11, %v11560_v32  ;;  %v3666_v9 = vsel %vm3655_vm3, %v3649_v53, %v11559_v47  ;;  %v17276_v32 = vld [vmem:[#allocation27_spill] sm:$0xff]  ;;  %v17277_v11 = vld [vmem:[#allocation28_spill] sm:$0xff] }
 0xdf7   :  { %v3664_v51 = vsel %vm3655_vm3, %v3647_v14, %v11554_v37  ;;  %v3665_v26 = vsel %vm3655_vm3, %v3648_v58, %v11555_v33  ;;  %v11568_v48 = vpop.permute.xlu1 %11567  ;;  %v3677_v34 = vpack.c.bf16 %v3667_v16, %v3666_v9 }
 0xdf8   :  { %v11563_v25 = vpop.permute.xlu0 %11562  ;;  %v3676_v23 = vpack.c.bf16 %v3665_v26, %v3664_v51  ;;  %v11570_v55 = vunpack.i.h.bf16 %v11568_v48  ;;  %v11569_v8 = vunpack.i.l.bf16 %v11568_v48 }
 0xdf9   :  { %v11565_v7 = vunpack.i.h.bf16 %v11563_v25  ;;  %v11564_v29 = vunpack.i.l.bf16 %v11563_v25 }
 0xdfa   :  { %10753 = vmatprep.mubr.msk.bf16.mxu1 %vm484_vm1, %v3676_v23  ;;  %v3638_v38 = vsel %vm216_vm0, %v17270_v4, %v11570_v55  ;;  %v3637_v62 = vsel %vm216_vm0, %v17271_v41, %v11569_v8  ;;  %v17279_v8 = vld [vmem:[#allocation32_spill] sm:$0xff] }
 0xdfb   :  { %v11578_v24 = vpop.permute.xlu1 %11577  ;;  %10754 = vmatmul.mubr.msk.bf16.gmra.mrb[96].mxu1 %vm484_vm1, %v3677_v34  ;;  %v3636_v3 = vsel %vm216_vm0, %v17272_v40, %v11565_v7  ;;  %v3635_v2 = vsel %vm216_vm0, %v17273_v54, %v11564_v29  ;;  %v17278_v34 = vld [vmem:[#allocation30_spill] sm:$0xff]  ;;  %v17280_v7 = vld [vmem:[#allocation31_spill] sm:$0xff] }
 0xdfc   :  { %v11573_v28 = vpop.permute.xlu0 %11572  ;;  %v11580_v45 = vunpack.i.h.bf16 %v11578_v24  ;;  %v11579_v57 = vunpack.i.l.bf16 %v11578_v24  ;;  %v17282_v54 = vld [vmem:[#allocation34_spill] sm:$0xff] }
 0xdfd   :  { %v11575_v10 = vunpack.i.h.bf16 %v11573_v28  ;;  %v11574_v6 = vunpack.i.l.bf16 %v11573_v28 }
 0xdfe   :  { %v3653_v60 = vsel %vm906_vm2, %v3637_v62, %v11579_v57  ;;  %v3654_v36 = vsel %vm906_vm2, %v3638_v38, %v11580_v45  ;;  %v17281_v45 = vld [vmem:[#allocation33_spill] sm:$0xff] }
 0xdff   :  { %v11588_v18 = vpop.permute.xlu1 %11587  ;;  %v3651_v63 = vsel %vm906_vm2, %v3635_v2, %v11574_v6  ;;  %v3652_v27 = vsel %vm906_vm2, %v3636_v3, %v11575_v10 }
 0xe00   :  { %v11590_v59 = vunpack.i.h.bf16 %v11588_v18  ;;  %v11589_v0 = vunpack.i.l.bf16 %v11588_v18  ;;  %v11583_v19 = vpop.permute.xlu0 %11582 }
 0xe01   :  { %v11585_v49 = vunpack.i.h.bf16 %v11583_v19  ;;  %v11584_v35 = vunpack.i.l.bf16 %v11583_v19  ;;  %v17283_v19 = vld [vmem:[#allocation36_spill] sm:$0xff] }
 0xe02   :  { %v3670_v46 = vsel %vm3655_vm3, %v3653_v60, %v11589_v0  ;;  %v3671_v5 = vsel %vm3655_vm3, %v3654_v36, %v11590_v59  ;;  %v17284_v36 = vld [vmem:[#allocation35_spill] sm:$0xff] }
 0xe03   :  { %v3668_v56 = vsel %vm3655_vm3, %v3651_v63, %v11584_v35  ;;  %v3669_v61 = vsel %vm3655_vm3, %v3652_v27, %v11585_v49  ;;  %v3679_v52 = vpack.c.bf16 %v3671_v5, %v3670_v46  ;;  %v17285_v63 = vld [vmem:[#allocation37_spill] sm:$0xff] }
 0xe04   :  { %v3678_v12 = vpack.c.bf16 %v3669_v61, %v3668_v56 }
 0xe06   :  { %10757 = vmatprep.mubr.msk.bf16.mxu1 %vm484_vm1, %v3678_v12 }
 0xe07   :  { %10758 = vmatmul.mubr.msk.bf16.gmra.mrb[100].mxu1 %vm484_vm1, %v3679_v52 }
 0xe85   :  { %v10747_v43 = vpop.f32.mrb[88].mxu1 }
 0xe86   :  { %v3775_v30 = vpop.f32.mrb[89].mxu1  ;;  %v3784_v31 = vadd.f32 %v10747_v43, %v14371_v1 }
 0xe87   :  { %v3776_v21 = vadd.f32 %v14371_v1, %v3775_v30  ;;  %v10748_v13 = vpop.f32.mrb[90].mxu1 }
 0xe88   :  { %v3778_v20 = vpop.f32.mrb[91].mxu1  ;;  %v14380_v17 = vadd.f32 %v3784_v31, %v17275_v15  ;;  %v3787_v42 = vadd.f32 %v10748_v13, %v14371_v1 }
 0xe89   :  { %v14376_v50 = vadd.f32 %v3776_v21, %v17274_v44  ;;  %v3779_v22 = vadd.f32 %v14371_v1, %v3778_v20  ;;  %v17286_v21 = vld [vmem:[#allocation38_spill] sm:$0xff] }
 0xe8a   :  { %v14391_v33 = vadd.f32 %v3787_v42, %v17277_v11  ;;  %v3862_v37 = vsel %vm484_vm1, %v14380_v17, 0.0  ;;  %v17288_v42 = vld [vmem:[#allocation39_spill] sm:$0xff] }
 0xe8b   :  { %v14384_v47 = vadd.f32 %v3779_v22, %v17276_v32  ;;  %v3856_v39 = vsel %vm484_vm1, %v14376_v50, 0.0  ;;  %v17287_v22 = vld [vmem:[#allocation40_spill] sm:$0xff] }
 0xe8c   :  { %3857 = vadd.xlane.f32.xlu0 %v3856_v39  ;;  %v3865_v14 = vsel %vm484_vm1, %v14391_v33, 0.0 }
 0xe8d   :  { %v3859_v53 = vsel %vm484_vm1, %v14384_v47, 0.0 }
 0xe8e   :  { %3860 = vadd.xlane.f32.xlu1 %v3859_v53  ;;  %v17289_v53 = vld [vmem:[#allocation41_spill] sm:$0xff] }
 0xe90   :  { %3863 = vadd.xlane.f32.xlu0 %v3862_v37 }
 0xe94   :  { %3866 = vadd.xlane.f32.xlu0 %v3865_v14 }
 0xec2   :  { %v10751_v58 = vpop.f32.mrb[92].mxu1 }
 0xec3   :  { %v3791_v16 = vpop.f32.mrb[93].mxu1  ;;  %v3800_v9 = vadd.f32 %v10751_v58, %v14371_v1 }
 0xec4   :  { %v3792_v51 = vadd.f32 %v14371_v1, %v3791_v16  ;;  %v10752_v26 = vpop.f32.mrb[94].mxu1 }
 0xec5   :  { %v3794_v48 = vpop.f32.mrb[95].mxu1  ;;  %v3803_v23 = vadd.f32 %v10752_v26, %v14371_v1  ;;  %v14405_v24 = vadd.f32 %v3800_v9, %v17279_v8 }
 0xec6   :  { %v14400_v25 = vadd.f32 %v3792_v51, %v17278_v34  ;;  %v3795_v55 = vadd.f32 %v14371_v1, %v3794_v48 }
 0xec7   :  { %v14413_v57 = vadd.f32 %v3803_v23, %v17281_v45  ;;  %v3874_v6 = vsel %vm484_vm1, %v14405_v24, 0.0 }
 0xec8   :  { %v14408_v29 = vadd.f32 %v3795_v55, %v17280_v7  ;;  %v3868_v28 = vsel %vm484_vm1, %v14400_v25, 0.0 }
 0xec9   :  { %3869 = vadd.xlane.f32.xlu1 %v3868_v28  ;;  %v3877_v38 = vsel %vm484_vm1, %v14413_v57, 0.0 }
 0xeca   :  { %v3871_v10 = vsel %vm484_vm1, %v14408_v29, 0.0 }
 0xecb   :  { %3872 = vadd.xlane.f32.xlu0 %v3871_v10 }
 0xecd   :  { %3875 = vadd.xlane.f32.xlu1 %v3874_v6 }
 0xece   :  { %v10755_v4 = vpop.f32.mrb[96].mxu1 }
 0xecf   :  { %v3807_v41 = vpop.f32.mrb[97].mxu1  ;;  %3878 = vadd.xlane.f32.xlu0 %v3877_v38  ;;  %v3816_v62 = vadd.f32 %v10755_v4, %v14371_v1 }
 0xed0   :  { %v3808_v18 = vadd.f32 %v14371_v1, %v3807_v41  ;;  %v10756_v40 = vpop.f32.mrb[98].mxu1  ;;  %v11730_v41 = vld [vmem:[#allocation14] sm:$0xff]  }
 0xed1   :  { %v3810_v3 = vpop.f32.mrb[99].mxu1  ;;  %v3819_v59 = vadd.f32 %v10756_v40, %v14371_v1  ;;  %v14429_v60 = vadd.f32 %v3816_v62, %v17283_v19  ;;  %10761 = vmatprep.subr.bf16.mxu0 %v11730_v41  ;;  %v11731_v62 = vld [vmem:[#allocation14 + $0x8] sm:$0xff]  }
 0xed2   :  { %v14424_v2 = vadd.f32 %v3808_v18, %v17282_v54  ;;  %v3811_v0 = vadd.f32 %v14371_v1, %v3810_v3  ;;  %10762 = vmatpush3.bf16.msra.mxu0 %v11730_v41  ;;  %v11732_v18 = vld [vmem:[#allocation14 + $0x10] sm:$0xff]  }
 0xed3   :  { %v14437_v27 = vadd.f32 %v3819_v59, %v17285_v63  ;;  %v3886_v5 = vsel %vm484_vm1, %v14429_v60, 0.0  ;;  %10763 = vmatprep.subr.bf16.mxu0 %v11731_v62 }
 0xed4   :  { %v14432_v49 = vadd.f32 %v3811_v0, %v17284_v36  ;;  %v3880_v35 = vsel %vm484_vm1, %v14424_v2, 0.0 }
 0xed5   :  { %3881 = vadd.xlane.f32.xlu1 %v3880_v35  ;;  %v3889_v61 = vsel %vm484_vm1, %v14437_v27, 0.0 }
 0xed6   :  { %v3883_v46 = vsel %vm484_vm1, %v14432_v49, 0.0  ;;  %10764 = vmatpush3.bf16.msra.mxu0 %v11731_v62 }
 0xed7   :  { %3884 = vadd.xlane.f32.xlu0 %v3883_v46  ;;  %10765 = vmatprep.subr.bf16.mxu0 %v11732_v18 }
 0xed9   :  { %3887 = vadd.xlane.f32.xlu1 %v3886_v5 }
 0xeda   :  { %v10759_v56 = vpop.f32.mrb[100].mxu1  ;;  %10766 = vmatpush3.bf16.msra.mxu0 %v11732_v18 }
 0xedb   :  { %v3823_v52 = vpop.f32.mrb[101].mxu1  ;;  %3890 = vadd.xlane.f32.xlu0 %v3889_v61  ;;  %v3832_v12 = vadd.f32 %v10759_v56, %v14371_v1 }
 0xedc   :  { %v3824_v43 = vadd.f32 %v14371_v1, %v3823_v52  ;;  %v10760_v30 = vpop.f32.mrb[102].mxu1 }
 0xedd   :  { %v3826_v31 = vpop.f32.mrb[103].mxu1  ;;  %v3835_v20 = vadd.f32 %v10760_v30, %v14371_v1  ;;  %v14453_v15 = vadd.f32 %v3832_v12, %v17287_v22 }
 0xede   :  { %v14448_v13 = vadd.f32 %v3824_v43, %v17286_v21  ;;  %v3827_v44 = vadd.f32 %v14371_v1, %v3826_v31 }
 0xedf   :  { %v14461_v11 = vadd.f32 %v3835_v20, %v17289_v53  ;;  %v3898_v1 = vsel %vm484_vm1, %v14453_v15, 0.0 }
 0xee0   :  { %v14456_v32 = vadd.f32 %v3827_v44, %v17288_v42  ;;  %v3892_v39 = vsel %vm484_vm1, %v14448_v13, 0.0 }
 0xee1   :  { %3893 = vadd.xlane.f32.xlu1 %v3892_v39  ;;  %v3901_v14 = vsel %vm484_vm1, %v14461_v11, 0.0 }
 0xee2   :  { %v3895_v37 = vsel %vm484_vm1, %v14456_v32, 0.0 }
 0xee3   :  { %3896 = vadd.xlane.f32.xlu0 %v3895_v37 }
 0xee5   :  { %3899 = vadd.xlane.f32.xlu1 %v3898_v1 }
 0xee7   :  { %3902 = vadd.xlane.f32.xlu0 %v3901_v14 }
 0xf19   :  { %v3858_v58 = vpop.xlane.xlu0 %3857 }
 0xf1a   :  { %v3905_v16 = vmul.f32 0.015625, %v3858_v58 }
 0xf1b   :  { %v3861_v9 = vpop.xlane.xlu1 %3860 }
 0xf1c   :  { %v14470_v51 = vsub.f32 %v14376_v50, %v3905_v16  ;;  %v3906_v26 = vmul.f32 0.015625, %v3861_v9 }
 0xf1d   :  { %v3864_v48 = vpop.xlane.xlu0 %3863 }
 0xf1e   :  { %v14473_v34 = vsub.f32 %v14384_v47, %v3906_v26  ;;  %v3907_v23 = vmul.f32 0.015625, %v3864_v48  ;;  %v3937_v55 = vmul.f32 %v14470_v51, %v14470_v51 }
 0xf20   :  { %v14478_v8 = vsub.f32 %v14380_v17, %v3907_v23  ;;  %v3953_v7 = vsel %vm484_vm1, %v3937_v55, 0.0  ;;  %v3938_v28 = vmul.f32 %v14473_v34, %v14473_v34 }
 0xf21   :  { %3954 = vadd.xlane.f32.xlu1 %v3953_v7  ;;  %v3867_v50 = vpop.xlane.xlu0 %3866 }
 0xf22   :  { %v3908_v45 = vmul.f32 0.015625, %v3867_v50  ;;  %v3956_v10 = vsel %vm484_vm1, %v3938_v28, 0.0  ;;  %v3939_v47 = vmul.f32 %v14478_v8, %v14478_v8 }
 0xf23   :  { %3957 = vadd.xlane.f32.xlu0 %v3956_v10 }
 0xf24   :  { %v14487_v6 = vsub.f32 %v14391_v33, %v3908_v45  ;;  %v3959_v17 = vsel %vm484_vm1, %v3939_v47, 0.0  ;;  %v11733_v33 = vld [vmem:[#allocation14 + $0x18] sm:$0xff]  }
 0xf25   :  { %3960 = vadd.xlane.f32.xlu1 %v3959_v17  ;;  %10767 = vmatprep.subr.bf16.mxu0 %v11733_v33 }
 0xf26   :  { %v3940_v4 = vmul.f32 %v14487_v6, %v14487_v6  ;;  %10768 = vmatpush3.bf16.msra.mxu0 %v11733_v33 }
 0xf28   :  { %v3962_v38 = vsel %vm484_vm1, %v3940_v4, 0.0 }
 0xf29   :  { %3963 = vadd.xlane.f32.xlu0 %v3962_v38 }
 0xf56   :  { %v3870_v40 = vpop.xlane.xlu1 %3869 }
 0xf57   :  { %v3909_v3 = vmul.f32 0.015625, %v3870_v40 }
 0xf58   :  { %v3873_v54 = vpop.xlane.xlu0 %3872 }
 0xf59   :  { %v14494_v59 = vsub.f32 %v14400_v25, %v3909_v3  ;;  %v3910_v0 = vmul.f32 0.015625, %v3873_v54  ;;  %v11735_v3 = vld [vmem:[%s17117_s11 + $0x8] sm:$0xff]   ;;  %v11736_v54 = vld [vmem:[%s17117_s11 + $0x10] sm:$0xff]  }
 0xf5a   :  { %v3876_v19 = vpop.xlane.xlu1 %3875 }
 0xf5b   :  { %v14497_v36 = vsub.f32 %v14408_v29, %v3910_v0  ;;  %v3911_v35 = vmul.f32 0.015625, %v3876_v19  ;;  %v3941_v63 = vmul.f32 %v14494_v59, %v14494_v59  ;;  %v11737_v0 = vld [vmem:[%s17117_s11 + $0x18] sm:$0xff]   ;;  %v11738_v19 = vld [vmem:[%s17117_s11 + $0x20] sm:$0xff]  }
 0xf5c   :  { %v3879_v46 = vpop.xlane.xlu0 %3878 }
 0xf5d   :  { %v14502_v5 = vsub.f32 %v14405_v24, %v3911_v35  ;;  %v3912_v56 = vmul.f32 0.015625, %v3879_v46  ;;  %v3965_v61 = vsel %vm484_vm1, %v3941_v63, 0.0  ;;  %v3942_v25 = vmul.f32 %v14497_v36, %v14497_v36 }
 0xf5e   :  { %3966 = vadd.xlane.f32.xlu1 %v3965_v61 }
 0xf5f   :  { %v14508_v52 = vsub.f32 %v14413_v57, %v3912_v56  ;;  %v3968_v29 = vsel %vm484_vm1, %v3942_v25, 0.0  ;;  %v3943_v12 = vmul.f32 %v14502_v5, %v14502_v5  ;;  %v11739_v25 = vld [vmem:[%s17117_s11 + $0x28] sm:$0xff]  }
 0xf60   :  { %3969 = vadd.xlane.f32.xlu0 %v3968_v29 }
 0xf61   :  { %v3971_v43 = vsel %vm484_vm1, %v3943_v12, 0.0  ;;  %v3944_v24 = vmul.f32 %v14508_v52, %v14508_v52 }
 0xf62   :  { %v3882_v30 = vpop.xlane.xlu1 %3881  ;;  %3972 = vadd.xlane.f32.xlu1 %v3971_v43 }
 0xf63   :  { %v3913_v31 = vmul.f32 0.015625, %v3882_v30  ;;  %v3974_v21 = vsel %vm484_vm1, %v3944_v24, 0.0 }
 0xf64   :  { %3975 = vadd.xlane.f32.xlu0 %v3974_v21  ;;  %v3885_v20 = vpop.xlane.xlu0 %3884 }
 0xf65   :  { %v14518_v57 = vsub.f32 %v14424_v2, %v3913_v31  ;;  %v3914_v44 = vmul.f32 0.015625, %v3885_v20 }
 0xf66   :  { %v3888_v22 = vpop.xlane.xlu1 %3887 }
 0xf67   :  { %v14521_v42 = vsub.f32 %v14432_v49, %v3914_v44  ;;  %v3915_v39 = vmul.f32 0.015625, %v3888_v22  ;;  %v3945_v53 = vmul.f32 %v14518_v57, %v14518_v57  ;;  %v14583_v44 = vld [vmem:[#allocation12] ss:$0 sm:$0xff] }
 0xf68   :  { %v3891_v37 = vpop.xlane.xlu0 %3890 }
 0xf69   :  { %v14526_v1 = vsub.f32 %v14429_v60, %v3915_v39  ;;  %v3916_v14 = vmul.f32 0.015625, %v3891_v37  ;;  %v3977_v58 = vsel %vm484_vm1, %v3945_v53, 0.0  ;;  %v3946_v2 = vmul.f32 %v14521_v42, %v14521_v42 }
 0xf6a   :  { %3978 = vadd.xlane.f32.xlu1 %v3977_v58  ;;  %v14588_v58 = vld [vmem:[#allocation12 + $0x1] ss:$0 sm:$0xff] }
 0xf6b   :  { %v14532_v16 = vsub.f32 %v14437_v27, %v3916_v14  ;;  %v3980_v49 = vsel %vm484_vm1, %v3946_v2, 0.0  ;;  %v3947_v9 = vmul.f32 %v14526_v1, %v14526_v1 }
 0xf6c   :  { %3981 = vadd.xlane.f32.xlu0 %v3980_v49 }
 0xf6d   :  { %v3983_v26 = vsel %vm484_vm1, %v3947_v9, 0.0  ;;  %v3948_v60 = vmul.f32 %v14532_v16, %v14532_v16 }
 0xf6e   :  { %v3894_v48 = vpop.xlane.xlu1 %3893  ;;  %3984 = vadd.xlane.f32.xlu1 %v3983_v26 }
 0xf6f   :  { %v3917_v23 = vmul.f32 0.015625, %v3894_v48  ;;  %v3986_v55 = vsel %vm484_vm1, %v3948_v60, 0.0 }
 0xf70   :  { %3987 = vadd.xlane.f32.xlu0 %v3986_v55  ;;  %v3897_v7 = vpop.xlane.xlu0 %3896 }
 0xf71   :  { %v14542_v27 = vsub.f32 %v14448_v13, %v3917_v23  ;;  %v3918_v28 = vmul.f32 0.015625, %v3897_v7 }
 0xf72   :  { %v3900_v50 = vpop.xlane.xlu1 %3899 }
 0xf73   :  { %v14545_v45 = vsub.f32 %v14456_v32, %v3918_v28  ;;  %v3919_v10 = vmul.f32 0.015625, %v3900_v50  ;;  %v3949_v47 = vmul.f32 %v14542_v27, %v14542_v27 }
 0xf74   :  { %v3903_v17 = vpop.xlane.xlu0 %3902 }
 0xf75   :  { %v14550_v4 = vsub.f32 %v14453_v15, %v3919_v10  ;;  %v3920_v38 = vmul.f32 0.015625, %v3903_v17  ;;  %v3989_v41 = vsel %vm484_vm1, %v3949_v47, 0.0  ;;  %v3950_v13 = vmul.f32 %v14545_v45, %v14545_v45 }
 0xf76   :  { %3990 = vadd.xlane.f32.xlu1 %v3989_v41 }
 0xf77   :  { %v14556_v62 = vsub.f32 %v14461_v11, %v3920_v38  ;;  %v3992_v32 = vsel %vm484_vm1, %v3950_v13, 0.0  ;;  %v3951_v18 = vmul.f32 %v14550_v4, %v14550_v4  ;;  %v11734_v11 = vld [vmem:[%s17117_s11] sm:$0xff]  }
 0xf78   :  { %3993 = vadd.xlane.f32.xlu0 %v3992_v32  ;;  %10785 = vmatprep.subr.bf16.mxu1 %v11734_v11 }
 0xf79   :  { %v3995_v33 = vsel %vm484_vm1, %v3951_v18, 0.0  ;;  %v3952_v15 = vmul.f32 %v14556_v62, %v14556_v62  ;;  %10786 = vmatpush3.bf16.msra.mxu1 %v11734_v11 }
 0xf7a   :  { %3996 = vadd.xlane.f32.xlu1 %v3995_v33  ;;  %10787 = vmatprep.subr.bf16.mxu1 %v11735_v3 }
 0xf7b   :  { %v3998_v40 = vsel %vm484_vm1, %v3952_v15, 0.0 }
 0xf7c   :  { %3999 = vadd.xlane.f32.xlu0 %v3998_v40 }
 0xf7d   :  { %10788 = vmatpush3.bf16.msra.mxu1 %v11735_v3 }
 0xf7e   :  { %10789 = vmatprep.subr.bf16.mxu1 %v11736_v54 }
 0xf81   :  { %10790 = vmatpush3.bf16.msra.mxu1 %v11736_v54 }
 0xf82   :  { %10791 = vmatprep.subr.bf16.mxu1 %v11737_v0 }
 0xf85   :  { %10792 = vmatpush3.bf16.msra.mxu1 %v11737_v0 }
 0xf86   :  { %10793 = vmatprep.subr.bf16.mxu1 %v11738_v19 }
 0xf89   :  { %10794 = vmatpush3.bf16.msra.mxu1 %v11738_v19 }
 0xf8a   :  { %10795 = vmatprep.subr.bf16.mxu1 %v11739_v25 }
 0xf8d   :  { %10796 = vmatpush3.bf16.msra.mxu1 %v11739_v25 }
 0xfae   :  { %v3955_v35 = vpop.xlane.xlu1 %3954 }
 0xfaf   :  { %v4001_v63 = vmul.f32 0.015625, %v3955_v35 }
 0xfb0   :  { %v3958_v46 = vpop.xlane.xlu0 %3957 }
 0xfb1   :  { %v4017_v56 = vadd.f32 1e-05, %v4001_v63  ;;  %v4002_v61 = vmul.f32 0.015625, %v3958_v46 }
 0xfb2   :  { %v3961_v29 = vpop.xlane.xlu1 %3960 }
 0xfb3   :  { %12026 = vrsqrt.f32 %v4017_v56  ;;  %v4018_v12 = vadd.f32 1e-05, %v4002_v61  ;;  %v4003_v43 = vmul.f32 0.015625, %v3961_v29 }
 0xfb5   :  { %12028 = vrsqrt.f32 %v4018_v12  ;;  %v4019_v24 = vadd.f32 1e-05, %v4003_v43 }
 0xfb6   :  { %v3964_v30 = vpop.xlane.xlu0 %3963 }
 0xfb7   :  { %12030 = vrsqrt.f32 %v4019_v24  ;;  %v4004_v31 = vmul.f32 0.015625, %v3964_v30 }
 0xfb9   :  { %v4020_v21 = vadd.f32 1e-05, %v4004_v31 }
 0xfbb   :  { %12032 = vrsqrt.f32 %v4020_v21 }
 0xfbd   :  { %v12027_v20 = vpop.eup %12026 }
 0xfbe   :  { %v4049_v22 = vmul.f32 %v12027_v20, %v14470_v51 }
 0xfbf   :  { %v12029_v39 = vpop.eup %12028 }
 0xfc0   :  { %v4050_v53 = vmul.f32 %v12029_v39, %v14473_v34  ;;  %v4069_v37 = vmul.f32 %v14583_v44, %v4049_v22 }
 0xfc1   :  { %v12031_v14 = vpop.eup %12030 }
 0xfc2   :  { %v4051_v2 = vmul.f32 %v12031_v14, %v14478_v8  ;;  %v4070_v49 = vmul.f32 %v14583_v44, %v4050_v53  ;;  %v14593_v9 = vadd.f32 %v14588_v58, %v4069_v37 }
 0xfc4   :  { %v14596_v26 = vadd.f32 %v14588_v58, %v4070_v49  ;;  %v4071_v51 = vmul.f32 %v14583_v44, %v4051_v2 }
 0xfc5   :  { %v12033_v60 = vpop.eup %12032 }
 0xfc6   :  { %v4052_v34 = vmul.f32 %v12033_v60, %v14487_v6  ;;  %v4105_v48 = vpack.c.bf16 %v14596_v26, %v14593_v9  ;;  %v14605_v8 = vadd.f32 %v14588_v58, %v4071_v51 }
 0xfc8   :  { %v4072_v23 = vmul.f32 %v14583_v44, %v4052_v34  ;;  %10769 = vmatprep.mubr.msk.bf16.mxu0 %vm484_vm1, %v4105_v48 }
 0xfca   :  { %v14608_v55 = vadd.f32 %v14588_v58, %v4072_v23 }
 0xfcc   :  { %v4106_v7 = vpack.c.bf16 %v14608_v55, %v14605_v8 }
 0xfce   :  { %10770 = vmatmul.mubr.msk.bf16.vlgmr.msra.gmra.mrb[88].mxu0 %vm484_vm1, %v4106_v7 }
 0xfeb   :  { %v3967_v28 = vpop.xlane.xlu1 %3966 }
 0xfec   :  { %v4005_v6 = vmul.f32 0.015625, %v3967_v28 }
 0xfed   :  { %v3970_v50 = vpop.xlane.xlu0 %3969 }
 0xfee   :  { %v4021_v10 = vadd.f32 1e-05, %v4005_v6  ;;  %v4006_v47 = vmul.f32 0.015625, %v3970_v50 }
 0xfef   :  { %v3973_v17 = vpop.xlane.xlu1 %3972 }
 0xff0   :  { %12034 = vrsqrt.f32 %v4021_v10  ;;  %v4022_v38 = vadd.f32 1e-05, %v4006_v47  ;;  %v4007_v41 = vmul.f32 0.015625, %v3973_v17 }
 0xff1   :  { %v3976_v13 = vpop.xlane.xlu0 %3975 }
 0xff2   :  { %12036 = vrsqrt.f32 %v4022_v38  ;;  %v4023_v32 = vadd.f32 1e-05, %v4007_v41  ;;  %v4008_v18 = vmul.f32 0.015625, %v3976_v13 }
 0xff4   :  { %12038 = vrsqrt.f32 %v4023_v32  ;;  %v4024_v33 = vadd.f32 1e-05, %v4008_v18 }
 0xff6   :  { %12040 = vrsqrt.f32 %v4024_v33 }
 0xff7   :  { %v3979_v15 = vpop.xlane.xlu1 %3978 }
 0xff8   :  { %v4009_v40 = vmul.f32 0.015625, %v3979_v15 }
 0xff9   :  { %v3982_v11 = vpop.xlane.xlu0 %3981 }
 0xffa   :  { %v12035_v3 = vpop.eup %12034  ;;  %v4025_v54 = vadd.f32 1e-05, %v4009_v40  ;;  %v4010_v0 = vmul.f32 0.015625, %v3982_v11 }
 0xffb   :  { %v3985_v19 = vpop.xlane.xlu1 %3984  ;;  %v4053_v35 = vmul.f32 %v12035_v3, %v14494_v59 }
 0xffc   :  { %v12037_v63 = vpop.eup %12036  ;;  %12042 = vrsqrt.f32 %v4025_v54  ;;  %v4026_v46 = vadd.f32 1e-05, %v4010_v0  ;;  %v4011_v56 = vmul.f32 0.015625, %v3985_v19 }
 0xffd   :  { %v3988_v61 = vpop.xlane.xlu0 %3987  ;;  %v4054_v25 = vmul.f32 %v12037_v63, %v14497_v36  ;;  %v4073_v29 = vmul.f32 %v14583_v44, %v4053_v35 }
 0xffe   :  { %v12039_v12 = vpop.eup %12038  ;;  %12044 = vrsqrt.f32 %v4026_v46  ;;  %v4027_v43 = vadd.f32 1e-05, %v4011_v56  ;;  %v4012_v24 = vmul.f32 0.015625, %v3988_v61 }
 0xfff   :  { %v4074_v30 = vmul.f32 %v14583_v44, %v4054_v25  ;;  %v4055_v31 = vmul.f32 %v12039_v12, %v14502_v5  ;;  %v14619_v20 = vadd.f32 %v14588_v58, %v4073_v29 }
0x1000   :  { %v12041_v21 = vpop.eup %12040  ;;  %12046 = vrsqrt.f32 %v4027_v43  ;;  %v4028_v59 = vadd.f32 1e-05, %v4012_v24 }
0x1001   :  { %v14622_v22 = vadd.f32 %v14588_v58, %v4074_v30  ;;  %v4056_v36 = vmul.f32 %v12041_v21, %v14508_v52  ;;  %v4075_v39 = vmul.f32 %v14583_v44, %v4055_v31 }
0x1002   :  { %12048 = vrsqrt.f32 %v4028_v59 }
0x1003   :  { %v3991_v53 = vpop.xlane.xlu1 %3990  ;;  %v4107_v37 = vpack.c.bf16 %v14622_v22, %v14619_v20  ;;  %v4076_v5 = vmul.f32 %v14583_v44, %v4056_v36  ;;  %v14631_v49 = vadd.f32 %v14588_v58, %v4075_v39  ;;  %v11740_v36 = vld [vmem:[%s17117_s11 + $0x30] sm:$0xff]  }
0x1004   :  { %v4013_v14 = vmul.f32 0.015625, %v3991_v53  ;;  %10797 = vmatprep.subr.bf16.mxu1 %v11740_v36 }
0x1005   :  { %10773 = vmatprep.mubr.msk.bf16.mxu0 %vm484_vm1, %v4107_v37  ;;  %v3994_v2 = vpop.xlane.xlu0 %3993  ;;  %v14634_v60 = vadd.f32 %v14588_v58, %v4076_v5  ;;  %10798 = vmatpush3.bf16.msra.mxu1 %v11740_v36 }
0x1006   :  { %v12043_v52 = vpop.eup %12042  ;;  %v4029_v51 = vadd.f32 1e-05, %v4013_v14  ;;  %v4014_v34 = vmul.f32 0.015625, %v3994_v2 }
0x1007   :  { %v3997_v48 = vpop.xlane.xlu1 %3996  ;;  %v4108_v23 = vpack.c.bf16 %v14634_v60, %v14631_v49  ;;  %v4057_v7 = vmul.f32 %v12043_v52, %v14518_v57 }
0x1008   :  { %v12045_v28 = vpop.eup %12044  ;;  %12050 = vrsqrt.f32 %v4029_v51  ;;  %v4030_v6 = vadd.f32 1e-05, %v4014_v34  ;;  %v4015_v50 = vmul.f32 0.015625, %v3997_v48 }
0x1009   :  { %10774 = vmatmul.mubr.msk.bf16.gmra.mrb[92].mxu0 %vm484_vm1, %v4108_v23  ;;  %v4000_v10 = vpop.xlane.xlu0 %3999  ;;  %v4058_v47 = vmul.f32 %v12045_v28, %v14521_v42  ;;  %v4077_v17 = vmul.f32 %v14583_v44, %v4057_v7 }
0x100a   :  { %v12047_v38 = vpop.eup %12046  ;;  %12052 = vrsqrt.f32 %v4030_v6  ;;  %v4031_v41 = vadd.f32 1e-05, %v4015_v50  ;;  %v4016_v13 = vmul.f32 0.015625, %v4000_v10 }
0x100b   :  { %v4078_v32 = vmul.f32 %v14583_v44, %v4058_v47  ;;  %v4059_v18 = vmul.f32 %v12047_v38, %v14526_v1  ;;  %v14645_v15 = vadd.f32 %v14588_v58, %v4077_v17 }
0x100c   :  { %v12049_v57 = vpop.eup %12048  ;;  %12054 = vrsqrt.f32 %v4031_v41  ;;  %v4032_v33 = vadd.f32 1e-05, %v4016_v13 }
0x100d   :  { %v14648_v40 = vadd.f32 %v14588_v58, %v4078_v32  ;;  %v4060_v42 = vmul.f32 %v12049_v57, %v14532_v16  ;;  %v4079_v11 = vmul.f32 %v14583_v44, %v4059_v18 }
0x100e   :  { %12056 = vrsqrt.f32 %v4032_v33 }
0x100f   :  { %v4109_v3 = vpack.c.bf16 %v14648_v40, %v14645_v15  ;;  %v4080_v54 = vmul.f32 %v14583_v44, %v4060_v42  ;;  %v14657_v1 = vadd.f32 %v14588_v58, %v4079_v11 }
0x1011   :  { %10777 = vmatprep.mubr.msk.bf16.mxu0 %vm484_vm1, %v4109_v3  ;;  %v14660_v0 = vadd.f32 %v14588_v58, %v4080_v54 }
0x1012   :  { %v12051_v19 = vpop.eup %12050 }
0x1013   :  { %v4110_v16 = vpack.c.bf16 %v14660_v0, %v14657_v1  ;;  %v4061_v35 = vmul.f32 %v12051_v19, %v14542_v27 }
0x1014   :  { %v12053_v63 = vpop.eup %12052 }
0x1015   :  { %10778 = vmatmul.mubr.msk.bf16.gmra.mrb[96].mxu0 %vm484_vm1, %v4110_v16  ;;  %v4062_v46 = vmul.f32 %v12053_v63, %v14545_v45  ;;  %v4081_v56 = vmul.f32 %v14583_v44, %v4061_v35 }
0x1016   :  { %v12055_v61 = vpop.eup %12054 }
0x1017   :  { %v4082_v25 = vmul.f32 %v14583_v44, %v4062_v46  ;;  %v4063_v29 = vmul.f32 %v12055_v61, %v14550_v4  ;;  %v14671_v43 = vadd.f32 %v14588_v58, %v4081_v56 }
0x1018   :  { %v12057_v12 = vpop.eup %12056 }
0x1019   :  { %v14674_v24 = vadd.f32 %v14588_v58, %v4082_v25  ;;  %v4064_v27 = vmul.f32 %v12057_v12, %v14556_v62  ;;  %v4083_v30 = vmul.f32 %v14583_v44, %v4063_v29  ;;  %v17290_v62 = vmov 0  }
0x101b   :  { %v4111_v45 = vpack.c.bf16 %v14674_v24, %v14671_v43  ;;  %v4084_v31 = vmul.f32 %v14583_v44, %v4064_v27  ;;  %v14683_v4 = vadd.f32 %v14588_v58, %v4083_v30  ;;  %v11741_v44 = vld [vmem:[%s17117_s11 + $0x38] sm:$0xff]  }
0x101c   :  { %10799 = vmatprep.subr.bf16.mxu1 %v11741_v44 }
0x101d   :  { %10781 = vmatprep.mubr.msk.bf16.mxu0 %vm484_vm1, %v4111_v45  ;;  %v14686_v21 = vadd.f32 %v14588_v58, %v4084_v31  ;;  %10800 = vmatpush3.bf16.msra.mxu1 %v11741_v44  ;;  %v9843_v58 = vld [vmem:[%s17116_s10] ss:$0 sm:$0xff] }
0x101f   :  { %v4112_v59 = vpack.c.bf16 %v14686_v21, %v14683_v4 }
0x1021   :  { %10782 = vmatmul.mubr.msk.bf16.gmra.mrb[100].mxu0 %vm484_vm1, %v4112_v59 }
0x1022   :  { %4853 = vmatprep.mubr.bf16.mxu0 %v17290_v62 }
0x10a1   :  { %v10771_v39 = vpop.f32.mrb[88].mxu0 }
0x10a2   :  { %v4217_v53 = vadd.f32 %v10771_v39, %v9843_v58  ;;  %v4208_v37 = vpop.f32.mrb[89].mxu0 }
0x10a3   :  { %v4209_v5 = vadd.f32 %v9843_v58, %v4208_v37  ;;  %v10772_v14 = vpop.f32.mrb[90].mxu0 }
0x10a4   :  { %v4220_v2 = vadd.f32 %v10772_v14, %v9843_v58  ;;  %v4211_v52 = vpop.f32.mrb[91].mxu0  ;;  %v4273_v34 = vmax.f32 %v4217_v53, 0.0 }
0x10a5   :  { %v4212_v51 = vadd.f32 %v9843_v58, %v4211_v52  ;;  %v4271_v23 = vmax.f32 %v4209_v5, 0.0 }
0x10a6   :  { %v4274_v48 = vmax.f32 %v4220_v2, 0.0 }
0x10a7   :  { %v4272_v7 = vmax.f32 %v4212_v51, 0.0 }
0x10a8   :  { %v4288_v28 = vpack.c.bf16 %v4274_v48, %v4273_v34 }
0x10a9   :  { %v4287_v6 = vpack.c.bf16 %v4272_v7, %v4271_v23  ;;  %v14704_v23 = vld [vmem:[%s17118_s12] ss:$0 sm:$0xff] }
0x10ab   :  { %10801 = vmatprep.mubr.bf16.mxu1 %v4287_v6 }
0x10ac   :  { %10802 = vmatmul.mubr.bf16.vlgmr.msra.gmra.mrb[104].mxu1 %v4288_v28 }
0x10dc   :  { %v10775_v50 = vpop.f32.mrb[92].mxu0 }
0x10dd   :  { %v4233_v10 = vadd.f32 %v10775_v50, %v9843_v58  ;;  %v4224_v47 = vpop.f32.mrb[93].mxu0 }
0x10de   :  { %v4225_v17 = vadd.f32 %v9843_v58, %v4224_v47  ;;  %v10776_v38 = vpop.f32.mrb[94].mxu0 }
0x10df   :  { %v4236_v41 = vadd.f32 %v10776_v38, %v9843_v58  ;;  %v4227_v13 = vpop.f32.mrb[95].mxu0  ;;  %v4277_v18 = vmax.f32 %v4233_v10, 0.0 }
0x10e0   :  { %v4228_v32 = vadd.f32 %v9843_v58, %v4227_v13  ;;  %v4275_v33 = vmax.f32 %v4225_v17, 0.0 }
0x10e1   :  { %v4278_v57 = vmax.f32 %v4236_v41, 0.0 }
0x10e2   :  { %v4276_v42 = vmax.f32 %v4228_v32, 0.0 }
0x10e3   :  { %v4290_v11 = vpack.c.bf16 %v4278_v57, %v4277_v18 }
0x10e4   :  { %v4289_v3 = vpack.c.bf16 %v4276_v42, %v4275_v33 }
0x10e6   :  { %10805 = vmatprep.mubr.bf16.mxu1 %v4289_v3 }
0x10e7   :  { %10806 = vmatmul.mubr.bf16.gmra.mrb[108].mxu1 %v4290_v11 }
0x10e8   :  { %v10779_v54 = vpop.f32.mrb[96].mxu0 }
0x10e9   :  { %v4249_v19 = vadd.f32 %v10779_v54, %v9843_v58  ;;  %v4240_v16 = vpop.f32.mrb[97].mxu0 }
0x10ea   :  { %v4241_v35 = vadd.f32 %v9843_v58, %v4240_v16  ;;  %v10780_v63 = vpop.f32.mrb[98].mxu0 }
0x10eb   :  { %v4252_v46 = vadd.f32 %v10780_v63, %v9843_v58  ;;  %v4243_v56 = vpop.f32.mrb[99].mxu0  ;;  %v4281_v25 = vmax.f32 %v4249_v19, 0.0 }
0x10ec   :  { %v4244_v61 = vadd.f32 %v9843_v58, %v4243_v56  ;;  %v4279_v12 = vmax.f32 %v4241_v35, 0.0 }
0x10ed   :  { %v4282_v29 = vmax.f32 %v4252_v46, 0.0 }
0x10ee   :  { %v4280_v27 = vmax.f32 %v4244_v61, 0.0 }
0x10ef   :  { %v4292_v30 = vpack.c.bf16 %v4282_v29, %v4281_v25 }
0x10f0   :  { %v4291_v45 = vpack.c.bf16 %v4280_v27, %v4279_v12 }
0x10f2   :  { %10809 = vmatprep.mubr.bf16.mxu1 %v4291_v45 }
0x10f3   :  { %10810 = vmatmul.mubr.bf16.gmra.mrb[112].mxu1 %v4292_v30 }
0x10f4   :  { %v10783_v31 = vpop.f32.mrb[100].mxu0 }
0x10f5   :  { %v4265_v59 = vadd.f32 %v10783_v31, %v9843_v58  ;;  %v4256_v36 = vpop.f32.mrb[101].mxu0 }
0x10f6   :  { %v4257_v44 = vadd.f32 %v9843_v58, %v4256_v36  ;;  %v10784_v39 = vpop.f32.mrb[102].mxu0 }
0x10f7   :  { %v4268_v53 = vadd.f32 %v10784_v39, %v9843_v58  ;;  %v4259_v37 = vpop.f32.mrb[103].mxu0  ;;  %v4285_v14 = vmax.f32 %v4265_v59, 0.0 }
0x10f8   :  { %v4260_v5 = vadd.f32 %v9843_v58, %v4259_v37  ;;  %v4283_v52 = vmax.f32 %v4257_v44, 0.0 }
0x10f9   :  { %v4286_v2 = vmax.f32 %v4268_v53, 0.0 }
0x10fa   :  { %v4284_v51 = vmax.f32 %v4260_v5, 0.0 }
0x10fb   :  { %v4294_v34 = vpack.c.bf16 %v4286_v2, %v4285_v14 }
0x10fc   :  { %v4293_v48 = vpack.c.bf16 %v4284_v51, %v4283_v52 }
0x10fe   :  { %10813 = vmatprep.mubr.bf16.mxu1 %v4293_v48 }
0x10ff   :  { %10814 = vmatmul.mubr.bf16.gmra.mrb[116].mxu1 %v4294_v34 }
0x117f   :  { %v10803_v7 = vpop.f32.mrb[104].mxu1 }
0x1180   :  { %v4398_v28 = vpop.f32.mrb[105].mxu1  ;;  %v4407_v6 = vadd.f32 %v10803_v7, %v14704_v23 }
0x1181   :  { %v4399_v50 = vadd.f32 %v14704_v23, %v4398_v28  ;;  %v10804_v58 = vpop.f32.mrb[106].mxu1 }
0x1182   :  { %v4401_v10 = vpop.f32.mrb[107].mxu1  ;;  %v4410_v17 = vadd.f32 %v10804_v58, %v14704_v23  ;;  %v14714_v41 = vadd.f32 %v4407_v6, %v14605_v8 }
0x1183   :  { %v14709_v47 = vadd.f32 %v4399_v50, %v14593_v9  ;;  %v4402_v38 = vadd.f32 %v14704_v23, %v4401_v10 }
0x1184   :  { %v14722_v18 = vadd.f32 %v4410_v17, %v14608_v55  ;;  %v4485_v57 = vsel %vm484_vm1, %v14714_v41, 0.0 }
0x1185   :  { %v14717_v13 = vadd.f32 %v4402_v38, %v14596_v26  ;;  %v4479_v32 = vsel %vm484_vm1, %v14709_v47, 0.0 }
0x1186   :  { %4480 = vadd.xlane.f32.xlu1 %v4479_v32  ;;  %v4488_v8 = vsel %vm484_vm1, %v14722_v18, 0.0 }
0x1187   :  { %v4482_v9 = vsel %vm484_vm1, %v14717_v13, 0.0 }
0x1188   :  { %4483 = vadd.xlane.f32.xlu0 %v4482_v9 }
0x118a   :  { %4486 = vadd.xlane.f32.xlu1 %v4485_v57 }
0x118c   :  { %4489 = vadd.xlane.f32.xlu0 %v4488_v8 }
0x11ba   :  { %v10807_v26 = vpop.f32.mrb[108].mxu1 }
0x11bb   :  { %v4414_v33 = vpop.f32.mrb[109].mxu1  ;;  %v4423_v42 = vadd.f32 %v10807_v26, %v14704_v23 }
0x11bc   :  { %v4415_v11 = vadd.f32 %v14704_v23, %v4414_v33  ;;  %v10808_v55 = vpop.f32.mrb[110].mxu1 }
0x11bd   :  { %v4417_v3 = vpop.f32.mrb[111].mxu1  ;;  %v4426_v19 = vadd.f32 %v10808_v55, %v14704_v23  ;;  %v14738_v35 = vadd.f32 %v4423_v42, %v14631_v49 }
0x11be   :  { %v14733_v54 = vadd.f32 %v4415_v11, %v14619_v20  ;;  %v4418_v16 = vadd.f32 %v14704_v23, %v4417_v3 }
0x11bf   :  { %v14746_v56 = vadd.f32 %v4426_v19, %v14634_v60  ;;  %v4497_v61 = vsel %vm484_vm1, %v14738_v35, 0.0  ;;  %v11742_v19 = vld [vmem:[%s17200_s25 + $0x40] ss:$8 sps:$4 sm:$0xff]  }
0x11c0   :  { %v14741_v63 = vadd.f32 %v4418_v16, %v14622_v22  ;;  %v4491_v46 = vsel %vm484_vm1, %v14733_v54, 0.0  ;;  %v11747_v16 = vld [vmem:[%s17200_s25 + $0x54] ss:$8 sps:$4 sm:$0xff]  }
0x11c1   :  { %4492 = vadd.xlane.f32.xlu1 %v4491_v46  ;;  %v4500_v22 = vsel %vm484_vm1, %v14746_v56, 0.0  ;;  %v11745_v46 = vld [vmem:[%s17200_s25 + $0x50] ss:$8 sps:$4 sm:$0xff]  }
0x11c2   :  { %v4494_v20 = vsel %vm484_vm1, %v14741_v63, 0.0 }
0x11c3   :  { %4495 = vadd.xlane.f32.xlu0 %v4494_v20  ;;  %v11750_v20 = vld [vmem:[%s17200_s25 + $0x64] ss:$8 sps:$4 sm:$0xff]  }
0x11c5   :  { %4498 = vadd.xlane.f32.xlu1 %v4497_v61  ;;  %v11748_v61 = vld [vmem:[%s17200_s25 + $0x60] ss:$8 sps:$4 sm:$0xff]  }
0x11c6   :  { %v10811_v49 = vpop.f32.mrb[112].mxu1 }
0x11c7   :  { %4501 = vadd.xlane.f32.xlu0 %v4500_v22  ;;  %v4430_v25 = vpop.f32.mrb[113].mxu1  ;;  %v4439_v29 = vadd.f32 %v10811_v49, %v14704_v23  ;;  %v11753_v49 = vld [vmem:[%s17200_s25 + $0x74] ss:$8 sps:$4 sm:$0xff]   ;;  %v11751_v22 = vld [vmem:[%s17200_s25 + $0x70] ss:$8 sps:$4 sm:$0xff]  }
0x11c8   :  { %v4431_v12 = vadd.f32 %v14704_v23, %v4430_v25  ;;  %v10812_v60 = vpop.f32.mrb[114].mxu1 }
0x11c9   :  { %v4433_v27 = vpop.f32.mrb[115].mxu1  ;;  %v4442_v45 = vadd.f32 %v10812_v60, %v14704_v23  ;;  %v14762_v59 = vadd.f32 %v4439_v29, %v14657_v1 }
0x11ca   :  { %v14757_v30 = vadd.f32 %v4431_v12, %v14645_v15  ;;  %v4434_v31 = vadd.f32 %v14704_v23, %v4433_v27 }
0x11cb   :  { %v14770_v39 = vadd.f32 %v4442_v45, %v14660_v0  ;;  %v4509_v53 = vsel %vm484_vm1, %v14762_v59, 0.0 }
0x11cc   :  { %v14765_v36 = vadd.f32 %v4434_v31, %v14648_v40  ;;  %v4503_v44 = vsel %vm484_vm1, %v14757_v30, 0.0 }
0x11cd   :  { %4504 = vadd.xlane.f32.xlu1 %v4503_v44  ;;  %v4512_v40 = vsel %vm484_vm1, %v14770_v39, 0.0 }
0x11ce   :  { %v4506_v15 = vsel %vm484_vm1, %v14765_v36, 0.0 }
0x11cf   :  { %4507 = vadd.xlane.f32.xlu0 %v4506_v15 }
0x11d1   :  { %4510 = vadd.xlane.f32.xlu1 %v4509_v53 }
0x11d2   :  { %v10815_v1 = vpop.f32.mrb[116].mxu1 }
0x11d3   :  { %4513 = vadd.xlane.f32.xlu0 %v4512_v40  ;;  %v4446_v37 = vpop.f32.mrb[117].mxu1  ;;  %v4455_v5 = vadd.f32 %v10815_v1, %v14704_v23 }
0x11d4   :  { %v4447_v14 = vadd.f32 %v14704_v23, %v4446_v37  ;;  %v10816_v0 = vpop.f32.mrb[118].mxu1 }
0x11d5   :  { %v4449_v2 = vpop.f32.mrb[119].mxu1  ;;  %v4458_v51 = vadd.f32 %v10816_v0, %v14704_v23  ;;  %v14786_v48 = vadd.f32 %v4455_v5, %v14683_v4 }
0x11d6   :  { %v14781_v52 = vadd.f32 %v4447_v14, %v14671_v43  ;;  %v4450_v34 = vadd.f32 %v14704_v23, %v4449_v2 }
0x11d7   :  { %v14794_v6 = vadd.f32 %v4458_v51, %v14686_v21  ;;  %v4521_v23 = vsel %vm484_vm1, %v14786_v48, 0.0 }
0x11d8   :  { %v14789_v7 = vadd.f32 %v4450_v34, %v14674_v24  ;;  %v4515_v28 = vsel %vm484_vm1, %v14781_v52, 0.0 }
0x11d9   :  { %4516 = vadd.xlane.f32.xlu1 %v4515_v28  ;;  %v4524_v4 = vsel %vm484_vm1, %v14794_v6, 0.0 }
0x11da   :  { %v4518_v43 = vsel %vm484_vm1, %v14789_v7, 0.0 }
0x11db   :  { %4519 = vadd.xlane.f32.xlu0 %v4518_v43 }
0x11dd   :  { %4522 = vadd.xlane.f32.xlu1 %v4521_v23 }
0x11df   :  { %4525 = vadd.xlane.f32.xlu0 %v4524_v4 }
0x1213   :  { %v4481_v24 = vpop.xlane.xlu1 %4480 }
0x1214   :  { %v4527_v50 = vmul.f32 0.015625, %v4481_v24 }
0x1215   :  { %v4484_v58 = vpop.xlane.xlu0 %4483 }
0x1216   :  { %v14803_v10 = vsub.f32 %v14709_v47, %v4527_v50  ;;  %v4528_v21 = vmul.f32 0.015625, %v4484_v58 }
0x1217   :  { %v4487_v17 = vpop.xlane.xlu1 %4486 }
0x1218   :  { %v14806_v38 = vsub.f32 %v14717_v13, %v4528_v21  ;;  %v4529_v32 = vmul.f32 0.015625, %v4487_v17  ;;  %v4559_v9 = vmul.f32 %v14803_v10, %v14803_v10 }
0x1219   :  { %v4490_v57 = vpop.xlane.xlu0 %4489 }
0x121a   :  { %v14811_v8 = vsub.f32 %v14714_v41, %v4529_v32  ;;  %v4530_v26 = vmul.f32 0.015625, %v4490_v57  ;;  %v4575_v33 = vsel %vm484_vm1, %v4559_v9, 0.0  ;;  %v4560_v47 = vmul.f32 %v14806_v38, %v14806_v38 }
0x121b   :  { %4576 = vadd.xlane.f32.xlu1 %v4575_v33 }
0x121c   :  { %v14817_v42 = vsub.f32 %v14722_v18, %v4530_v26  ;;  %v4578_v13 = vsel %vm484_vm1, %v4560_v47, 0.0  ;;  %v4561_v11 = vmul.f32 %v14811_v8, %v14811_v8  ;;  %v11744_v18 = vld [vmem:[%s17200_s25 + $0x44] ss:$8 sps:$4 sm:$0xff]  }
0x121d   :  { %4579 = vadd.xlane.f32.xlu0 %v4578_v13  ;;  %4821 = vmatprep.subr.bf16.mxu0 %v11744_v18 }
0x121e   :  { %v4581_v55 = vsel %vm484_vm1, %v4561_v11, 0.0  ;;  %v4562_v41 = vmul.f32 %v14817_v42, %v14817_v42  ;;  %4822 = vmatpush1.bf16.msra.mxu0 %v11742_v19 }
0x121f   :  { %4582 = vadd.xlane.f32.xlu1 %v4581_v55  ;;  %4823 = vmatprep.subr.bf16.mxu0 %v11747_v16 }
0x1220   :  { %v4584_v3 = vsel %vm484_vm1, %v4562_v41, 0.0 }
0x1221   :  { %4585 = vadd.xlane.f32.xlu0 %v4584_v3 }
0x1222   :  { %4824 = vmatpush1.bf16.msra.mxu0 %v11745_v46 }
0x1223   :  { %4825 = vmatprep.subr.bf16.mxu0 %v11750_v20 }
0x1226   :  { %4826 = vmatpush1.bf16.msra.mxu0 %v11748_v61 }
0x1227   :  { %4827 = vmatprep.subr.bf16.mxu0 %v11753_v49 }
0x122a   :  { %4828 = vmatpush1.bf16.msra.mxu0 %v11751_v22 }
0x124e   :  { %v4493_v25 = vpop.xlane.xlu1 %4492 }
0x124f   :  { %v4531_v29 = vmul.f32 0.015625, %v4493_v25 }
0x1250   :  { %v4496_v12 = vpop.xlane.xlu0 %4495 }
0x1251   :  { %v14851_v60 = vsub.f32 %v14733_v54, %v4531_v29  ;;  %v4532_v27 = vmul.f32 0.015625, %v4496_v12 }
0x1252   :  { %v4499_v45 = vpop.xlane.xlu1 %4498 }
0x1253   :  { %v14854_v31 = vsub.f32 %v14741_v63, %v4532_v27  ;;  %v4533_v44 = vmul.f32 0.015625, %v4499_v45  ;;  %v4563_v15 = vmul.f32 %v14851_v60, %v14851_v60 }
0x1254   :  { %v4502_v53 = vpop.xlane.xlu0 %4501 }
0x1255   :  { %v14859_v1 = vsub.f32 %v14738_v35, %v4533_v44  ;;  %v4534_v40 = vmul.f32 0.015625, %v4502_v53  ;;  %v4587_v37 = vsel %vm484_vm1, %v4563_v15, 0.0  ;;  %v4564_v54 = vmul.f32 %v14854_v31, %v14854_v31 }
0x1256   :  { %4588 = vadd.xlane.f32.xlu1 %v4587_v37 }
0x1257   :  { %v14865_v5 = vsub.f32 %v14746_v56, %v4534_v40  ;;  %v4590_v63 = vsel %vm484_vm1, %v4564_v54, 0.0  ;;  %v4565_v14 = vmul.f32 %v14859_v1, %v14859_v1 }
0x1258   :  { %4591 = vadd.xlane.f32.xlu0 %v4590_v63 }
0x1259   :  { %v4593_v0 = vsel %vm484_vm1, %v4565_v14, 0.0  ;;  %v4566_v35 = vmul.f32 %v14865_v5, %v14865_v5 }
0x125a   :  { %v4505_v2 = vpop.xlane.xlu1 %4504  ;;  %4594 = vadd.xlane.f32.xlu1 %v4593_v0 }
0x125b   :  { %v4535_v51 = vmul.f32 0.015625, %v4505_v2  ;;  %v4596_v34 = vsel %vm484_vm1, %v4566_v35, 0.0  ;;  %v14922_v35 = vld [vmem:[#allocation12 + $0x2] ss:$0 sm:$0xff] }
0x125c   :  { %4597 = vadd.xlane.f32.xlu0 %v4596_v34  ;;  %v4508_v28 = vpop.xlane.xlu0 %4507 }
0x125d   :  { %v14875_v56 = vsub.f32 %v14757_v30, %v4535_v51  ;;  %v4536_v43 = vmul.f32 0.015625, %v4508_v28 }
0x125e   :  { %v4511_v23 = vpop.xlane.xlu1 %4510 }
0x125f   :  { %v14878_v4 = vsub.f32 %v14765_v36, %v4536_v43  ;;  %v4537_v24 = vmul.f32 0.015625, %v4511_v23  ;;  %v4567_v50 = vmul.f32 %v14875_v56, %v14875_v56  ;;  %v14927_v23 = vld [vmem:[#allocation12 + $0x3] ss:$0 sm:$0xff] }
0x1260   :  { %v4514_v58 = vpop.xlane.xlu0 %4513 }
0x1261   :  { %v14883_v21 = vsub.f32 %v14762_v59, %v4537_v24  ;;  %v4538_v17 = vmul.f32 0.015625, %v4514_v58  ;;  %v4599_v32 = vsel %vm484_vm1, %v4567_v50, 0.0  ;;  %v4568_v30 = vmul.f32 %v14878_v4, %v14878_v4 }
0x1262   :  { %4600 = vadd.xlane.f32.xlu1 %v4599_v32 }
0x1263   :  { %v14889_v9 = vsub.f32 %v14770_v39, %v4538_v17  ;;  %v4602_v36 = vsel %vm484_vm1, %v4568_v30, 0.0  ;;  %v4569_v57 = vmul.f32 %v14883_v21, %v14883_v21 }
0x1264   :  { %4603 = vadd.xlane.f32.xlu0 %v4602_v36 }
0x1265   :  { %v4605_v26 = vsel %vm484_vm1, %v4569_v57, 0.0  ;;  %v4570_v59 = vmul.f32 %v14889_v9, %v14889_v9 }
0x1266   :  { %4606 = vadd.xlane.f32.xlu1 %v4605_v26  ;;  %v4517_v33 = vpop.xlane.xlu1 %4516 }
0x1267   :  { %v4539_v47 = vmul.f32 0.015625, %v4517_v33  ;;  %v4608_v13 = vsel %vm484_vm1, %v4570_v59, 0.0 }
0x1268   :  { %4609 = vadd.xlane.f32.xlu0 %v4608_v13  ;;  %v4520_v11 = vpop.xlane.xlu0 %4519 }
0x1269   :  { %v14899_v39 = vsub.f32 %v14781_v52, %v4539_v47  ;;  %v4540_v55 = vmul.f32 0.015625, %v4520_v11 }
0x126a   :  { %v4523_v41 = vpop.xlane.xlu1 %4522 }
0x126b   :  { %v14902_v3 = vsub.f32 %v14789_v7, %v4540_v55  ;;  %v4541_v18 = vmul.f32 0.015625, %v4523_v41  ;;  %v4571_v19 = vmul.f32 %v14899_v39, %v14899_v39 }
0x126c   :  { %v4526_v16 = vpop.xlane.xlu0 %4525 }
0x126d   :  { %v14907_v46 = vsub.f32 %v14786_v48, %v4541_v18  ;;  %v4542_v20 = vmul.f32 0.015625, %v4526_v16  ;;  %v4611_v61 = vsel %vm484_vm1, %v4571_v19, 0.0  ;;  %v4572_v52 = vmul.f32 %v14902_v3, %v14902_v3 }
0x126e   :  { %4612 = vadd.xlane.f32.xlu1 %v4611_v61 }
0x126f   :  { %v14913_v49 = vsub.f32 %v14794_v6, %v4542_v20  ;;  %v4614_v7 = vsel %vm484_vm1, %v4572_v52, 0.0  ;;  %v4573_v22 = vmul.f32 %v14907_v46, %v14907_v46 }
0x1270   :  { %4615 = vadd.xlane.f32.xlu0 %v4614_v7 }
0x1271   :  { %v4617_v25 = vsel %vm484_vm1, %v4573_v22, 0.0  ;;  %v4574_v48 = vmul.f32 %v14913_v49, %v14913_v49 }
0x1272   :  { %4618 = vadd.xlane.f32.xlu1 %v4617_v25 }
0x1273   :  { %v4620_v29 = vsel %vm484_vm1, %v4574_v48, 0.0 }
0x1274   :  { %4621 = vadd.xlane.f32.xlu0 %v4620_v29 }
0x12a8   :  { %v4577_v12 = vpop.xlane.xlu1 %4576 }
0x12a9   :  { %v4623_v27 = vmul.f32 0.015625, %v4577_v12 }
0x12aa   :  { %v4580_v45 = vpop.xlane.xlu0 %4579 }
0x12ab   :  { %v4639_v6 = vadd.f32 1e-05, %v4623_v27  ;;  %v4624_v44 = vmul.f32 0.015625, %v4580_v45 }
0x12ac   :  { %v4583_v15 = vpop.xlane.xlu1 %4582 }
0x12ad   :  { %12058 = vrsqrt.f32 %v4639_v6  ;;  %v4640_v53 = vadd.f32 1e-05, %v4624_v44  ;;  %v4625_v40 = vmul.f32 0.015625, %v4583_v15 }
0x12ae   :  { %v4586_v37 = vpop.xlane.xlu0 %4585 }
0x12af   :  { %12060 = vrsqrt.f32 %v4640_v53  ;;  %v4641_v54 = vadd.f32 1e-05, %v4625_v40  ;;  %v4626_v63 = vmul.f32 0.015625, %v4586_v37 }
0x12b1   :  { %12062 = vrsqrt.f32 %v4641_v54  ;;  %v4642_v14 = vadd.f32 1e-05, %v4626_v63 }
0x12b3   :  { %12064 = vrsqrt.f32 %v4642_v14 }
0x12b7   :  { %v12059_v0 = vpop.eup %12058 }
0x12b8   :  { %v4671_v2 = vmul.f32 %v12059_v0, %v14803_v10 }
0x12b9   :  { %v12061_v51 = vpop.eup %12060 }
0x12ba   :  { %v4691_v34 = vmul.f32 %v14922_v35, %v4671_v2  ;;  %v4672_v28 = vmul.f32 %v12061_v51, %v14806_v38 }
0x12bb   :  { %v12063_v43 = vpop.eup %12062 }
0x12bc   :  { %v4692_v24 = vmul.f32 %v14922_v35, %v4672_v28  ;;  %v14931_v58 = vadd.f32 %v14927_v23, %v4691_v34  ;;  %v4673_v32 = vmul.f32 %v12063_v43, %v14811_v8 }
0x12bd   :  { %v12065_v50 = vpop.eup %12064 }
0x12be   :  { %17291 = vst [vmem:[#allocation59_spill] sm:$0xff] %v14931_v58  ;;  %v14934_v17 = vadd.f32 %v14927_v23, %v4692_v24  ;;  %v4674_v10 = vmul.f32 %v12065_v50, %v14817_v42  ;;  %v4693_v36 = vmul.f32 %v14922_v35, %v4673_v32 }
0x12c0   :  { %17292 = vst [vmem:[#allocation58_spill] sm:$0xff] %v14934_v17  ;;  %v4727_v30 = vpack.c.bf16 %v14934_v17, %v14931_v58  ;;  %v4694_v38 = vmul.f32 %v14922_v35, %v4674_v10  ;;  %v14948_v26 = vadd.f32 %v14927_v23, %v4693_v36 }
0x12c2   :  { %9883 = vmatmul.mubr.msk.bf16.vlgmr.msra.gmra.mrb[104].mxu0 %vm484_vm1, %v4727_v30  ;;  %v14945_v57 = vadd.f32 %v14927_v23, %v4694_v38  ;;  %17294 = vst [vmem:[#allocation45_spill] sm:$0xff] %v14948_v26 }
0x12c3   :  { %4863 = vmatprep.mubr.bf16.mxu0 %v17290_v62 }
0x12c4   :  { %17293 = vst [vmem:[#allocation60_spill] sm:$0xff] %v14945_v57  ;;  %v4728_v8 = vpack.c.bf16 %v14945_v57, %v14948_v26 }
0x12ca   :  { %9884 = vmatmul.mubr.msk.bf16.gmra.mrb[108].mxu0 %vm484_vm1, %v4728_v8 }
0x12cb   :  { %4873 = vmatprep.mubr.bf16.mxu0 %v17290_v62 }
0x12e3   :  { %v4589_v42 = vpop.xlane.xlu1 %4588 }
0x12e4   :  { %v4627_v59 = vmul.f32 0.015625, %v4589_v42 }
0x12e5   :  { %v4592_v33 = vpop.xlane.xlu0 %4591 }
0x12e6   :  { %v4643_v47 = vadd.f32 1e-05, %v4627_v59  ;;  %v4628_v13 = vmul.f32 0.015625, %v4592_v33 }
0x12e7   :  { %v4595_v11 = vpop.xlane.xlu1 %4594 }
0x12e8   :  { %12066 = vrsqrt.f32 %v4643_v47  ;;  %v4644_v55 = vadd.f32 1e-05, %v4628_v13  ;;  %v4629_v41 = vmul.f32 0.015625, %v4595_v11 }
0x12e9   :  { %v4598_v18 = vpop.xlane.xlu0 %4597 }
0x12ea   :  { %12068 = vrsqrt.f32 %v4644_v55  ;;  %v4645_v19 = vadd.f32 1e-05, %v4629_v41  ;;  %v4630_v16 = vmul.f32 0.015625, %v4598_v18 }
0x12ec   :  { %12070 = vrsqrt.f32 %v4645_v19  ;;  %v4646_v20 = vadd.f32 1e-05, %v4630_v16 }
0x12ee   :  { %12072 = vrsqrt.f32 %v4646_v20 }
0x12ef   :  { %v4601_v61 = vpop.xlane.xlu1 %4600 }
0x12f0   :  { %v4631_v52 = vmul.f32 0.015625, %v4601_v61 }
0x12f1   :  { %v4604_v7 = vpop.xlane.xlu0 %4603 }
0x12f2   :  { %v12067_v22 = vpop.eup %12066  ;;  %v4647_v25 = vadd.f32 1e-05, %v4631_v52  ;;  %v4632_v48 = vmul.f32 0.015625, %v4604_v7 }
0x12f3   :  { %v4607_v29 = vpop.xlane.xlu1 %4606  ;;  %v4675_v12 = vmul.f32 %v12067_v22, %v14851_v60 }
0x12f4   :  { %v12069_v27 = vpop.eup %12068  ;;  %12074 = vrsqrt.f32 %v4647_v25  ;;  %v4648_v45 = vadd.f32 1e-05, %v4632_v48  ;;  %v4633_v6 = vmul.f32 0.015625, %v4607_v29 }
0x12f5   :  { %v4610_v44 = vpop.xlane.xlu0 %4609  ;;  %v4676_v15 = vmul.f32 %v12069_v27, %v14854_v31  ;;  %v4695_v53 = vmul.f32 %v14922_v35, %v4675_v12 }
0x12f6   :  { %v12071_v40 = vpop.eup %12070  ;;  %12076 = vrsqrt.f32 %v4648_v45  ;;  %v4634_v37 = vmul.f32 0.015625, %v4610_v44  ;;  %v4649_v14 = vadd.f32 1e-05, %v4633_v6 }
0x12f7   :  { %v4696_v54 = vmul.f32 %v14922_v35, %v4676_v15  ;;  %v14959_v2 = vadd.f32 %v14927_v23, %v4695_v53  ;;  %v4677_v51 = vmul.f32 %v12071_v40, %v14859_v1 }
0x12f8   :  { %v12073_v63 = vpop.eup %12072  ;;  %v4650_v0 = vadd.f32 1e-05, %v4634_v37 }
0x12f9   :  { %17295 = vst [vmem:[#allocation43_spill] sm:$0xff] %v14959_v2  ;;  %v14962_v60 = vadd.f32 %v14927_v23, %v4696_v54  ;;  %v4678_v31 = vmul.f32 %v12073_v63, %v14865_v5  ;;  %v4697_v32 = vmul.f32 %v14922_v35, %v4677_v51 }
0x12fa   :  { %12078 = vrsqrt.f32 %v4650_v0 }
0x12fb   :  { %17296 = vst [vmem:[#allocation44_spill] sm:$0xff] %v14962_v60  ;;  %v4613_v34 = vpop.xlane.xlu1 %4612  ;;  %v4729_v28 = vpack.c.bf16 %v14962_v60, %v14959_v2  ;;  %v4698_v43 = vmul.f32 %v14922_v35, %v4678_v31  ;;  %12080 = vrsqrt.f32 %v4649_v14  ;;  %v14976_v59 = vadd.f32 %v14927_v23, %v4697_v32  ;;  %v4745_v31 = vld [vmem:[#allocation9 + $0x2] sm:$0x3] }
0x12fc   :  { %v4635_v24 = vmul.f32 0.015625, %v4613_v34  ;;  %v17307_v34 = vld [vmem:[#allocation25_spill] sm:$0xff] }
0x12fd   :  { %9885 = vmatmul.mubr.msk.bf16.gmra.mrb[112].mxu0 %vm484_vm1, %v4729_v28  ;;  %v4616_v50 = vpop.xlane.xlu0 %4615  ;;  %v14973_v1 = vadd.f32 %v14927_v23, %v4698_v43  ;;  %17298 = vst [vmem:[#allocation48_spill] sm:$0xff] %v14976_v59  ;;  %v15038_v28 = vrot.slane %v4745_v31, %v17307_v34 }
0x12fe   :  { %v12075_v10 = vpop.eup %12074  ;;  %v4636_v30 = vmul.f32 0.015625, %v4616_v50  ;;  %4883 = vmatprep.mubr.bf16.mxu0 %v17290_v62  ;;  %v4651_v38 = vadd.f32 1e-05, %v4635_v24  ;;  %v17308_v24 = vld [vmem:[#allocation24_spill] sm:$0xff] }
0x12ff   :  { %17297 = vst [vmem:[#allocation42_spill] sm:$0xff] %v14973_v1  ;;  %v4619_v8 = vpop.xlane.xlu1 %4618  ;;  %v4679_v33 = vmul.f32 %v12075_v10, %v14875_v56  ;;  %v4730_v11 = vpack.c.bf16 %v14973_v1, %v14976_v59 }
0x1300   :  { %v12077_v5 = vpop.eup %12076  ;;  %v4652_v36 = vadd.f32 1e-05, %v4636_v30  ;;  %v4637_v18 = vmul.f32 0.015625, %v4619_v8 }
0x1301   :  { %v4622_v42 = vpop.xlane.xlu0 %4621  ;;  %v4680_v47 = vmul.f32 %v12077_v5, %v14878_v4  ;;  %v4699_v19 = vmul.f32 %v14922_v35, %v4679_v33 }
0x1302   :  { %12082 = vrsqrt.f32 %v4652_v36  ;;  %v4638_v13 = vmul.f32 0.015625, %v4622_v42  ;;  %v4653_v61 = vadd.f32 1e-05, %v4637_v18 }
0x1303   :  { %v4700_v55 = vmul.f32 %v14922_v35, %v4680_v47  ;;  %12084 = vrsqrt.f32 %v4651_v38  ;;  %v14991_v52 = vadd.f32 %v14927_v23, %v4699_v19 }
0x1304   :  { %v12079_v41 = vpop.eup %12078  ;;  %v4654_v20 = vadd.f32 1e-05, %v4638_v13 }
0x1305   :  { %9886 = vmatmul.mubr.msk.bf16.gmra.mrb[116].mxu0 %vm484_vm1, %v4730_v11  ;;  %v12081_v16 = vpop.eup %12080  ;;  %v14987_v56 = vadd.f32 %v14927_v23, %v4700_v55  ;;  %v4682_v4 = vmul.f32 %v12079_v41, %v14889_v9  ;;  %17300 = vst [vmem:[#allocation49_spill] sm:$0xff] %v14991_v52 }
0x1306   :  { %4893 = vmatprep.mubr.bf16.mxu0 %v17290_v62  ;;  %v4681_v7 = vmul.f32 %v12081_v16, %v14883_v21  ;;  %12086 = vrsqrt.f32 %v4654_v20 }
0x1307   :  { %17299 = vst [vmem:[#allocation46_spill] sm:$0xff] %v14987_v56  ;;  %v4731_v22 = vpack.c.bf16 %v14987_v56, %v14991_v52  ;;  %v4702_v25 = vmul.f32 %v14922_v35, %v4682_v4  ;;  %12088 = vrsqrt.f32 %v4653_v61 }
0x1308   :  { %v4701_v29 = vmul.f32 %v14922_v35, %v4681_v7 }
0x1309   :  { %v15001_v9 = vadd.f32 %v14927_v23, %v4702_v25 }
0x130a   :  { %v15005_v27 = vadd.f32 %v14927_v23, %v4701_v29 }
0x130b   :  { %17301 = vst [vmem:[#allocation47_spill] sm:$0xff] %v15001_v9 }
0x130c   :  { %v12083_v48 = vpop.eup %12082  ;;  %17302 = vst [vmem:[#allocation52_spill] sm:$0xff] %v15005_v27  ;;  %v4732_v6 = vpack.c.bf16 %v15001_v9, %v15005_v27 }
0x130d   :  { %9887 = vmatmul.mubr.msk.bf16.gmra.mrb[120].mxu0 %vm484_vm1, %v4731_v22  ;;  %v12085_v12 = vpop.eup %12084  ;;  %v4684_v21 = vmul.f32 %v12083_v48, %v14902_v3 }
0x130e   :  { %4903 = vmatprep.mubr.bf16.mxu0 %v17290_v62  ;;  %v4683_v45 = vmul.f32 %v12085_v12, %v14899_v39 }
0x130f   :  { %v4704_v44 = vmul.f32 %v14922_v35, %v4684_v21 }
0x1310   :  { %v12087_v15 = vpop.eup %12086  ;;  %v4703_v53 = vmul.f32 %v14922_v35, %v4683_v45 }
0x1311   :  { %v12089_v40 = vpop.eup %12088  ;;  %v15015_v3 = vadd.f32 %v14927_v23, %v4704_v44  ;;  %v4686_v37 = vmul.f32 %v12087_v15, %v14913_v49 }
0x1312   :  { %v15019_v39 = vadd.f32 %v14927_v23, %v4703_v53  ;;  %v4685_v54 = vmul.f32 %v12089_v40, %v14907_v46 }
0x1313   :  { %17303 = vst [vmem:[#allocation50_spill] sm:$0xff] %v15015_v3  ;;  %v4706_v14 = vmul.f32 %v14922_v35, %v4686_v37 }
0x1314   :  { %17304 = vst [vmem:[#allocation53_spill] sm:$0xff] %v15019_v39  ;;  %v4733_v63 = vpack.c.bf16 %v15015_v3, %v15019_v39  ;;  %v4705_v0 = vmul.f32 %v14922_v35, %v4685_v54  ;;  %v17309_v35 = vsub.s32 1, %v17308_v24 }
0x1315   :  { %9888 = vmatmul.mubr.msk.bf16.gmra.mrb[124].mxu0 %vm484_vm1, %v4732_v6  ;;  %v15029_v51 = vadd.f32 %v14927_v23, %v4706_v14 }
0x1316   :  { %4913 = vmatprep.mubr.bf16.mxu0 %v17290_v62  ;;  %v15032_v49 = vadd.f32 %v14927_v23, %v4705_v0  ;;  %v15042_v50 = vrot.slane %v4745_v31, %v17309_v35 }
0x1317   :  { %17305 = vst [vmem:[#allocation51_spill] sm:$0xff] %v15029_v51 }
0x1318   :  { %17306 = vst [vmem:[#allocation56_spill] sm:$0xff] %v15032_v49  ;;  %v4734_v46 = vpack.c.bf16 %v15029_v51, %v15032_v49 }
0x131d   :  { %9889 = vmatmul.mubr.msk.bf16.gmra.mrb[128].mxu0 %vm484_vm1, %v4733_v63 }
0x131e   :  { %4923 = vmatprep.mubr.bf16.mxu0 %v17290_v62 }
0x1325   :  { %9890 = vmatmul.mubr.msk.bf16.gmra.mrb[132].mxu0 %vm484_vm1, %v4734_v46 }
0x1395   :  { %v4855_v43 = vpop.f32.mrb[104].mxu0 }
0x1396   :  { %v4857_v62 = vpop.f32.mrb[105].mxu0  ;;  %v4856_v10 = vadd.f32 %v4855_v43, %v15038_v28 }
0x1397   :  { %v4859_v32 = vpop.f32.mrb[106].mxu0  ;;  %v4858_v5 = vadd.f32 %v4857_v62, %v15042_v50 }
0x1398   :  { %v4860_v23 = vadd.f32 %v4859_v32, %v15038_v28  ;;  %v4861_v30 = vpop.f32.mrb[107].mxu0 }
0x1399   :  { %v4862_v38 = vadd.f32 %v4861_v30, %v15042_v50 }
0x139a   :  { %v15048_v36 = vpack.c.bf16 %v4860_v23, %v4856_v10 }
0x139b   :  { %v15050_v8 = vpack.c.bf16 %v4862_v38, %v4858_v5 }
0x139c   :  { %4952 = vrot.lane.b32.xlu1 %v15048_v36, %s17196_s29  ;;  %10821 = vmatprep.mubr.msk.bf16.mxu1 %vm216_vm0, %v15048_v36 }
0x139d   :  { %v4865_v42 = vpop.f32.mrb[108].mxu0 }
0x139e   :  { %v4867_v33 = vpop.f32.mrb[109].mxu0  ;;  %v4866_v13 = vadd.f32 %v4865_v42, %v15038_v28 }
0x139f   :  { %v4869_v47 = vpop.f32.mrb[110].mxu0  ;;  %v4868_v41 = vadd.f32 %v4867_v33, %v15042_v50 }
0x13a0   :  { %v4870_v11 = vadd.f32 %v4869_v47, %v15038_v28  ;;  %v4871_v55 = vpop.f32.mrb[111].mxu0 }
0x13a1   :  { %v4872_v18 = vadd.f32 %v4871_v55, %v15042_v50 }
0x13a2   :  { %v15060_v19 = vpack.c.bf16 %v4870_v11, %v4866_v13 }
0x13a3   :  { %v15062_v16 = vpack.c.bf16 %v4872_v18, %v4868_v41 }
0x13a4   :  { %4954 = vrot.lane.b32.xlu0 %v15060_v19, %s17196_s29 }
0x13d0   :  { %v4875_v20 = vpop.f32.mrb[112].mxu0 }
0x13d1   :  { %v4877_v4 = vpop.f32.mrb[113].mxu0  ;;  %v4876_v7 = vadd.f32 %v4875_v20, %v15038_v28 }
0x13d2   :  { %v4879_v61 = vpop.f32.mrb[114].mxu0  ;;  %v4878_v48 = vadd.f32 %v4877_v4, %v15042_v50 }
0x13d3   :  { %v4880_v22 = vadd.f32 %v4879_v61, %v15038_v28  ;;  %v4881_v25 = vpop.f32.mrb[115].mxu0 }
0x13d4   :  { %v4882_v29 = vadd.f32 %v4881_v25, %v15042_v50 }
0x13d5   :  { %v15070_v12 = vpack.c.bf16 %v4880_v22, %v4876_v7 }
0x13d6   :  { %v15072_v21 = vpack.c.bf16 %v4882_v29, %v4878_v48 }
0x13d7   :  { %5019 = vrot.lane.b32.xlu1 %v15070_v12, %s17196_s29 }
0x13d8   :  { %v4885_v45 = vpop.f32.mrb[116].mxu0 }
0x13d9   :  { %v4887_v6 = vpop.f32.mrb[117].mxu0  ;;  %v4886_v15 = vadd.f32 %v4885_v45, %v15038_v28 }
0x13da   :  { %v4889_v44 = vpop.f32.mrb[118].mxu0  ;;  %v4888_v37 = vadd.f32 %v4887_v6, %v15042_v50 }
0x13db   :  { %v4890_v53 = vadd.f32 %v4889_v44, %v15038_v28  ;;  %v4891_v40 = vpop.f32.mrb[119].mxu0 }
0x13dc   :  { %v4892_v54 = vadd.f32 %v4891_v40, %v15042_v50 }
0x13dd   :  { %v15080_v63 = vpack.c.bf16 %v4890_v53, %v4886_v15 }
0x13de   :  { %v15082_v14 = vpack.c.bf16 %v4892_v54, %v4888_v37 }
0x13df   :  { %5021 = vrot.lane.b32.xlu1 %v15080_v63, %s17196_s29 }
0x13e0   :  { %v4895_v0 = vpop.f32.mrb[120].mxu0 }
0x13e1   :  { %v4897_v46 = vpop.f32.mrb[121].mxu0  ;;  %v4896_v34 = vadd.f32 %v4895_v0, %v15038_v28 }
0x13e2   :  { %v4899_v31 = vpop.f32.mrb[122].mxu0  ;;  %v4898_v35 = vadd.f32 %v4897_v46, %v15042_v50 }
0x13e3   :  { %v4900_v43 = vadd.f32 %v4899_v31, %v15038_v28  ;;  %v4901_v24 = vpop.f32.mrb[123].mxu0 }
0x13e4   :  { %v4902_v62 = vadd.f32 %v4901_v24, %v15042_v50 }
0x13e5   :  { %v15090_v32 = vpack.c.bf16 %v4900_v43, %v4896_v34 }
0x13e6   :  { %v15092_v10 = vpack.c.bf16 %v4902_v62, %v4898_v35 }
0x13e7   :  { %5086 = vrot.lane.b32.xlu0 %v15090_v32, %s17196_s29 }
0x13e8   :  { %v4905_v23 = vpop.f32.mrb[124].mxu0 }
0x13e9   :  { %v4907_v30 = vpop.f32.mrb[125].mxu0  ;;  %v4906_v38 = vadd.f32 %v4905_v23, %v15038_v28 }
0x13ea   :  { %v4909_v5 = vpop.f32.mrb[126].mxu0  ;;  %v4908_v47 = vadd.f32 %v4907_v30, %v15042_v50 }
0x13eb   :  { %v4910_v42 = vadd.f32 %v4909_v5, %v15038_v28  ;;  %v4911_v33 = vpop.f32.mrb[127].mxu0 }
0x13ec   :  { %v4912_v13 = vadd.f32 %v4911_v33, %v15042_v50 }
0x13ed   :  { %v15100_v11 = vpack.c.bf16 %v4910_v42, %v4906_v38 }
0x13ee   :  { %v15102_v55 = vpack.c.bf16 %v4912_v13, %v4908_v47 }
0x13ef   :  { %5088 = vrot.lane.b32.xlu1 %v15100_v11, %s17196_s29 }
0x13f0   :  { %v4915_v41 = vpop.f32.mrb[128].mxu0 }
0x13f1   :  { %v4917_v18 = vpop.f32.mrb[129].mxu0  ;;  %v4916_v4 = vadd.f32 %v4915_v41, %v15038_v28 }
0x13f2   :  { %v4919_v20 = vpop.f32.mrb[130].mxu0  ;;  %v4918_v22 = vadd.f32 %v4917_v18, %v15042_v50 }
0x13f3   :  { %v4920_v61 = vadd.f32 %v4919_v20, %v15038_v28  ;;  %v4921_v7 = vpop.f32.mrb[131].mxu0 }
0x13f4   :  { %v4922_v25 = vadd.f32 %v4921_v7, %v15042_v50 }
0x13f5   :  { %v15110_v48 = vpack.c.bf16 %v4920_v61, %v4916_v4 }
0x13f6   :  { %v15112_v29 = vpack.c.bf16 %v4922_v25, %v4918_v22 }
0x13f7   :  { %5153 = vrot.lane.b32.xlu0 %v15110_v48, %s17196_s29  ;;  %10845 = vmatprep.mubr.msk.bf16.mxu0 %vm216_vm0, %v15110_v48 }
0x13f8   :  { %v4925_v45 = vpop.f32.mrb[132].mxu0 }
0x13f9   :  { %v4927_v6 = vpop.f32.mrb[133].mxu0  ;;  %v4926_v15 = vadd.f32 %v4925_v45, %v15038_v28 }
0x13fa   :  { %v4929_v44 = vpop.f32.mrb[134].mxu0  ;;  %v4928_v37 = vadd.f32 %v4927_v6, %v15042_v50 }
0x13fb   :  { %v4930_v53 = vadd.f32 %v4929_v44, %v15038_v28  ;;  %v4931_v40 = vpop.f32.mrb[135].mxu0 }
0x13fc   :  { %v4932_v54 = vadd.f32 %v4931_v40, %v15042_v50 }
0x13fd   :  { %v15122_v0 = vpack.c.bf16 %v4930_v53, %v4926_v15 }
0x13fe   :  { %v15124_v46 = vpack.c.bf16 %v4932_v54, %v4928_v37 }
0x13ff   :  { %5155 = vrot.lane.b32.xlu1 %v15122_v0, %s17196_s29 }
0x140e   :  { %v4953_v31 = vpop.permute.xlu1 %4952 }
0x140f   :  { %11417 = vmatprep.subr.msk.bf16.mxu1 %vm216_vm0, %v4953_v31  ;;  %v4963_v34 = vsel %vm216_vm0, %v4953_v31, 0 }
0x1410   :  { %10818 = vmatpush3.bf16.xpose.msra.mxu1 %v4963_v34 }
0x1416   :  { %v4955_v43 = vpop.permute.xlu0 %4954 }
0x1417   :  { %11418 = vmatprep.subr.msk.bf16.mxu1 %vm216_vm0, %v4955_v43  ;;  %v4966_v28 = vsel %vm216_vm0, %v4955_v43, 0 }
0x1418   :  { %10820 = vmatpush3.bf16.xpose.msra.mxu1 %v4966_v28 }
0x141f   :  { %10822 = vmatmul.mubr.msk.bf16.vlgmr.msra.gmra.mrb[120].mxu1 %vm216_vm0, %v15060_v19 }
0x1420   :  { %10829 = vmatprep.mubr.msk.bf16.mxu1 %vm216_vm0, %v15070_v12 }
0x1449   :  { %v5020_v50 = vpop.permute.xlu1 %5019 }
0x144a   :  { %11419 = vmatprep.subr.msk.bf16.mxu1 %vm216_vm0, %v5020_v50  ;;  %v5030_v24 = vsel %vm216_vm0, %v5020_v50, 0 }
0x144b   :  { %10826 = vmatpush3.bf16.xpose.msra.mxu1 %v5030_v24 }
0x1451   :  { %v5022_v35 = vpop.permute.xlu1 %5021 }
0x1452   :  { %11420 = vmatprep.subr.msk.bf16.mxu1 %vm216_vm0, %v5022_v35  ;;  %v5033_v62 = vsel %vm216_vm0, %v5022_v35, 0 }
0x1453   :  { %10828 = vmatpush3.bf16.xpose.msra.mxu1 %v5033_v62 }
0x1459   :  { %v5087_v23 = vpop.permute.xlu0 %5086 }
0x145a   :  { %10830 = vmatmul.mubr.msk.bf16.vlgmr.msra.gmra.mrb[124].mxu1 %vm216_vm0, %v15080_v63  ;;  %11421 = vmatprep.subr.msk.bf16.mxu1 %vm216_vm0, %v5087_v23  ;;  %v5097_v30 = vsel %vm216_vm0, %v5087_v23, 0 }
0x145b   :  { %10834 = vmatpush3.bf16.xpose.msra.mxu1 %v5097_v30  ;;  %10837 = vmatprep.mubr.msk.bf16.mxu1 %vm216_vm0, %v15090_v32 }
0x1461   :  { %v5089_v5 = vpop.permute.xlu1 %5088 }
0x1462   :  { %11422 = vmatprep.subr.msk.bf16.mxu1 %vm216_vm0, %v5089_v5  ;;  %v5100_v38 = vsel %vm216_vm0, %v5089_v5, 0 }
0x1463   :  { %10836 = vmatpush3.bf16.xpose.msra.mxu1 %v5100_v38 }
0x1464   :  { %10849 = vmatprep.subr.bf16.mxu1 %v15050_v8 }
0x1469   :  { %v5154_v42 = vpop.permute.xlu0 %5153 }
0x146a   :  { %10838 = vmatmul.mubr.msk.bf16.vlgmr.msra.gmra.mrb[128].mxu1 %vm216_vm0, %v15100_v11  ;;  %11423 = vmatprep.subr.msk.bf16.mxu0 %vm216_vm0, %v5154_v42  ;;  %v5164_v33 = vsel %vm216_vm0, %v5154_v42, 0 }
0x146b   :  { %10842 = vmatpush3.bf16.xpose.msra.mxu0 %v5164_v33  ;;  %10850 = vmatpush3.bf16.msra.mxu1 %v15050_v8 }
0x146c   :  { %10851 = vmatprep.subr.bf16.mxu1 %v15062_v16 }
0x146f   :  { %10852 = vmatpush3.bf16.msra.mxu1 %v15062_v16 }
0x1470   :  { %10865 = vmatprep.subr.bf16.mxu1 %v15092_v10 }
0x1471   :  { %v5156_v47 = vpop.permute.xlu1 %5155 }
0x1472   :  { %11424 = vmatprep.subr.msk.bf16.mxu0 %vm216_vm0, %v5156_v47  ;;  %v5167_v13 = vsel %vm216_vm0, %v5156_v47, 0 }
0x1473   :  { %10844 = vmatpush3.bf16.xpose.msra.mxu0 %v5167_v13 }
0x1474   :  { %10857 = vmatprep.subr.bf16.mxu0 %v15072_v21 }
0x147a   :  { %10846 = vmatmul.mubr.msk.bf16.vlgmr.msra.gmra.mrb[136].mxu0 %vm216_vm0, %v15122_v0 }
0x147b   :  { %10858 = vmatpush3.bf16.msra.mxu0 %v15072_v21 }
0x147c   :  { %10859 = vmatprep.subr.bf16.mxu0 %v15082_v14 }
0x147f   :  { %10860 = vmatpush3.bf16.msra.mxu0 %v15082_v14 }
0x1480   :  { %10873 = vmatprep.subr.bf16.mxu0 %v15112_v29 }
0x14f2   :  { %v10823_v41 = vpop.f32.mrb[120].mxu1 }
0x14f3   :  { %v5002_v18 = vpop.f32.mrb[121].mxu1  ;;  %v5224_v20 = vsel %vm906_vm2, %v10823_v41, -inf }
0x14f4   :  { %5225 = vmax.xlane.f32.xlu0 %v5224_v20  ;;  %v10824_v4 = vpop.f32.mrb[122].mxu1  ;;  %v5218_v22 = vsel %vm906_vm2, %v5002_v18, -inf }
0x14f5   :  { %v5005_v61 = vpop.f32.mrb[123].mxu1  ;;  %v5227_v25 = vsel %vm906_vm2, %v10824_v4, -inf }
0x14f6   :  { %v5221_v7 = vsel %vm906_vm2, %v5005_v61, -inf }
0x14f7   :  { %5222 = vmax.xlane.f32.xlu1 %v5221_v7 }
0x14f8   :  { %5219 = vmax.xlane.f32.xlu0 %v5218_v22 }
0x14fc   :  { %5228 = vmax.xlane.f32.xlu0 %v5227_v25 }
0x152d   :  { %v15170_v45 = vpop.f32.mrb[124].mxu1 }
0x152e   :  { %v15172_v6 = vpop.f32.mrb[125].mxu1  ;;  %v5236_v44 = vsel %vm906_vm2, %v15170_v45, -inf }
0x152f   :  { %5237 = vmax.xlane.f32.xlu1 %v5236_v44  ;;  %v15176_v15 = vpop.f32.mrb[126].mxu1  ;;  %v5230_v37 = vsel %vm906_vm2, %v15172_v6, -inf }
0x1530   :  { %v15178_v53 = vpop.f32.mrb[127].mxu1  ;;  %v5239_v40 = vsel %vm906_vm2, %v15176_v15, -inf }
0x1531   :  { %5240 = vmax.xlane.f32.xlu0 %v5239_v40  ;;  %v5233_v54 = vsel %vm906_vm2, %v15178_v53, -inf }
0x1533   :  { %5231 = vmax.xlane.f32.xlu1 %v5230_v37 }
0x1535   :  { %5234 = vmax.xlane.f32.xlu0 %v5233_v54 }
0x153d   :  { %v15186_v31 = vpop.f32.mrb[128].mxu1 }
0x153e   :  { %v15188_v34 = vpop.f32.mrb[129].mxu1  ;;  %v5248_v43 = vsel %vm906_vm2, %v15186_v31, -inf }
0x153f   :  { %5249 = vmax.xlane.f32.xlu1 %v5248_v43  ;;  %v15192_v28 = vpop.f32.mrb[130].mxu1  ;;  %v5242_v35 = vsel %vm906_vm2, %v15188_v34, -inf }
0x1540   :  { %v15194_v50 = vpop.f32.mrb[131].mxu1  ;;  %v5251_v62 = vsel %vm906_vm2, %v15192_v28, -inf }
0x1541   :  { %v5245_v24 = vsel %vm906_vm2, %v15194_v50, -inf }
0x1542   :  { %5246 = vmax.xlane.f32.xlu0 %v5245_v24 }
0x1543   :  { %5243 = vmax.xlane.f32.xlu1 %v5242_v35 }
0x1546   :  { %5252 = vmax.xlane.f32.xlu0 %v5251_v62 }
0x154d   :  { %v15202_v23 = vpop.f32.mrb[136].mxu0 }
0x154e   :  { %v15204_v30 = vpop.f32.mrb[137].mxu0  ;;  %v5260_v5 = vsel %vm906_vm2, %v15202_v23, -inf }
0x154f   :  { %5261 = vmax.xlane.f32.xlu1 %v5260_v5  ;;  %v15208_v38 = vpop.f32.mrb[138].mxu0  ;;  %v5254_v47 = vsel %vm906_vm2, %v15204_v30, -inf }
0x1550   :  { %v15210_v42 = vpop.f32.mrb[139].mxu0  ;;  %v5263_v13 = vsel %vm906_vm2, %v15208_v38, -inf }
0x1551   :  { %v5257_v33 = vsel %vm906_vm2, %v15210_v42, -inf }
0x1552   :  { %5258 = vmax.xlane.f32.xlu0 %v5257_v33 }
0x1553   :  { %5255 = vmax.xlane.f32.xlu1 %v5254_v47 }
0x1556   :  { %5264 = vmax.xlane.f32.xlu0 %v5263_v13 }
0x1564   :  { %5626 = vrot.lane.b32.xlu1 %v15048_v36, %s12636_s23 }
0x1581   :  { %v5226_v20 = vpop.xlane.xlu0 %5225 }
0x1582   :  { %v5268_v7 = vsub.f32 %v10823_v41, %v5226_v20 }
0x1584   :  { %v5286_v22 = vmul.f32 1.442695, %v5268_v7  ;;  %v5223_v25 = vpop.xlane.xlu1 %5222 }
0x1585   :  { %v5220_v44 = vpop.xlane.xlu0 %5219  ;;  %v5267_v37 = vsub.f32 %v5005_v61, %v5223_v25 }
0x1586   :  { %12090 = vpow2.f32 %v5286_v22  ;;  %v5266_v40 = vsub.f32 %v5002_v18, %v5220_v44 }
0x1587   :  { %v5284_v35 = vmul.f32 1.442695, %v5267_v37 }
0x1588   :  { %v5282_v54 = vmul.f32 1.442695, %v5266_v40 }
0x1589   :  { %v5229_v43 = vpop.xlane.xlu0 %5228 }
0x158a   :  { %12092 = vpow2.f32 %v5282_v54  ;;  %v5269_v24 = vsub.f32 %v10824_v4, %v5229_v43 }
0x158c   :  { %v5288_v62 = vmul.f32 1.442695, %v5269_v24 }
0x158e   :  { %12094 = vpow2.f32 %v5288_v62 }
0x158f   :  { %12096 = vpow2.f32 %v5284_v35 }
0x1590   :  { %v15220_v5 = vpop.eup %12090 }
0x1591   :  { %v5320_v33 = vsel %vm906_vm2, %v15220_v5, 0.0 }
0x1592   :  { %5321 = vadd.xlane.f32.xlu1 %v5320_v33 }
0x1594   :  { %v15224_v41 = vpop.eup %12092 }
0x1595   :  { %v5314_v18 = vsel %vm906_vm2, %v15224_v41, 0.0 }
0x1596   :  { %5315 = vadd.xlane.f32.xlu1 %v5314_v18 }
0x1598   :  { %v15228_v61 = vpop.eup %12094 }
0x1599   :  { %v5323_v4 = vsel %vm906_vm2, %v15228_v61, 0.0  ;;  %v15232_v47 = vpop.eup %12096 }
0x159a   :  { %5324 = vadd.xlane.f32.xlu0 %v5323_v4  ;;  %v5317_v13 = vsel %vm906_vm2, %v15232_v47, 0.0 }
0x159e   :  { %5318 = vadd.xlane.f32.xlu0 %v5317_v13 }
0x15bc   :  { %v5238_v20 = vpop.xlane.xlu1 %5237 }
0x15bd   :  { %v5272_v7 = vsub.f32 %v15170_v45, %v5238_v20 }
0x15be   :  { %v5241_v22 = vpop.xlane.xlu0 %5240 }
0x15bf   :  { %v5294_v25 = vmul.f32 1.442695, %v5272_v7  ;;  %v5273_v44 = vsub.f32 %v15176_v15, %v5241_v22 }
0x15c0   :  { %v5232_v40 = vpop.xlane.xlu1 %5231 }
0x15c1   :  { %12098 = vpow2.f32 %v5294_v25  ;;  %v5296_v37 = vmul.f32 1.442695, %v5273_v44  ;;  %v5270_v54 = vsub.f32 %v15172_v6, %v5232_v40 }
0x15c2   :  { %v5235_v43 = vpop.xlane.xlu0 %5234 }
0x15c3   :  { %12100 = vpow2.f32 %v5296_v37  ;;  %v5290_v24 = vmul.f32 1.442695, %v5270_v54  ;;  %v5271_v35 = vsub.f32 %v15178_v53, %v5235_v43 }
0x15c5   :  { %12102 = vpow2.f32 %v5290_v24  ;;  %v5292_v62 = vmul.f32 1.442695, %v5271_v35 }
0x15c7   :  { %12104 = vpow2.f32 %v5292_v62 }
0x15cb   :  { %v15240_v33 = vpop.eup %12098 }
0x15cc   :  { %v5250_v45 = vpop.xlane.xlu1 %5249  ;;  %v5332_v18 = vsel %vm906_vm2, %v15240_v33, 0.0 }
0x15cd   :  { %v15244_v15 = vpop.eup %12100  ;;  %v5276_v4 = vsub.f32 %v15186_v31, %v5250_v45  ;;  %5333 = vadd.xlane.f32.xlu1 %v5332_v18 }
0x15ce   :  { %v5335_v6 = vsel %vm906_vm2, %v15244_v15, 0.0 }
0x15cf   :  { %v15249_v13 = vpop.eup %12102  ;;  %v5302_v53 = vmul.f32 1.442695, %v5276_v4  ;;  %5336 = vadd.xlane.f32.xlu0 %v5335_v6  ;;  %v5247_v20 = vpop.xlane.xlu0 %5246 }
0x15d0   :  { %v5244_v7 = vpop.xlane.xlu1 %5243  ;;  %v5326_v22 = vsel %vm906_vm2, %v15249_v13, 0.0  ;;  %v5275_v31 = vsub.f32 %v15194_v50, %v5247_v20 }
0x15d1   :  { %v15253_v25 = vpop.eup %12104  ;;  %12106 = vpow2.f32 %v5302_v53  ;;  %v5274_v44 = vsub.f32 %v15188_v34, %v5244_v7  ;;  %5327 = vadd.xlane.f32.xlu1 %v5326_v22 }
0x15d2   :  { %v5329_v40 = vsel %vm906_vm2, %v15253_v25, 0.0  ;;  %v5300_v24 = vmul.f32 1.442695, %v5275_v31 }
0x15d3   :  { %v5298_v37 = vmul.f32 1.442695, %v5274_v44  ;;  %5330 = vadd.xlane.f32.xlu0 %v5329_v40  ;;  %v5253_v54 = vpop.xlane.xlu0 %5252 }
0x15d4   :  { %v5277_v43 = vsub.f32 %v15192_v28, %v5253_v54 }
0x15d5   :  { %12108 = vpow2.f32 %v5298_v37 }
0x15d6   :  { %v5304_v35 = vmul.f32 1.442695, %v5277_v43 }
0x15d8   :  { %12110 = vpow2.f32 %v5304_v35 }
0x15d9   :  { %12112 = vpow2.f32 %v5300_v24 }
0x15db   :  { %v15260_v62 = vpop.eup %12106 }
0x15dc   :  { %v5262_v45 = vpop.xlane.xlu1 %5261  ;;  %v5344_v34 = vsel %vm906_vm2, %v15260_v62, 0.0 }
0x15dd   :  { %v5280_v50 = vsub.f32 %v15202_v23, %v5262_v45  ;;  %5345 = vadd.xlane.f32.xlu1 %v5344_v34 }
0x15df   :  { %v15265_v18 = vpop.eup %12108  ;;  %v5310_v4 = vmul.f32 1.442695, %v5280_v50  ;;  %v5259_v6 = vpop.xlane.xlu0 %5258 }
0x15e0   :  { %v5256_v53 = vpop.xlane.xlu1 %5255  ;;  %v5338_v28 = vsel %vm906_vm2, %v15265_v18, 0.0  ;;  %v5279_v22 = vsub.f32 %v15210_v42, %v5259_v6 }
0x15e1   :  { %12114 = vpow2.f32 %v5310_v4  ;;  %v5278_v20 = vsub.f32 %v15204_v30, %v5256_v53  ;;  %5339 = vadd.xlane.f32.xlu1 %v5338_v28 }
0x15e2   :  { %v15270_v7 = vpop.eup %12110  ;;  %v5308_v54 = vmul.f32 1.442695, %v5279_v22 }
0x15e3   :  { %v5306_v44 = vmul.f32 1.442695, %v5278_v20  ;;  %v5265_v31 = vpop.xlane.xlu0 %5264  ;;  %v5347_v23 = vsel %vm906_vm2, %v15270_v7, 0.0  ;;  %v15275_v40 = vpop.eup %12112 }
0x15e4   :  { %v5281_v37 = vsub.f32 %v15208_v38, %v5265_v31  ;;  %5348 = vadd.xlane.f32.xlu0 %v5347_v23  ;;  %v5341_v30 = vsel %vm906_vm2, %v15275_v40, 0.0  ;;  %v15318_v6 = vpop.permute.xlu1 %5626 }
0x15e5   :  { %12116 = vpow2.f32 %v5306_v44 }
0x15e6   :  { %v5312_v43 = vmul.f32 1.442695, %v5281_v37 }
0x15e8   :  { %12118 = vpow2.f32 %v5312_v43  ;;  %5342 = vadd.xlane.f32.xlu0 %v5341_v30 }
0x15e9   :  { %12120 = vpow2.f32 %v5308_v54 }
0x15eb   :  { %v15280_v42 = vpop.eup %12114 }
0x15ec   :  { %v5356_v24 = vsel %vm906_vm2, %v15280_v42, 0.0 }
0x15ed   :  { %5357 = vadd.xlane.f32.xlu1 %v5356_v24 }
0x15ef   :  { %v15284_v35 = vpop.eup %12116 }
0x15f0   :  { %v5350_v38 = vsel %vm906_vm2, %v15284_v35, 0.0 }
0x15f1   :  { %5351 = vadd.xlane.f32.xlu1 %v5350_v38 }
0x15f2   :  { %v15288_v45 = vpop.eup %12118 }
0x15f3   :  { %v5359_v34 = vsel %vm906_vm2, %v15288_v45, 0.0  ;;  %v15292_v50 = vpop.eup %12120 }
0x15f4   :  { %5360 = vadd.xlane.f32.xlu0 %v5359_v34  ;;  %v5353_v4 = vsel %vm906_vm2, %v15292_v50, 0.0 }
0x15f8   :  { %5354 = vadd.xlane.f32.xlu0 %v5353_v4 }
0x1602   :  { %5695 = vrot.lane.b32.xlu1 %v15070_v12, %s12636_s23 }
0x1606   :  { %5622 = vrot.lane.b32.xlu1 %v15048_v36, %s12637_s3 }
0x160a   :  { %5764 = vrot.lane.b32.xlu1 %v15090_v32, %s12636_s23 }
0x160e   :  { %5691 = vrot.lane.b32.xlu1 %v15070_v12, %s12637_s3  ;;  %5628 = vrot.lane.b32.xlu0 %v15060_v19, %s12636_s23 }
0x1612   :  { %5833 = vrot.lane.b32.xlu1 %v15110_v48, %s12636_s23  ;;  %5697 = vrot.lane.b32.xlu0 %v15080_v63, %s12636_s23 }
0x1616   :  { %5760 = vrot.lane.b32.xlu1 %v15090_v32, %s12637_s3  ;;  %5624 = vrot.lane.b32.xlu0 %v15060_v19, %s12637_s3 }
0x161a   :  { %5835 = vrot.lane.b32.xlu1 %v15122_v0, %s12636_s23  ;;  %5766 = vrot.lane.b32.xlu0 %v15100_v11, %s12636_s23 }
0x161e   :  { %5831 = vrot.lane.b32.xlu1 %v15122_v0, %s12637_s3  ;;  %5693 = vrot.lane.b32.xlu0 %v15080_v63, %s12637_s3 }
0x161f   :  { %v5322_v53 = vpop.xlane.xlu1 %5321 }
0x1622   :  { %6084 = vrot.lane.b32.xlu1 %v15050_v8, %s12637_s3  ;;  %5762 = vrot.lane.b32.xlu0 %v15100_v11, %s12637_s3 }
0x1623   :  { %v5316_v28 = vpop.xlane.xlu1 %5315 }
0x1626   :  { %6147 = vrot.lane.b32.xlu1 %v15072_v21, %s12637_s3  ;;  %5829 = vrot.lane.b32.xlu0 %v15110_v48, %s12637_s3 }
0x1627   :  { %v5325_v20 = vpop.xlane.xlu0 %5324 }
0x1628   :  { %12122 = vrcp.f32 %v5325_v20 }
0x1629   :  { %12124 = vrcp.f32 %v5316_v28 }
0x162a   :  { %6210 = vrot.lane.b32.xlu1 %v15092_v10, %s12637_s3  ;;  %6086 = vrot.lane.b32.xlu0 %v15062_v16, %s12637_s3  ;;  %12126 = vrcp.f32 %v5322_v53 }
0x162b   :  { %v5319_v22 = vpop.xlane.xlu0 %5318 }
0x162c   :  { %12128 = vrcp.f32 %v5319_v22 }
0x162e   :  { %6149 = vrot.lane.b32.xlu1 %v15082_v14, %s12637_s3 }
0x1632   :  { %6212 = vrot.lane.b32.xlu1 %v15102_v55, %s12637_s3  ;;  %v12123_v44 = vpop.eup %12122 }
0x1633   :  { %v12125_v31 = vpop.eup %12124  ;;  %v5381_v54 = vmul.f32 %v12123_v44, %v15228_v61 }
0x1634   :  { %v12127_v23 = vpop.eup %12126  ;;  %v5378_v43 = vmul.f32 %v12125_v31, %v15224_v41 }
0x1635   :  { %v5380_v24 = vmul.f32 %v12127_v23, %v15220_v5 }
0x1636   :  { %v12129_v37 = vpop.eup %12128 }
0x1637   :  { %v5379_v30 = vmul.f32 %v12129_v37, %v15232_v47  ;;  %v5395_v34 = vpack.c.bf16 %v5381_v54, %v5380_v24 }
0x1639   :  { %v5394_v38 = vpack.c.bf16 %v5379_v30, %v5378_v43 }
0x163b   :  { %10853 = vmatprep.mubr.msk.bf16.mxu1 %vm906_vm2, %v5394_v38 }
0x163c   :  { %10854 = vmatmul.mubr.msk.bf16.vlgmr.msra.gmra.mrb[132].mxu1 %vm906_vm2, %v5395_v34 }
0x163d   :  { %10866 = vmatpush3.bf16.msra.mxu1 %v15092_v10 }
0x163e   :  { %10867 = vmatprep.subr.bf16.mxu1 %v15102_v55 }
0x1641   :  { %10868 = vmatpush3.bf16.msra.mxu1 %v15102_v55 }
0x1642   :  { %11425 = vmatprep.subr.msk.bf16.mxu1 %vm216_vm0, %v15318_v6 }
0x165a   :  { %v5334_v41 = vpop.xlane.xlu1 %5333 }
0x165c   :  { %v5337_v61 = vpop.xlane.xlu0 %5336 }
0x165d   :  { %12130 = vrcp.f32 %v5337_v61 }
0x165e   :  { %v5328_v47 = vpop.xlane.xlu1 %5327 }
0x165f   :  { %12132 = vrcp.f32 %v5328_v47 }
0x1660   :  { %12134 = vrcp.f32 %v5334_v41  ;;  %v5331_v5 = vpop.xlane.xlu0 %5330 }
0x1661   :  { %12136 = vrcp.f32 %v5331_v5 }
0x1667   :  { %v12131_v4 = vpop.eup %12130 }
0x1668   :  { %v5385_v22 = vmul.f32 %v12131_v4, %v15244_v15 }
0x1669   :  { %v12133_v53 = vpop.eup %12132 }
0x166a   :  { %v12135_v28 = vpop.eup %12134  ;;  %v5346_v44 = vpop.xlane.xlu1 %5345  ;;  %v5382_v31 = vmul.f32 %v12133_v53, %v15249_v13 }
0x166b   :  { %v12137_v20 = vpop.eup %12136  ;;  %v5384_v37 = vmul.f32 %v12135_v28, %v15240_v33 }
0x166c   :  { %v5383_v23 = vmul.f32 %v12137_v20, %v15253_v25 }
0x166d   :  { %v5397_v43 = vpack.c.bf16 %v5385_v22, %v5384_v37 }
0x166e   :  { %v5396_v54 = vpack.c.bf16 %v5383_v23, %v5382_v31  ;;  %v5340_v30 = vpop.xlane.xlu1 %5339 }
0x1670   :  { %10861 = vmatprep.mubr.msk.bf16.mxu0 %vm906_vm2, %v5396_v54 }
0x1671   :  { %10862 = vmatmul.mubr.msk.bf16.vlgmr.msra.gmra.mrb[140].mxu0 %vm906_vm2, %v5397_v43  ;;  %v5349_v24 = vpop.xlane.xlu0 %5348 }
0x1672   :  { %10874 = vmatpush3.bf16.msra.mxu0 %v15112_v29  ;;  %12138 = vrcp.f32 %v5349_v24 }
0x1673   :  { %10875 = vmatprep.subr.bf16.mxu0 %v15124_v46  ;;  %12140 = vrcp.f32 %v5340_v30 }
0x1674   :  { %12142 = vrcp.f32 %v5346_v44 }
0x1675   :  { %v5343_v15 = vpop.xlane.xlu0 %5342 }
0x1676   :  { %10876 = vmatpush3.bf16.msra.mxu0 %v15124_v46  ;;  %12144 = vrcp.f32 %v5343_v15 }
0x167a   :  { %v5358_v33 = vpop.xlane.xlu1 %5357 }
0x167c   :  { %v12139_v13 = vpop.eup %12138 }
0x167d   :  { %v12141_v25 = vpop.eup %12140  ;;  %v5389_v61 = vmul.f32 %v12139_v13, %v15270_v7 }
0x167e   :  { %v5352_v38 = vpop.xlane.xlu1 %5351  ;;  %v12143_v34 = vpop.eup %12142  ;;  %v5386_v5 = vmul.f32 %v12141_v25, %v15265_v18  ;;  %v5637_v18 = vsel %vm216_vm0, %v15318_v6, 0 }
0x167f   :  { %v5388_v53 = vmul.f32 %v12143_v34, %v15260_v62 }
0x1680   :  { %v12145_v41 = vpop.eup %12144 }
0x1681   :  { %v5361_v47 = vpop.xlane.xlu0 %5360  ;;  %v5387_v4 = vmul.f32 %v12145_v41, %v15275_v40  ;;  %v5399_v22 = vpack.c.bf16 %v5389_v61, %v5388_v53 }
0x1682   :  { %v5696_v28 = vpop.permute.xlu1 %5695  ;;  %12146 = vrcp.f32 %v5361_v47 }
0x1683   :  { %11427 = vmatprep.subr.msk.bf16.mxu0 %vm216_vm0, %v5696_v28  ;;  %v5398_v20 = vpack.c.bf16 %v5387_v4, %v5386_v5  ;;  %12148 = vrcp.f32 %v5352_v38 }
0x1684   :  { %12150 = vrcp.f32 %v5358_v33 }
0x1685   :  { %10869 = vmatprep.mubr.msk.bf16.mxu1 %vm906_vm2, %v5398_v20  ;;  %v5355_v44 = vpop.xlane.xlu0 %5354 }
0x1686   :  { %12152 = vrcp.f32 %v5355_v44  ;;  %v5623_v7 = vpop.permute.xlu1 %5622  ;;  %10870 = vmatmul.mubr.msk.bf16.vlgmr.msra.gmra.mrb[136].mxu1 %vm906_vm2, %v5399_v22 }
0x1687   :  { %10882 = vmatpush3.bf16.xpose.msra.mxu1 %v5637_v18  ;;  %10885 = vmatprep.mubr.msk.bf16.mxu1 %vm216_vm0, %v5623_v7 }
0x1689   :  { %v5629_v62 = vpop.permute.xlu0 %5628 }
0x168a   :  { %v5765_v40 = vpop.permute.xlu1 %5764  ;;  %11426 = vmatprep.subr.msk.bf16.mxu1 %vm216_vm0, %v5629_v62  ;;  %v5640_v43 = vsel %vm216_vm0, %v5629_v62, 0 }
0x168b   :  { %v5775_v5 = vsel %vm216_vm0, %v5765_v40, 0 }
0x168c   :  { %v12147_v31 = vpop.eup %12146 }
0x168d   :  { %v5698_v23 = vpop.permute.xlu0 %5697  ;;  %v12149_v37 = vpop.eup %12148  ;;  %v5393_v15 = vmul.f32 %v12147_v31, %v15288_v45  ;;  %v5706_v45 = vsel %vm216_vm0, %v5696_v28, 0 }
0x168e   :  { %v5692_v54 = vpop.permute.xlu1 %5691  ;;  %v12151_v30 = vpop.eup %12150  ;;  %v5390_v33 = vmul.f32 %v12149_v37, %v15284_v35  ;;  %v5709_v53 = vsel %vm216_vm0, %v5698_v23, 0 }
0x168f   :  { %10884 = vmatpush3.bf16.xpose.msra.mxu1 %v5640_v43  ;;  %v5392_v25 = vmul.f32 %v12151_v30, %v15280_v42 }
0x1690   :  { %v12153_v24 = vpop.eup %12152  ;;  %11429 = vmatprep.subr.msk.bf16.mxu1 %vm216_vm0, %v5765_v40 }
0x1691   :  { %v5625_v6 = vpop.permute.xlu0 %5624  ;;  %v5391_v13 = vmul.f32 %v12153_v24, %v15292_v50  ;;  %v5401_v41 = vpack.c.bf16 %v5393_v15, %v5392_v25 }
0x1692   :  { %v5834_v38 = vpop.permute.xlu1 %5833 }
0x1693   :  { %v5400_v34 = vpack.c.bf16 %v5391_v13, %v5390_v33  ;;  %v5844_v18 = vsel %vm216_vm0, %v5834_v38, 0 }
0x1695   :  { %10877 = vmatprep.mubr.msk.bf16.mxu0 %vm906_vm2, %v5400_v34  ;;  %v5767_v61 = vpop.permute.xlu0 %5766 }
0x1696   :  { %10886 = vmatmul.mubr.msk.bf16.vlgmr.msra.gmra.mrb[140].mxu1 %vm216_vm0, %v5625_v6  ;;  %v5761_v47 = vpop.permute.xlu1 %5760  ;;  %10878 = vmatmul.mubr.msk.bf16.vlgmr.msra.gmra.mrb[144].mxu0 %vm906_vm2, %v5401_v41  ;;  %v5778_v28 = vsel %vm216_vm0, %v5767_v61, 0 }
0x1697   :  { %10890 = vmatpush3.bf16.xpose.msra.mxu0 %v5706_v45  ;;  %10898 = vmatpush3.bf16.xpose.msra.mxu1 %v5775_v5 }
0x1698   :  { %11428 = vmatprep.subr.msk.bf16.mxu0 %vm216_vm0, %v5698_v23  ;;  %10893 = vmatprep.mubr.msk.bf16.mxu0 %vm216_vm0, %v5692_v54 }
0x1699   :  { %11430 = vmatprep.subr.msk.bf16.mxu1 %vm216_vm0, %v5767_v61  ;;  %10901 = vmatprep.mubr.msk.bf16.mxu1 %vm216_vm0, %v5761_v47  ;;  %v5694_v42 = vpop.permute.xlu0 %5693 }
0x169a   :  { %v5836_v35 = vpop.permute.xlu1 %5835 }
0x169b   :  { %v5847_v40 = vsel %vm216_vm0, %v5836_v35, 0 }
0x169d   :  { %v5763_v50 = vpop.permute.xlu0 %5762 }
0x169e   :  { %v5832_v4 = vpop.permute.xlu1 %5831 }
0x169f   :  { %10892 = vmatpush3.bf16.xpose.msra.mxu0 %v5709_v53  ;;  %10900 = vmatpush3.bf16.xpose.msra.mxu1 %v5778_v28 }
0x16a0   :  { %11431 = vmatprep.subr.msk.bf16.mxu0 %vm216_vm0, %v5834_v38 }
0x16a1   :  { %v5830_v20 = vpop.permute.xlu0 %5829 }
0x16a2   :  { %v6085_v22 = vpop.permute.xlu1 %6084 }
0x16a3   :  { %10913 = vmatprep.subr.bf16.mxu1 %v6085_v22 }
0x16a5   :  { %v6087_v44 = vpop.permute.xlu0 %6086 }
0x16a6   :  { %10894 = vmatmul.mubr.msk.bf16.vlgmr.msra.gmra.mrb[148].mxu0 %vm216_vm0, %v5694_v42  ;;  %10902 = vmatmul.mubr.msk.bf16.vlgmr.msra.gmra.mrb[144].mxu1 %vm216_vm0, %v5763_v50  ;;  %v6148_v7 = vpop.permute.xlu1 %6147 }
0x16a7   :  { %10906 = vmatpush3.bf16.xpose.msra.mxu0 %v5844_v18  ;;  %10909 = vmatprep.mubr.msk.bf16.mxu0 %vm216_vm0, %v5830_v20 }
0x16a8   :  { %10914 = vmatpush3.bf16.msra.mxu1 %v6085_v22  ;;  %11432 = vmatprep.subr.msk.bf16.mxu0 %vm216_vm0, %v5836_v35 }
0x16a9   :  { %10915 = vmatprep.subr.bf16.mxu1 %v6087_v44 }
0x16aa   :  { %v15394_v62 = vpop.permute.xlu1 %6210 }
0x16ac   :  { %10916 = vmatpush3.bf16.msra.mxu1 %v6087_v44 }
0x16ad   :  { %10929 = vmatprep.subr.bf16.mxu1 %v15394_v62 }
0x16ae   :  { %v6150_v31 = vpop.permute.xlu1 %6149 }
0x16af   :  { %10908 = vmatpush3.bf16.xpose.msra.mxu0 %v5847_v40 }
0x16b0   :  { %10921 = vmatprep.subr.bf16.mxu0 %v6148_v7 }
0x16b6   :  { %10910 = vmatmul.mubr.msk.bf16.vlgmr.msra.gmra.mrb[152].mxu0 %vm216_vm0, %v5832_v4 }
0x16b7   :  { %10922 = vmatpush3.bf16.msra.mxu0 %v6148_v7 }
0x16b8   :  { %10923 = vmatprep.subr.bf16.mxu0 %v6150_v31 }
0x16bb   :  { %10924 = vmatpush3.bf16.msra.mxu0 %v6150_v31 }
0x170f   :  { %v15399_v23 = vpop.f32.mrb[132].mxu1 }
0x1710   :  { %17310 = vst [vmem:[#allocation54_spill] sm:$0xff] %v15399_v23  ;;  %v15401_v37 = vpop.f32.mrb[133].mxu1 }
0x1711   :  { %17311 = vst [vmem:[#allocation57_spill] sm:$0xff] %v15401_v37  ;;  %v15403_v54 = vpop.f32.mrb[134].mxu1 }
0x1712   :  { %17312 = vst [vmem:[#allocation55_spill] sm:$0xff] %v15403_v54  ;;  %v15405_v43 = vpop.f32.mrb[135].mxu1 }
0x1713   :  { %17313 = vst [vmem:[#allocation26_spill] sm:$0xff] %v15405_v43 }
0x1744   :  { %v15407_v30 = vpop.f32.mrb[140].mxu0 }
0x1745   :  { %17314 = vst [vmem:[#allocation29_spill] sm:$0xff] %v15407_v30  ;;  %v15409_v24 = vpop.f32.mrb[141].mxu0 }
0x1746   :  { %17315 = vst [vmem:[#allocation27_spill] sm:$0xff] %v15409_v24  ;;  %v15411_v15 = vpop.f32.mrb[142].mxu0 }
0x1747   :  { %17316 = vst [vmem:[#allocation28_spill] sm:$0xff] %v15411_v15  ;;  %v15413_v6 = vpop.f32.mrb[143].mxu0 }
0x1748   :  { %17317 = vst [vmem:[#allocation30_spill] sm:$0xff] %v15413_v6 }
0x1759   :  { %v15415_v33 = vpop.f32.mrb[136].mxu1 }
0x175a   :  { %17318 = vst [vmem:[#allocation32_spill] sm:$0xff] %v15415_v33  ;;  %v15417_v13 = vpop.f32.mrb[137].mxu1 }
0x175b   :  { %17319 = vst [vmem:[#allocation31_spill] sm:$0xff] %v15417_v13  ;;  %v15419_v25 = vpop.f32.mrb[138].mxu1 }
0x175c   :  { %17320 = vst [vmem:[#allocation33_spill] sm:$0xff] %v15419_v25  ;;  %v15421_v38 = vpop.f32.mrb[139].mxu1 }
0x175d   :  { %17321 = vst [vmem:[#allocation34_spill] sm:$0xff] %v15421_v38 }
0x1769   :  { %v10887_v34 = vpop.f32.mrb[140].mxu1  ;;  %v15423_v41 = vpop.f32.mrb[144].mxu0 }
0x176a   :  { %17322 = vst [vmem:[#allocation36_spill] sm:$0xff] %v15423_v41  ;;  %v5676_v61 = vpop.f32.mrb[141].mxu1  ;;  %v15425_v47 = vpop.f32.mrb[145].mxu0  ;;  %v5904_v45 = vsel %vm906_vm2, %v10887_v34, -inf }
0x176b   :  { %17323 = vst [vmem:[#allocation35_spill] sm:$0xff] %v15425_v47  ;;  %5905 = vmax.xlane.f32.xlu0 %v5904_v45  ;;  %v15428_v5 = vpop.f32.mrb[142].mxu1  ;;  %v15430_v42 = vpop.f32.mrb[146].mxu0  ;;  %v5898_v53 = vsel %vm906_vm2, %v5676_v61, -inf }
0x176c   :  { %17324 = vst [vmem:[#allocation37_spill] sm:$0xff] %v15430_v42  ;;  %v5679_v35 = vpop.f32.mrb[143].mxu1  ;;  %v15432_v50 = vpop.f32.mrb[147].mxu0  ;;  %v5907_v28 = vsel %vm906_vm2, %v15428_v5, -inf }
0x176d   :  { %17325 = vst [vmem:[#allocation38_spill] sm:$0xff] %v15432_v50  ;;  %v5901_v4 = vsel %vm906_vm2, %v5679_v35, -inf }
0x176e   :  { %5902 = vmax.xlane.f32.xlu1 %v5901_v4 }
0x176f   :  { %5899 = vmax.xlane.f32.xlu0 %v5898_v53 }
0x1773   :  { %5908 = vmax.xlane.f32.xlu0 %v5907_v28 }
0x1779   :  { %v15438_v20 = vpop.f32.mrb[148].mxu0  ;;  %v15440_v22 = vpop.f32.mrb[144].mxu1 }
0x177a   :  { %v15442_v44 = vpop.f32.mrb[149].mxu0  ;;  %v15444_v7 = vpop.f32.mrb[145].mxu1  ;;  %v5916_v18 = vsel %vm906_vm2, %v15438_v20, -inf  ;;  %v5928_v28 = vsel %vm906_vm2, %v15440_v22, -inf }
0x177b   :  { %5917 = vmax.xlane.f32.xlu1 %v5916_v18  ;;  %v10896_v40 = vpop.f32.mrb[150].mxu0  ;;  %v15448_v31 = vpop.f32.mrb[146].mxu1  ;;  %v5910_v18 = vsel %vm906_vm2, %v15442_v44, -inf  ;;  %v5922_v49 = vsel %vm906_vm2, %v15444_v7, -inf }
0x177c   :  { %v15450_v45 = vpop.f32.mrb[151].mxu0  ;;  %v15452_v4 = vpop.f32.mrb[147].mxu1  ;;  %v5919_v53 = vsel %vm906_vm2, %v10896_v40, -inf  ;;  %v5931_v51 = vsel %vm906_vm2, %v15448_v31, -inf }
0x177d   :  { %5920 = vmax.xlane.f32.xlu0 %v5919_v53  ;;  %v5913_v3 = vsel %vm906_vm2, %v15450_v45, -inf  ;;  %v5925_v53 = vsel %vm906_vm2, %v15452_v4, -inf }
0x177f   :  { %5929 = vmax.xlane.f32.xlu1 %v5928_v28 }
0x1781   :  { %5932 = vmax.xlane.f32.xlu0 %v5931_v51 }
0x1783   :  { %5911 = vmax.xlane.f32.xlu1 %v5910_v18 }
0x1785   :  { %5914 = vmax.xlane.f32.xlu0 %v5913_v3 }
0x1787   :  { %5923 = vmax.xlane.f32.xlu1 %v5922_v49 }
0x1789   :  { %5926 = vmax.xlane.f32.xlu0 %v5925_v53  ;;  %v15467_v28 = vpop.f32.mrb[152].mxu0 }
0x178a   :  { %v15469_v39 = vpop.f32.mrb[153].mxu0  ;;  %v5940_v51 = vsel %vm906_vm2, %v15467_v28, -inf }
0x178b   :  { %5941 = vmax.xlane.f32.xlu1 %v5940_v51  ;;  %v15473_v18 = vpop.f32.mrb[154].mxu0  ;;  %v5934_v49 = vsel %vm906_vm2, %v15469_v39, -inf  ;;  %v15489_v51 = vpop.permute.xlu1 %6212 }
0x178c   :  { %v15475_v9 = vpop.f32.mrb[155].mxu0  ;;  %v5943_v3 = vsel %vm906_vm2, %v15473_v18, -inf }
0x178d   :  { %5944 = vmax.xlane.f32.xlu0 %v5943_v3  ;;  %v5937_v53 = vsel %vm906_vm2, %v15475_v9, -inf }
0x178f   :  { %5935 = vmax.xlane.f32.xlu1 %v5934_v49 }
0x1791   :  { %5938 = vmax.xlane.f32.xlu0 %v5937_v53 }
0x17a0   :  { %6275 = vrot.lane.b32.xlu1 %v15124_v46, %s12637_s3 }
0x17a7   :  { %6273 = vrot.lane.b32.xlu0 %v15112_v29, %s12637_s3 }
0x17ab   :  { %6338 = vrot.lane.b32.xlu0 %v15048_v36, %s17235_s26 }
0x17f8   :  { %v5906_v3 = vpop.xlane.xlu0 %5905 }
0x17f9   :  { %v5948_v56 = vsub.f32 %v10887_v34, %v5906_v3 }
0x17fb   :  { %v5966_v27 = vmul.f32 1.442695, %v5948_v56  ;;  %v5903_v52 = vpop.xlane.xlu1 %5902 }
0x17fc   :  { %v5900_v49 = vpop.xlane.xlu0 %5899  ;;  %v5947_v60 = vsub.f32 %v5679_v35, %v5903_v52 }
0x17fd   :  { %12154 = vpow2.f32 %v5966_v27  ;;  %v5946_v1 = vsub.f32 %v5676_v61, %v5900_v49 }
0x17fe   :  { %v5964_v57 = vmul.f32 1.442695, %v5947_v60 }
0x17ff   :  { %v5962_v53 = vmul.f32 1.442695, %v5946_v1 }
0x1800   :  { %v5909_v59 = vpop.xlane.xlu0 %5908 }
0x1801   :  { %12156 = vpow2.f32 %v5962_v53  ;;  %v5949_v2 = vsub.f32 %v15428_v5, %v5909_v59 }
0x1803   :  { %v5968_v17 = vmul.f32 1.442695, %v5949_v2 }
0x1805   :  { %12158 = vpow2.f32 %v5968_v17 }
0x1806   :  { %12160 = vpow2.f32 %v5964_v57 }
0x1807   :  { %v15492_v26 = vpop.eup %12154 }
0x1808   :  { %v5918_v58 = vpop.xlane.xlu1 %5917  ;;  %v6000_v56 = vsel %vm906_vm2, %v15492_v26, 0.0 }
0x1809   :  { %v5952_v34 = vsub.f32 %v15438_v20, %v5918_v58  ;;  %6001 = vadd.xlane.f32.xlu1 %v6000_v56 }
0x180a   :  { %v5921_v27 = vpop.xlane.xlu0 %5920 }
0x180b   :  { %v15497_v52 = vpop.eup %12156  ;;  %v5974_v1 = vmul.f32 1.442695, %v5952_v34  ;;  %v5953_v61 = vsub.f32 %v10896_v40, %v5921_v27 }
0x180c   :  { %v5930_v35 = vpop.xlane.xlu1 %5929  ;;  %v5994_v2 = vsel %vm906_vm2, %v15497_v52, 0.0 }
0x180d   :  { %12162 = vpow2.f32 %v5974_v1  ;;  %v5976_v17 = vmul.f32 1.442695, %v5953_v61  ;;  %v5956_v57 = vsub.f32 %v15440_v22, %v5930_v35  ;;  %5995 = vadd.xlane.f32.xlu1 %v5994_v2 }
0x180e   :  { %v5933_v60 = vpop.xlane.xlu0 %5932 }
0x180f   :  { %v15502_v59 = vpop.eup %12158  ;;  %12164 = vpow2.f32 %v5976_v17  ;;  %v5982_v58 = vmul.f32 1.442695, %v5956_v57  ;;  %v5957_v5 = vsub.f32 %v15448_v31, %v5933_v60 }
0x1810   :  { %v5912_v20 = vpop.xlane.xlu1 %5911  ;;  %v6003_v40 = vsel %vm906_vm2, %v15502_v59, 0.0  ;;  %v15507_v3 = vpop.eup %12160 }
0x1811   :  { %12166 = vpow2.f32 %v5982_v58  ;;  %v5984_v49 = vmul.f32 1.442695, %v5957_v5  ;;  %v5950_v53 = vsub.f32 %v15442_v44, %v5912_v20  ;;  %6004 = vadd.xlane.f32.xlu0 %v6003_v40  ;;  %v5997_v31 = vsel %vm906_vm2, %v15507_v3, 0.0 }
0x1812   :  { %v5915_v22 = vpop.xlane.xlu0 %5914 }
0x1813   :  { %12168 = vpow2.f32 %v5984_v49  ;;  %v5970_v56 = vmul.f32 1.442695, %v5950_v53  ;;  %v5951_v34 = vsub.f32 %v15450_v45, %v5915_v22 }
0x1814   :  { %v5924_v27 = vpop.xlane.xlu1 %5923 }
0x1815   :  { %12170 = vpow2.f32 %v5970_v56  ;;  %v5972_v1 = vmul.f32 1.442695, %v5951_v34  ;;  %v5954_v61 = vsub.f32 %v15444_v7, %v5924_v27  ;;  %5998 = vadd.xlane.f32.xlu0 %v5997_v31 }
0x1816   :  { %v5927_v35 = vpop.xlane.xlu0 %5926 }
0x1817   :  { %v15514_v2 = vpop.eup %12162  ;;  %12172 = vpow2.f32 %v5972_v1  ;;  %v5978_v44 = vmul.f32 1.442695, %v5954_v61  ;;  %v5955_v17 = vsub.f32 %v15452_v4, %v5927_v35 }
0x1818   :  { %v5942_v57 = vpop.xlane.xlu1 %5941  ;;  %v6012_v45 = vsel %vm906_vm2, %v15514_v2, 0.0 }
0x1819   :  { %v15519_v60 = vpop.eup %12164  ;;  %12174 = vpow2.f32 %v5978_v44  ;;  %v5980_v58 = vmul.f32 1.442695, %v5955_v17  ;;  %v5960_v5 = vsub.f32 %v15467_v28, %v5942_v57  ;;  %6013 = vadd.xlane.f32.xlu1 %v6012_v45 }
0x181a   :  { %v5945_v7 = vpop.xlane.xlu0 %5944  ;;  %v6015_v20 = vsel %vm906_vm2, %v15519_v60, 0.0 }
0x181b   :  { %v15524_v40 = vpop.eup %12166  ;;  %12176 = vpow2.f32 %v5980_v58  ;;  %v5990_v49 = vmul.f32 1.442695, %v5960_v5  ;;  %v5961_v4 = vsub.f32 %v15473_v18, %v5945_v7  ;;  %6016 = vadd.xlane.f32.xlu0 %v6015_v20 }
0x181c   :  { %v6024_v53 = vsel %vm906_vm2, %v15524_v40, 0.0 }
0x181d   :  { %v15529_v22 = vpop.eup %12168  ;;  %12178 = vpow2.f32 %v5990_v49  ;;  %v5992_v56 = vmul.f32 1.442695, %v5961_v4  ;;  %6025 = vadd.xlane.f32.xlu1 %v6024_v53  ;;  %v5936_v53 = vpop.xlane.xlu1 %5935 }
0x181e   :  { %v5939_v28 = vpop.xlane.xlu0 %5938  ;;  %v6027_v34 = vsel %vm906_vm2, %v15529_v22, 0.0 }
0x181f   :  { %v15533_v27 = vpop.eup %12170  ;;  %v5959_v31 = vsub.f32 %v15475_v9, %v5939_v28  ;;  %6028 = vadd.xlane.f32.xlu0 %v6027_v34  ;;  %12180 = vpow2.f32 %v5992_v56  ;;  %v5958_v56 = vsub.f32 %v15469_v39, %v5936_v53 }
0x1820   :  { %v6006_v18 = vsel %vm906_vm2, %v15533_v27, 0.0 }
0x1821   :  { %v15538_v1 = vpop.eup %12172  ;;  %v5988_v61 = vmul.f32 1.442695, %v5959_v31  ;;  %6007 = vadd.xlane.f32.xlu1 %v6006_v18  ;;  %v5986_v28 = vmul.f32 1.442695, %v5958_v56  ;;  %v15610_v31 = vpop.permute.xlu1 %6275 }
0x1822   :  { %v15540_v35 = vpop.permute.xlu0 %6273  ;;  %v6009_v44 = vsel %vm906_vm2, %v15538_v1, 0.0 }
0x1823   :  { %v15544_v17 = vpop.eup %12174  ;;  %6010 = vadd.xlane.f32.xlu0 %v6009_v44  ;;  %10937 = vmatprep.subr.bf16.mxu0 %v15540_v35  ;;  %12182 = vpow2.f32 %v5988_v61 }
0x1824   :  { %v6018_v9 = vsel %vm906_vm2, %v15544_v17, 0.0  ;;  %12184 = vpow2.f32 %v5986_v28 }
0x1825   :  { %v15549_v57 = vpop.eup %12176  ;;  %6019 = vadd.xlane.f32.xlu1 %v6018_v9 }
0x1826   :  { %v6021_v45 = vsel %vm906_vm2, %v15549_v57, 0.0  ;;  %v15614_v61 = vpop.permute.xlu0 %6338 }
0x1827   :  { %v15553_v58 = vpop.eup %12178  ;;  %6022 = vadd.xlane.f32.xlu0 %v6021_v45 }
0x1828   :  { %v6036_v5 = vsel %vm906_vm2, %v15553_v58, 0.0 }
0x1829   :  { %v15557_v7 = vpop.eup %12180 }
0x182a   :  { %v6039_v20 = vsel %vm906_vm2, %v15557_v7, 0.0 }
0x182b   :  { %6037 = vadd.xlane.f32.xlu0 %v6036_v5 }
0x182d   :  { %v15561_v49 = vpop.eup %12182 }
0x182e   :  { %v6033_v4 = vsel %vm906_vm2, %v15561_v49, 0.0  ;;  %v15576_v34 = vpop.eup %12184 }
0x182f   :  { %6040 = vadd.xlane.f32.xlu0 %v6039_v20  ;;  %v6030_v39 = vsel %vm906_vm2, %v15576_v34, 0.0 }
0x1833   :  { %6034 = vadd.xlane.f32.xlu0 %v6033_v4 }
0x1836   :  { %6340 = vrot.lane.b32.xlu1 %v15060_v19, %s17235_s26 }
0x1849   :  { %6407 = vrot.lane.b32.xlu0 %v15070_v12, %s17235_s26 }
0x184d   :  { %6409 = vrot.lane.b32.xlu0 %v15080_v63, %s17235_s26 }
0x1851   :  { %6336 = vrot.lane.b32.xlu0 %v15060_v19, %s12638_s2 }
0x1855   :  { %6478 = vrot.lane.b32.xlu0 %v15100_v11, %s17235_s26 }
0x1859   :  { %6405 = vrot.lane.b32.xlu0 %v15080_v63, %s12638_s2 }
0x185a   :  { %6031 = vadd.xlane.f32.xlu1 %v6030_v39 }
0x185d   :  { %6474 = vrot.lane.b32.xlu0 %v15100_v11, %s12638_s2 }
0x1861   :  { %6541 = vrot.lane.b32.xlu0 %v15110_v48, %s12638_s2 }
0x1865   :  { %6796 = vrot.lane.b32.xlu0 %v15062_v16, %s12638_s2 }
0x186b   :  { %6334 = vrot.lane.b32.xlu1 %v15048_v36, %s12638_s2 }
0x186f   :  { %6476 = vrot.lane.b32.xlu1 %v15090_v32, %s17235_s26 }
0x1873   :  { %6403 = vrot.lane.b32.xlu1 %v15070_v12, %s12638_s2 }
0x1877   :  { %6545 = vrot.lane.b32.xlu1 %v15110_v48, %s17235_s26 }
0x187b   :  { %6472 = vrot.lane.b32.xlu1 %v15090_v32, %s12638_s2 }
0x187f   :  { %6547 = vrot.lane.b32.xlu1 %v15122_v0, %s17235_s26 }
0x1883   :  { %6543 = vrot.lane.b32.xlu1 %v15122_v0, %s12638_s2 }
0x1887   :  { %6794 = vrot.lane.b32.xlu1 %v15050_v8, %s12638_s2 }
0x188b   :  { %6855 = vrot.lane.b32.xlu1 %v15072_v21, %s12638_s2 }
0x188f   :  { %6916 = vrot.lane.b32.xlu1 %v15092_v10, %s12638_s2 }
0x1893   :  { %6857 = vrot.lane.b32.xlu1 %v15082_v14, %s12638_s2 }
0x1896   :  { %v6002_v18 = vpop.xlane.xlu1 %6001 }
0x1897   :  { %6918 = vrot.lane.b32.xlu1 %v15102_v55, %s12638_s2 }
0x189a   :  { %v5996_v44 = vpop.xlane.xlu1 %5995 }
0x189e   :  { %v6005_v9 = vpop.xlane.xlu0 %6004 }
0x189f   :  { %12186 = vrcp.f32 %v6005_v9 }
0x18a0   :  { %12188 = vrcp.f32 %v5996_v44 }
0x18a1   :  { %12190 = vrcp.f32 %v6002_v18 }
0x18a2   :  { %v5999_v45 = vpop.xlane.xlu0 %5998 }
0x18a3   :  { %12192 = vrcp.f32 %v5999_v45 }
0x18a6   :  { %v6014_v5 = vpop.xlane.xlu1 %6013 }
0x18a8   :  { %v6017_v20 = vpop.xlane.xlu0 %6016 }
0x18a9   :  { %v12187_v4 = vpop.eup %12186  ;;  %12194 = vrcp.f32 %v6017_v20 }
0x18aa   :  { %v6026_v53 = vpop.xlane.xlu1 %6025  ;;  %v12189_v56 = vpop.eup %12188  ;;  %v6061_v42 = vmul.f32 %v12187_v4, %v15502_v59 }
0x18ab   :  { %v12191_v28 = vpop.eup %12190  ;;  %v6058_v50 = vmul.f32 %v12189_v56, %v15497_v52 }
0x18ac   :  { %v6029_v39 = vpop.xlane.xlu0 %6028  ;;  %v6060_v18 = vmul.f32 %v12191_v28, %v15492_v26 }
0x18ad   :  { %v12193_v41 = vpop.eup %12192 }
0x18ae   :  { %v6008_v47 = vpop.xlane.xlu1 %6007  ;;  %v6059_v9 = vmul.f32 %v12193_v41, %v15507_v3  ;;  %v6075_v13 = vpack.c.bf16 %v6061_v42, %v6060_v18 }
0x18af   :  { %12196 = vrcp.f32 %v6008_v47 }
0x18b0   :  { %12198 = vrcp.f32 %v6014_v5  ;;  %v6011_v44 = vpop.xlane.xlu0 %6010  ;;  %v6074_v45 = vpack.c.bf16 %v6059_v9, %v6058_v50 }
0x18b1   :  { %12200 = vrcp.f32 %v6011_v44 }
0x18b2   :  { %12202 = vrcp.f32 %v6029_v39  ;;  %v6020_v38 = vpop.xlane.xlu1 %6019  ;;  %10917 = vmatprep.mubr.msk.bf16.mxu1 %vm906_vm2, %v6074_v45 }
0x18b3   :  { %12204 = vrcp.f32 %v6020_v38  ;;  %10918 = vmatmul.mubr.msk.bf16.vlgmr.msra.gmra.mrb[148].mxu1 %vm906_vm2, %v6075_v13  ;;  %v12195_v26 = vpop.eup %12194 }
0x18b4   :  { %12206 = vrcp.f32 %v6026_v53  ;;  %10930 = vmatpush3.bf16.msra.mxu1 %v15394_v62  ;;  %v6023_v52 = vpop.xlane.xlu0 %6022  ;;  %v6065_v38 = vmul.f32 %v12195_v26, %v15519_v60 }
0x18b5   :  { %10931 = vmatprep.subr.bf16.mxu1 %v15489_v51  ;;  %12208 = vrcp.f32 %v6023_v52 }
0x18b6   :  { %v6341_v18 = vpop.permute.xlu1 %6340 }
0x18b8   :  { %10932 = vmatpush3.bf16.msra.mxu1 %v15489_v51  ;;  %v6038_v41 = vpop.xlane.xlu0 %6037 }
0x18b9   :  { %v12197_v47 = vpop.eup %12196  ;;  %11433 = vmatprep.subr.msk.bf16.mxu1 %vm216_vm0, %v15614_v61 }
0x18ba   :  { %v12199_v42 = vpop.eup %12198  ;;  %v6062_v62 = vmul.f32 %v12197_v47, %v15533_v27 }
0x18bb   :  { %v12201_v50 = vpop.eup %12200  ;;  %v6064_v20 = vmul.f32 %v12199_v42, %v15514_v2 }
0x18bc   :  { %v12203_v13 = vpop.eup %12202  ;;  %v6041_v59 = vpop.xlane.xlu0 %6040  ;;  %v6063_v3 = vmul.f32 %v12201_v50, %v15538_v1 }
0x18bd   :  { %v12205_v5 = vpop.eup %12204  ;;  %v6069_v56 = vmul.f32 %v12203_v13, %v15529_v22  ;;  %v6077_v28 = vpack.c.bf16 %v6065_v38, %v6064_v20  ;;  %12210 = vrcp.f32 %v6041_v59 }
0x18be   :  { %v12207_v4 = vpop.eup %12206  ;;  %v6076_v51 = vpack.c.bf16 %v6063_v3, %v6062_v62  ;;  %v6066_v60 = vmul.f32 %v12205_v5, %v15544_v17  ;;  %v6349_v17 = vsel %vm216_vm0, %v15614_v61, 0 }
0x18bf   :  { %v12209_v53 = vpop.eup %12208  ;;  %v6068_v27 = vmul.f32 %v12207_v4, %v15524_v40  ;;  %v6352_v40 = vsel %vm216_vm0, %v6341_v18, 0 }
0x18c0   :  { %10925 = vmatprep.mubr.msk.bf16.mxu0 %vm906_vm2, %v6076_v51  ;;  %v6035_v39 = vpop.xlane.xlu0 %6034  ;;  %v6067_v9 = vmul.f32 %v12209_v53, %v15549_v57 }
0x18c1   :  { %10926 = vmatmul.mubr.msk.bf16.vlgmr.msra.gmra.mrb[156].mxu0 %vm906_vm2, %v6077_v28  ;;  %v6079_v1 = vpack.c.bf16 %v6069_v56, %v6068_v27  ;;  %12212 = vrcp.f32 %v6035_v39 }
0x18c2   :  { %10938 = vmatpush3.bf16.msra.mxu0 %v15540_v35  ;;  %v6078_v2 = vpack.c.bf16 %v6067_v9, %v6066_v60  ;;  %12214 = vrcp.f32 %v6038_v41 }
0x18c3   :  { %10939 = vmatprep.subr.bf16.mxu0 %v15610_v31 }
0x18c4   :  { %10933 = vmatprep.mubr.msk.bf16.mxu1 %vm906_vm2, %v6078_v2  ;;  %v6408_v22 = vpop.permute.xlu0 %6407 }
0x18c5   :  { %10934 = vmatmul.mubr.msk.bf16.vlgmr.msra.gmra.mrb[152].mxu1 %vm906_vm2, %v6079_v1  ;;  %v6418_v51 = vsel %vm216_vm0, %v6408_v22, 0 }
0x18c6   :  { %10940 = vmatpush3.bf16.msra.mxu0 %v15610_v31  ;;  %10946 = vmatpush3.bf16.xpose.msra.mxu1 %v6349_v17 }
0x18c7   :  { %11434 = vmatprep.subr.msk.bf16.mxu1 %vm216_vm0, %v6341_v18  ;;  %11435 = vmatprep.subr.msk.bf16.mxu0 %vm216_vm0, %v6408_v22  ;;  %v12211_v31 = vpop.eup %12210 }
0x18c8   :  { %v6410_v35 = vpop.permute.xlu0 %6409  ;;  %v6073_v41 = vmul.f32 %v12211_v31, %v15557_v7 }
0x18c9   :  { %v6421_v53 = vsel %vm216_vm0, %v6410_v35, 0 }
0x18cb   :  { %v12213_v52 = vpop.eup %12212 }
0x18cc   :  { %v6337_v44 = vpop.permute.xlu0 %6336  ;;  %v12215_v47 = vpop.eup %12214  ;;  %v6071_v59 = vmul.f32 %v12213_v52, %v15561_v49 }
0x18cd   :  { %v6072_v62 = vmul.f32 %v12215_v47, %v15553_v58 }
0x18ce   :  { %10948 = vmatpush3.bf16.xpose.msra.mxu1 %v6352_v40 }
0x18cf   :  { %v6081_v5 = vpack.c.bf16 %v6073_v41, %v6072_v62 }
0x18d0   :  { %v6479_v42 = vpop.permute.xlu0 %6478 }
0x18d1   :  { %v6490_v7 = vsel %vm216_vm0, %v6479_v42, 0 }
0x18d4   :  { %v6406_v4 = vpop.permute.xlu0 %6405 }
0x18d8   :  { %v6475_v58 = vpop.permute.xlu0 %6474 }
0x18dc   :  { %v6542_v28 = vpop.permute.xlu0 %6541 }
0x18e0   :  { %v6797_v9 = vpop.permute.xlu0 %6796 }
0x18e7   :  { %v6032_v57 = vpop.xlane.xlu1 %6031 }
0x18e8   :  { %12216 = vrcp.f32 %v6032_v57 }
0x18eb   :  { %v6335_v45 = vpop.permute.xlu1 %6334 }
0x18ec   :  { %10949 = vmatprep.mubr.msk.bf16.mxu1 %vm216_vm0, %v6335_v45 }
0x18ed   :  { %10950 = vmatmul.mubr.msk.bf16.vlgmr.msra.gmra.mrb[156].mxu1 %vm216_vm0, %v6337_v44 }
0x18ef   :  { %v6477_v61 = vpop.permute.xlu1 %6476 }
0x18f0   :  { %11437 = vmatprep.subr.msk.bf16.mxu1 %vm216_vm0, %v6477_v61  ;;  %v6487_v26 = vsel %vm216_vm0, %v6477_v61, 0 }
0x18f1   :  { %10962 = vmatpush3.bf16.xpose.msra.mxu1 %v6487_v26 }
0x18f2   :  { %v12217_v50 = vpop.eup %12216  ;;  %11438 = vmatprep.subr.msk.bf16.mxu1 %vm216_vm0, %v6479_v42 }
0x18f3   :  { %v6404_v38 = vpop.permute.xlu1 %6403  ;;  %v6070_v13 = vmul.f32 %v12217_v50, %v15576_v34 }
0x18f5   :  { %v6080_v3 = vpack.c.bf16 %v6071_v59, %v6070_v13 }
0x18f7   :  { %v6546_v20 = vpop.permute.xlu1 %6545  ;;  %10941 = vmatprep.mubr.msk.bf16.mxu0 %vm906_vm2, %v6080_v3 }
0x18f8   :  { %10942 = vmatmul.mubr.msk.bf16.vlgmr.msra.gmra.mrb[160].mxu0 %vm906_vm2, %v6081_v5  ;;  %v6556_v60 = vsel %vm216_vm0, %v6546_v20, 0 }
0x18f9   :  { %10954 = vmatpush3.bf16.xpose.msra.mxu0 %v6418_v51  ;;  %10957 = vmatprep.mubr.msk.bf16.mxu0 %vm216_vm0, %v6404_v38 }
0x18fa   :  { %11436 = vmatprep.subr.msk.bf16.mxu0 %vm216_vm0, %v6410_v35  ;;  %10964 = vmatpush3.bf16.xpose.msra.mxu1 %v6490_v7 }
0x18fb   :  { %v6473_v49 = vpop.permute.xlu1 %6472 }
0x18fc   :  { %10965 = vmatprep.mubr.msk.bf16.mxu1 %vm216_vm0, %v6473_v49 }
0x18ff   :  { %v6548_v34 = vpop.permute.xlu1 %6547 }
0x1900   :  { %v6559_v1 = vsel %vm216_vm0, %v6548_v34, 0 }
0x1901   :  { %10956 = vmatpush3.bf16.xpose.msra.mxu0 %v6421_v53  ;;  %10966 = vmatmul.mubr.msk.bf16.vlgmr.msra.gmra.mrb[160].mxu1 %vm216_vm0, %v6475_v58 }
0x1902   :  { %11439 = vmatprep.subr.msk.bf16.mxu0 %vm216_vm0, %v6546_v20 }
0x1903   :  { %v6544_v56 = vpop.permute.xlu1 %6543 }
0x1907   :  { %v6795_v39 = vpop.permute.xlu1 %6794 }
0x1908   :  { %10958 = vmatmul.mubr.msk.bf16.vlgmr.msra.gmra.mrb[164].mxu0 %vm216_vm0, %v6406_v4  ;;  %10977 = vmatprep.subr.bf16.mxu1 %v6795_v39 }
0x1909   :  { %10970 = vmatpush3.bf16.xpose.msra.mxu0 %v6556_v60  ;;  %10973 = vmatprep.mubr.msk.bf16.mxu0 %vm216_vm0, %v6542_v28 }
0x190a   :  { %11440 = vmatprep.subr.msk.bf16.mxu0 %vm216_vm0, %v6548_v34  ;;  %10978 = vmatpush3.bf16.msra.mxu1 %v6795_v39 }
0x190b   :  { %10979 = vmatprep.subr.bf16.mxu1 %v6797_v9  ;;  %v6856_v27 = vpop.permute.xlu1 %6855 }
0x190e   :  { %10980 = vmatpush3.bf16.msra.mxu1 %v6797_v9 }
0x190f   :  { %v15670_v2 = vpop.permute.xlu1 %6916 }
0x1910   :  { %10993 = vmatprep.subr.bf16.mxu1 %v15670_v2 }
0x1911   :  { %10972 = vmatpush3.bf16.xpose.msra.mxu0 %v6559_v1 }
0x1912   :  { %10985 = vmatprep.subr.bf16.mxu0 %v6856_v27 }
0x1913   :  { %v6858_v22 = vpop.permute.xlu1 %6857 }
0x1918   :  { %10974 = vmatmul.mubr.msk.bf16.vlgmr.msra.gmra.mrb[168].mxu0 %vm216_vm0, %v6544_v56 }
0x1919   :  { %10986 = vmatpush3.bf16.msra.mxu0 %v6856_v27 }
0x191a   :  { %10987 = vmatprep.subr.bf16.mxu0 %v6858_v22 }
0x191d   :  { %10988 = vmatpush3.bf16.msra.mxu0 %v6858_v22 }
0x1986   :  { %v15675_v17 = vpop.f32.mrb[148].mxu1 }
0x1987   :  { %v15677_v18 = vpop.f32.mrb[149].mxu1 }
0x1988   :  { %v15679_v40 = vpop.f32.mrb[150].mxu1 }
0x1989   :  { %v15683_v57 = vpop.f32.mrb[151].mxu1 }
0x1994   :  { %v15687_v45 = vpop.f32.mrb[156].mxu0 }
0x1995   :  { %v15689_v31 = vpop.f32.mrb[157].mxu0 }
0x1996   :  { %v15691_v61 = vpop.f32.mrb[158].mxu0 }
0x1997   :  { %v15695_v26 = vpop.f32.mrb[159].mxu0 }
0x1998   :  { %v15699_v42 = vpop.f32.mrb[152].mxu1 }
0x1999   :  { %v15701_v50 = vpop.f32.mrb[153].mxu1 }
0x199a   :  { %v15703_v41 = vpop.f32.mrb[154].mxu1 }
0x199b   :  { %v15707_v13 = vpop.f32.mrb[155].mxu1 }
0x19c0   :  { %v10951_v62 = vpop.f32.mrb[156].mxu1 }
0x19c1   :  { %v15711_v3 = vpop.f32.mrb[157].mxu1  ;;  %v6616_v5 = vsel %vm906_vm2, %v10951_v62, -inf }
0x19c2   :  { %6617 = vmax.xlane.f32.xlu0 %v6616_v5  ;;  %v15714_v20 = vpop.f32.mrb[158].mxu1  ;;  %v6610_v7 = vsel %vm906_vm2, %v15711_v3, -inf }
0x19c3   :  { %v15716_v4 = vpop.f32.mrb[159].mxu1  ;;  %v6619_v49 = vsel %vm906_vm2, %v15714_v20, -inf }
0x19c4   :  { %v6613_v51 = vsel %vm906_vm2, %v15716_v4, -inf }
0x19c5   :  { %6614 = vmax.xlane.f32.xlu1 %v6613_v51 }
0x19c6   :  { %6611 = vmax.xlane.f32.xlu0 %v6610_v7 }
0x19ca   :  { %6620 = vmax.xlane.f32.xlu0 %v6619_v49 }
0x19cb   :  { %v15724_v58 = vpop.f32.mrb[160].mxu0 }
0x19cc   :  { %17326 = vst [vmem:[#allocation40_spill] sm:$0xff] %v15724_v58  ;;  %v15726_v34 = vpop.f32.mrb[161].mxu0 }
0x19cd   :  { %v15728_v53 = vpop.f32.mrb[162].mxu0 }
0x19ce   :  { %v15732_v28 = vpop.f32.mrb[163].mxu0 }
0x19d4   :  { %v15736_v60 = vpop.f32.mrb[160].mxu1 }
0x19d5   :  { %v15738_v9 = vpop.f32.mrb[161].mxu1  ;;  %v6640_v39 = vsel %vm906_vm2, %v15736_v60, -inf }
0x19d6   :  { %v15740_v27 = vpop.f32.mrb[162].mxu1  ;;  %v6634_v38 = vsel %vm906_vm2, %v15738_v9, -inf }
0x19d7   :  { %v15742_v1 = vpop.f32.mrb[163].mxu1  ;;  %v6643_v59 = vsel %vm906_vm2, %v15740_v27, -inf }
0x19db   :  { %v15744_v22 = vpop.f32.mrb[164].mxu0 }
0x19dc   :  { %v15746_v5 = vpop.f32.mrb[165].mxu0  ;;  %v6628_v51 = vsel %vm906_vm2, %v15744_v22, -inf }
0x19dd   :  { %6629 = vmax.xlane.f32.xlu1 %v6628_v51  ;;  %v15750_v7 = vpop.f32.mrb[166].mxu0  ;;  %v6622_v47 = vsel %vm906_vm2, %v15746_v5, -inf }
0x19de   :  { %v15752_v49 = vpop.f32.mrb[167].mxu0  ;;  %v6631_v56 = vsel %vm906_vm2, %v15750_v7, -inf }
0x19df   :  { %6632 = vmax.xlane.f32.xlu0 %v6631_v56  ;;  %v6625_v51 = vsel %vm906_vm2, %v15752_v49, -inf  ;;  %v6637_v56 = vsel %vm906_vm2, %v15742_v1, -inf }
0x19e1   :  { %6641 = vmax.xlane.f32.xlu1 %v6640_v39 }
0x19e3   :  { %6644 = vmax.xlane.f32.xlu0 %v6643_v59 }
0x19e5   :  { %6623 = vmax.xlane.f32.xlu1 %v6622_v47 }
0x19e7   :  { %6626 = vmax.xlane.f32.xlu0 %v6625_v51 }
0x19e9   :  { %6635 = vmax.xlane.f32.xlu1 %v6634_v38 }
0x19eb   :  { %6638 = vmax.xlane.f32.xlu0 %v6637_v56  ;;  %v15768_v39 = vpop.f32.mrb[168].mxu0 }
0x19ec   :  { %v15770_v44 = vpop.f32.mrb[169].mxu0  ;;  %v6652_v59 = vsel %vm906_vm2, %v15768_v39, -inf }
0x19ed   :  { %6653 = vmax.xlane.f32.xlu1 %v6652_v59  ;;  %v15774_v47 = vpop.f32.mrb[170].mxu0  ;;  %v6646_v38 = vsel %vm906_vm2, %v15770_v44, -inf  ;;  %v15790_v59 = vpop.permute.xlu1 %6918 }
0x19ee   :  { %v15776_v52 = vpop.f32.mrb[171].mxu0  ;;  %v6655_v51 = vsel %vm906_vm2, %v15774_v47, -inf }
0x19ef   :  { %6656 = vmax.xlane.f32.xlu0 %v6655_v51  ;;  %v6649_v56 = vsel %vm906_vm2, %v15776_v52, -inf }
0x19f1   :  { %6647 = vmax.xlane.f32.xlu1 %v6646_v38 }
0x19f3   :  { %6650 = vmax.xlane.f32.xlu0 %v6649_v56 }
0x1a02   :  { %6979 = vrot.lane.b32.xlu1 %v15124_v46, %s12638_s2 }
0x1a09   :  { %6977 = vrot.lane.b32.xlu0 %v15112_v29, %s12638_s2 }
0x1a0d   :  { %7042 = vrot.lane.b32.xlu0 %v15048_v36, %s12639_s9 }
0x1a4f   :  { %v6618_v51 = vpop.xlane.xlu0 %6617 }
0x1a50   :  { %v6660_v35 = vsub.f32 %v10951_v62, %v6618_v51 }
0x1a52   :  { %v6678_v33 = vmul.f32 1.442695, %v6660_v35  ;;  %v6615_v25 = vpop.xlane.xlu1 %6614 }
0x1a53   :  { %v6612_v38 = vpop.xlane.xlu0 %6611  ;;  %v6659_v56 = vsub.f32 %v15716_v4, %v6615_v25 }
0x1a54   :  { %12218 = vpow2.f32 %v6678_v33  ;;  %v6658_v24 = vsub.f32 %v15711_v3, %v6612_v38 }
0x1a55   :  { %v6676_v37 = vmul.f32 1.442695, %v6659_v56 }
0x1a56   :  { %v6674_v6 = vmul.f32 1.442695, %v6658_v24 }
0x1a57   :  { %v6621_v30 = vpop.xlane.xlu0 %6620 }
0x1a58   :  { %12220 = vpow2.f32 %v6674_v6  ;;  %v6661_v15 = vsub.f32 %v15714_v20, %v6621_v30 }
0x1a5a   :  { %v6680_v43 = vmul.f32 1.442695, %v6661_v15 }
0x1a5c   :  { %12222 = vpow2.f32 %v6680_v43 }
0x1a5d   :  { %12224 = vpow2.f32 %v6676_v37 }
0x1a5e   :  { %v15795_v23 = vpop.eup %12218 }
0x1a5f   :  { %v6712_v35 = vsel %vm906_vm2, %v15795_v23, 0.0 }
0x1a60   :  { %6713 = vadd.xlane.f32.xlu1 %v6712_v35 }
0x1a62   :  { %v15799_v33 = vpop.eup %12220 }
0x1a63   :  { %v6706_v25 = vsel %vm906_vm2, %v15799_v33, 0.0 }
0x1a64   :  { %6707 = vadd.xlane.f32.xlu1 %v6706_v25 }
0x1a66   :  { %v15803_v24 = vpop.eup %12222 }
0x1a67   :  { %v6715_v30 = vsel %vm906_vm2, %v15803_v24, 0.0  ;;  %v15807_v15 = vpop.eup %12224 }
0x1a68   :  { %6716 = vadd.xlane.f32.xlu0 %v6715_v30  ;;  %v6709_v6 = vsel %vm906_vm2, %v15807_v15, 0.0 }
0x1a6a   :  { %v6630_v43 = vpop.xlane.xlu1 %6629 }
0x1a6b   :  { %v6664_v37 = vsub.f32 %v15744_v22, %v6630_v43 }
0x1a6c   :  { %v6633_v62 = vpop.xlane.xlu0 %6632  ;;  %6710 = vadd.xlane.f32.xlu0 %v6709_v6 }
0x1a6d   :  { %v6686_v3 = vmul.f32 1.442695, %v6664_v37  ;;  %v6665_v20 = vsub.f32 %v15750_v7, %v6633_v62 }
0x1a6e   :  { %v6642_v4 = vpop.xlane.xlu1 %6641 }
0x1a6f   :  { %12226 = vpow2.f32 %v6686_v3  ;;  %v6688_v51 = vmul.f32 1.442695, %v6665_v20  ;;  %v6668_v38 = vsub.f32 %v15736_v60, %v6642_v4 }
0x1a70   :  { %v6645_v56 = vpop.xlane.xlu0 %6644 }
0x1a71   :  { %12228 = vpow2.f32 %v6688_v51  ;;  %v6694_v35 = vmul.f32 1.442695, %v6668_v38  ;;  %v6669_v25 = vsub.f32 %v15740_v27, %v6645_v56 }
0x1a72   :  { %v6624_v30 = vpop.xlane.xlu1 %6623 }
0x1a73   :  { %12230 = vpow2.f32 %v6694_v35  ;;  %v6696_v22 = vmul.f32 1.442695, %v6669_v25  ;;  %v6662_v43 = vsub.f32 %v15746_v5, %v6624_v30 }
0x1a74   :  { %v6627_v54 = vpop.xlane.xlu0 %6626 }
0x1a75   :  { %12232 = vpow2.f32 %v6696_v22  ;;  %v6682_v37 = vmul.f32 1.442695, %v6662_v43  ;;  %v6663_v7 = vsub.f32 %v15752_v49, %v6627_v54 }
0x1a76   :  { %v6636_v6 = vpop.xlane.xlu1 %6635 }
0x1a77   :  { %12234 = vpow2.f32 %v6682_v37  ;;  %v6684_v62 = vmul.f32 1.442695, %v6663_v7  ;;  %v6666_v60 = vsub.f32 %v15738_v9, %v6636_v6 }
0x1a78   :  { %v6639_v3 = vpop.xlane.xlu0 %6638 }
0x1a79   :  { %v15818_v20 = vpop.eup %12226  ;;  %12236 = vpow2.f32 %v6684_v62  ;;  %v6690_v27 = vmul.f32 1.442695, %v6666_v60  ;;  %v6667_v4 = vsub.f32 %v15742_v1, %v6639_v3 }
0x1a7a   :  { %v6654_v51 = vpop.xlane.xlu1 %6653  ;;  %v6724_v5 = vsel %vm906_vm2, %v15818_v20, 0.0 }
0x1a7b   :  { %v15823_v38 = vpop.eup %12228  ;;  %12238 = vpow2.f32 %v6690_v27  ;;  %v6692_v54 = vmul.f32 1.442695, %v6667_v4  ;;  %v6672_v49 = vsub.f32 %v15768_v39, %v6654_v51  ;;  %6725 = vadd.xlane.f32.xlu1 %v6724_v5 }
0x1a7c   :  { %v6657_v56 = vpop.xlane.xlu0 %6656  ;;  %v6727_v9 = vsel %vm906_vm2, %v15823_v38, 0.0 }
0x1a7d   :  { %v15828_v35 = vpop.eup %12230  ;;  %12240 = vpow2.f32 %v6692_v54  ;;  %v6702_v25 = vmul.f32 1.442695, %v6672_v49  ;;  %v6673_v1 = vsub.f32 %v15774_v47, %v6657_v56  ;;  %6728 = vadd.xlane.f32.xlu0 %v6727_v9 }
0x1a7e   :  { %v6736_v30 = vsel %vm906_vm2, %v15828_v35, 0.0 }
0x1a7f   :  { %v15833_v22 = vpop.eup %12232  ;;  %12242 = vpow2.f32 %v6702_v25  ;;  %v6704_v43 = vmul.f32 1.442695, %v6673_v1  ;;  %6737 = vadd.xlane.f32.xlu1 %v6736_v30  ;;  %v6648_v30 = vpop.xlane.xlu1 %6647 }
0x1a80   :  { %v6651_v39 = vpop.xlane.xlu0 %6650  ;;  %v6739_v37 = vsel %vm906_vm2, %v15833_v22, 0.0 }
0x1a81   :  { %v15837_v7 = vpop.eup %12234  ;;  %v6671_v6 = vsub.f32 %v15776_v52, %v6651_v39  ;;  %6740 = vadd.xlane.f32.xlu0 %v6739_v37  ;;  %12244 = vpow2.f32 %v6704_v43  ;;  %v6670_v43 = vsub.f32 %v15770_v44, %v6648_v30 }
0x1a82   :  { %v6718_v47 = vsel %vm906_vm2, %v15837_v7, 0.0 }
0x1a83   :  { %v15842_v62 = vpop.eup %12236  ;;  %v6700_v60 = vmul.f32 1.442695, %v6671_v6  ;;  %6719 = vadd.xlane.f32.xlu1 %v6718_v47  ;;  %v6698_v39 = vmul.f32 1.442695, %v6670_v43 }
0x1a84   :  { %v15844_v3 = vpop.permute.xlu0 %6977  ;;  %v6721_v27 = vsel %vm906_vm2, %v15842_v62, 0.0 }
0x1a85   :  { %v15848_v4 = vpop.eup %12238  ;;  %6722 = vadd.xlane.f32.xlu0 %v6721_v27  ;;  %11001 = vmatprep.subr.bf16.mxu0 %v15844_v3  ;;  %12246 = vpow2.f32 %v6700_v60 }
0x1a86   :  { %v6730_v52 = vsel %vm906_vm2, %v15848_v4, 0.0  ;;  %12248 = vpow2.f32 %v6698_v39 }
0x1a87   :  { %v15853_v51 = vpop.eup %12240  ;;  %6731 = vadd.xlane.f32.xlu1 %v6730_v52 }
0x1a88   :  { %v6733_v5 = vsel %vm906_vm2, %v15853_v51, 0.0 }
0x1a89   :  { %v15857_v54 = vpop.eup %12242  ;;  %6734 = vadd.xlane.f32.xlu0 %v6733_v5 }
0x1a8a   :  { %v6748_v49 = vsel %vm906_vm2, %v15857_v54, 0.0 }
0x1a8b   :  { %v15861_v56 = vpop.eup %12244 }
0x1a8c   :  { %v6751_v9 = vsel %vm906_vm2, %v15861_v56, 0.0 }
0x1a8d   :  { %6749 = vadd.xlane.f32.xlu0 %v6748_v49 }
0x1a8f   :  { %v15865_v25 = vpop.eup %12246 }
0x1a90   :  { %v6745_v1 = vsel %vm906_vm2, %v15865_v25, 0.0  ;;  %v15880_v37 = vpop.eup %12248 }
0x1a91   :  { %6752 = vadd.xlane.f32.xlu0 %v6751_v9  ;;  %v6742_v44 = vsel %vm906_vm2, %v15880_v37, 0.0 }
0x1a95   :  { %6746 = vadd.xlane.f32.xlu0 %v6745_v1 }
0x1a98   :  { %7044 = vrot.lane.b32.xlu1 %v15060_v19, %s12639_s9 }
0x1aab   :  { %7111 = vrot.lane.b32.xlu0 %v15070_v12, %s12639_s9 }
0x1aaf   :  { %7040 = vrot.lane.b32.xlu0 %v15060_v19, %s12640_s0  ;;  %v15904_v19 = vpop.permute.xlu1 %6979 }
0x1ab3   :  { %7180 = vrot.lane.b32.xlu0 %v15090_v32, %s12639_s9 }
0x1ab7   :  { %7109 = vrot.lane.b32.xlu0 %v15080_v63, %s12640_s0 }
0x1abb   :  { %7249 = vrot.lane.b32.xlu0 %v15110_v48, %s12639_s9 }
0x1abc   :  { %6743 = vadd.xlane.f32.xlu1 %v6742_v44 }
0x1abf   :  { %7178 = vrot.lane.b32.xlu0 %v15100_v11, %s12640_s0 }
0x1ac3   :  { %7245 = vrot.lane.b32.xlu0 %v15110_v48, %s12640_s0  ;;  %v15906_v48 = vpop.permute.xlu0 %7042 }
0x1acd   :  { %7038 = vrot.lane.b32.xlu1 %v15048_v36, %s12640_s0 }
0x1ad1   :  { %7113 = vrot.lane.b32.xlu1 %v15080_v63, %s12639_s9 }
0x1ad5   :  { %7107 = vrot.lane.b32.xlu1 %v15070_v12, %s12640_s0 }
0x1ad9   :  { %7182 = vrot.lane.b32.xlu1 %v15100_v11, %s12639_s9 }
0x1add   :  { %7176 = vrot.lane.b32.xlu1 %v15090_v32, %s12640_s0 }
0x1ae1   :  { %7251 = vrot.lane.b32.xlu1 %v15122_v0, %s12639_s9 }
0x1ae5   :  { %7247 = vrot.lane.b32.xlu1 %v15122_v0, %s12640_s0 }
0x1aed   :  { %v6714_v36 = vpop.xlane.xlu1 %6713 }
0x1af1   :  { %v6708_v63 = vpop.xlane.xlu1 %6707 }
0x1af5   :  { %v6717_v6 = vpop.xlane.xlu0 %6716 }
0x1af6   :  { %12250 = vrcp.f32 %v6717_v6 }
0x1af7   :  { %12252 = vrcp.f32 %v6708_v63 }
0x1af8   :  { %12254 = vrcp.f32 %v6714_v36 }
0x1af9   :  { %v6711_v12 = vpop.xlane.xlu0 %6710 }
0x1afa   :  { %12256 = vrcp.f32 %v6711_v12 }
0x1b00   :  { %v12251_v11 = vpop.eup %12250 }
0x1b01   :  { %v12253_v32 = vpop.eup %12252  ;;  %v6773_v27 = vmul.f32 %v12251_v11, %v15803_v24 }
0x1b02   :  { %v12255_v47 = vpop.eup %12254  ;;  %v6770_v0 = vmul.f32 %v12253_v32, %v15799_v33 }
0x1b03   :  { %v6772_v5 = vmul.f32 %v12255_v47, %v15795_v23 }
0x1b04   :  { %v12257_v60 = vpop.eup %12256 }
0x1b05   :  { %v6771_v52 = vmul.f32 %v12257_v60, %v15807_v15  ;;  %v6787_v1 = vpack.c.bf16 %v6773_v27, %v6772_v5 }
0x1b07   :  { %v6786_v49 = vpack.c.bf16 %v6771_v52, %v6770_v0 }
0x1b08   :  { %v6726_v9 = vpop.xlane.xlu1 %6725 }
0x1b09   :  { %10981 = vmatprep.mubr.msk.bf16.mxu1 %vm906_vm2, %v6786_v49 }
0x1b0a   :  { %v6729_v30 = vpop.xlane.xlu0 %6728  ;;  %10982 = vmatmul.mubr.msk.bf16.vlgmr.msra.gmra.mrb[164].mxu1 %vm906_vm2, %v6787_v1 }
0x1b0b   :  { %10994 = vmatpush3.bf16.msra.mxu1 %v15670_v2  ;;  %12258 = vrcp.f32 %v6729_v30 }
0x1b0c   :  { %v6738_v43 = vpop.xlane.xlu1 %6737  ;;  %10995 = vmatprep.subr.bf16.mxu1 %v15790_v59 }
0x1b0e   :  { %v6741_v24 = vpop.xlane.xlu0 %6740 }
0x1b0f   :  { %10996 = vmatpush3.bf16.msra.mxu1 %v15790_v59 }
0x1b10   :  { %v6720_v33 = vpop.xlane.xlu1 %6719  ;;  %11441 = vmatprep.subr.msk.bf16.mxu1 %vm216_vm0, %v15906_v48 }
0x1b11   :  { %12260 = vrcp.f32 %v6720_v33 }
0x1b12   :  { %12262 = vrcp.f32 %v6726_v9  ;;  %v6723_v23 = vpop.xlane.xlu0 %6722 }
0x1b13   :  { %12264 = vrcp.f32 %v6723_v23 }
0x1b14   :  { %12266 = vrcp.f32 %v6741_v24  ;;  %v6732_v15 = vpop.xlane.xlu1 %6731 }
0x1b15   :  { %12268 = vrcp.f32 %v6732_v15  ;;  %v12259_v39 = vpop.eup %12258 }
0x1b16   :  { %12270 = vrcp.f32 %v6738_v43  ;;  %v6735_v2 = vpop.xlane.xlu0 %6734  ;;  %v6777_v6 = vmul.f32 %v12259_v39, %v15823_v38 }
0x1b17   :  { %12272 = vrcp.f32 %v6735_v2 }
0x1b18   :  { %v7045_v43 = vpop.permute.xlu1 %7044 }
0x1b1a   :  { %v6750_v44 = vpop.xlane.xlu0 %6749 }
0x1b1b   :  { %v12261_v36 = vpop.eup %12260 }
0x1b1c   :  { %v12263_v63 = vpop.eup %12262  ;;  %v6774_v32 = vmul.f32 %v12261_v36, %v15837_v7 }
0x1b1d   :  { %v12265_v59 = vpop.eup %12264  ;;  %v6776_v27 = vmul.f32 %v12263_v63, %v15818_v20 }
0x1b1e   :  { %v12267_v12 = vpop.eup %12266  ;;  %v6753_v11 = vpop.xlane.xlu0 %6752  ;;  %v6775_v47 = vmul.f32 %v12265_v59, %v15842_v62 }
0x1b1f   :  { %v12269_v60 = vpop.eup %12268  ;;  %v6781_v49 = vmul.f32 %v12267_v12, %v15833_v22  ;;  %v6789_v9 = vpack.c.bf16 %v6777_v6, %v6776_v27  ;;  %12274 = vrcp.f32 %v6753_v11 }
0x1b20   :  { %v12271_v0 = vpop.eup %12270  ;;  %v6788_v52 = vpack.c.bf16 %v6775_v47, %v6774_v32  ;;  %v6778_v38 = vmul.f32 %v12269_v60, %v15848_v4  ;;  %v7053_v4 = vsel %vm216_vm0, %v15906_v48, 0 }
0x1b21   :  { %v12273_v5 = vpop.eup %12272  ;;  %v6780_v7 = vmul.f32 %v12271_v0, %v15828_v35 }
0x1b22   :  { %10989 = vmatprep.mubr.msk.bf16.mxu0 %vm906_vm2, %v6788_v52  ;;  %v6747_v1 = vpop.xlane.xlu0 %6746  ;;  %v6779_v30 = vmul.f32 %v12273_v5, %v15853_v51  ;;  %v7056_v51 = vsel %vm216_vm0, %v7045_v43, 0 }
0x1b23   :  { %10990 = vmatmul.mubr.msk.bf16.vlgmr.msra.gmra.mrb[172].mxu0 %vm906_vm2, %v6789_v9  ;;  %v6791_v62 = vpack.c.bf16 %v6781_v49, %v6780_v7  ;;  %12276 = vrcp.f32 %v6747_v1 }
0x1b24   :  { %11002 = vmatpush3.bf16.msra.mxu0 %v15844_v3  ;;  %v6790_v20 = vpack.c.bf16 %v6779_v30, %v6778_v38  ;;  %12278 = vrcp.f32 %v6750_v44 }
0x1b25   :  { %11003 = vmatprep.subr.bf16.mxu0 %v15904_v19 }
0x1b26   :  { %10997 = vmatprep.mubr.msk.bf16.mxu1 %vm906_vm2, %v6790_v20  ;;  %v7112_v22 = vpop.permute.xlu0 %7111 }
0x1b27   :  { %10998 = vmatmul.mubr.msk.bf16.vlgmr.msra.gmra.mrb[168].mxu1 %vm906_vm2, %v6791_v62  ;;  %v7122_v60 = vsel %vm216_vm0, %v7112_v22, 0 }
0x1b28   :  { %11004 = vmatpush3.bf16.msra.mxu0 %v15904_v19  ;;  %11010 = vmatpush3.bf16.xpose.msra.mxu1 %v7053_v4 }
0x1b29   :  { %11442 = vmatprep.subr.msk.bf16.mxu1 %vm216_vm0, %v7045_v43  ;;  %11443 = vmatprep.subr.msk.bf16.mxu0 %vm216_vm0, %v7112_v22  ;;  %v12275_v33 = vpop.eup %12274 }
0x1b2a   :  { %v7041_v35 = vpop.permute.xlu0 %7040  ;;  %v6785_v36 = vmul.f32 %v12275_v33, %v15861_v56 }
0x1b2d   :  { %v12277_v15 = vpop.eup %12276 }
0x1b2e   :  { %v7181_v3 = vpop.permute.xlu0 %7180  ;;  %v12279_v2 = vpop.eup %12278  ;;  %v6783_v59 = vmul.f32 %v12277_v15, %v15865_v25 }
0x1b2f   :  { %v7191_v19 = vsel %vm216_vm0, %v7181_v3, 0  ;;  %v6784_v6 = vmul.f32 %v12279_v2, %v15857_v54 }
0x1b30   :  { %11012 = vmatpush3.bf16.xpose.msra.mxu1 %v7056_v51 }
0x1b31   :  { %11445 = vmatprep.subr.msk.bf16.mxu1 %vm216_vm0, %v7181_v3  ;;  %v6793_v32 = vpack.c.bf16 %v6785_v36, %v6784_v6 }
0x1b32   :  { %v7110_v12 = vpop.permute.xlu0 %7109 }
0x1b36   :  { %v7250_v25 = vpop.permute.xlu0 %7249 }
0x1b37   :  { %v7260_v52 = vsel %vm216_vm0, %v7250_v25, 0 }
0x1b49   :  { %v6744_v24 = vpop.xlane.xlu1 %6743 }
0x1b4a   :  { %12280 = vrcp.f32 %v6744_v24 }
0x1b4d   :  { %v7039_v48 = vpop.permute.xlu1 %7038 }
0x1b4e   :  { %11013 = vmatprep.mubr.msk.bf16.mxu1 %vm216_vm0, %v7039_v48 }
0x1b4f   :  { %11014 = vmatmul.mubr.msk.bf16.vlgmr.msra.gmra.mrb[172].mxu1 %vm216_vm0, %v7041_v35 }
0x1b50   :  { %11026 = vmatpush3.bf16.xpose.msra.mxu1 %v7191_v19 }
0x1b51   :  { %v7114_v23 = vpop.permute.xlu1 %7113 }
0x1b52   :  { %v7125_v27 = vsel %vm216_vm0, %v7114_v23, 0 }
0x1b54   :  { %v12281_v39 = vpop.eup %12280 }
0x1b55   :  { %v7108_v63 = vpop.permute.xlu1 %7107  ;;  %v6782_v44 = vmul.f32 %v12281_v39, %v15880_v37  ;;  %v7179_v37 = vpop.permute.xlu0 %7178 }
0x1b57   :  { %v6792_v11 = vpack.c.bf16 %v6783_v59, %v6782_v44 }
0x1b59   :  { %v7183_v47 = vpop.permute.xlu1 %7182  ;;  %11005 = vmatprep.mubr.msk.bf16.mxu0 %vm906_vm2, %v6792_v11  ;;  %v7246_v0 = vpop.permute.xlu0 %7245 }
0x1b5a   :  { %11006 = vmatmul.mubr.msk.bf16.vlgmr.msra.gmra.mrb[176].mxu0 %vm906_vm2, %v6793_v32  ;;  %11446 = vmatprep.subr.msk.bf16.mxu1 %vm216_vm0, %v7183_v47  ;;  %v7194_v56 = vsel %vm216_vm0, %v7183_v47, 0 }
0x1b5b   :  { %11018 = vmatpush3.bf16.xpose.msra.mxu0 %v7122_v60  ;;  %11021 = vmatprep.mubr.msk.bf16.mxu0 %vm216_vm0, %v7108_v63 }
0x1b5c   :  { %11444 = vmatprep.subr.msk.bf16.mxu0 %vm216_vm0, %v7114_v23  ;;  %11028 = vmatpush3.bf16.xpose.msra.mxu1 %v7194_v56 }
0x1b5d   :  { %v7177_v54 = vpop.permute.xlu1 %7176 }
0x1b5e   :  { %11029 = vmatprep.mubr.msk.bf16.mxu1 %vm216_vm0, %v7177_v54 }
0x1b61   :  { %v7252_v5 = vpop.permute.xlu1 %7251 }
0x1b62   :  { %v7263_v49 = vsel %vm216_vm0, %v7252_v5, 0 }
0x1b63   :  { %11020 = vmatpush3.bf16.xpose.msra.mxu0 %v7125_v27  ;;  %11030 = vmatmul.mubr.msk.bf16.vlgmr.msra.gmra.mrb[176].mxu1 %vm216_vm0, %v7179_v37 }
0x1b64   :  { %11447 = vmatprep.subr.msk.bf16.mxu0 %vm216_vm0, %v7250_v25 }
0x1b65   :  { %v7248_v9 = vpop.permute.xlu1 %7247 }
0x1b6a   :  { %11022 = vmatmul.mubr.msk.bf16.vlgmr.msra.gmra.mrb[180].mxu0 %vm216_vm0, %v7110_v12 }
0x1b6b   :  { %11034 = vmatpush3.bf16.xpose.msra.mxu0 %v7260_v52  ;;  %11037 = vmatprep.mubr.msk.bf16.mxu0 %vm216_vm0, %v7246_v0 }
0x1b6c   :  { %11448 = vmatprep.subr.msk.bf16.mxu0 %vm216_vm0, %v7252_v5 }
0x1b73   :  { %11036 = vmatpush3.bf16.xpose.msra.mxu0 %v7263_v49 }
0x1b7a   :  { %11038 = vmatmul.mubr.msk.bf16.vlgmr.msra.gmra.mrb[184].mxu0 %vm216_vm0, %v7248_v9 }
0x1bdd   :  { %v15964_v1 = vpop.f32.mrb[164].mxu1 }
0x1bde   :  { %v15966_v38 = vpop.f32.mrb[165].mxu1 }
0x1bdf   :  { %v15968_v30 = vpop.f32.mrb[166].mxu1 }
0x1be0   :  { %v15972_v20 = vpop.f32.mrb[167].mxu1 }
0x1bf6   :  { %v15976_v22 = vpop.f32.mrb[172].mxu0 }
0x1bf7   :  { %v15978_v4 = vpop.f32.mrb[173].mxu0 }
0x1bf8   :  { %v15980_v43 = vpop.f32.mrb[174].mxu0 }
0x1bf9   :  { %v15984_v3 = vpop.f32.mrb[175].mxu0 }
0x1bfa   :  { %v15988_v24 = vpop.f32.mrb[168].mxu1 }
0x1bfb   :  { %v15990_v48 = vpop.f32.mrb[169].mxu1 }
0x1bfc   :  { %v15992_v19 = vpop.f32.mrb[170].mxu1 }
0x1bfd   :  { %v15996_v23 = vpop.f32.mrb[171].mxu1 }
0x1c22   :  { %v11015_v2 = vpop.f32.mrb[172].mxu1 }
0x1c23   :  { %v16000_v39 = vpop.f32.mrb[173].mxu1  ;;  %v7320_v36 = vsel %vm906_vm2, %v11015_v2, -inf }
0x1c24   :  { %7321 = vmax.xlane.f32.xlu0 %v7320_v36  ;;  %v16003_v63 = vpop.f32.mrb[174].mxu1  ;;  %v7314_v6 = vsel %vm906_vm2, %v16000_v39, -inf }
0x1c25   :  { %v16005_v44 = vpop.f32.mrb[175].mxu1  ;;  %v7323_v12 = vsel %vm906_vm2, %v16003_v63, -inf }
0x1c26   :  { %v7317_v59 = vsel %vm906_vm2, %v16005_v44, -inf }
0x1c27   :  { %7318 = vmax.xlane.f32.xlu1 %v7317_v59 }
0x1c28   :  { %7315 = vmax.xlane.f32.xlu0 %v7314_v6 }
0x1c2c   :  { %7324 = vmax.xlane.f32.xlu0 %v7323_v12 }
0x1c2d   :  { %v16013_v11 = vpop.f32.mrb[176].mxu0 }
0x1c2e   :  { %17327 = vst [vmem:[#allocation39_spill] sm:$0xff] %v16013_v11  ;;  %v16015_v32 = vpop.f32.mrb[177].mxu0 }
0x1c2f   :  { %17328 = vst [vmem:[#allocation41_spill] sm:$0xff] %v16015_v32  ;;  %v16017_v47 = vpop.f32.mrb[178].mxu0 }
0x1c30   :  { %17329 = vst [vmem:[#allocation25_spill] sm:$0xff] %v16017_v47  ;;  %v16021_v56 = vpop.f32.mrb[179].mxu0 }
0x1c31   :  { %17330 = vst [vmem:[#allocation24_spill] sm:$0xff] %v16021_v56 }
0x1c36   :  { %v16025_v54 = vpop.f32.mrb[176].mxu1 }
0x1c37   :  { %v16027_v37 = vpop.f32.mrb[177].mxu1  ;;  %v7344_v60 = vsel %vm906_vm2, %v16025_v54, -inf }
0x1c38   :  { %v16029_v27 = vpop.f32.mrb[178].mxu1  ;;  %v7338_v25 = vsel %vm906_vm2, %v16027_v37, -inf }
0x1c39   :  { %v16031_v0 = vpop.f32.mrb[179].mxu1 }
0x1c3d   :  { %v16033_v52 = vpop.f32.mrb[180].mxu0 }
0x1c3e   :  { %v16035_v5 = vpop.f32.mrb[181].mxu0  ;;  %v7332_v49 = vsel %vm906_vm2, %v16033_v52, -inf }
0x1c3f   :  { %7333 = vmax.xlane.f32.xlu1 %v7332_v49  ;;  %v16039_v9 = vpop.f32.mrb[182].mxu0  ;;  %v7326_v6 = vsel %vm906_vm2, %v16035_v5, -inf  ;;  %v7341_v49 = vsel %vm906_vm2, %v16031_v0, -inf }
0x1c40   :  { %v16041_v36 = vpop.f32.mrb[183].mxu0  ;;  %v7335_v12 = vsel %vm906_vm2, %v16039_v9, -inf }
0x1c41   :  { %v7329_v59 = vsel %vm906_vm2, %v16041_v36, -inf }
0x1c42   :  { %7330 = vmax.xlane.f32.xlu0 %v7329_v59 }
0x1c43   :  { %7327 = vmax.xlane.f32.xlu1 %v7326_v6  ;;  %v7347_v6 = vsel %vm906_vm2, %v16029_v27, -inf }
0x1c46   :  { %7336 = vmax.xlane.f32.xlu0 %v7335_v12 }
0x1c47   :  { %7339 = vmax.xlane.f32.xlu1 %v7338_v25 }
0x1c4a   :  { %7342 = vmax.xlane.f32.xlu0 %v7341_v49 }
0x1c4b   :  { %7345 = vmax.xlane.f32.xlu1 %v7344_v60 }
0x1c4d   :  { %v16055_v59 = vpop.f32.mrb[184].mxu0 }
0x1c4e   :  { %7348 = vmax.xlane.f32.xlu0 %v7347_v6  ;;  %v16059_v15 = vpop.f32.mrb[185].mxu0  ;;  %v7356_v12 = vsel %vm906_vm2, %v16055_v59, -inf }
0x1c4f   :  { %7357 = vmax.xlane.f32.xlu1 %v7356_v12  ;;  %v16063_v25 = vpop.f32.mrb[186].mxu0  ;;  %v7350_v60 = vsel %vm906_vm2, %v16059_v15, -inf }
0x1c50   :  { %v16065_v33 = vpop.f32.mrb[187].mxu0  ;;  %v7359_v6 = vsel %vm906_vm2, %v16063_v25, -inf }
0x1c51   :  { %v7353_v49 = vsel %vm906_vm2, %v16065_v33, -inf }
0x1c52   :  { %7354 = vmax.xlane.f32.xlu0 %v7353_v49 }
0x1c53   :  { %7351 = vmax.xlane.f32.xlu1 %v7350_v60 }
0x1c56   :  { %7360 = vmax.xlane.f32.xlu0 %v7359_v6 }
0x1c64   :  { %7498 = vrot.lane.b32.xlu1 %v15050_v8, %s12640_s0 }
0x1c68   :  { %7500 = vrot.lane.b32.xlu1 %v15062_v16, %s12640_s0 }
0x1cb1   :  { %v7322_v12 = vpop.xlane.xlu0 %7321 }
0x1cb2   :  { %v7364_v51 = vsub.f32 %v11015_v2, %v7322_v12 }
0x1cb4   :  { %v7382_v62 = vmul.f32 1.442695, %v7364_v51  ;;  %v7319_v35 = vpop.xlane.xlu1 %7318 }
0x1cb5   :  { %v7316_v7 = vpop.xlane.xlu0 %7315  ;;  %v7363_v60 = vsub.f32 %v16005_v44, %v7319_v35 }
0x1cb6   :  { %12282 = vpow2.f32 %v7382_v62  ;;  %v7362_v49 = vsub.f32 %v16000_v39, %v7316_v7 }
0x1cb7   :  { %v7380_v11 = vmul.f32 1.442695, %v7363_v60 }
0x1cb8   :  { %v7378_v32 = vmul.f32 1.442695, %v7362_v49 }
0x1cb9   :  { %v7325_v56 = vpop.xlane.xlu0 %7324 }
0x1cba   :  { %12284 = vpow2.f32 %v7378_v32  ;;  %v7365_v6 = vsub.f32 %v16003_v63, %v7325_v56 }
0x1cbc   :  { %v7384_v8 = vmul.f32 1.442695, %v7365_v6 }
0x1cbe   :  { %12286 = vpow2.f32 %v7384_v8 }
0x1cbf   :  { %12288 = vpow2.f32 %v7380_v11 }
0x1cc0   :  { %v16080_v47 = vpop.eup %12282 }
0x1cc1   :  { %v7416_v16 = vsel %vm906_vm2, %v16080_v47, 0.0 }
0x1cc2   :  { %7417 = vadd.xlane.f32.xlu1 %v7416_v16 }
0x1cc4   :  { %v16084_v62 = vpop.eup %12284 }
0x1cc5   :  { %v7410_v7 = vsel %vm906_vm2, %v16084_v62, 0.0 }
0x1cc6   :  { %7411 = vadd.xlane.f32.xlu1 %v7410_v7 }
0x1cc8   :  { %v16088_v35 = vpop.eup %12286 }
0x1cc9   :  { %v7419_v51 = vsel %vm906_vm2, %v16088_v35, 0.0  ;;  %v16092_v2 = vpop.eup %12288 }
0x1cca   :  { %7420 = vadd.xlane.f32.xlu0 %v7419_v51  ;;  %v7413_v44 = vsel %vm906_vm2, %v16092_v2, 0.0 }
0x1ccc   :  { %v7334_v39 = vpop.xlane.xlu1 %7333 }
0x1ccd   :  { %v7368_v63 = vsub.f32 %v16033_v52, %v7334_v39 }
0x1cce   :  { %7414 = vadd.xlane.f32.xlu0 %v7413_v44 }
0x1ccf   :  { %v7390_v11 = vmul.f32 1.442695, %v7368_v63  ;;  %v7331_v32 = vpop.xlane.xlu0 %7330 }
0x1cd0   :  { %v7328_v56 = vpop.xlane.xlu1 %7327  ;;  %v7367_v51 = vsub.f32 %v16041_v36, %v7331_v32 }
0x1cd1   :  { %12290 = vpow2.f32 %v7390_v11  ;;  %v7366_v8 = vsub.f32 %v16035_v5, %v7328_v56 }
0x1cd2   :  { %v7388_v56 = vmul.f32 1.442695, %v7367_v51 }
0x1cd3   :  { %v7337_v12 = vpop.xlane.xlu0 %7336  ;;  %v7386_v63 = vmul.f32 1.442695, %v7366_v8 }
0x1cd4   :  { %v7369_v49 = vsub.f32 %v16039_v9, %v7337_v12  ;;  %v7340_v60 = vpop.xlane.xlu1 %7339 }
0x1cd5   :  { %v7370_v44 = vsub.f32 %v16027_v37, %v7340_v60 }
0x1cd6   :  { %v7392_v6 = vmul.f32 1.442695, %v7369_v49 }
0x1cd7   :  { %v7343_v16 = vpop.xlane.xlu0 %7342  ;;  %v7394_v36 = vmul.f32 1.442695, %v7370_v44 }
0x1cd8   :  { %12292 = vpow2.f32 %v7392_v6  ;;  %v7346_v7 = vpop.xlane.xlu1 %7345 }
0x1cd9   :  { %v7372_v52 = vsub.f32 %v16025_v54, %v7346_v7  ;;  %v7371_v54 = vsub.f32 %v16031_v0, %v7343_v16 }
0x1cdb   :  { %v16101_v39 = vpop.eup %12290  ;;  %v7398_v11 = vmul.f32 1.442695, %v7372_v52  ;;  %v7349_v58 = vpop.xlane.xlu0 %7348  ;;  %v7396_v60 = vmul.f32 1.442695, %v7371_v54 }
0x1cdc   :  { %v7373_v9 = vsub.f32 %v16029_v27, %v7349_v58  ;;  %v7358_v12 = vpop.xlane.xlu1 %7357  ;;  %v7428_v5 = vsel %vm906_vm2, %v16101_v39, 0.0 }
0x1cdd   :  { %12294 = vpow2.f32 %v7398_v11  ;;  %7429 = vadd.xlane.f32.xlu1 %v7428_v5  ;;  %v7376_v58 = vsub.f32 %v16055_v59, %v7358_v12 }
0x1cde   :  { %v7400_v49 = vmul.f32 1.442695, %v7373_v9  ;;  %12296 = vpow2.f32 %v7386_v63 }
0x1cdf   :  { %v7355_v6 = vpop.xlane.xlu0 %7354  ;;  %v7406_v0 = vmul.f32 1.442695, %v7376_v58 }
0x1ce0   :  { %12298 = vpow2.f32 %v7400_v49  ;;  %v7352_v32 = vpop.xlane.xlu1 %7351  ;;  %v7375_v54 = vsub.f32 %v16065_v33, %v7355_v6 }
0x1ce1   :  { %12300 = vpow2.f32 %v7388_v56  ;;  %v7374_v16 = vsub.f32 %v16059_v15, %v7352_v32 }
0x1ce2   :  { %v16108_v37 = vpop.eup %12292  ;;  %12302 = vpow2.f32 %v7394_v36 }
0x1ce3   :  { %v7431_v27 = vsel %vm906_vm2, %v16108_v37, 0.0  ;;  %12304 = vpow2.f32 %v7396_v60  ;;  %v7361_v52 = vpop.xlane.xlu0 %7360  ;;  %v7402_v11 = vmul.f32 1.442695, %v7374_v16  ;;  %v7404_v60 = vmul.f32 1.442695, %v7375_v54 }
0x1ce4   :  { %v7499_v8 = vpop.permute.xlu1 %7498  ;;  %7432 = vadd.xlane.f32.xlu0 %v7431_v27  ;;  %12306 = vpow2.f32 %v7406_v0  ;;  %v7377_v9 = vsub.f32 %v16063_v25, %v7361_v52 }
0x1ce5   :  { %11041 = vmatprep.subr.bf16.mxu1 %v7499_v8  ;;  %12308 = vpow2.f32 %v7402_v11 }
0x1ce6   :  { %11042 = vmatpush3.bf16.msra.mxu1 %v7499_v8  ;;  %v7408_v49 = vmul.f32 1.442695, %v7377_v9 }
0x1ce7   :  { %v16114_v7 = vpop.eup %12294 }
0x1ce8   :  { %v7501_v51 = vpop.permute.xlu1 %7500  ;;  %v7440_v63 = vsel %vm906_vm2, %v16114_v7, 0.0  ;;  %v16118_v59 = vpop.eup %12296  ;;  %12310 = vpow2.f32 %v7408_v49 }
0x1ce9   :  { %11043 = vmatprep.subr.bf16.mxu1 %v7501_v51  ;;  %7441 = vadd.xlane.f32.xlu1 %v7440_v63  ;;  %v7422_v5 = vsel %vm906_vm2, %v16118_v59, 0.0  ;;  %12312 = vpow2.f32 %v7404_v60  ;;  %v17332_v63 = vpack.i.bf16 %v15968_v30, %v15964_v1 }
0x1cea   :  { %v16120_v44 = vpop.eup %12298  ;;  %11044 = vmatpush3.bf16.msra.mxu1 %v7501_v51 }
0x1ceb   :  { %v7443_v15 = vsel %vm906_vm2, %v16120_v44, 0.0  ;;  %v16125_v12 = vpop.eup %12300 }
0x1cec   :  { %7444 = vadd.xlane.f32.xlu0 %v7443_v15  ;;  %v16129_v56 = vpop.eup %12302  ;;  %v7425_v25 = vsel %vm906_vm2, %v16125_v12, 0.0 }
0x1ced   :  { %7423 = vadd.xlane.f32.xlu1 %v7422_v5  ;;  %v16134_v36 = vpop.eup %12304  ;;  %v7434_v32 = vsel %vm906_vm2, %v16129_v56, 0.0 }
0x1cee   :  { %v7437_v58 = vsel %vm906_vm2, %v16134_v36, 0.0  ;;  %v16140_v27 = vpop.eup %12306 }
0x1cef   :  { %v7452_v33 = vsel %vm906_vm2, %v16140_v27, 0.0  ;;  %v16144_v6 = vpop.eup %12308 }
0x1cf0   :  { %7426 = vadd.xlane.f32.xlu0 %v7425_v25  ;;  %v7446_v8 = vsel %vm906_vm2, %v16144_v6, 0.0 }
0x1cf1   :  { %7435 = vadd.xlane.f32.xlu1 %v7434_v32 }
0x1cf2   :  { %v16148_v0 = vpop.eup %12310 }
0x1cf3   :  { %v7455_v16 = vsel %vm906_vm2, %v16148_v0, 0.0  ;;  %v16152_v52 = vpop.eup %12312 }
0x1cf4   :  { %7438 = vadd.xlane.f32.xlu0 %v7437_v58  ;;  %v7449_v51 = vsel %vm906_vm2, %v16152_v52, 0.0 }
0x1cf8   :  { %7453 = vadd.xlane.f32.xlu0 %v7452_v33 }
0x1cfc   :  { %7447 = vadd.xlane.f32.xlu0 %v7446_v8 }
0x1d00   :  { %7456 = vadd.xlane.f32.xlu0 %v7455_v16 }
0x1d02   :  { %7561 = vrot.lane.b32.xlu1 %v15082_v14, %s12640_s0  ;;  %v17331_v14 = vpack.i.bf16 %v15679_v40, %v15675_v17  ;;  %v17338_v17 = vpack.i.bf16 %v15695_v26, %v15689_v31  ;;  %v17340_v40 = vpack.i.bf16 %v15707_v13, %v15701_v50 }
0x1d04   :  { %7450 = vadd.xlane.f32.xlu0 %v7449_v51 }
0x1d06   :  { %7620 = vrot.lane.b32.xlu1 %v15092_v10, %s12640_s0  ;;  %v17333_v10 = vpack.i.bf16 %v15691_v61, %v15687_v45 }
0x1d0a   :  { %7622 = vrot.lane.b32.xlu1 %v15102_v55, %s12640_s0  ;;  %v17334_v55 = vpack.i.bf16 %v15683_v57, %v15677_v18  ;;  %v17339_v18 = vpack.i.bf16 %v15984_v3, %v15978_v4 }
0x1d0e   :  { %7681 = vrot.lane.b32.xlu1 %v15112_v29, %s12640_s0  ;;  %v17335_v29 = vpack.i.bf16 %v15980_v43, %v15976_v22 }
0x1d12   :  { %7683 = vrot.lane.b32.xlu1 %v15124_v46, %s12640_s0  ;;  %v17336_v46 = vpack.i.bf16 %v15972_v20, %v15966_v38 }
0x1d16   :  { %11597 = vrot.lane.b32.xlu1 %v17331_v14, %s12639_s9 }
0x1d1a   :  { %11607 = vrot.lane.b32.xlu1 %v17332_v63, %s17235_s26  ;;  %7559 = vrot.lane.b32.xlu0 %v15072_v21, %s12640_s0  ;;  %v17337_v21 = vpack.i.bf16 %v15703_v41, %v15699_v42 }
0x1d1e   :  { %11617 = vrot.lane.b32.xlu1 %v17333_v10, %s12639_s9  ;;  %11592 = vrot.lane.b32.xlu0 %v17334_v55, %s12639_s9 }
0x1d22   :  { %11627 = vrot.lane.b32.xlu1 %v17335_v29, %s17235_s26  ;;  %11602 = vrot.lane.b32.xlu0 %v17336_v46, %s17235_s26 }
0x1d26   :  { %11637 = vrot.lane.b32.xlu1 %v17337_v21, %s12639_s9  ;;  %11612 = vrot.lane.b32.xlu0 %v17338_v17, %s12639_s9 }
0x1d2a   :  { %11622 = vrot.lane.b32.xlu0 %v17339_v18, %s17235_s26 }
0x1d2e   :  { %11632 = vrot.lane.b32.xlu0 %v17340_v40, %s12639_s9 }
0x1d4f   :  { %v7418_v57 = vpop.xlane.xlu1 %7417 }
0x1d53   :  { %v7412_v45 = vpop.xlane.xlu1 %7411 }
0x1d57   :  { %v7421_v61 = vpop.xlane.xlu0 %7420 }
0x1d58   :  { %12314 = vrcp.f32 %v7421_v61 }
0x1d59   :  { %12316 = vrcp.f32 %v7412_v45 }
0x1d5a   :  { %12318 = vrcp.f32 %v7418_v57 }
0x1d5b   :  { %v7415_v42 = vpop.xlane.xlu0 %7414 }
0x1d5c   :  { %12320 = vrcp.f32 %v7415_v42 }
0x1d62   :  { %v12315_v31 = vpop.eup %12314 }
0x1d63   :  { %v12317_v26 = vpop.eup %12316  ;;  %v7477_v38 = vmul.f32 %v12315_v31, %v16088_v35 }
0x1d64   :  { %v12319_v41 = vpop.eup %12318  ;;  %v7474_v30 = vmul.f32 %v12317_v26, %v16084_v62 }
0x1d65   :  { %v7476_v50 = vmul.f32 %v12319_v41, %v16080_v47 }
0x1d66   :  { %v12321_v1 = vpop.eup %12320 }
0x1d67   :  { %v7475_v20 = vmul.f32 %v12321_v1, %v16092_v2  ;;  %v7491_v22 = vpack.c.bf16 %v7477_v38, %v7476_v50 }
0x1d69   :  { %v7490_v13 = vpack.c.bf16 %v7475_v20, %v7474_v30  ;;  %v11755_v30 = vld [vmem:[#allocation11 + $0x28] sm:$0xff]   ;;  %v11757_v20 = vld [vmem:[#allocation11 + $0x38] sm:$0xff]  }
0x1d6a   :  { %v7430_v4 = vpop.xlane.xlu1 %7429 }
0x1d6b   :  { %11045 = vmatprep.mubr.msk.bf16.mxu1 %vm906_vm2, %v7490_v13 }
0x1d6c   :  { %11046 = vmatmul.mubr.msk.bf16.vlgmr.msra.gmra.mrb[180].mxu1 %vm906_vm2, %v7491_v22 }
0x1d71   :  { %v7433_v43 = vpop.xlane.xlu0 %7432 }
0x1d76   :  { %v7442_v3 = vpop.xlane.xlu1 %7441 }
0x1d79   :  { %v7445_v11 = vpop.xlane.xlu0 %7444 }
0x1d7a   :  { %v7424_v9 = vpop.xlane.xlu1 %7423 }
0x1d7b   :  { %12322 = vrcp.f32 %v7424_v9 }
0x1d7d   :  { %v7427_v15 = vpop.xlane.xlu0 %7426 }
0x1d7e   :  { %12324 = vrcp.f32 %v7427_v15  ;;  %v7436_v35 = vpop.xlane.xlu1 %7435 }
0x1d7f   :  { %12326 = vrcp.f32 %v7445_v11 }
0x1d80   :  { %12328 = vrcp.f32 %v7436_v35 }
0x1d81   :  { %12330 = vrcp.f32 %v7442_v3  ;;  %v7439_v62 = vpop.xlane.xlu0 %7438  ;;  %v17342_v3 = vpack.i.bf16 %v15996_v23, %v15990_v48 }
0x1d82   :  { %12332 = vrcp.f32 %v7439_v62  ;;  %v7562_v47 = vpop.permute.xlu1 %7561 }
0x1d83   :  { %12334 = vrcp.f32 %v7433_v43  ;;  %v17341_v43 = vpack.i.bf16 %v15992_v19, %v15988_v24  ;;  %v17343_v19 = vpack.i.bf16 %v15732_v28, %v15726_v34  ;;  %v17350_v34 = vld [vmem:[#allocation41_spill] sm:$0xff] }
0x1d84   :  { %12336 = vrcp.f32 %v7430_v4 }
0x1d85   :  { %v7454_v2 = vpop.xlane.xlu0 %7453  ;;  %v12323_v5 = vpop.eup %12322 }
0x1d86   :  { %v7621_v54 = vpop.permute.xlu1 %7620  ;;  %v7478_v60 = vmul.f32 %v12323_v5, %v16118_v59 }
0x1d87   :  { %11057 = vmatprep.subr.bf16.mxu1 %v7621_v54 }
0x1d88   :  { %v12325_v49 = vpop.eup %12324  ;;  %11058 = vmatpush3.bf16.msra.mxu1 %v7621_v54 }
0x1d89   :  { %v12327_v25 = vpop.eup %12326  ;;  %v7448_v32 = vpop.xlane.xlu0 %7447  ;;  %v7479_v58 = vmul.f32 %v12325_v49, %v16125_v12 }
0x1d8a   :  { %v12329_v33 = vpop.eup %12328  ;;  %v7623_v8 = vpop.permute.xlu1 %7622  ;;  %v7485_v63 = vmul.f32 %v12327_v25, %v16120_v44  ;;  %12338 = vrcp.f32 %v7448_v32 }
0x1d8b   :  { %v12331_v16 = vpop.eup %12330  ;;  %11059 = vmatprep.subr.bf16.mxu1 %v7623_v8  ;;  %v7492_v51 = vpack.c.bf16 %v7479_v58, %v7478_v60  ;;  %v7482_v55 = vmul.f32 %v12329_v33, %v16129_v56 }
0x1d8c   :  { %v12333_v14 = vpop.eup %12332  ;;  %11060 = vmatpush3.bf16.msra.mxu1 %v7623_v8  ;;  %v7484_v12 = vmul.f32 %v12331_v16, %v16114_v7  ;;  %v17344_v8 = vld [vmem:[#allocation40_spill] sm:$0xff] }
0x1d8d   :  { %11053 = vmatprep.mubr.msk.bf16.mxu0 %vm906_vm2, %v7492_v51  ;;  %v7457_v10 = vpop.xlane.xlu0 %7456  ;;  %v7483_v59 = vmul.f32 %v12333_v14, %v16134_v36  ;;  %v12335_v44 = vpop.eup %12334  ;;  %v17345_v16 = vpack.i.bf16 %v15728_v53, %v17344_v8  ;;  %v17346_v51 = vld [vmem:[#allocation25_spill] sm:$0xff]  ;;  %v17347_v14 = vld [vmem:[#allocation39_spill] sm:$0xff]  ;;  %v17358_v8 = vld [vmem:[#allocation30_spill] sm:$0xff] }
0x1d8e   :  { %v7495_v46 = vpack.c.bf16 %v7485_v63, %v7484_v12  ;;  %v12337_v18 = vpop.eup %12336  ;;  %v7481_v56 = vmul.f32 %v12335_v44, %v16108_v37  ;;  %v7682_v7 = vpop.permute.xlu1 %7681  ;;  %v17348_v63 = vpack.i.bf16 %v17346_v51, %v17347_v14  ;;  %v17359_v51 = vld [vmem:[#allocation27_spill] sm:$0xff] }
0x1d8f   :  { %v7494_v29 = vpack.c.bf16 %v7483_v59, %v7482_v55  ;;  %v7480_v40 = vmul.f32 %v12337_v18, %v16101_v39 }
0x1d91   :  { %11061 = vmatprep.mubr.msk.bf16.mxu1 %vm906_vm2, %v7494_v29  ;;  %v7451_v21 = vpop.xlane.xlu0 %7450  ;;  %v7493_v45 = vpack.c.bf16 %v7481_v56, %v7480_v40 }
0x1d92   :  { %12340 = vrcp.f32 %v7451_v21  ;;  %11062 = vmatmul.mubr.msk.bf16.vlgmr.msra.gmra.mrb[184].mxu1 %vm906_vm2, %v7495_v46  ;;  %v7684_v41 = vpop.permute.xlu1 %7683 }
0x1d93   :  { %12342 = vrcp.f32 %v7457_v10  ;;  %v17349_v10 = vld [vmem:[#allocation24_spill] sm:$0xff] }
0x1d94   :  { %12344 = vrcp.f32 %v7454_v2  ;;  %v12339_v36 = vpop.eup %12338  ;;  %v17351_v28 = vpack.i.bf16 %v17349_v10, %v17350_v34 }
0x1d95   :  { %v7560_v17 = vpop.permute.xlu0 %7559  ;;  %v7486_v42 = vmul.f32 %v12339_v36, %v16144_v6  ;;  %v11754_v6 = vld [vmem:[#allocation11 + $0x20] sm:$0xff]  }
0x1d96   :  { %11049 = vmatprep.subr.bf16.mxu0 %v7560_v17  ;;  %11073 = vmatprep.subr.bf16.mxu1 %v11754_v6  ;;  %v11598_v55 = vpop.permute.xlu1 %11597 }
0x1d97   :  { %11050 = vmatpush3.bf16.msra.mxu0 %v7560_v17  ;;  %11074 = vmatpush3.bf16.msra.mxu1 %v11754_v6  ;;  %v11600_v17 = vunpack.i.h.bf16 %v11598_v55  ;;  %v11599_v18 = vunpack.i.l.bf16 %v11598_v55  ;;  %v17355_v6 = vld [vmem:[#allocation57_spill] sm:$0xff] }
0x1d98   :  { %11051 = vmatprep.subr.bf16.mxu0 %v7562_v47  ;;  %11075 = vmatprep.subr.bf16.mxu1 %v11755_v30 }
0x1d99   :  { %v11593_v59 = vpop.permute.xlu0 %11592 }
0x1d9a   :  { %v11608_v53 = vpop.permute.xlu1 %11607  ;;  %v11594_v36 = vunpack.i.l.bf16 %v11593_v59 }
0x1d9b   :  { %11052 = vmatpush3.bf16.msra.mxu0 %v7562_v47  ;;  %11076 = vmatpush3.bf16.msra.mxu1 %v11755_v30 }
0x1d9c   :  { %v12341_v57 = vpop.eup %12340  ;;  %11065 = vmatprep.subr.bf16.mxu0 %v7682_v7  ;;  %v7934_v30 = vsel %vm216_vm0, %v17355_v6, %v11594_v36 }
0x1d9d   :  { %v12343_v61 = vpop.eup %12342  ;;  %v7487_v31 = vmul.f32 %v12341_v57, %v16152_v52  ;;  %v11756_v52 = vld [vmem:[#allocation11 + $0x30] sm:$0xff]   ;;  %v11603_v12 = vpop.permute.xlu0 %11602  ;;  %v11610_v57 = vunpack.i.h.bf16 %v11608_v53 }
0x1d9e   :  { %11054 = vmatmul.mubr.msk.bf16.vlgmr.msra.gmra.mrb[188].mxu0 %vm906_vm2, %v7493_v45  ;;  %v12345_v26 = vpop.eup %12344  ;;  %v7489_v1 = vmul.f32 %v12343_v61, %v16148_v0  ;;  %11077 = vmatprep.subr.bf16.mxu1 %v11756_v52  ;;  %v11618_v29 = vpop.permute.xlu1 %11617  ;;  %v11609_v45 = vunpack.i.l.bf16 %v11608_v53  ;;  %v11605_v61 = vunpack.i.h.bf16 %v11603_v12 }
0x1d9f   :  { %11066 = vmatpush3.bf16.msra.mxu0 %v7682_v7  ;;  %v7496_v37 = vpack.c.bf16 %v7487_v31, %v7486_v42  ;;  %v7488_v39 = vmul.f32 %v12345_v26, %v16140_v27  ;;  %11078 = vmatpush3.bf16.msra.mxu1 %v11756_v52  ;;  %v11595_v7 = vunpack.i.h.bf16 %v11593_v59  ;;  %v11604_v42 = vunpack.i.l.bf16 %v11603_v12  ;;  %v17352_v31 = vld [vmem:[#allocation55_spill] sm:$0xff] }
0x1da0   :  { %11067 = vmatprep.subr.bf16.mxu0 %v7684_v41  ;;  %11079 = vmatprep.subr.bf16.mxu1 %v11757_v20  ;;  %v7937_v26 = vsel %vm216_vm0, %v17352_v31, %v11600_v17 }
0x1da1   :  { %11069 = vmatprep.mubr.msk.bf16.mxu0 %vm906_vm2, %v7496_v37  ;;  %v7497_v38 = vpack.c.bf16 %v7489_v1, %v7488_v39  ;;  %v11613_v46 = vpop.permute.xlu0 %11612  ;;  %v17354_v39 = vld [vmem:[#allocation26_spill] sm:$0xff] }
0x1da2   :  { %v11628_v21 = vpop.permute.xlu1 %11627 }
0x1da3   :  { %11068 = vmatpush3.bf16.msra.mxu0 %v7684_v41  ;;  %11080 = vmatpush3.bf16.msra.mxu1 %v11757_v20  ;;  %v17353_v41 = vld [vmem:[#allocation54_spill] sm:$0xff] }
0x1da4   :  { %v7936_v37 = vsel %vm216_vm0, %v17353_v41, %v11599_v18 }
0x1da5   :  { %v11623_v44 = vpop.permute.xlu0 %11622 }
0x1da6   :  { %11070 = vmatmul.mubr.msk.bf16.vlgmr.msra.gmra.mrb[192].mxu0 %vm906_vm2, %v7497_v38  ;;  %v16264_v56 = vpop.permute.xlu1 %11637  ;;  %v7935_v38 = vsel %vm216_vm0, %v17354_v39, %v11595_v7 }
0x1da7   :  { %v11640_v10 = vunpack.i.h.bf16 %v16264_v56  ;;  %v11639_v55 = vunpack.i.l.bf16 %v16264_v56 }
0x1da9   :  { %v16266_v40 = vpop.permute.xlu0 %11632 }
0x1daa   :  { %v11635_v6 = vunpack.i.h.bf16 %v16266_v40 }
0x1e3f   :  { %v11047_v0 = vpop.f32.mrb[180].mxu1 }
0x1e40   :  { %v7544_v50 = vpop.f32.mrb[181].mxu1 }
0x1e41   :  { %v11048_v13 = vpop.f32.mrb[182].mxu1 }
0x1e42   :  { %v11641_v27 = vpack.i.bf16 %v11048_v13, %v11047_v0  ;;  %v7547_v22 = vpop.f32.mrb[183].mxu1  ;;  %v7953_v13 = vsel %vm906_vm2, %v7937_v26, %v11610_v57  ;;  %v17360_v57 = vld [vmem:[#allocation33_spill] sm:$0xff]  ;;  %v17361_v26 = vld [vmem:[#allocation32_spill] sm:$0xff] }
0x1e43   :  { %v11646_v4 = vpack.i.bf16 %v7547_v22, %v7544_v50  ;;  %v7952_v50 = vsel %vm906_vm2, %v7936_v37, %v11609_v45  ;;  %v7945_v45 = vsel %vm216_vm0, %v17360_v57, %v11640_v10  ;;  %v7944_v41 = vsel %vm216_vm0, %v17361_v26, %v11639_v55  ;;  %v17366_v10 = vld [vmem:[#allocation37_spill] sm:$0xff] }
0x1e44   :  { %11642 = vrot.lane.b32.xlu1 %v11641_v27, %s12636_s23 }
0x1e45   :  { %11647 = vrot.lane.b32.xlu0 %v11646_v4, %s12636_s23  ;;  %v7950_v4 = vsel %vm906_vm2, %v7934_v30, %v11604_v42  ;;  %v11634_v30 = vunpack.i.l.bf16 %v16266_v40 }
0x1e48   :  { %11657 = vrot.lane.b32.xlu1 %v17341_v43, %s17235_s26  ;;  %v7951_v43 = vsel %vm906_vm2, %v7935_v38, %v11605_v61 }
0x1e49   :  { %11652 = vrot.lane.b32.xlu0 %v17342_v3, %s17235_s26 }
0x1e65   :  { %v11063_v11 = vpop.f32.mrb[184].mxu1 }
0x1e66   :  { %v7666_v9 = vpop.f32.mrb[185].mxu1 }
0x1e67   :  { %v11064_v15 = vpop.f32.mrb[186].mxu1 }
0x1e68   :  { %v11666_v35 = vpack.i.bf16 %v11064_v15, %v11063_v11  ;;  %v7669_v62 = vpop.f32.mrb[187].mxu1 }
0x1e69   :  { %v11686_v47 = vpack.i.bf16 %v7669_v62, %v7666_v9 }
0x1e71   :  { %v11055_v2 = vpop.f32.mrb[188].mxu0 }
0x1e72   :  { %v7605_v5 = vpop.f32.mrb[189].mxu0 }
0x1e73   :  { %v11056_v54 = vpop.f32.mrb[190].mxu0 }
0x1e74   :  { %v11661_v49 = vpack.i.bf16 %v11056_v54, %v11055_v2  ;;  %v7608_v25 = vpop.f32.mrb[191].mxu0  ;;  %v11619_v2 = vunpack.i.l.bf16 %v11618_v29  ;;  %v11614_v54 = vunpack.i.l.bf16 %v11613_v46 }
0x1e75   :  { %v11671_v32 = vpack.i.bf16 %v7608_v25, %v7605_v5  ;;  %v11615_v5 = vunpack.i.h.bf16 %v11613_v46 }
0x1e76   :  { %11662 = vrot.lane.b32.xlu1 %v11661_v49, %s12636_s23  ;;  %v11629_v49 = vunpack.i.l.bf16 %v11628_v21  ;;  %v7938_v14 = vsel %vm216_vm0, %v17359_v51, %v11614_v54  ;;  %v17365_v51 = vld [vmem:[#allocation35_spill] sm:$0xff] }
0x1e77   :  { %11672 = vrot.lane.b32.xlu0 %v11671_v32, %s12636_s23  ;;  %v11630_v32 = vunpack.i.h.bf16 %v11628_v21 }
0x1e79   :  { %v11071_v24 = vpop.f32.mrb[192].mxu0 }
0x1e7a   :  { %11667 = vrot.lane.b32.xlu1 %v11666_v35, %s12636_s23  ;;  %v7727_v48 = vpop.f32.mrb[193].mxu0 }
0x1e7b   :  { %11677 = vrot.lane.b32.xlu0 %v17343_v19, %s12639_s9  ;;  %v11072_v23 = vpop.f32.mrb[194].mxu0 }
0x1e7c   :  { %v11706_v60 = vpack.i.bf16 %v11072_v23, %v11071_v24  ;;  %v7730_v58 = vpop.f32.mrb[195].mxu0  ;;  %v17357_v23 = vld [vmem:[#allocation29_spill] sm:$0xff] }
0x1e7d   :  { %v11701_v33 = vpack.i.bf16 %v7730_v58, %v7727_v48  ;;  %v17356_v48 = vld [vmem:[#allocation28_spill] sm:$0xff]  ;;  %v11625_v58 = vunpack.i.h.bf16 %v11623_v44 }
0x1e7e   :  { %11682 = vrot.lane.b32.xlu1 %v17345_v16, %s12639_s9  ;;  %v7939_v16 = vsel %vm216_vm0, %v17358_v8, %v11615_v5  ;;  %v17364_v8 = vld [vmem:[#allocation38_spill] sm:$0xff] }
0x1e7f   :  { %11687 = vrot.lane.b32.xlu0 %v11686_v47, %s12636_s23  ;;  %v11620_v47 = vunpack.i.h.bf16 %v11618_v29  ;;  %v7955_v18 = vsel %vm906_vm2, %v7939_v16, %v11625_v58 }
0x1e81   :  { %v7941_v19 = vsel %vm216_vm0, %v17356_v48, %v11620_v47 }
0x1e82   :  { %11697 = vrot.lane.b32.xlu1 %v17348_v63, %s17235_s26 }
0x1e83   :  { %11692 = vrot.lane.b32.xlu0 %v17351_v28, %s17235_s26  ;;  %v7957_v28 = vsel %vm906_vm2, %v7941_v19, %v11630_v32 }
0x1e86   :  { %11707 = vrot.lane.b32.xlu1 %v11706_v60, %s12636_s23  ;;  %v7940_v60 = vsel %vm216_vm0, %v17357_v23, %v11619_v2 }
0x1e87   :  { %11702 = vrot.lane.b32.xlu0 %v11701_v33, %s12636_s23  ;;  %v11624_v33 = vunpack.i.l.bf16 %v11623_v44  ;;  %v7956_v63 = vsel %vm906_vm2, %v7940_v60, %v11629_v49 }
0x1e89   :  { %v7954_v17 = vsel %vm906_vm2, %v7938_v14, %v11624_v33 }
0x1eb6   :  { %v11643_v1 = vpop.permute.xlu1 %11642 }
0x1eb7   :  { %v11645_v52 = vunpack.i.h.bf16 %v11643_v1  ;;  %v11644_v20 = vunpack.i.l.bf16 %v11643_v1  ;;  %v11648_v0 = vpop.permute.xlu0 %11647 }
0x1eb8   :  { %v11650_v27 = vunpack.i.h.bf16 %v11648_v0  ;;  %v11649_v22 = vunpack.i.l.bf16 %v11648_v0 }
0x1eb9   :  { %v7969_v3 = vsel %vm3655_vm3, %v7953_v13, %v11645_v52  ;;  %v7968_v11 = vsel %vm3655_vm3, %v7952_v50, %v11644_v20 }
0x1eba   :  { %v7983_v9 = vpack.c.bf16 %v7969_v3, %v7968_v11  ;;  %v7966_v15 = vsel %vm3655_vm3, %v7950_v4, %v11649_v22  ;;  %v7967_v35 = vsel %vm3655_vm3, %v7951_v43, %v11650_v27  ;;  %v11658_v25 = vpop.permute.xlu1 %11657  ;;  %v17362_v3 = vld [vmem:[#allocation34_spill] sm:$0xff]  ;;  %v17363_v11 = vld [vmem:[#allocation31_spill] sm:$0xff] }
0x1ebb   :  { %v7982_v62 = vpack.c.bf16 %v7967_v35, %v7966_v15  ;;  %v11653_v24 = vpop.permute.xlu0 %11652  ;;  %v11660_v29 = vunpack.i.h.bf16 %v11658_v25  ;;  %v11659_v46 = vunpack.i.l.bf16 %v11658_v25  ;;  %v7943_v40 = vsel %vm216_vm0, %v17362_v3, %v11635_v6 }
0x1ebc   :  { %v11655_v0 = vunpack.i.h.bf16 %v11653_v24  ;;  %v11654_v50 = vunpack.i.l.bf16 %v11653_v24 }
0x1ebd   :  { %11081 = vmatprep.mubr.msk.bf16.mxu1 %vm484_vm1, %v7982_v62  ;;  %v7961_v52 = vsel %vm906_vm2, %v7945_v45, %v11660_v29  ;;  %v7960_v20 = vsel %vm906_vm2, %v7944_v41, %v11659_v46 }
0x1ebe   :  { %11082 = vmatmul.mubr.msk.bf16.vlgmr.msra.gmra.mrb[188].mxu1 %vm484_vm1, %v7983_v9  ;;  %v7942_v9 = vsel %vm216_vm0, %v17363_v11, %v11634_v30  ;;  %v7959_v47 = vsel %vm906_vm2, %v7943_v40, %v11655_v0 }
0x1ebf   :  { %v7958_v62 = vsel %vm906_vm2, %v7942_v9, %v11654_v50  ;;  %v17370_v50 = vld [vmem:[#allocation58_spill] sm:$0xff] }
0x1ee8   :  { %v11663_v34 = vpop.permute.xlu1 %11662 }
0x1ee9   :  { %v11665_v59 = vunpack.i.h.bf16 %v11663_v34  ;;  %v11664_v53 = vunpack.i.l.bf16 %v11663_v34  ;;  %v11673_v12 = vpop.permute.xlu0 %11672 }
0x1eea   :  { %v11675_v21 = vunpack.i.h.bf16 %v11673_v12  ;;  %v11674_v44 = vunpack.i.l.bf16 %v11673_v12 }
0x1eeb   :  { %v7973_v7 = vsel %vm3655_vm3, %v7957_v28, %v11665_v59  ;;  %v7972_v36 = vsel %vm3655_vm3, %v7956_v63, %v11664_v53  ;;  %v17367_v28 = vld [vmem:[#allocation36_spill] sm:$0xff] }
0x1eec   :  { %v7985_v61 = vpack.c.bf16 %v7973_v7, %v7972_v36  ;;  %v7970_v56 = vsel %vm3655_vm3, %v7954_v17, %v11674_v44  ;;  %v7971_v42 = vsel %vm3655_vm3, %v7955_v18, %v11675_v21  ;;  %v11668_v31 = vpop.permute.xlu1 %11667 }
0x1eed   :  { %v7984_v37 = vpack.c.bf16 %v7971_v42, %v7970_v56  ;;  %v11670_v1 = vunpack.i.h.bf16 %v11668_v31  ;;  %v11669_v39 = vunpack.i.l.bf16 %v11668_v31  ;;  %v11678_v38 = vpop.permute.xlu0 %11677  ;;  %v16347_v42 = vld [vmem:[%s17113_s7 + $0x1] ss:$0 sm:$0xff] }
0x1eee   :  { %v11680_v2 = vunpack.i.h.bf16 %v11678_v38  ;;  %v11679_v5 = vunpack.i.l.bf16 %v11678_v38  ;;  %v17368_v38 = vld [vmem:[#allocation59_spill] sm:$0xff] }
0x1eef   :  { %v7977_v13 = vsel %vm3655_vm3, %v7961_v52, %v11670_v1  ;;  %v7976_v27 = vsel %vm3655_vm3, %v7960_v20, %v11669_v39  ;;  %11085 = vmatprep.mubr.msk.bf16.mxu1 %vm484_vm1, %v7984_v37  ;;  %v17369_v52 = vld [vmem:[#allocation45_spill] sm:$0xff] }
0x1ef0   :  { %v7987_v22 = vpack.c.bf16 %v7977_v13, %v7976_v27  ;;  %v11683_v4 = vpop.permute.xlu1 %11682  ;;  %11086 = vmatmul.mubr.msk.bf16.gmra.mrb[192].mxu1 %vm484_vm1, %v7985_v61  ;;  %v7947_v16 = vsel %vm216_vm0, %v17364_v8, %v11680_v2  ;;  %v7946_v14 = vsel %vm216_vm0, %v17365_v51, %v11679_v5  ;;  %v17372_v2 = vld [vmem:[#allocation43_spill] sm:$0xff] }
0x1ef1   :  { %v11688_v43 = vpop.permute.xlu0 %11687  ;;  %v11685_v32 = vunpack.i.h.bf16 %v11683_v4  ;;  %v11684_v24 = vunpack.i.l.bf16 %v11683_v4  ;;  %v17371_v4 = vld [vmem:[#allocation60_spill] sm:$0xff] }
0x1ef2   :  { %v11690_v15 = vunpack.i.h.bf16 %v11688_v43  ;;  %v11689_v35 = vunpack.i.l.bf16 %v11688_v43 }
0x1ef3   :  { %v7949_v34 = vsel %vm216_vm0, %v17366_v10, %v11685_v32  ;;  %v7948_v55 = vsel %vm216_vm0, %v17367_v28, %v11684_v24  ;;  %v17374_v24 = vld [vmem:[#allocation44_spill] sm:$0xff] }
0x1ef4   :  { %v7974_v54 = vsel %vm3655_vm3, %v7958_v62, %v11689_v35  ;;  %v7975_v49 = vsel %vm3655_vm3, %v7959_v47, %v11690_v15  ;;  %v11698_v25 = vpop.permute.xlu1 %11697 }
0x1ef5   :  { %v7986_v48 = vpack.c.bf16 %v7975_v49, %v7974_v54  ;;  %v11693_v19 = vpop.permute.xlu0 %11692  ;;  %v11700_v23 = vunpack.i.h.bf16 %v11698_v25  ;;  %v11699_v60 = vunpack.i.l.bf16 %v11698_v25  ;;  %v17373_v25 = vld [vmem:[#allocation48_spill] sm:$0xff] }
0x1ef6   :  { %v11695_v58 = vunpack.i.h.bf16 %v11693_v19  ;;  %v11694_v33 = vunpack.i.l.bf16 %v11693_v19 }
0x1ef7   :  { %11089 = vmatprep.mubr.msk.bf16.mxu1 %vm484_vm1, %v7986_v48  ;;  %v7964_v29 = vsel %vm906_vm2, %v7948_v55, %v11699_v60  ;;  %v7965_v46 = vsel %vm906_vm2, %v7949_v34, %v11700_v23  ;;  %v17375_v23 = vld [vmem:[#allocation42_spill] sm:$0xff]  ;;  %v17376_v34 = vld [vmem:[#allocation49_spill] sm:$0xff] }
0x1ef8   :  { %v11708_v63 = vpop.permute.xlu1 %11707  ;;  %11090 = vmatmul.mubr.msk.bf16.gmra.mrb[196].mxu1 %vm484_vm1, %v7987_v22  ;;  %v7962_v17 = vsel %vm906_vm2, %v7946_v14, %v11694_v33  ;;  %v7963_v18 = vsel %vm906_vm2, %v7947_v16, %v11695_v58 }
0x1ef9   :  { %v11710_v59 = vunpack.i.h.bf16 %v11708_v63  ;;  %v11709_v53 = vunpack.i.l.bf16 %v11708_v63  ;;  %v11703_v12 = vpop.permute.xlu0 %11702 }
0x1efa   :  { %v11705_v21 = vunpack.i.h.bf16 %v11703_v12  ;;  %v11704_v44 = vunpack.i.l.bf16 %v11703_v12  ;;  %v17377_v12 = vld [vmem:[#allocation52_spill] sm:$0xff] }
0x1efb   :  { %v7981_v7 = vsel %vm3655_vm3, %v7965_v46, %v11710_v59  ;;  %v7980_v36 = vsel %vm3655_vm3, %v7964_v29, %v11709_v53  ;;  %v17378_v46 = vld [vmem:[#allocation46_spill] sm:$0xff] }
0x1efc   :  { %v7989_v57 = vpack.c.bf16 %v7981_v7, %v7980_v36  ;;  %v7978_v45 = vsel %vm3655_vm3, %v7962_v17, %v11704_v44  ;;  %v7979_v61 = vsel %vm3655_vm3, %v7963_v18, %v11705_v21  ;;  %v17379_v17 = vld [vmem:[#allocation47_spill] sm:$0xff] }
0x1efd   :  { %v7988_v56 = vpack.c.bf16 %v7979_v61, %v7978_v45 }
0x1eff   :  { %11093 = vmatprep.mubr.msk.bf16.mxu1 %vm484_vm1, %v7988_v56 }
0x1f00   :  { %11094 = vmatmul.mubr.msk.bf16.gmra.mrb[200].mxu1 %vm484_vm1, %v7989_v57 }
0x1f91   :  { %v11083_v31 = vpop.f32.mrb[188].mxu1 }
0x1f92   :  { %v8086_v26 = vpop.f32.mrb[189].mxu1  ;;  %v8095_v41 = vadd.f32 %v11083_v31, %v16347_v42 }
0x1f93   :  { %v8087_v37 = vadd.f32 %v16347_v42, %v8086_v26  ;;  %v11084_v1 = vpop.f32.mrb[190].mxu1 }
0x1f94   :  { %v8089_v39 = vpop.f32.mrb[191].mxu1  ;;  %v16356_v20 = vadd.f32 %v8095_v41, %v17369_v52  ;;  %v8098_v0 = vadd.f32 %v11084_v1, %v16347_v42  ;;  %v17380_v41 = vld [vmem:[#allocation53_spill] sm:$0xff] }
0x1f95   :  { %v16352_v6 = vadd.f32 %v8087_v37, %v17368_v38  ;;  %v8090_v30 = vadd.f32 %v16347_v42, %v8089_v39 }
0x1f96   :  { %v16367_v43 = vadd.f32 %v8098_v0, %v17371_v4  ;;  %v8174_v3 = vsel %vm484_vm1, %v16356_v20, 0.0  ;;  %v17382_v0 = vld [vmem:[#allocation50_spill] sm:$0xff] }
0x1f97   :  { %v16360_v13 = vadd.f32 %v8090_v30, %v17370_v50  ;;  %v8168_v27 = vsel %vm484_vm1, %v16352_v6, 0.0  ;;  %v17381_v30 = vld [vmem:[#allocation56_spill] sm:$0xff] }
0x1f98   :  { %8169 = vadd.xlane.f32.xlu0 %v8168_v27  ;;  %v8177_v40 = vsel %vm484_vm1, %v16367_v43, 0.0 }
0x1f99   :  { %v8171_v22 = vsel %vm484_vm1, %v16360_v13, 0.0 }
0x1f9a   :  { %8172 = vadd.xlane.f32.xlu1 %v8171_v22  ;;  %v17383_v22 = vld [vmem:[#allocation51_spill] sm:$0xff] }
0x1f9c   :  { %8175 = vadd.xlane.f32.xlu0 %v8174_v3 }
0x1fa0   :  { %8178 = vadd.xlane.f32.xlu0 %v8177_v40 }
0x1fc3   :  { %v11087_v11 = vpop.f32.mrb[192].mxu1 }
0x1fc4   :  { %v8102_v9 = vpop.f32.mrb[193].mxu1  ;;  %v8111_v15 = vadd.f32 %v11087_v11, %v16347_v42 }
0x1fc5   :  { %v8103_v35 = vadd.f32 %v16347_v42, %v8102_v9  ;;  %v11088_v62 = vpop.f32.mrb[194].mxu1 }
0x1fc6   :  { %v8105_v47 = vpop.f32.mrb[195].mxu1  ;;  %v8114_v54 = vadd.f32 %v11088_v62, %v16347_v42  ;;  %v16381_v32 = vadd.f32 %v8111_v15, %v17373_v25 }
0x1fc7   :  { %v16376_v5 = vadd.f32 %v8103_v35, %v17372_v2  ;;  %v8106_v49 = vadd.f32 %v16347_v42, %v8105_v47 }
0x1fc8   :  { %v16389_v60 = vadd.f32 %v8114_v54, %v17375_v23  ;;  %v8186_v63 = vsel %vm484_vm1, %v16381_v32, 0.0 }
0x1fc9   :  { %v16384_v48 = vadd.f32 %v8106_v49, %v17374_v24  ;;  %v8180_v19 = vsel %vm484_vm1, %v16376_v5, 0.0 }
0x1fca   :  { %8181 = vadd.xlane.f32.xlu1 %v8180_v19  ;;  %v8189_v53 = vsel %vm484_vm1, %v16389_v60, 0.0 }
0x1fcb   :  { %v11091_v58 = vpop.f32.mrb[196].mxu1  ;;  %v8183_v33 = vsel %vm484_vm1, %v16384_v48, 0.0 }
0x1fcc   :  { %v8118_v8 = vpop.f32.mrb[197].mxu1  ;;  %8184 = vadd.xlane.f32.xlu0 %v8183_v33  ;;  %v8127_v16 = vadd.f32 %v11091_v58, %v16347_v42 }
0x1fcd   :  { %v8119_v51 = vadd.f32 %v16347_v42, %v8118_v8  ;;  %v11092_v14 = vpop.f32.mrb[198].mxu1 }
0x1fce   :  { %v8121_v10 = vpop.f32.mrb[199].mxu1  ;;  %8187 = vadd.xlane.f32.xlu1 %v8186_v63  ;;  %v8130_v55 = vadd.f32 %v11092_v14, %v16347_v42  ;;  %v16405_v29 = vadd.f32 %v8127_v16, %v17377_v12  ;;  %v11759_v14 = vld [vmem:[#allocation14 + $0x28] sm:$0xff]   ;;  %v11760_v63 = vld [vmem:[#allocation14 + $0x30] sm:$0xff]  }
0x1fcf   :  { %v16398_v28 = vadd.f32 %v8119_v51, %v17376_v34  ;;  %v8122_v59 = vadd.f32 %v16347_v42, %v8121_v10  ;;  %v11758_v51 = vld [vmem:[#allocation14 + $0x20] sm:$0xff]  }
0x1fd0   :  { %8190 = vadd.xlane.f32.xlu0 %v8189_v53  ;;  %v16413_v18 = vadd.f32 %v8130_v55, %v17379_v17  ;;  %v8198_v31 = vsel %vm484_vm1, %v16405_v29, 0.0  ;;  %11097 = vmatprep.subr.bf16.mxu0 %v11758_v51 }
0x1fd1   :  { %v16408_v21 = vadd.f32 %v8122_v59, %v17378_v46  ;;  %v8192_v44 = vsel %vm484_vm1, %v16398_v28, 0.0  ;;  %11098 = vmatpush3.bf16.msra.mxu0 %v11758_v51 }
0x1fd2   :  { %8193 = vadd.xlane.f32.xlu1 %v8192_v44  ;;  %v8201_v38 = vsel %vm484_vm1, %v16413_v18, 0.0  ;;  %11099 = vmatprep.subr.bf16.mxu0 %v11759_v14 }
0x1fd3   :  { %v11095_v7 = vpop.f32.mrb[200].mxu1  ;;  %v8195_v36 = vsel %vm484_vm1, %v16408_v21, 0.0 }
0x1fd4   :  { %v8134_v57 = vpop.f32.mrb[201].mxu1  ;;  %8196 = vadd.xlane.f32.xlu0 %v8195_v36  ;;  %v8143_v45 = vadd.f32 %v11095_v7, %v16347_v42 }
0x1fd5   :  { %v8135_v61 = vadd.f32 %v16347_v42, %v8134_v57  ;;  %v11096_v56 = vpop.f32.mrb[202].mxu1  ;;  %11100 = vmatpush3.bf16.msra.mxu0 %v11759_v14 }
0x1fd6   :  { %v8137_v26 = vpop.f32.mrb[203].mxu1  ;;  %8199 = vadd.xlane.f32.xlu1 %v8198_v31  ;;  %v8146_v1 = vadd.f32 %v11096_v56, %v16347_v42  ;;  %v16429_v52 = vadd.f32 %v8143_v45, %v17381_v30  ;;  %11101 = vmatprep.subr.bf16.mxu0 %v11760_v63 }
0x1fd7   :  { %v16422_v37 = vadd.f32 %v8135_v61, %v17380_v41  ;;  %v8138_v39 = vadd.f32 %v16347_v42, %v8137_v26 }
0x1fd8   :  { %8202 = vadd.xlane.f32.xlu0 %v8201_v38  ;;  %v16437_v4 = vadd.f32 %v8146_v1, %v17383_v22  ;;  %v8210_v3 = vsel %vm484_vm1, %v16429_v52, 0.0 }
0x1fd9   :  { %v16432_v50 = vadd.f32 %v8138_v39, %v17382_v0  ;;  %v8204_v27 = vsel %vm484_vm1, %v16422_v37, 0.0  ;;  %11102 = vmatpush3.bf16.msra.mxu0 %v11760_v63 }
0x1fda   :  { %8205 = vadd.xlane.f32.xlu1 %v8204_v27  ;;  %v8213_v40 = vsel %vm484_vm1, %v16437_v4, 0.0 }
0x1fdb   :  { %v8207_v42 = vsel %vm484_vm1, %v16432_v50, 0.0 }
0x1fdc   :  { %8208 = vadd.xlane.f32.xlu0 %v8207_v42 }
0x1fde   :  { %8211 = vadd.xlane.f32.xlu1 %v8210_v3 }
0x1fe0   :  { %8214 = vadd.xlane.f32.xlu0 %v8213_v40 }
0x2025   :  { %v8170_v11 = vpop.xlane.xlu0 %8169 }
0x2026   :  { %v8216_v9 = vmul.f32 0.015625, %v8170_v11 }
0x2027   :  { %v8173_v15 = vpop.xlane.xlu1 %8172 }
0x2028   :  { %v16446_v35 = vsub.f32 %v16352_v6, %v8216_v9  ;;  %v8217_v62 = vmul.f32 0.015625, %v8173_v15 }
0x2029   :  { %v8176_v47 = vpop.xlane.xlu0 %8175 }
0x202a   :  { %v16449_v2 = vsub.f32 %v16360_v13, %v8217_v62  ;;  %v8218_v54 = vmul.f32 0.015625, %v8176_v47  ;;  %v8248_v49 = vmul.f32 %v16446_v35, %v16446_v35 }
0x202c   :  { %v16454_v25 = vsub.f32 %v16356_v20, %v8218_v54  ;;  %v8264_v24 = vsel %vm484_vm1, %v8248_v49, 0.0  ;;  %v8249_v19 = vmul.f32 %v16449_v2, %v16449_v2 }
0x202d   :  { %8265 = vadd.xlane.f32.xlu1 %v8264_v24  ;;  %v8179_v6 = vpop.xlane.xlu0 %8178 }
0x202e   :  { %v8219_v23 = vmul.f32 0.015625, %v8179_v6  ;;  %v8267_v58 = vsel %vm484_vm1, %v8249_v19, 0.0  ;;  %v8250_v13 = vmul.f32 %v16454_v25, %v16454_v25 }
0x202f   :  { %8268 = vadd.xlane.f32.xlu0 %v8267_v58 }
0x2030   :  { %v16463_v33 = vsub.f32 %v16367_v43, %v8219_v23  ;;  %v8270_v20 = vsel %vm484_vm1, %v8250_v13, 0.0  ;;  %v11761_v43 = vld [vmem:[#allocation14 + $0x38] sm:$0xff]  }
0x2031   :  { %8271 = vadd.xlane.f32.xlu1 %v8270_v20  ;;  %11103 = vmatprep.subr.bf16.mxu0 %v11761_v43 }
0x2032   :  { %v8251_v8 = vmul.f32 %v16463_v33, %v16463_v33  ;;  %11104 = vmatpush3.bf16.msra.mxu0 %v11761_v43 }
0x2034   :  { %v8273_v16 = vsel %vm484_vm1, %v8251_v8, 0.0 }
0x2035   :  { %8274 = vadd.xlane.f32.xlu0 %v8273_v16 }
0x2057   :  { %v8182_v10 = vpop.xlane.xlu1 %8181 }
0x2058   :  { %v8220_v34 = vmul.f32 0.015625, %v8182_v10 }
0x2059   :  { %v8185_v55 = vpop.xlane.xlu0 %8184 }
0x205a   :  { %v16470_v59 = vsub.f32 %v16376_v5, %v8220_v34  ;;  %v8221_v53 = vmul.f32 0.015625, %v8185_v55  ;;  %v11763_v34 = vld [vmem:[%s17117_s11 + $0x48] sm:$0xff]   ;;  %v11764_v55 = vld [vmem:[%s17117_s11 + $0x50] sm:$0xff]  }
0x205b   :  { %v8188_v12 = vpop.xlane.xlu1 %8187 }
0x205c   :  { %v16473_v46 = vsub.f32 %v16384_v48, %v8221_v53  ;;  %v8222_v44 = vmul.f32 0.015625, %v8188_v12  ;;  %v8252_v17 = vmul.f32 %v16470_v59, %v16470_v59  ;;  %v11765_v53 = vld [vmem:[%s17117_s11 + $0x58] sm:$0xff]   ;;  %v11766_v12 = vld [vmem:[%s17117_s11 + $0x60] sm:$0xff]  }
0x205d   :  { %v8191_v7 = vpop.xlane.xlu0 %8190 }
0x205e   :  { %v16478_v36 = vsub.f32 %v16381_v32, %v8222_v44  ;;  %v8223_v57 = vmul.f32 0.015625, %v8191_v7  ;;  %v8276_v45 = vsel %vm484_vm1, %v8252_v17, 0.0  ;;  %v8253_v5 = vmul.f32 %v16473_v46, %v16473_v46  ;;  %v11767_v44 = vld [vmem:[%s17117_s11 + $0x68] sm:$0xff]  }
0x205f   :  { %v8194_v61 = vpop.xlane.xlu1 %8193  ;;  %8277 = vadd.xlane.f32.xlu1 %v8276_v45 }
0x2060   :  { %v16484_v56 = vsub.f32 %v16389_v60, %v8223_v57  ;;  %v8224_v48 = vmul.f32 0.015625, %v8194_v61  ;;  %v8279_v31 = vsel %vm484_vm1, %v8253_v5, 0.0  ;;  %v8254_v26 = vmul.f32 %v16478_v36, %v16478_v36 }
0x2061   :  { %8280 = vadd.xlane.f32.xlu0 %v8279_v31  ;;  %v8197_v32 = vpop.xlane.xlu0 %8196 }
0x2062   :  { %v16490_v41 = vsub.f32 %v16398_v28, %v8224_v48  ;;  %v8225_v1 = vmul.f32 0.015625, %v8197_v32  ;;  %v8282_v39 = vsel %vm484_vm1, %v8254_v26, 0.0  ;;  %v8255_v38 = vmul.f32 %v16484_v56, %v16484_v56 }
0x2063   :  { %v8200_v30 = vpop.xlane.xlu1 %8199  ;;  %8283 = vadd.xlane.f32.xlu1 %v8282_v39 }
0x2064   :  { %v16496_v60 = vsub.f32 %v16408_v21, %v8225_v1  ;;  %v8226_v0 = vmul.f32 0.015625, %v8200_v30  ;;  %v8285_v27 = vsel %vm484_vm1, %v8255_v38, 0.0  ;;  %v8256_v22 = vmul.f32 %v16490_v41, %v16490_v41  ;;  %v16559_v30 = vld [vmem:[#allocation12 + $0x4] ss:$0 sm:$0xff] }
0x2065   :  { %8286 = vadd.xlane.f32.xlu0 %v8285_v27  ;;  %v8203_v28 = vpop.xlane.xlu0 %8202 }
0x2066   :  { %v16502_v42 = vsub.f32 %v16405_v29, %v8226_v0  ;;  %v8227_v3 = vmul.f32 0.015625, %v8203_v28  ;;  %v8288_v40 = vsel %vm484_vm1, %v8256_v22, 0.0  ;;  %v8257_v11 = vmul.f32 %v16496_v60, %v16496_v60 }
0x2067   :  { %v8206_v9 = vpop.xlane.xlu1 %8205  ;;  %8289 = vadd.xlane.f32.xlu1 %v8288_v40  ;;  %v16564_v40 = vld [vmem:[#allocation12 + $0x5] ss:$0 sm:$0xff] }
0x2068   :  { %v16508_v21 = vsub.f32 %v16413_v18, %v8227_v3  ;;  %v8228_v15 = vmul.f32 0.015625, %v8206_v9  ;;  %v8291_v62 = vsel %vm484_vm1, %v8257_v11, 0.0  ;;  %v8258_v47 = vmul.f32 %v16502_v42, %v16502_v42 }
0x2069   :  { %8292 = vadd.xlane.f32.xlu0 %v8291_v62  ;;  %v8209_v29 = vpop.xlane.xlu0 %8208 }
0x206a   :  { %v16514_v54 = vsub.f32 %v16422_v37, %v8228_v15  ;;  %v8229_v49 = vmul.f32 0.015625, %v8209_v29  ;;  %v8294_v24 = vsel %vm484_vm1, %v8258_v47, 0.0  ;;  %v8259_v19 = vmul.f32 %v16508_v21, %v16508_v21 }
0x206b   :  { %v8212_v6 = vpop.xlane.xlu1 %8211  ;;  %8295 = vadd.xlane.f32.xlu1 %v8294_v24 }
0x206c   :  { %v16520_v18 = vsub.f32 %v16432_v50, %v8229_v49  ;;  %v8230_v23 = vmul.f32 0.015625, %v8212_v6  ;;  %v8297_v58 = vsel %vm484_vm1, %v8259_v19, 0.0  ;;  %v8260_v13 = vmul.f32 %v16514_v54, %v16514_v54 }
0x206d   :  { %8298 = vadd.xlane.f32.xlu0 %v8297_v58  ;;  %v8215_v37 = vpop.xlane.xlu0 %8214 }
0x206e   :  { %v16526_v20 = vsub.f32 %v16429_v52, %v8230_v23  ;;  %v8231_v8 = vmul.f32 0.015625, %v8215_v37  ;;  %v8300_v16 = vsel %vm484_vm1, %v8260_v13, 0.0  ;;  %v8261_v51 = vmul.f32 %v16520_v18, %v16520_v18 }
0x206f   :  { %8301 = vadd.xlane.f32.xlu1 %v8300_v16 }
0x2070   :  { %v16532_v50 = vsub.f32 %v16437_v4, %v8231_v8  ;;  %v8303_v14 = vsel %vm484_vm1, %v8261_v51, 0.0  ;;  %v8262_v63 = vmul.f32 %v16526_v20, %v16526_v20  ;;  %v11762_v4 = vld [vmem:[%s17117_s11 + $0x40] sm:$0xff]  }
0x2071   :  { %8304 = vadd.xlane.f32.xlu0 %v8303_v14  ;;  %11121 = vmatprep.subr.bf16.mxu1 %v11762_v4 }
0x2072   :  { %v8306_v43 = vsel %vm484_vm1, %v8262_v63, 0.0  ;;  %v8263_v52 = vmul.f32 %v16532_v50, %v16532_v50  ;;  %11122 = vmatpush3.bf16.msra.mxu1 %v11762_v4 }
0x2073   :  { %8307 = vadd.xlane.f32.xlu1 %v8306_v43  ;;  %11123 = vmatprep.subr.bf16.mxu1 %v11763_v34 }
0x2074   :  { %v8309_v10 = vsel %vm484_vm1, %v8263_v52, 0.0 }
0x2075   :  { %8310 = vadd.xlane.f32.xlu0 %v8309_v10 }
0x2076   :  { %11124 = vmatpush3.bf16.msra.mxu1 %v11763_v34 }
0x2077   :  { %11125 = vmatprep.subr.bf16.mxu1 %v11764_v55 }
0x207a   :  { %11126 = vmatpush3.bf16.msra.mxu1 %v11764_v55 }
0x207b   :  { %11127 = vmatprep.subr.bf16.mxu1 %v11765_v53 }
0x207e   :  { %11128 = vmatpush3.bf16.msra.mxu1 %v11765_v53 }
0x207f   :  { %11129 = vmatprep.subr.bf16.mxu1 %v11766_v12 }
0x2082   :  { %11130 = vmatpush3.bf16.msra.mxu1 %v11766_v12 }
0x2083   :  { %11131 = vmatprep.subr.bf16.mxu1 %v11767_v44 }
0x2086   :  { %11132 = vmatpush3.bf16.msra.mxu1 %v11767_v44 }
0x20ba   :  { %v8266_v17 = vpop.xlane.xlu1 %8265 }
0x20bb   :  { %v8312_v7 = vmul.f32 0.015625, %v8266_v17 }
0x20bc   :  { %v8269_v57 = vpop.xlane.xlu0 %8268 }
0x20bd   :  { %v8328_v45 = vadd.f32 1e-05, %v8312_v7  ;;  %v8313_v5 = vmul.f32 0.015625, %v8269_v57 }
0x20be   :  { %v8272_v61 = vpop.xlane.xlu1 %8271 }
0x20bf   :  { %12346 = vrsqrt.f32 %v8328_v45  ;;  %v8329_v48 = vadd.f32 1e-05, %v8313_v5  ;;  %v8314_v31 = vmul.f32 0.015625, %v8272_v61 }
0x20c1   :  { %12348 = vrsqrt.f32 %v8329_v48  ;;  %v8330_v26 = vadd.f32 1e-05, %v8314_v31 }
0x20c2   :  { %v8275_v32 = vpop.xlane.xlu0 %8274 }
0x20c3   :  { %12350 = vrsqrt.f32 %v8330_v26  ;;  %v8315_v1 = vmul.f32 0.015625, %v8275_v32 }
0x20c5   :  { %v8331_v39 = vadd.f32 1e-05, %v8315_v1 }
0x20c7   :  { %12352 = vrsqrt.f32 %v8331_v39 }
0x20c9   :  { %v12347_v38 = vpop.eup %12346 }
0x20ca   :  { %v8360_v0 = vmul.f32 %v12347_v38, %v16446_v35 }
0x20cb   :  { %v12349_v27 = vpop.eup %12348 }
0x20cc   :  { %v8361_v22 = vmul.f32 %v12349_v27, %v16449_v2  ;;  %v8380_v28 = vmul.f32 %v16559_v30, %v8360_v0 }
0x20cd   :  { %v12351_v3 = vpop.eup %12350 }
0x20ce   :  { %v8362_v11 = vmul.f32 %v12351_v3, %v16454_v25  ;;  %v8381_v9 = vmul.f32 %v16559_v30, %v8361_v22  ;;  %v16569_v15 = vadd.f32 %v16564_v40, %v8380_v28 }
0x20d0   :  { %v16572_v62 = vadd.f32 %v16564_v40, %v8381_v9  ;;  %v8382_v35 = vmul.f32 %v16559_v30, %v8362_v11 }
0x20d1   :  { %v12353_v47 = vpop.eup %12352 }
0x20d2   :  { %v8363_v2 = vmul.f32 %v12353_v47, %v16463_v33  ;;  %v8416_v29 = vpack.c.bf16 %v16572_v62, %v16569_v15  ;;  %v16581_v25 = vadd.f32 %v16564_v40, %v8382_v35 }
0x20d4   :  { %v8383_v49 = vmul.f32 %v16559_v30, %v8363_v2  ;;  %11105 = vmatprep.mubr.msk.bf16.mxu0 %vm484_vm1, %v8416_v29 }
0x20d6   :  { %v16584_v24 = vadd.f32 %v16564_v40, %v8383_v49 }
0x20d8   :  { %v8417_v19 = vpack.c.bf16 %v16584_v24, %v16581_v25 }
0x20da   :  { %11106 = vmatmul.mubr.msk.bf16.vlgmr.msra.gmra.mrb[196].mxu0 %vm484_vm1, %v8417_v19 }
0x20ec   :  { %v8278_v6 = vpop.xlane.xlu1 %8277 }
0x20ed   :  { %v8316_v33 = vmul.f32 0.015625, %v8278_v6 }
0x20ee   :  { %v8281_v23 = vpop.xlane.xlu0 %8280 }
0x20ef   :  { %v8332_v58 = vadd.f32 1e-05, %v8316_v33  ;;  %v8317_v13 = vmul.f32 0.015625, %v8281_v23 }
0x20f0   :  { %v8284_v37 = vpop.xlane.xlu1 %8283 }
0x20f1   :  { %12354 = vrsqrt.f32 %v8332_v58  ;;  %v8333_v8 = vadd.f32 1e-05, %v8317_v13  ;;  %v8318_v16 = vmul.f32 0.015625, %v8284_v37 }
0x20f2   :  { %v8287_v51 = vpop.xlane.xlu0 %8286 }
0x20f3   :  { %12356 = vrsqrt.f32 %v8333_v8  ;;  %v8334_v14 = vadd.f32 1e-05, %v8318_v16  ;;  %v8319_v63 = vmul.f32 0.015625, %v8287_v51 }
0x20f4   :  { %v8290_v43 = vpop.xlane.xlu1 %8289 }
0x20f5   :  { %12358 = vrsqrt.f32 %v8334_v14  ;;  %v8335_v52 = vadd.f32 1e-05, %v8319_v63  ;;  %v8320_v10 = vmul.f32 0.015625, %v8290_v43 }
0x20f6   :  { %v8293_v4 = vpop.xlane.xlu0 %8292 }
0x20f7   :  { %12360 = vrsqrt.f32 %v8335_v52  ;;  %v8336_v34 = vadd.f32 1e-05, %v8320_v10  ;;  %v8321_v55 = vmul.f32 0.015625, %v8293_v4 }
0x20f8   :  { %v8296_v53 = vpop.xlane.xlu1 %8295 }
0x20f9   :  { %12362 = vrsqrt.f32 %v8336_v34  ;;  %v8337_v12 = vadd.f32 1e-05, %v8321_v55  ;;  %v8322_v44 = vmul.f32 0.015625, %v8296_v53 }
0x20fa   :  { %v8299_v17 = vpop.xlane.xlu0 %8298 }
0x20fb   :  { %v12355_v7 = vpop.eup %12354  ;;  %12364 = vrsqrt.f32 %v8337_v12  ;;  %v8338_v57 = vadd.f32 1e-05, %v8322_v44  ;;  %v8323_v45 = vmul.f32 0.015625, %v8299_v17 }
0x20fc   :  { %v8364_v5 = vmul.f32 %v12355_v7, %v16470_v59  ;;  %v8302_v61 = vpop.xlane.xlu1 %8301 }
0x20fd   :  { %v12357_v48 = vpop.eup %12356  ;;  %12366 = vrsqrt.f32 %v8338_v57  ;;  %v8339_v31 = vadd.f32 1e-05, %v8323_v45  ;;  %v8324_v26 = vmul.f32 0.015625, %v8302_v61 }
0x20fe   :  { %v8365_v32 = vmul.f32 %v12357_v48, %v16473_v46  ;;  %v8305_v1 = vpop.xlane.xlu0 %8304  ;;  %v8384_v39 = vmul.f32 %v16559_v30, %v8364_v5 }
0x20ff   :  { %v12359_v38 = vpop.eup %12358  ;;  %12368 = vrsqrt.f32 %v8339_v31  ;;  %v8340_v0 = vadd.f32 1e-05, %v8324_v26  ;;  %v8325_v27 = vmul.f32 0.015625, %v8305_v1 }
0x2100   :  { %v8366_v22 = vmul.f32 %v12359_v38, %v16478_v36  ;;  %v8308_v28 = vpop.xlane.xlu1 %8307  ;;  %v8385_v3 = vmul.f32 %v16559_v30, %v8365_v32  ;;  %v16596_v46 = vadd.f32 %v16564_v40, %v8384_v39  ;;  %v11768_v38 = vld [vmem:[%s17117_s11 + $0x70] sm:$0xff]  }
0x2101   :  { %v12361_v59 = vpop.eup %12360  ;;  %12370 = vrsqrt.f32 %v8340_v0  ;;  %v8341_v11 = vadd.f32 1e-05, %v8325_v27  ;;  %v8326_v9 = vmul.f32 0.015625, %v8308_v28  ;;  %11133 = vmatprep.subr.bf16.mxu1 %v11768_v38 }
0x2102   :  { %v8367_v47 = vmul.f32 %v12361_v59, %v16484_v56  ;;  %v8311_v35 = vpop.xlane.xlu0 %8310  ;;  %v16599_v2 = vadd.f32 %v16564_v40, %v8385_v3  ;;  %v8386_v29 = vmul.f32 %v16559_v30, %v8366_v22  ;;  %11134 = vmatpush3.bf16.msra.mxu1 %v11768_v38 }
0x2103   :  { %v12363_v49 = vpop.eup %12362  ;;  %12372 = vrsqrt.f32 %v8341_v11  ;;  %v8342_v36 = vadd.f32 1e-05, %v8326_v9  ;;  %v8327_v19 = vmul.f32 0.015625, %v8311_v35 }
0x2104   :  { %v8368_v6 = vmul.f32 %v12363_v49, %v16490_v41  ;;  %v8418_v33 = vpack.c.bf16 %v16599_v2, %v16596_v46  ;;  %v8387_v56 = vmul.f32 %v16559_v30, %v8367_v47  ;;  %v16609_v37 = vadd.f32 %v16564_v40, %v8386_v29 }
0x2105   :  { %v12365_v23 = vpop.eup %12364  ;;  %12374 = vrsqrt.f32 %v8342_v36  ;;  %v8343_v58 = vadd.f32 1e-05, %v8327_v19 }
0x2106   :  { %v8369_v13 = vmul.f32 %v12365_v23, %v16496_v60  ;;  %11109 = vmatprep.mubr.msk.bf16.mxu0 %vm484_vm1, %v8418_v33  ;;  %v16612_v8 = vadd.f32 %v16564_v40, %v8387_v56  ;;  %v8388_v41 = vmul.f32 %v16559_v30, %v8368_v6 }
0x2107   :  { %v12367_v16 = vpop.eup %12366  ;;  %12376 = vrsqrt.f32 %v8343_v58 }
0x2108   :  { %v8370_v51 = vmul.f32 %v12367_v16, %v16502_v42  ;;  %v8419_v14 = vpack.c.bf16 %v16612_v8, %v16609_v37  ;;  %v8389_v63 = vmul.f32 %v16559_v30, %v8369_v13  ;;  %v16622_v52 = vadd.f32 %v16564_v40, %v8388_v41 }
0x2109   :  { %v12369_v60 = vpop.eup %12368 }
0x210a   :  { %v8371_v43 = vmul.f32 %v12369_v60, %v16508_v21  ;;  %11110 = vmatmul.mubr.msk.bf16.gmra.mrb[200].mxu0 %vm484_vm1, %v8419_v14  ;;  %v16625_v10 = vadd.f32 %v16564_v40, %v8389_v63  ;;  %v8390_v4 = vmul.f32 %v16559_v30, %v8370_v51 }
0x210b   :  { %v12371_v34 = vpop.eup %12370 }
0x210c   :  { %v8372_v42 = vmul.f32 %v12371_v34, %v16514_v54  ;;  %v8420_v55 = vpack.c.bf16 %v16625_v10, %v16622_v52  ;;  %v8391_v53 = vmul.f32 %v16559_v30, %v8371_v43  ;;  %v16635_v44 = vadd.f32 %v16564_v40, %v8390_v4 }
0x210d   :  { %v12373_v12 = vpop.eup %12372 }
0x210e   :  { %v8373_v21 = vmul.f32 %v12373_v12, %v16520_v18  ;;  %11113 = vmatprep.mubr.msk.bf16.mxu0 %vm484_vm1, %v8420_v55  ;;  %v16638_v17 = vadd.f32 %v16564_v40, %v8391_v53  ;;  %v8392_v7 = vmul.f32 %v16559_v30, %v8372_v42 }
0x210f   :  { %v12375_v57 = vpop.eup %12374 }
0x2110   :  { %v8374_v54 = vmul.f32 %v12375_v57, %v16526_v20  ;;  %v8421_v45 = vpack.c.bf16 %v16638_v17, %v16635_v44  ;;  %v8393_v5 = vmul.f32 %v16559_v30, %v8373_v21  ;;  %v16648_v48 = vadd.f32 %v16564_v40, %v8392_v7 }
0x2111   :  { %v12377_v61 = vpop.eup %12376 }
0x2112   :  { %v8375_v18 = vmul.f32 %v12377_v61, %v16532_v50  ;;  %11114 = vmatmul.mubr.msk.bf16.gmra.mrb[204].mxu0 %vm484_vm1, %v8421_v45  ;;  %v16651_v31 = vadd.f32 %v16564_v40, %v8393_v5  ;;  %v8394_v26 = vmul.f32 %v16559_v30, %v8374_v54 }
0x2114   :  { %v8422_v20 = vpack.c.bf16 %v16651_v31, %v16648_v48  ;;  %v8395_v32 = vmul.f32 %v16559_v30, %v8375_v18  ;;  %v16659_v1 = vadd.f32 %v16564_v40, %v8394_v26  ;;  %v11769_v30 = vld [vmem:[%s17117_s11 + $0x78] sm:$0xff]  }
0x2115   :  { %11135 = vmatprep.subr.bf16.mxu1 %v11769_v30 }
0x2116   :  { %11117 = vmatprep.mubr.msk.bf16.mxu0 %vm484_vm1, %v8422_v20  ;;  %v16662_v50 = vadd.f32 %v16564_v40, %v8395_v32  ;;  %11136 = vmatpush3.bf16.msra.mxu1 %v11769_v30  ;;  %v9970_v40 = vld [vmem:[%s17116_s10 + $0x1] ss:$0 sm:$0xff] }
0x2118   :  { %v8423_v39 = vpack.c.bf16 %v16662_v50, %v16659_v1 }
0x211a   :  { %11118 = vmatmul.mubr.msk.bf16.gmra.mrb[208].mxu0 %vm484_vm1, %v8423_v39 }
0x21ad   :  { %v11107_v0 = vpop.f32.mrb[196].mxu0 }
0x21ae   :  { %v8529_v27 = vadd.f32 %v11107_v0, %v9970_v40  ;;  %v8520_v22 = vpop.f32.mrb[197].mxu0 }
0x21af   :  { %v8521_v28 = vadd.f32 %v9970_v40, %v8520_v22  ;;  %v11108_v3 = vpop.f32.mrb[198].mxu0 }
0x21b0   :  { %v8532_v59 = vadd.f32 %v11108_v3, %v9970_v40  ;;  %v8523_v11 = vpop.f32.mrb[199].mxu0  ;;  %v8585_v47 = vmax.f32 %v8529_v27, 0.0 }
0x21b1   :  { %v8524_v9 = vadd.f32 %v9970_v40, %v8523_v11  ;;  %v8583_v29 = vmax.f32 %v8521_v28, 0.0 }
0x21b2   :  { %v8586_v35 = vmax.f32 %v8532_v59, 0.0 }
0x21b3   :  { %v8584_v49 = vmax.f32 %v8524_v9, 0.0 }
0x21b4   :  { %v8600_v36 = vpack.c.bf16 %v8586_v35, %v8585_v47  ;;  %v16679_v35 = vld [vmem:[%s17118_s12 + $0x1] ss:$0 sm:$0xff] }
0x21b5   :  { %v8599_v19 = vpack.c.bf16 %v8584_v49, %v8583_v29 }
0x21b7   :  { %11137 = vmatprep.mubr.bf16.mxu1 %v8599_v19 }
0x21b8   :  { %11138 = vmatmul.mubr.bf16.vlgmr.msra.gmra.mrb[204].mxu1 %v8600_v36 }
0x21dd   :  { %v11111_v6 = vpop.f32.mrb[200].mxu0 }
0x21de   :  { %v8545_v33 = vadd.f32 %v11111_v6, %v9970_v40  ;;  %v8536_v56 = vpop.f32.mrb[201].mxu0 }
0x21df   :  { %v8537_v23 = vadd.f32 %v9970_v40, %v8536_v56  ;;  %v11112_v58 = vpop.f32.mrb[202].mxu0 }
0x21e0   :  { %v8548_v13 = vadd.f32 %v11112_v58, %v9970_v40  ;;  %v8539_v41 = vpop.f32.mrb[203].mxu0  ;;  %v8589_v51 = vmax.f32 %v8545_v33, 0.0 }
0x21e1   :  { %v8540_v16 = vadd.f32 %v9970_v40, %v8539_v41  ;;  %v8587_v63 = vmax.f32 %v8537_v23, 0.0 }
0x21e2   :  { %v8590_v14 = vmax.f32 %v8548_v13, 0.0 }
0x21e3   :  { %v8588_v60 = vmax.f32 %v8540_v16, 0.0 }
0x21e4   :  { %v8602_v43 = vpack.c.bf16 %v8590_v14, %v8589_v51 }
0x21e5   :  { %v8601_v4 = vpack.c.bf16 %v8588_v60, %v8587_v63  ;;  %v11115_v34 = vpop.f32.mrb[204].mxu0 }
0x21e6   :  { %v8561_v42 = vadd.f32 %v11115_v34, %v9970_v40  ;;  %v8552_v55 = vpop.f32.mrb[205].mxu0 }
0x21e7   :  { %v8553_v53 = vadd.f32 %v9970_v40, %v8552_v55  ;;  %v11116_v12 = vpop.f32.mrb[206].mxu0  ;;  %11141 = vmatprep.mubr.bf16.mxu1 %v8601_v4 }
0x21e8   :  { %v8564_v21 = vadd.f32 %v11116_v12, %v9970_v40  ;;  %v8555_v7 = vpop.f32.mrb[207].mxu0  ;;  %11142 = vmatmul.mubr.bf16.gmra.mrb[208].mxu1 %v8602_v43  ;;  %v8593_v54 = vmax.f32 %v8561_v42, 0.0 }
0x21e9   :  { %v8556_v57 = vadd.f32 %v9970_v40, %v8555_v7  ;;  %v8591_v5 = vmax.f32 %v8553_v53, 0.0 }
0x21ea   :  { %v8594_v45 = vmax.f32 %v8564_v21, 0.0 }
0x21eb   :  { %v8592_v61 = vmax.f32 %v8556_v57, 0.0 }
0x21ec   :  { %v8604_v18 = vpack.c.bf16 %v8594_v45, %v8593_v54 }
0x21ed   :  { %v8603_v26 = vpack.c.bf16 %v8592_v61, %v8591_v5  ;;  %v11119_v20 = vpop.f32.mrb[208].mxu0 }
0x21ee   :  { %v8577_v32 = vadd.f32 %v11119_v20, %v9970_v40  ;;  %v8568_v39 = vpop.f32.mrb[209].mxu0 }
0x21ef   :  { %v8569_v38 = vadd.f32 %v9970_v40, %v8568_v39  ;;  %v11120_v30 = vpop.f32.mrb[210].mxu0  ;;  %11145 = vmatprep.mubr.bf16.mxu1 %v8603_v26 }
0x21f0   :  { %v8580_v0 = vadd.f32 %v11120_v30, %v9970_v40  ;;  %v8571_v27 = vpop.f32.mrb[211].mxu0  ;;  %11146 = vmatmul.mubr.bf16.gmra.mrb[212].mxu1 %v8604_v18  ;;  %v8597_v28 = vmax.f32 %v8577_v32, 0.0 }
0x21f1   :  { %v8572_v22 = vadd.f32 %v9970_v40, %v8571_v27  ;;  %v8595_v59 = vmax.f32 %v8569_v38, 0.0 }
0x21f2   :  { %v8598_v3 = vmax.f32 %v8580_v0, 0.0 }
0x21f3   :  { %v8596_v11 = vmax.f32 %v8572_v22, 0.0 }
0x21f4   :  { %v8606_v9 = vpack.c.bf16 %v8598_v3, %v8597_v28 }
0x21f5   :  { %v8605_v47 = vpack.c.bf16 %v8596_v11, %v8595_v59 }
0x21f7   :  { %11149 = vmatprep.mubr.bf16.mxu1 %v8605_v47 }
0x21f8   :  { %11150 = vmatmul.mubr.bf16.gmra.mrb[216].mxu1 %v8606_v9 }
0x228b   :  { %v11139_v29 = vpop.f32.mrb[204].mxu1 }
0x228c   :  { %v8711_v49 = vpop.f32.mrb[205].mxu1  ;;  %v8720_v36 = vadd.f32 %v11139_v29, %v16679_v35 }
0x228d   :  { %v8712_v19 = vadd.f32 %v16679_v35, %v8711_v49  ;;  %v11140_v40 = vpop.f32.mrb[206].mxu1 }
0x228e   :  { %v8714_v6 = vpop.f32.mrb[207].mxu1  ;;  %v8723_v56 = vadd.f32 %v11140_v40, %v16679_v35  ;;  %v16689_v58 = vadd.f32 %v8720_v36, %v16581_v25 }
0x228f   :  { %v16684_v33 = vadd.f32 %v8712_v19, %v16569_v15  ;;  %v8715_v23 = vadd.f32 %v16679_v35, %v8714_v6 }
0x2290   :  { %v16697_v16 = vadd.f32 %v8723_v56, %v16584_v24  ;;  %v8798_v51 = vsel %vm484_vm1, %v16689_v58, 0.0 }
0x2291   :  { %v16692_v13 = vadd.f32 %v8715_v23, %v16572_v62  ;;  %v8792_v41 = vsel %vm484_vm1, %v16684_v33, 0.0 }
0x2292   :  { %8793 = vadd.xlane.f32.xlu1 %v8792_v41  ;;  %v8801_v25 = vsel %vm484_vm1, %v16697_v16, 0.0 }
0x2293   :  { %v8795_v15 = vsel %vm484_vm1, %v16692_v13, 0.0 }
0x2294   :  { %8796 = vadd.xlane.f32.xlu0 %v8795_v15 }
0x2296   :  { %8799 = vadd.xlane.f32.xlu1 %v8798_v51 }
0x2298   :  { %8802 = vadd.xlane.f32.xlu0 %v8801_v25 }
0x22bb   :  { %v11143_v62 = vpop.f32.mrb[208].mxu1 }
0x22bc   :  { %v8727_v14 = vpop.f32.mrb[209].mxu1  ;;  %v8736_v63 = vadd.f32 %v11143_v62, %v16679_v35 }
0x22bd   :  { %v8728_v60 = vadd.f32 %v16679_v35, %v8727_v14  ;;  %v11144_v24 = vpop.f32.mrb[210].mxu1 }
0x22be   :  { %v8730_v43 = vpop.f32.mrb[211].mxu1  ;;  %v8739_v34 = vadd.f32 %v11144_v24, %v16679_v35  ;;  %v16713_v55 = vadd.f32 %v8736_v63, %v16609_v37 }
0x22bf   :  { %v16708_v4 = vadd.f32 %v8728_v60, %v16596_v46  ;;  %v8731_v42 = vadd.f32 %v16679_v35, %v8730_v43  ;;  %v9040_v43 = vld [vmem:[#allocation15] sm:$0xff] }
0x22c0   :  { %v16721_v21 = vadd.f32 %v8739_v34, %v16612_v8  ;;  %v9041_v34 = vld [vmem:[#allocation15 + $0x8] sm:$0xff] }
0x22c1   :  { %v16716_v53 = vadd.f32 %v8731_v42, %v16599_v2  ;;  %v8804_v12 = vsel %vm484_vm1, %v16708_v4, 0.0  ;;  %v8810_v2 = vsel %vm484_vm1, %v16713_v55, 0.0  ;;  %v11305_v42 = vpack.c.bf16 %v9041_v34, %v9040_v43 }
0x22c2   :  { %8805 = vadd.xlane.f32.xlu1 %v8804_v12  ;;  %v8813_v26 = vsel %vm484_vm1, %v16721_v21, 0.0  ;;  %v9043_v12 = vld [vmem:[#allocation15 + $0x18] sm:$0xff] }
0x22c3   :  { %v11147_v7 = vpop.f32.mrb[212].mxu1  ;;  %v8807_v46 = vsel %vm484_vm1, %v16716_v53, 0.0  ;;  %11306 = vmatprep.subr.bf16.mxu0 %v11305_v42 }
0x22c4   :  { %8808 = vadd.xlane.f32.xlu0 %v8807_v46  ;;  %v8743_v57 = vpop.f32.mrb[213].mxu1  ;;  %v8752_v54 = vadd.f32 %v11147_v7, %v16679_v35  ;;  %11308 = vmatpush3.bf16.msra.mxu0 %v11305_v42  ;;  %v9044_v46 = vld [vmem:[#allocation15 + $0x20] sm:$0xff] }
0x22c5   :  { %v8744_v37 = vadd.f32 %v16679_v35, %v8743_v57  ;;  %v11148_v45 = vpop.f32.mrb[214].mxu1  ;;  %v9045_v57 = vld [vmem:[#allocation15 + $0x28] sm:$0xff] }
0x22c6   :  { %8811 = vadd.xlane.f32.xlu1 %v8810_v2  ;;  %v8746_v5 = vpop.f32.mrb[215].mxu1  ;;  %v8755_v8 = vadd.f32 %v11148_v45, %v16679_v35  ;;  %v16737_v20 = vadd.f32 %v8752_v54, %v16635_v44  ;;  %v11313_v54 = vpack.c.bf16 %v9045_v57, %v9044_v46  ;;  %v9047_v45 = vld [vmem:[#allocation15 + $0x38] sm:$0xff] }
0x22c7   :  { %v16730_v61 = vadd.f32 %v8744_v37, %v16622_v52  ;;  %v8747_v18 = vadd.f32 %v16679_v35, %v8746_v5  ;;  %v9046_v37 = vld [vmem:[#allocation15 + $0x30] sm:$0xff] }
0x22c8   :  { %8814 = vadd.xlane.f32.xlu0 %v8813_v26  ;;  %v16745_v52 = vadd.f32 %v8755_v8, %v16638_v17  ;;  %v11317_v2 = vpack.c.bf16 %v9047_v45, %v9046_v37 }
0x22c9   :  { %v16740_v32 = vadd.f32 %v8747_v18, %v16625_v10  ;;  %v8816_v39 = vsel %vm484_vm1, %v16730_v61, 0.0  ;;  %v8822_v10 = vsel %vm484_vm1, %v16737_v20, 0.0 }
0x22ca   :  { %8817 = vadd.xlane.f32.xlu1 %v8816_v39  ;;  %v8825_v11 = vsel %vm484_vm1, %v16745_v52, 0.0 }
0x22cb   :  { %v11151_v38 = vpop.f32.mrb[216].mxu1  ;;  %v8819_v30 = vsel %vm484_vm1, %v16740_v32, 0.0 }
0x22cc   :  { %8820 = vadd.xlane.f32.xlu0 %v8819_v30  ;;  %v8759_v0 = vpop.f32.mrb[217].mxu1  ;;  %v8768_v27 = vadd.f32 %v11151_v38, %v16679_v35 }
0x22cd   :  { %v8760_v44 = vadd.f32 %v16679_v35, %v8759_v0  ;;  %v11152_v22 = vpop.f32.mrb[218].mxu1 }
0x22ce   :  { %8823 = vadd.xlane.f32.xlu1 %v8822_v10  ;;  %v8762_v28 = vpop.f32.mrb[219].mxu1  ;;  %v8771_v17 = vadd.f32 %v11152_v22, %v16679_v35  ;;  %v16761_v9 = vadd.f32 %v8768_v27, %v16659_v1 }
0x22cf   :  { %v16754_v3 = vadd.f32 %v8760_v44, %v16648_v48  ;;  %v8763_v59 = vadd.f32 %v16679_v35, %v8762_v28 }
0x22d0   :  { %8826 = vadd.xlane.f32.xlu0 %v8825_v11  ;;  %v16769_v48 = vadd.f32 %v8771_v17, %v16662_v50  ;;  %v8834_v49 = vsel %vm484_vm1, %v16761_v9, 0.0 }
0x22d1   :  { %v16764_v47 = vadd.f32 %v8763_v59, %v16651_v31  ;;  %v8828_v29 = vsel %vm484_vm1, %v16754_v3, 0.0 }
0x22d2   :  { %8829 = vadd.xlane.f32.xlu1 %v8828_v29  ;;  %v8837_v1 = vsel %vm484_vm1, %v16769_v48, 0.0 }
0x22d3   :  { %v8831_v35 = vsel %vm484_vm1, %v16764_v47, 0.0 }
0x22d4   :  { %8832 = vadd.xlane.f32.xlu0 %v8831_v35 }
0x22d6   :  { %8835 = vadd.xlane.f32.xlu1 %v8834_v49 }
0x22d8   :  { %8838 = vadd.xlane.f32.xlu0 %v8837_v1 }
0x231f   :  { %v8794_v31 = vpop.xlane.xlu1 %8793 }
0x2320   :  { %v8840_v36 = vmul.f32 0.015625, %v8794_v31 }
0x2321   :  { %v8797_v19 = vpop.xlane.xlu0 %8796 }
0x2322   :  { %v16778_v40 = vsub.f32 %v16684_v33, %v8840_v36  ;;  %v8841_v50 = vmul.f32 0.015625, %v8797_v19 }
0x2323   :  { %v8800_v6 = vpop.xlane.xlu1 %8799 }
0x2324   :  { %v16781_v56 = vsub.f32 %v16692_v13, %v8841_v50  ;;  %v8842_v23 = vmul.f32 0.015625, %v8800_v6  ;;  %v8872_v41 = vmul.f32 %v16778_v40, %v16778_v40 }
0x2325   :  { %v8803_v15 = vpop.xlane.xlu0 %8802 }
0x2326   :  { %v16786_v51 = vsub.f32 %v16689_v58, %v8842_v23  ;;  %v8843_v25 = vmul.f32 0.015625, %v8803_v15  ;;  %v8888_v62 = vsel %vm484_vm1, %v8872_v41, 0.0  ;;  %v8873_v33 = vmul.f32 %v16781_v56, %v16781_v56 }
0x2327   :  { %8889 = vadd.xlane.f32.xlu1 %v8888_v62 }
0x2328   :  { %v16792_v14 = vsub.f32 %v16697_v16, %v8843_v25  ;;  %v8891_v13 = vsel %vm484_vm1, %v8873_v33, 0.0  ;;  %v8874_v63 = vmul.f32 %v16786_v51, %v16786_v51  ;;  %v9042_v16 = vld [vmem:[#allocation15 + $0x10] sm:$0xff] }
0x2329   :  { %8892 = vadd.xlane.f32.xlu0 %v8891_v13  ;;  %v11309_v7 = vpack.c.bf16 %v9043_v12, %v9042_v16 }
0x232a   :  { %v8894_v60 = vsel %vm484_vm1, %v8874_v63, 0.0  ;;  %v8875_v58 = vmul.f32 %v16792_v14, %v16792_v14 }
0x232b   :  { %8895 = vadd.xlane.f32.xlu1 %v8894_v60  ;;  %11310 = vmatprep.subr.bf16.mxu0 %v11309_v7 }
0x232c   :  { %v8897_v24 = vsel %vm484_vm1, %v8875_v58, 0.0  ;;  %11312 = vmatpush3.bf16.msra.mxu0 %v11309_v7 }
0x232d   :  { %8898 = vadd.xlane.f32.xlu0 %v8897_v24  ;;  %11314 = vmatprep.subr.bf16.mxu0 %v11313_v54 }
0x2330   :  { %11316 = vmatpush3.bf16.msra.mxu0 %v11313_v54 }
0x2331   :  { %11318 = vmatprep.subr.bf16.mxu0 %v11317_v2 }
0x2334   :  { %11320 = vmatpush3.bf16.msra.mxu0 %v11317_v2 }
0x234f   :  { %v8806_v5 = vpop.xlane.xlu1 %8805 }
0x2350   :  { %v8844_v8 = vmul.f32 0.015625, %v8806_v5 }
0x2351   :  { %v8809_v18 = vpop.xlane.xlu0 %8808 }
0x2352   :  { %v16802_v26 = vsub.f32 %v16708_v4, %v8844_v8  ;;  %v8845_v39 = vmul.f32 0.015625, %v8809_v18  ;;  %v9265_v8 = vld [vmem:[%s17123_s17 + $0x8] sm:$0xff]  ;;  %v9266_v18 = vld [vmem:[%s17123_s17 + $0x10] sm:$0xff] }
0x2353   :  { %v8812_v38 = vpop.xlane.xlu1 %8811 }
0x2354   :  { %v16805_v30 = vsub.f32 %v16716_v53, %v8845_v39  ;;  %v8846_v0 = vmul.f32 0.015625, %v8812_v38  ;;  %v8876_v27 = vmul.f32 %v16802_v26, %v16802_v26  ;;  %v9267_v38 = vld [vmem:[%s17123_s17 + $0x18] sm:$0xff] }
0x2355   :  { %v8815_v44 = vpop.xlane.xlu0 %8814 }
0x2356   :  { %v16810_v22 = vsub.f32 %v16713_v55, %v8846_v0  ;;  %v8847_v10 = vmul.f32 0.015625, %v8815_v44  ;;  %v8900_v28 = vsel %vm484_vm1, %v8876_v27, 0.0  ;;  %v8877_v4 = vmul.f32 %v16805_v30, %v16805_v30  ;;  %v9268_v27 = vld [vmem:[%s17123_s17 + $0x20] sm:$0xff]  ;;  %v9269_v44 = vld [vmem:[%s17123_s17 + $0x28] sm:$0xff] }
0x2357   :  { %v8818_v17 = vpop.xlane.xlu1 %8817  ;;  %8901 = vadd.xlane.f32.xlu1 %v8900_v28  ;;  %v11325_v0 = vpack.c.bf16 %v9267_v38, %v9266_v18  ;;  %v9270_v28 = vld [vmem:[%s17123_s17 + $0x30] sm:$0xff] }
0x2358   :  { %v16816_v59 = vsub.f32 %v16721_v21, %v8847_v10  ;;  %v8848_v53 = vmul.f32 0.015625, %v8818_v17  ;;  %v8903_v11 = vsel %vm484_vm1, %v8877_v4, 0.0  ;;  %v8878_v29 = vmul.f32 %v16810_v22, %v16810_v22  ;;  %v9271_v4 = vld [vmem:[%s17123_s17 + $0x38] sm:$0xff] }
0x2359   :  { %8904 = vadd.xlane.f32.xlu0 %v8903_v11  ;;  %v8821_v55 = vpop.xlane.xlu0 %8820  ;;  %v11329_v10 = vpack.c.bf16 %v9269_v44, %v9268_v27  ;;  %v11333_v17 = vpack.c.bf16 %v9271_v4, %v9270_v28  ;;  %v9273_v11 = vld [vmem:[%s17123_s17 + $0x48] sm:$0xff] }
0x235a   :  { %v16822_v35 = vsub.f32 %v16730_v61, %v8848_v53  ;;  %v8849_v49 = vmul.f32 0.015625, %v8821_v55  ;;  %v8906_v1 = vsel %vm484_vm1, %v8878_v29, 0.0  ;;  %v8879_v31 = vmul.f32 %v16816_v59, %v16816_v59  ;;  %v9272_v53 = vld [vmem:[%s17123_s17 + $0x40] sm:$0xff]  ;;  %v9274_v55 = vld [vmem:[%s17123_s17 + $0x50] sm:$0xff] }
0x235b   :  { %v8824_v36 = vpop.xlane.xlu1 %8823  ;;  %8907 = vadd.xlane.f32.xlu1 %v8906_v1  ;;  %v11337_v29 = vpack.c.bf16 %v9273_v11, %v9272_v53 }
0x235c   :  { %v16828_v21 = vsub.f32 %v16740_v32, %v8849_v49  ;;  %v8850_v19 = vmul.f32 0.015625, %v8824_v36  ;;  %v8909_v50 = vsel %vm484_vm1, %v8879_v31, 0.0  ;;  %v8880_v6 = vmul.f32 %v16822_v35, %v16822_v35  ;;  %v9275_v49 = vld [vmem:[%s17123_s17 + $0x58] sm:$0xff]  ;;  %v9276_v31 = vld [vmem:[%s17123_s17 + $0x60] sm:$0xff]  ;;  %v9277_v36 = vld [vmem:[%s17123_s17 + $0x68] sm:$0xff] }
0x235d   :  { %8910 = vadd.xlane.f32.xlu0 %v8909_v50  ;;  %v8827_v61 = vpop.xlane.xlu0 %8826  ;;  %v11341_v1 = vpack.c.bf16 %v9275_v49, %v9274_v55 }
0x235e   :  { %v16834_v23 = vsub.f32 %v16737_v20, %v8850_v19  ;;  %v8851_v41 = vmul.f32 0.015625, %v8827_v61  ;;  %v8912_v15 = vsel %vm484_vm1, %v8880_v6, 0.0  ;;  %v8881_v25 = vmul.f32 %v16828_v21, %v16828_v21 }
0x235f   :  { %8913 = vadd.xlane.f32.xlu1 %v8912_v15  ;;  %v8830_v32 = vpop.xlane.xlu1 %8829  ;;  %v11345_v19 = vpack.c.bf16 %v9277_v36, %v9276_v31 }
0x2360   :  { %v16840_v62 = vsub.f32 %v16745_v52, %v8851_v41  ;;  %v8852_v33 = vmul.f32 0.015625, %v8830_v32  ;;  %v8915_v13 = vsel %vm484_vm1, %v8881_v25, 0.0  ;;  %v8882_v63 = vmul.f32 %v16834_v23, %v16834_v23 }
0x2361   :  { %8916 = vadd.xlane.f32.xlu0 %v8915_v13  ;;  %v8833_v20 = vpop.xlane.xlu0 %8832 }
0x2362   :  { %v16846_v60 = vsub.f32 %v16754_v3, %v8852_v33  ;;  %v8853_v58 = vmul.f32 0.015625, %v8833_v20  ;;  %v8918_v24 = vsel %vm484_vm1, %v8882_v63, 0.0  ;;  %v8883_v43 = vmul.f32 %v16840_v62, %v16840_v62 }
0x2363   :  { %8919 = vadd.xlane.f32.xlu1 %v8918_v24  ;;  %v8836_v52 = vpop.xlane.xlu1 %8835 }
0x2364   :  { %v16852_v34 = vsub.f32 %v16764_v47, %v8853_v58  ;;  %v8854_v42 = vmul.f32 0.015625, %v8836_v52  ;;  %v8921_v16 = vsel %vm484_vm1, %v8883_v43, 0.0  ;;  %v8884_v12 = vmul.f32 %v16846_v60, %v16846_v60  ;;  %v16915_v43 = vld [vmem:[#allocation12 + $0x6] ss:$0 sm:$0xff] }
0x2365   :  { %8922 = vadd.xlane.f32.xlu0 %v8921_v16  ;;  %v8839_v3 = vpop.xlane.xlu0 %8838  ;;  %v16918_v16 = vld [vmem:[#allocation12 + $0x7] ss:$0 sm:$0xff] }
0x2366   :  { %v16858_v7 = vsub.f32 %v16761_v9, %v8854_v42  ;;  %v8855_v46 = vmul.f32 0.015625, %v8839_v3  ;;  %v8924_v57 = vsel %vm484_vm1, %v8884_v12, 0.0  ;;  %v8885_v54 = vmul.f32 %v16852_v34, %v16852_v34 }
0x2367   :  { %8925 = vadd.xlane.f32.xlu1 %v8924_v57 }
0x2368   :  { %v16864_v47 = vsub.f32 %v16769_v48, %v8855_v46  ;;  %v8927_v37 = vsel %vm484_vm1, %v8885_v54, 0.0  ;;  %v8886_v45 = vmul.f32 %v16858_v7, %v16858_v7  ;;  %v9264_v48 = vld [vmem:[%s17123_s17] sm:$0xff] }
0x2369   :  { %8928 = vadd.xlane.f32.xlu0 %v8927_v37  ;;  %v11321_v39 = vpack.c.bf16 %v9265_v8, %v9264_v48 }
0x236a   :  { %v8930_v2 = vsel %vm484_vm1, %v8886_v45, 0.0  ;;  %v8887_v9 = vmul.f32 %v16864_v47, %v16864_v47 }
0x236b   :  { %8931 = vadd.xlane.f32.xlu1 %v8930_v2  ;;  %11322 = vmatprep.subr.bf16.mxu1 %v11321_v39 }
0x236c   :  { %v8933_v5 = vsel %vm484_vm1, %v8887_v9, 0.0  ;;  %11324 = vmatpush3.bf16.msra.mxu1 %v11321_v39 }
0x236d   :  { %8934 = vadd.xlane.f32.xlu0 %v8933_v5  ;;  %11326 = vmatprep.subr.bf16.mxu1 %v11325_v0 }
0x2370   :  { %11328 = vmatpush3.bf16.msra.mxu1 %v11325_v0 }
0x2371   :  { %11330 = vmatprep.subr.bf16.mxu1 %v11329_v10 }
0x2374   :  { %11332 = vmatpush3.bf16.msra.mxu1 %v11329_v10 }
0x2375   :  { %11334 = vmatprep.subr.bf16.mxu1 %v11333_v17 }
0x2378   :  { %11336 = vmatpush3.bf16.msra.mxu1 %v11333_v17 }
0x2379   :  { %11338 = vmatprep.subr.bf16.mxu1 %v11337_v29 }
0x237c   :  { %11340 = vmatpush3.bf16.msra.mxu1 %v11337_v29 }
0x237d   :  { %11342 = vmatprep.subr.bf16.mxu1 %v11341_v1 }
0x2380   :  { %11344 = vmatpush3.bf16.msra.mxu1 %v11341_v1 }
0x2381   :  { %11346 = vmatprep.subr.bf16.mxu1 %v11345_v19 }
0x2384   :  { %11348 = vmatpush3.bf16.msra.mxu1 %v11345_v19 }
0x23b4   :  { %v8890_v50 = vpop.xlane.xlu1 %8889 }
0x23b5   :  { %v8936_v6 = vmul.f32 0.015625, %v8890_v50 }
0x23b6   :  { %v8893_v61 = vpop.xlane.xlu0 %8892 }
0x23b7   :  { %v8952_v41 = vadd.f32 1e-05, %v8936_v6  ;;  %v8937_v15 = vmul.f32 0.015625, %v8893_v61 }
0x23b8   :  { %v8896_v25 = vpop.xlane.xlu1 %8895 }
0x23b9   :  { %12378 = vrsqrt.f32 %v8952_v41  ;;  %v8953_v32 = vadd.f32 1e-05, %v8937_v15  ;;  %v8938_v33 = vmul.f32 0.015625, %v8896_v25 }
0x23ba   :  { %v8899_v13 = vpop.xlane.xlu0 %8898 }
0x23bb   :  { %12380 = vrsqrt.f32 %v8953_v32  ;;  %v8954_v63 = vadd.f32 1e-05, %v8938_v33  ;;  %v8939_v20 = vmul.f32 0.015625, %v8899_v13 }
0x23bd   :  { %12382 = vrsqrt.f32 %v8954_v63  ;;  %v8955_v58 = vadd.f32 1e-05, %v8939_v20 }
0x23bf   :  { %12384 = vrsqrt.f32 %v8955_v58 }
0x23c3   :  { %v12379_v24 = vpop.eup %12378 }
0x23c4   :  { %v8984_v52 = vmul.f32 %v12379_v24, %v16778_v40 }
0x23c5   :  { %v12381_v42 = vpop.eup %12380 }
0x23c6   :  { %v8985_v12 = vmul.f32 %v12381_v42, %v16781_v56  ;;  %v9004_v3 = vmul.f32 %v16915_v43, %v8984_v52 }
0x23c7   :  { %v12383_v46 = vpop.eup %12382 }
0x23c8   :  { %v9005_v57 = vmul.f32 %v16915_v43, %v8985_v12  ;;  %v9024_v54 = vadd.f32 %v16918_v16, %v9004_v3  ;;  %v8986_v37 = vmul.f32 %v12383_v46, %v16786_v51 }
0x23c9   :  { %v12385_v45 = vpop.eup %12384 }
0x23ca   :  { %v9025_v2 = vadd.f32 %v16918_v16, %v9005_v57  ;;  %11169 = vmatprep.mubr.msk.f32.mxu0 %vm484_vm1, %v9024_v54  ;;  %v9006_v40 = vmul.f32 %v16915_v43, %v8986_v37  ;;  %v8987_v9 = vmul.f32 %v12385_v45, %v16792_v14 }
0x23cc   :  { %11170 = vmatmul.mubr.msk.f32.vlgmr.msra.gmra.mrb[212].mxu0 %vm484_vm1, %v9025_v2  ;;  %v9026_v56 = vadd.f32 %v16918_v16, %v9006_v40  ;;  %v9007_v5 = vmul.f32 %v16915_v43, %v8987_v9 }
0x23ce   :  { %11172 = vmatprep.mubr.msk.f32.mxu0 %vm484_vm1, %v9026_v56  ;;  %v9027_v48 = vadd.f32 %v16918_v16, %v9007_v5 }
0x23d0   :  { %11173 = vmatmul.mubr.msk.f32.gmra.mrb[214].mxu0 %vm484_vm1, %v9027_v48 }
0x23e4   :  { %v8902_v51 = vpop.xlane.xlu1 %8901 }
0x23e5   :  { %v8940_v8 = vmul.f32 0.015625, %v8902_v51 }
0x23e6   :  { %v8905_v18 = vpop.xlane.xlu0 %8904 }
0x23e7   :  { %v8956_v39 = vadd.f32 1e-05, %v8940_v8  ;;  %v8941_v38 = vmul.f32 0.015625, %v8905_v18 }
0x23e8   :  { %v8908_v0 = vpop.xlane.xlu1 %8907 }
0x23e9   :  { %12386 = vrsqrt.f32 %v8956_v39  ;;  %v8957_v14 = vadd.f32 1e-05, %v8941_v38  ;;  %v8942_v27 = vmul.f32 0.015625, %v8908_v0 }
0x23ea   :  { %v8911_v44 = vpop.xlane.xlu0 %8910 }
0x23eb   :  { %12388 = vrsqrt.f32 %v8957_v14  ;;  %v8958_v10 = vadd.f32 1e-05, %v8942_v27  ;;  %v8943_v28 = vmul.f32 0.015625, %v8911_v44 }
0x23ec   :  { %v8914_v4 = vpop.xlane.xlu1 %8913 }
0x23ed   :  { %12390 = vrsqrt.f32 %v8958_v10  ;;  %v8959_v17 = vadd.f32 1e-05, %v8943_v28  ;;  %v8944_v53 = vmul.f32 0.015625, %v8914_v4 }
0x23ee   :  { %v8917_v11 = vpop.xlane.xlu0 %8916 }
0x23ef   :  { %12392 = vrsqrt.f32 %v8959_v17  ;;  %v8960_v29 = vadd.f32 1e-05, %v8944_v53  ;;  %v8945_v55 = vmul.f32 0.015625, %v8917_v11 }
0x23f0   :  { %v8920_v49 = vpop.xlane.xlu1 %8919 }
0x23f1   :  { %12394 = vrsqrt.f32 %v8960_v29  ;;  %v8961_v1 = vadd.f32 1e-05, %v8945_v55  ;;  %v8946_v31 = vmul.f32 0.015625, %v8920_v49 }
0x23f2   :  { %v8923_v36 = vpop.xlane.xlu0 %8922 }
0x23f3   :  { %v12387_v19 = vpop.eup %12386  ;;  %12396 = vrsqrt.f32 %v8961_v1  ;;  %v8962_v50 = vadd.f32 1e-05, %v8946_v31  ;;  %v8947_v6 = vmul.f32 0.015625, %v8923_v36 }
0x23f4   :  { %v8926_v61 = vpop.xlane.xlu1 %8925  ;;  %v8988_v41 = vmul.f32 %v12387_v19, %v16802_v26 }
0x23f5   :  { %v12389_v15 = vpop.eup %12388  ;;  %12398 = vrsqrt.f32 %v8962_v50  ;;  %v8963_v25 = vadd.f32 1e-05, %v8947_v6  ;;  %v8948_v32 = vmul.f32 0.015625, %v8926_v61 }
0x23f6   :  { %v8929_v33 = vpop.xlane.xlu0 %8928  ;;  %v9008_v13 = vmul.f32 %v16915_v43, %v8988_v41  ;;  %v8989_v63 = vmul.f32 %v12389_v15, %v16805_v30  ;;  %v9450_v41 = vld [vmem:[%s17125_s19 + $0x10] sm:$0xff] }
0x23f7   :  { %v12391_v20 = vpop.eup %12390  ;;  %12400 = vrsqrt.f32 %v8963_v25  ;;  %v8964_v58 = vadd.f32 1e-05, %v8948_v32  ;;  %v8949_v24 = vmul.f32 0.015625, %v8929_v33  ;;  %v9451_v25 = vld [vmem:[%s17125_s19 + $0x18] sm:$0xff]  ;;  %v9452_v33 = vld [vmem:[%s17125_s19 + $0x20] sm:$0xff] }
0x23f8   :  { %v8932_v52 = vpop.xlane.xlu1 %8931  ;;  %v9028_v42 = vadd.f32 %v16918_v16, %v9008_v13  ;;  %v9009_v12 = vmul.f32 %v16915_v43, %v8989_v63  ;;  %v8990_v26 = vmul.f32 %v12391_v20, %v16810_v22  ;;  %v11357_v32 = vpack.c.bf16 %v9451_v25, %v9450_v41  ;;  %v9453_v13 = vld [vmem:[%s17125_s19 + $0x28] sm:$0xff]  ;;  %v9454_v20 = vld [vmem:[%s17125_s19 + $0x30] sm:$0xff] }
0x23f9   :  { %v12393_v3 = vpop.eup %12392  ;;  %12402 = vrsqrt.f32 %v8964_v58  ;;  %v8965_v46 = vadd.f32 1e-05, %v8949_v24  ;;  %v8950_v57 = vmul.f32 0.015625, %v8932_v52  ;;  %v11361_v63 = vpack.c.bf16 %v9453_v13, %v9452_v33  ;;  %v9455_v58 = vld [vmem:[%s17125_s19 + $0x38] sm:$0xff]  ;;  %v9456_v52 = vld [vmem:[%s17125_s19 + $0x40] sm:$0xff]  ;;  %v9462_v33 = vld [vmem:[%s17125_s19 + $0x70] sm:$0xff] }
0x23fa   :  { %11175 = vmatprep.mubr.msk.f32.mxu0 %vm484_vm1, %v9028_v42  ;;  %v8935_v54 = vpop.xlane.xlu0 %8934  ;;  %v9029_v30 = vadd.f32 %v16918_v16, %v9009_v12  ;;  %v9010_v37 = vmul.f32 %v16915_v43, %v8990_v26  ;;  %v8991_v45 = vmul.f32 %v12393_v3, %v16816_v59  ;;  %v11365_v24 = vpack.c.bf16 %v9455_v58, %v9454_v20  ;;  %v9457_v42 = vld [vmem:[%s17125_s19 + $0x48] sm:$0xff]  ;;  %v9458_v26 = vld [vmem:[%s17125_s19 + $0x50] sm:$0xff]  ;;  %v9459_v3 = vld [vmem:[%s17125_s19 + $0x58] sm:$0xff] }
0x23fb   :  { %v12395_v2 = vpop.eup %12394  ;;  %12404 = vrsqrt.f32 %v8965_v46  ;;  %v8966_v40 = vadd.f32 1e-05, %v8950_v57  ;;  %v8951_v9 = vmul.f32 0.015625, %v8935_v54  ;;  %v11369_v12 = vpack.c.bf16 %v9457_v42, %v9456_v52  ;;  %v9460_v57 = vld [vmem:[%s17125_s19 + $0x60] sm:$0xff]  ;;  %v9461_v54 = vld [vmem:[%s17125_s19 + $0x68] sm:$0xff]  ;;  %v9463_v13 = vld [vmem:[%s17125_s19 + $0x78] sm:$0xff] }
0x23fc   :  { %11176 = vmatmul.mubr.msk.f32.gmra.mrb[216].mxu0 %vm484_vm1, %v9029_v30  ;;  %v9030_v22 = vadd.f32 %v16918_v16, %v9010_v37  ;;  %v9011_v56 = vmul.f32 %v16915_v43, %v8991_v45  ;;  %v8992_v5 = vmul.f32 %v12395_v2, %v16822_v35  ;;  %v11373_v46 = vpack.c.bf16 %v9459_v3, %v9458_v26  ;;  %v10010_v37 = vld [vmem:[%s17122_s16] ss:$0 sm:$0xff]  ;;  %v9617_v58 = vld [vmem:[%s17119_s13 + $0x8] sm:$0xff]  ;;  %v9619_v52 = vld [vmem:[%s17119_s13 + $0x18] sm:$0xff] }
0x23fd   :  { %v12397_v48 = vpop.eup %12396  ;;  %12406 = vrsqrt.f32 %v8966_v40  ;;  %v8967_v51 = vadd.f32 1e-05, %v8951_v9  ;;  %v11377_v30 = vpack.c.bf16 %v9461_v54, %v9460_v57  ;;  %v9616_v20 = vld [vmem:[%s17119_s13] sm:$0xff]  ;;  %9627 = vperm.xlu0 %11712, %v9617_v58  }
0x23fe   :  { %11178 = vmatprep.mubr.msk.f32.mxu0 %vm484_vm1, %v9030_v22  ;;  %v9031_v8 = vadd.f32 %v16918_v16, %v9011_v56  ;;  %v9012_v59 = vmul.f32 %v16915_v43, %v8992_v5  ;;  %v8993_v18 = vmul.f32 %v12397_v48, %v16828_v21  ;;  %9622 = vperm.xlu1 %11711, %v9616_v20   ;;  %v10029_v42 = vld [vmem:[#allocation2] ss:$0 sm:$0xff] }
0x23ff   :  { %v12399_v39 = vpop.eup %12398  ;;  %12408 = vrsqrt.f32 %v8967_v51 }
0x2400   :  { %11179 = vmatmul.mubr.msk.f32.gmra.mrb[218].mxu0 %vm484_vm1, %v9031_v8  ;;  %v9032_v38 = vadd.f32 %v16918_v16, %v9012_v59  ;;  %v9013_v0 = vmul.f32 %v16915_v43, %v8993_v18  ;;  %v8994_v35 = vmul.f32 %v12399_v39, %v16834_v23 }
0x2401   :  { %v12401_v14 = vpop.eup %12400 }
0x2402   :  { %11181 = vmatprep.mubr.msk.f32.mxu0 %vm484_vm1, %v9032_v38  ;;  %v9033_v27 = vadd.f32 %v16918_v16, %v9013_v0  ;;  %v9014_v44 = vmul.f32 %v16915_v43, %v8994_v35  ;;  %v8995_v10 = vmul.f32 %v12401_v14, %v16840_v62 }
0x2403   :  { %v12403_v21 = vpop.eup %12402 }
0x2404   :  { %11182 = vmatmul.mubr.msk.f32.gmra.mrb[220].mxu0 %vm484_vm1, %v9033_v27  ;;  %v9034_v28 = vadd.f32 %v16918_v16, %v9014_v44  ;;  %v9015_v4 = vmul.f32 %v16915_v43, %v8995_v10  ;;  %v8996_v17 = vmul.f32 %v12403_v21, %v16846_v60 }
0x2405   :  { %v12405_v53 = vpop.eup %12404 }
0x2406   :  { %11184 = vmatprep.mubr.msk.f32.mxu0 %vm484_vm1, %v9034_v28  ;;  %v9035_v23 = vadd.f32 %v16918_v16, %v9015_v4  ;;  %v9016_v11 = vmul.f32 %v16915_v43, %v8996_v17  ;;  %v8997_v29 = vmul.f32 %v12405_v53, %v16852_v34 }
0x2407   :  { %v12407_v55 = vpop.eup %12406 }
0x2408   :  { %11185 = vmatmul.mubr.msk.f32.gmra.mrb[222].mxu0 %vm484_vm1, %v9035_v23  ;;  %v9036_v62 = vadd.f32 %v16918_v16, %v9016_v11  ;;  %v9017_v49 = vmul.f32 %v16915_v43, %v8997_v29  ;;  %v8998_v1 = vmul.f32 %v12407_v55, %v16858_v7  ;;  %v9278_v7 = vld [vmem:[%s17123_s17 + $0x70] sm:$0xff] }
0x2409   :  { %v12409_v31 = vpop.eup %12408 }
0x240a   :  { %11187 = vmatprep.mubr.msk.f32.mxu0 %vm484_vm1, %v9036_v62  ;;  %v9037_v60 = vadd.f32 %v16918_v16, %v9017_v49  ;;  %v9018_v36 = vmul.f32 %v16915_v43, %v8998_v1  ;;  %v8999_v19 = vmul.f32 %v12409_v31, %v16864_v47  ;;  %v9279_v47 = vld [vmem:[%s17123_s17 + $0x78] sm:$0xff] }
0x240b   :  { %v11349_v61 = vpack.c.bf16 %v9279_v47, %v9278_v7 }
0x240c   :  { %11188 = vmatmul.mubr.msk.f32.gmra.mrb[224].mxu0 %vm484_vm1, %v9037_v60  ;;  %v9038_v34 = vadd.f32 %v16918_v16, %v9018_v36  ;;  %v9019_v50 = vmul.f32 %v16915_v43, %v8999_v19  ;;  %v9448_v43 = vld [vmem:[%s17125_s19] sm:$0xff] }
0x240d   :  { %11350 = vmatprep.subr.bf16.mxu1 %v11349_v61 }
0x240e   :  { %11190 = vmatprep.mubr.msk.f32.mxu0 %vm484_vm1, %v9038_v34  ;;  %v9039_v6 = vadd.f32 %v16918_v16, %v9019_v50  ;;  %11352 = vmatpush3.bf16.msra.mxu1 %v11349_v61  ;;  %v9449_v16 = vld [vmem:[%s17125_s19 + $0x8] sm:$0xff] }
0x240f   :  { %v11353_v15 = vpack.c.bf16 %v9449_v16, %v9448_v43 }
0x2410   :  { %11191 = vmatmul.mubr.msk.f32.gmra.mrb[226].mxu0 %vm484_vm1, %v9039_v6 }
0x2411   :  { %11354 = vmatprep.subr.bf16.mxu0 %v11353_v15 }
0x2412   :  { %11356 = vmatpush3.bf16.msra.mxu0 %v11353_v15 }
0x2413   :  { %11358 = vmatprep.subr.bf16.mxu0 %v11357_v32 }
0x2416   :  { %11360 = vmatpush3.bf16.msra.mxu0 %v11357_v32 }
0x2417   :  { %11362 = vmatprep.subr.bf16.mxu0 %v11361_v63 }
0x241a   :  { %11364 = vmatpush3.bf16.msra.mxu0 %v11361_v63  ;;  %v11381_v63 = vpack.c.bf16 %v9463_v13, %v9462_v33 }
0x241b   :  { %11366 = vmatprep.subr.bf16.mxu0 %v11365_v24 }
0x241e   :  { %11368 = vmatpush3.bf16.msra.mxu0 %v11365_v24  ;;  %v9618_v24 = vld [vmem:[%s17119_s13 + $0x10] sm:$0xff] }
0x241f   :  { %11370 = vmatprep.subr.bf16.mxu0 %v11369_v12  ;;  %9632 = vperm.xlu1 %11711, %v9618_v24  }
0x2422   :  { %11372 = vmatpush3.bf16.msra.mxu0 %v11369_v12  ;;  %v10027_v12 = vld [vmem:[%s17124_s18] ss:$0 sm:$0xff] }
0x2423   :  { %11374 = vmatprep.subr.bf16.mxu0 %v11373_v46  ;;  %9637 = vperm.xlu1 %11711, %v9619_v52  }
0x2426   :  { %11376 = vmatpush3.bf16.msra.mxu0 %v11373_v46 }
0x2427   :  { %11378 = vmatprep.subr.bf16.mxu0 %v11377_v30  ;;  %9699 = vperm.xlu1 %11711, %v10029_v42  }
0x242a   :  { %11380 = vmatpush3.bf16.msra.mxu0 %v11377_v30 }
0x242b   :  { %11382 = vmatprep.subr.bf16.mxu0 %v11381_v63 }
0x242e   :  { %11384 = vmatpush3.bf16.msra.mxu0 %v11381_v63 }
0x249f   :  { %v11171_v45 = vpop.f32.mrb[212].mxu0 }
0x24a0   :  { %v9175_v2 = vadd.f32 %v11171_v45, %v10010_v37  ;;  %v9169_v40 = vpop.f32.mrb[213].mxu0 }
0x24a1   :  { %v9170_v9 = vadd.f32 %v10010_v37, %v9169_v40 }
0x24a2   :  { %v9249_v5 = vmax.f32 %v9175_v2, 0.0 }
0x24a3   :  { %v9248_v22 = vmax.f32 %v9170_v9, 0.0  ;;  %v11174_v56 = vpop.f32.mrb[214].mxu0 }
0x24a4   :  { %v9185_v48 = vadd.f32 %v11174_v56, %v10010_v37  ;;  %v9179_v51 = vpop.f32.mrb[215].mxu0 }
0x24a5   :  { %v9180_v8 = vadd.f32 %v10010_v37, %v9179_v51  ;;  %11225 = vmatprep.mubr.f32.mxu1 %v9248_v22 }
0x24a6   :  { %11226 = vmatmul.mubr.f32.vlgmr.msra.gmra.mrb[220].mxu1 %v9249_v5  ;;  %v9251_v18 = vmax.f32 %v9185_v48, 0.0 }
0x24a7   :  { %v9250_v59 = vmax.f32 %v9180_v8, 0.0 }
0x24a9   :  { %11228 = vmatprep.mubr.f32.mxu1 %v9250_v59 }
0x24aa   :  { %11229 = vmatmul.mubr.f32.gmra.mrb[222].mxu1 %v9251_v18 }
0x24cf   :  { %v11177_v39 = vpop.f32.mrb[216].mxu0 }
0x24d0   :  { %v9195_v38 = vadd.f32 %v11177_v39, %v10010_v37  ;;  %v9189_v0 = vpop.f32.mrb[217].mxu0 }
0x24d1   :  { %v9190_v35 = vadd.f32 %v10010_v37, %v9189_v0 }
0x24d2   :  { %v9253_v44 = vmax.f32 %v9195_v38, 0.0 }
0x24d3   :  { %v9252_v14 = vmax.f32 %v9190_v35, 0.0  ;;  %v11180_v27 = vpop.f32.mrb[218].mxu0 }
0x24d4   :  { %v9205_v10 = vadd.f32 %v11180_v27, %v10010_v37  ;;  %v9199_v21 = vpop.f32.mrb[219].mxu0 }
0x24d5   :  { %v9200_v28 = vadd.f32 %v10010_v37, %v9199_v21  ;;  %11231 = vmatprep.mubr.f32.mxu1 %v9252_v14 }
0x24d6   :  { %11232 = vmatmul.mubr.f32.gmra.mrb[224].mxu1 %v9253_v44  ;;  %v9255_v53 = vmax.f32 %v9205_v10, 0.0 }
0x24d7   :  { %v9254_v4 = vmax.f32 %v9200_v28, 0.0  ;;  %v11183_v17 = vpop.f32.mrb[220].mxu0 }
0x24d8   :  { %v9215_v23 = vadd.f32 %v11183_v17, %v10010_v37  ;;  %v9209_v11 = vpop.f32.mrb[221].mxu0 }
0x24d9   :  { %v9210_v29 = vadd.f32 %v10010_v37, %v9209_v11  ;;  %11234 = vmatprep.mubr.f32.mxu1 %v9254_v4 }
0x24da   :  { %11235 = vmatmul.mubr.f32.gmra.mrb[226].mxu1 %v9255_v53  ;;  %v9257_v49 = vmax.f32 %v9215_v23, 0.0 }
0x24db   :  { %v9256_v55 = vmax.f32 %v9210_v29, 0.0  ;;  %v11186_v62 = vpop.f32.mrb[222].mxu0 }
0x24dc   :  { %v9225_v1 = vadd.f32 %v11186_v62, %v10010_v37  ;;  %v9219_v31 = vpop.f32.mrb[223].mxu0 }
0x24dd   :  { %v9220_v60 = vadd.f32 %v10010_v37, %v9219_v31  ;;  %11237 = vmatprep.mubr.f32.mxu1 %v9256_v55 }
0x24de   :  { %11238 = vmatmul.mubr.f32.gmra.mrb[228].mxu1 %v9257_v49  ;;  %v9259_v34 = vmax.f32 %v9225_v1, 0.0 }
0x24df   :  { %v9258_v36 = vmax.f32 %v9220_v60, 0.0  ;;  %v11189_v19 = vpop.f32.mrb[224].mxu0 }
0x24e0   :  { %v9235_v50 = vadd.f32 %v11189_v19, %v10010_v37  ;;  %v9229_v6 = vpop.f32.mrb[225].mxu0 }
0x24e1   :  { %v9230_v7 = vadd.f32 %v10010_v37, %v9229_v6  ;;  %11240 = vmatprep.mubr.f32.mxu1 %v9258_v36 }
0x24e2   :  { %11241 = vmatmul.mubr.f32.gmra.mrb[230].mxu1 %v9259_v34  ;;  %v9261_v43 = vmax.f32 %v9235_v50, 0.0 }
0x24e3   :  { %v9260_v47 = vmax.f32 %v9230_v7, 0.0  ;;  %v11192_v61 = vpop.f32.mrb[226].mxu0 }
0x24e4   :  { %v9245_v16 = vadd.f32 %v11192_v61, %v10010_v37  ;;  %v9239_v41 = vpop.f32.mrb[227].mxu0  ;;  %v17055_v61 = vpop.permute.xlu1 %9622 }
0x24e5   :  { %v9240_v15 = vadd.f32 %v10010_v37, %v9239_v41  ;;  %11243 = vmatprep.mubr.f32.mxu1 %v9260_v47  ;;  %v9628_v41 = vpop.permute.xlu0 %9627 }
0x24e6   :  { %11244 = vmatmul.mubr.f32.gmra.mrb[232].mxu1 %v9261_v43  ;;  %v9263_v32 = vmax.f32 %v9245_v16, 0.0  ;;  %v17060_v43 = vld [vmem:[%s17126_s20] ss:$0 sm:$0xff]  ;;  %s12641_s20 = smov [#allocation17]  }
0x24e7   :  { %v9262_v25 = vmax.f32 %v9240_v15, 0.0  ;;  %s9724_s14 = sshll.u32 %s12641_s20, 4  ;;  %s9725_s14 = int_to_ptr.vmem [resolvable:$true] %s9724_s14 }
0x24e8   :  { %s12586_s10 = scalar_lea.vmem %s9725_s14, 64  ;;  %p12591_p9 = scmp.lt.s32.totalorder %s9725_s14, %s9725_s14 }
0x24e9   :  { %11246 = vmatprep.mubr.f32.mxu1 %v9262_v25  ;;  %p12587_p8 = scmp.ne.s32.totalorder %s9725_s14, %s12586_s10  ;;  %p12592_p10 = scmp.lt.s32.totalorder %s12586_s10, %s12586_s10 }
0x24ea   :  { %11247 = vmatmul.mubr.f32.gmra.mrb[234].mxu1 %v9263_v32  ;;  %v17063_v32 = vpop.permute.xlu1 %9632 }
0x24eb   :  { %p12593_p11 = por %p12592_p10, %p12591_p9 }
0x24ed   :  { %p12594_p12 = pnand %p12593_p11, %p12587_p8 }
0x2579   :  { %v11227_v26 = vpop.f32.mrb[220].mxu1 }
0x257a   :  { %v9359_v3 = vadd.f32 %v11227_v26, %v10027_v12  ;;  %v9353_v46 = vpop.f32.mrb[221].mxu1 }
0x257b   :  { %v9354_v57 = vadd.f32 %v10027_v12, %v9353_v46 }
0x257c   :  { %v9433_v37 = vmax.f32 %v9359_v3, 0.0 }
0x257d   :  { %v9432_v54 = vmax.f32 %v9354_v57, 0.0  ;;  %v11230_v30 = vpop.f32.mrb[222].mxu1 }
0x257e   :  { %v9369_v45 = vadd.f32 %v11230_v30, %v10027_v12  ;;  %v9363_v2 = vpop.f32.mrb[223].mxu1 }
0x257f   :  { %v9364_v40 = vadd.f32 %v10027_v12, %v9363_v2  ;;  %11281 = vmatprep.mubr.f32.mxu0 %v9432_v54 }
0x2580   :  { %11282 = vmatmul.mubr.f32.vlgmr.msra.gmra.mrb[228].mxu0 %v9433_v37  ;;  %v9435_v22 = vmax.f32 %v9369_v45, 0.0 }
0x2581   :  { %v9434_v9 = vmax.f32 %v9364_v40, 0.0 }
0x2583   :  { %11284 = vmatprep.mubr.f32.mxu0 %v9434_v9 }
0x2584   :  { %11285 = vmatmul.mubr.f32.gmra.mrb[230].mxu0 %v9435_v22 }
0x25a9   :  { %v11233_v56 = vpop.f32.mrb[224].mxu1 }
0x25aa   :  { %v9379_v5 = vadd.f32 %v11233_v56, %v10027_v12  ;;  %v9373_v48 = vpop.f32.mrb[225].mxu1 }
0x25ab   :  { %v9374_v51 = vadd.f32 %v10027_v12, %v9373_v48 }
0x25ac   :  { %v9437_v18 = vmax.f32 %v9379_v5, 0.0 }
0x25ad   :  { %v9436_v8 = vmax.f32 %v9374_v51, 0.0  ;;  %v11236_v59 = vpop.f32.mrb[226].mxu1 }
0x25ae   :  { %v9389_v39 = vadd.f32 %v11236_v59, %v10027_v12  ;;  %v9383_v38 = vpop.f32.mrb[227].mxu1 }
0x25af   :  { %v9384_v0 = vadd.f32 %v10027_v12, %v9383_v38  ;;  %11287 = vmatprep.mubr.f32.mxu0 %v9436_v8 }
0x25b0   :  { %11288 = vmatmul.mubr.f32.gmra.mrb[232].mxu0 %v9437_v18  ;;  %v9439_v27 = vmax.f32 %v9389_v39, 0.0 }
0x25b1   :  { %v9438_v35 = vmax.f32 %v9384_v0, 0.0  ;;  %v11239_v14 = vpop.f32.mrb[228].mxu1 }
0x25b2   :  { %v9399_v44 = vadd.f32 %v11239_v14, %v10027_v12  ;;  %v9393_v10 = vpop.f32.mrb[229].mxu1 }
0x25b3   :  { %v9394_v21 = vadd.f32 %v10027_v12, %v9393_v10  ;;  %11290 = vmatprep.mubr.f32.mxu0 %v9438_v35 }
0x25b4   :  { %11291 = vmatmul.mubr.f32.gmra.mrb[234].mxu0 %v9439_v27  ;;  %v9441_v17 = vmax.f32 %v9399_v44, 0.0 }
0x25b5   :  { %v9440_v28 = vmax.f32 %v9394_v21, 0.0  ;;  %v11242_v4 = vpop.f32.mrb[230].mxu1 }
0x25b6   :  { %v9409_v53 = vadd.f32 %v11242_v4, %v10027_v12  ;;  %v9403_v23 = vpop.f32.mrb[231].mxu1 }
0x25b7   :  { %v9404_v11 = vadd.f32 %v10027_v12, %v9403_v23  ;;  %11293 = vmatprep.mubr.f32.mxu0 %v9440_v28 }
0x25b8   :  { %11294 = vmatmul.mubr.f32.gmra.mrb[236].mxu0 %v9441_v17  ;;  %v9443_v62 = vmax.f32 %v9409_v53, 0.0 }
0x25b9   :  { %v9442_v29 = vmax.f32 %v9404_v11, 0.0  ;;  %v11245_v55 = vpop.f32.mrb[232].mxu1 }
0x25ba   :  { %v9419_v49 = vadd.f32 %v11245_v55, %v10027_v12  ;;  %v9413_v1 = vpop.f32.mrb[233].mxu1 }
0x25bb   :  { %v9414_v31 = vadd.f32 %v10027_v12, %v9413_v1  ;;  %11296 = vmatprep.mubr.f32.mxu0 %v9442_v29 }
0x25bc   :  { %11297 = vmatmul.mubr.f32.gmra.mrb[238].mxu0 %v9443_v62  ;;  %v9445_v19 = vmax.f32 %v9419_v49, 0.0 }
0x25bd   :  { %v9444_v60 = vmax.f32 %v9414_v31, 0.0  ;;  %v11248_v36 = vpop.f32.mrb[234].mxu1 }
0x25be   :  { %v9429_v34 = vadd.f32 %v11248_v36, %v10027_v12  ;;  %v9423_v50 = vpop.f32.mrb[235].mxu1 }
0x25bf   :  { %v9424_v6 = vadd.f32 %v10027_v12, %v9423_v50  ;;  %11299 = vmatprep.mubr.f32.mxu0 %v9444_v60  ;;  %v17069_v12 = vpop.permute.xlu1 %9637 }
0x25c0   :  { %11300 = vmatmul.mubr.f32.gmra.mrb[240].mxu0 %v9445_v19  ;;  %v9447_v47 = vmax.f32 %v9429_v34, 0.0 }
0x25c1   :  { %v9446_v7 = vmax.f32 %v9424_v6, 0.0 }
0x25c3   :  { %11302 = vmatprep.mubr.f32.mxu0 %v9446_v7 }
0x25c4   :  { %11303 = vmatmul.mubr.f32.gmra.mrb[242].mxu0 %v9447_v47 }
0x2653   :  { %v11283_v16 = vpop.f32.mrb[228].mxu0 }
0x2654   :  { %v9543_v15 = vadd.f32 %v11283_v16, %v17060_v43  ;;  %v9537_v25 = vpop.f32.mrb[229].mxu0 }
0x2655   :  { %v9538_v33 = vadd.f32 %v17060_v43, %v9537_v25 }
0x2656   :  { %v9641_v13 = vmul.f32 %v9628_v41, %v9543_v15 }
0x2657   :  { %v9640_v63 = vmul.f32 %v17055_v61, %v9538_v33  ;;  %v11286_v20 = vpop.f32.mrb[230].mxu0 }
0x2658   :  { %v9547_v58 = vpop.f32.mrb[231].mxu0  ;;  %v9553_v52 = vadd.f32 %v11286_v20, %v17060_v43 }
0x2659   :  { %v9656_v24 = vadd.f32 %v9641_v13, %v9640_v63  ;;  %v9548_v42 = vadd.f32 %v17060_v43, %v9547_v58  ;;  %v9700_v63 = vpop.permute.xlu1 %9699 }
0x265a   :  { %v9643_v46 = vmul.f32 %v17069_v12, %v9553_v52 }
0x265b   :  { %v9642_v26 = vmul.f32 %v17063_v32, %v9548_v42 }
0x265d   :  { %v9657_v3 = vadd.f32 %v9656_v24, %v9642_v26 }
0x265f   :  { %v9658_v57 = vadd.f32 %v9657_v3, %v9643_v46 }
0x2661   :  { %v9659_v30 = vrot.slane %v9658_v57, 4 }
0x2663   :  { %v9660_v56 = vadd.f32 %v9659_v30, %v9658_v57 }
0x2665   :  { %v9661_v39 = vrot.slane %v9660_v56, 2 }
0x2667   :  { %v9662_v4 = vadd.f32 %v9661_v39, %v9660_v56 }
0x2669   :  { %v9663_v1 = vrot.slane %v9662_v4, 1 }
0x266b   :  { %v9664_v25 = vadd.f32 %v9663_v1, %v9662_v4 }
0x2683   :  { %v11289_v54 = vpop.f32.mrb[232].mxu0 }
0x2684   :  { %v9563_v37 = vadd.f32 %v11289_v54, %v17060_v43  ;;  %v9557_v45 = vpop.f32.mrb[233].mxu0 }
0x2685   :  { %v9558_v2 = vadd.f32 %v17060_v43, %v9557_v45 }
0x2686   :  { %v9645_v40 = vmul.f32 %v9628_v41, %v9563_v37 }
0x2687   :  { %v9644_v9 = vmul.f32 %v17055_v61, %v9558_v2  ;;  %v11292_v22 = vpop.f32.mrb[234].mxu0 }
0x2688   :  { %v9567_v5 = vpop.f32.mrb[235].mxu0  ;;  %v9573_v51 = vadd.f32 %v11292_v22, %v17060_v43 }
0x2689   :  { %v9665_v48 = vadd.f32 %v9645_v40, %v9644_v9  ;;  %v9568_v8 = vadd.f32 %v17060_v43, %v9567_v5 }
0x268a   :  { %v9647_v35 = vmul.f32 %v17069_v12, %v9573_v51 }
0x268b   :  { %v9646_v59 = vmul.f32 %v17063_v32, %v9568_v8  ;;  %v11295_v18 = vpop.f32.mrb[236].mxu0 }
0x268c   :  { %v9583_v38 = vadd.f32 %v11295_v18, %v17060_v43  ;;  %v9577_v0 = vpop.f32.mrb[237].mxu0 }
0x268d   :  { %v9666_v14 = vadd.f32 %v9665_v48, %v9646_v59  ;;  %v9578_v27 = vadd.f32 %v17060_v43, %v9577_v0 }
0x268e   :  { %v9649_v44 = vmul.f32 %v9628_v41, %v9583_v38 }
0x268f   :  { %v9667_v10 = vadd.f32 %v9666_v14, %v9647_v35  ;;  %v9648_v21 = vmul.f32 %v17055_v61, %v9578_v27  ;;  %v11298_v28 = vpop.f32.mrb[238].mxu0 }
0x2690   :  { %v9587_v17 = vpop.f32.mrb[239].mxu0  ;;  %v9593_v11 = vadd.f32 %v11298_v28, %v17060_v43 }
0x2691   :  { %v9668_v53 = vrot.slane %v9667_v10, 4  ;;  %v9674_v23 = vadd.f32 %v9649_v44, %v9648_v21  ;;  %v9588_v29 = vadd.f32 %v17060_v43, %v9587_v17 }
0x2692   :  { %v9651_v19 = vmul.f32 %v17069_v12, %v9593_v11 }
0x2693   :  { %v9669_v55 = vadd.f32 %v9668_v53, %v9667_v10  ;;  %v9650_v62 = vmul.f32 %v17063_v32, %v9588_v29  ;;  %v11301_v49 = vpop.f32.mrb[240].mxu0 }
0x2694   :  { %v9603_v31 = vadd.f32 %v11301_v49, %v17060_v43  ;;  %v9597_v60 = vpop.f32.mrb[241].mxu0 }
0x2695   :  { %v9670_v36 = vrot.slane %v9669_v55, 2  ;;  %v9675_v34 = vadd.f32 %v9674_v23, %v9650_v62  ;;  %v9598_v50 = vadd.f32 %v17060_v43, %v9597_v60 }
0x2696   :  { %v9653_v6 = vmul.f32 %v9628_v41, %v9603_v31  ;;  %v9702_v41 = vadd.f32 %v9700_v63, %v9664_v25 }
0x2697   :  { %v9671_v7 = vadd.f32 %v9670_v36, %v9669_v55  ;;  %v9676_v47 = vadd.f32 %v9675_v34, %v9651_v19  ;;  %v9652_v16 = vmul.f32 %v17055_v61, %v9598_v50  ;;  %v11304_v15 = vpop.f32.mrb[242].mxu0 }
0x2698   :  { %v9613_v33 = vadd.f32 %v11304_v15, %v17060_v43  ;;  %v9607_v13 = vpop.f32.mrb[243].mxu0 }
0x2699   :  { %v9672_v20 = vrot.slane %v9671_v7, 1  ;;  %v9677_v58 = vrot.slane %v9676_v47, 4  ;;  %v9683_v24 = vadd.f32 %v9653_v6, %v9652_v16  ;;  %v9608_v52 = vadd.f32 %v17060_v43, %v9607_v13 }
0x269a   :  { %v9655_v61 = vmul.f32 %v17069_v12, %v9613_v33 }
0x269b   :  { %v9673_v42 = vadd.f32 %v9672_v20, %v9671_v7  ;;  %v9678_v26 = vadd.f32 %v9677_v58, %v9676_v47  ;;  %v9654_v3 = vmul.f32 %v17063_v32, %v9608_v52 }
0x269d   :  { %v9679_v46 = vrot.slane %v9678_v26, 2  ;;  %v9684_v57 = vadd.f32 %v9683_v24, %v9654_v3  ;;  %v9703_v54 = vadd.f32 %v9700_v63, %v9673_v42 }
0x269f   :  { %v9680_v30 = vadd.f32 %v9679_v46, %v9678_v26  ;;  %v9685_v37 = vadd.f32 %v9684_v57, %v9655_v61  ;;  %v9711_v45 = vsel %vm9710_vm4, %v9703_v54, %v9702_v41 }
0x26a1   :  { %v9681_v2 = vrot.slane %v9680_v30, 1  ;;  %v9686_v40 = vrot.slane %v9685_v37, 4 }
0x26a3   :  { %v9687_v9 = vadd.f32 %v9686_v40, %v9685_v37  ;;  %v9682_v22 = vadd.f32 %v9681_v2, %v9680_v30 }
0x26a5   :  { %v9688_v43 = vrot.slane %v9687_v9, 2  ;;  %v9704_v56 = vadd.f32 %v9700_v63, %v9682_v22 }
0x26a7   :  { %v9689_v5 = vadd.f32 %v9688_v43, %v9687_v9  ;;  %v9713_v48 = vsel %vm9712_vm5, %v9704_v56, %v9711_v45 }
0x26a9   :  { %v9690_v32 = vrot.slane %v9689_v5, 1 }
0x26ab   :  { %v9691_v51 = vadd.f32 %v9690_v32, %v9689_v5 }
0x26ad   :  { %v9705_v12 = vadd.f32 %v9700_v63, %v9691_v51 }
0x26af   :  { %v9715_v8 = vsel %vm9714_vm6, %v9705_v12, %v9713_v48 }
0x26b0   :  { %9717 = vst [vmem:[#allocation17] sm:$0xf] %v9715_v8 }
0x26b1   :  { %12597 = shalt.err (!%p12594_p12)
}
0x26b2   :  { %s17384_s24 = sld [smem:[#allocation67_spill]] }
0x26b8   :  { %s12598_s30 = scalar_lea.hbm %s17384_s24, 64 }
0x26b9   :  { %p12599_p13 = scmp.ne.s32.totalorder %s17384_s24, %s12598_s30  ;;  %p12602_p0 = scmp.lt.u32.totalorder %s12598_s30, %s17384_s24 }
0x26bb   :  { %p12604_p1 = pnand %p12602_p0, %p12599_p13 }
0x26bd   :  { %12607 = shalt.err (!%p12604_p1)
}
0x26be   :  { %9727 = dma.vmem_to_hbm [thread:$0]  %s9725_s14, 64, %s17384_s24, [#allocation5]  }
0x26bf   :  { %12618 = dma.done.wait [#allocation5], 64  }
0x26c0   :  { %12619 = vsyncadd [#allocation5], 4294967232 }
0x26c1   :  { %9731 = vsyncpa [#allocation4], 1 }
0x26c2   :  { %9732 = vsyncpa [#allocation7], 1 }
0x26c3   :  { %9733 = vsyncpa [#allocation10], 1 }
0x26c4   :  { %9734 = vsyncpa [#allocation13], 1 }
0x26c5   :  { %9735 = vsyncpa [#allocation16], 1 }
0x26c6   :  { %9736 = vsyncpa [#allocation5], 1 }

</bundles_post_ra>
